<compile_context>
chip_gen: v6e
topology: v6e:2x2x1
jax: 0.10.0
libtpu: 0.0.40
codegen_flags: <defaults>
</compile_context>

<pallas_src>
import functools
import math

import jax
import jax.numpy as jnp
from jax.experimental import pallas as pl
from jax.experimental.pallas import tpu as pltpu

NEG_INF = -1e9


def _round_up(x, m):
    return ((x + m - 1) // m) * m


# ---------------------------------------------------------------------------
# Fused multi-head self-attention + additive-attention pooling kernel.
# One grid step handles TILE_N items entirely in VMEM: batched QKV / output
# projections as single (TILE_N*L, d) matmuls, per-head batched attention,
# and the additive pooling reduction.
# ---------------------------------------------------------------------------
def mha_pool_kernel(*refs, h, seq, use_mask):
    if use_mask:
        (x_ref, mask_ref, wq_ref, wk_ref, wv_ref, bq_ref, bk_ref, bv_ref,
         wo_ref, bo_ref, wa_ref, ba_ref, va_ref, out_ref) = refs
    else:
        (x_ref, wq_ref, wk_ref, wv_ref, bq_ref, bk_ref, bv_ref,
         wo_ref, bo_ref, wa_ref, ba_ref, va_ref, out_ref) = refs
        mask_ref = None

    tile_n, d_out = out_ref.shape
    rows = tile_n * seq
    dk = d_out // h
    a_dim = wa_ref.shape[1]
    scale = 1.0 / math.sqrt(dk)

    x = x_ref[...]                                          # (rows, d_in) bf16

    # Batched projections: one big (rows, d_in) @ (d_in, d_out) matmul each.
    q = jnp.dot(x, wq_ref[...], preferred_element_type=jnp.float32) + bq_ref[...]
    k = jnp.dot(x, wk_ref[...], preferred_element_type=jnp.float32) + bk_ref[...]
    v = jnp.dot(x, wv_ref[...], preferred_element_type=jnp.float32) + bv_ref[...]

    if use_mask:
        km = mask_ref[...]                                  # (tile_n, seq), 1 = keep
        neg = (1.0 - km) * NEG_INF                          # (tile_n, seq)
        # query-bias + key-bias == the reference outer-product mask
        bias = neg[:, None, :] + neg[:, :, None]            # (tile_n, seq, seq)
    else:
        neg = None
        bias = None

    acc = jnp.zeros((rows, d_out), jnp.float32)
    for i in range(h):                                      # static unroll over heads
        qh = q[:, i * dk:(i + 1) * dk].reshape(tile_n, seq, dk)
        kh = k[:, i * dk:(i + 1) * dk].reshape(tile_n, seq, dk)
        vh = v[:, i * dk:(i + 1) * dk].reshape(tile_n, seq, dk)
        s = jax.lax.dot_general(qh, kh, (((2,), (2,)), ((0,), (0,))),
                                preferred_element_type=jnp.float32) * scale
        if bias is not None:
            s = s + bias
        m = jnp.max(s, axis=-1, keepdims=True)
        e = jnp.exp(s - m)
        p = e * pl.reciprocal(jnp.sum(e, axis=-1, keepdims=True), approx=True)
        ctx = jax.lax.dot_general(p, vh, (((2,), (1,)), ((0,), (0,))),
                                  preferred_element_type=jnp.float32)
        ctx = ctx.reshape(rows, dk)
        # Accumulate the output projection per head (no lane-repacking concat).
        acc = acc + jnp.dot(ctx.astype(jnp.bfloat16),
                            wo_ref[i * dk:(i + 1) * dk, :],
                            preferred_element_type=jnp.float32)
    o = acc + bo_ref[...]                                   # (rows, d_out) f32

    # Additive-attention pooling over the sequence axis.
    e_att = jnp.tanh(jnp.dot(o.astype(jnp.bfloat16), wa_ref[...],
                             preferred_element_type=jnp.float32) + ba_ref[...])
    e3 = e_att.reshape(tile_n, seq, a_dim)
    sc = jnp.sum(e3 * va_ref[...], axis=-1)                 # (tile_n, seq) VPU+lane reduce
    if neg is not None:
        # TODO(synk): masking of the additive pooling assumes the standard
        # NRMS formulation (padded history entries get zero pooling weight).
        sc = sc + neg
    m2 = jnp.max(sc, axis=-1, keepdims=True)
    w = jnp.exp(sc - m2)
    alpha = w * pl.reciprocal(jnp.sum(w, axis=-1, keepdims=True), approx=True)
    pooled = jnp.sum(alpha[:, :, None] * o.reshape(tile_n, seq, d_out), axis=1)
    out_ref[...] = pooled                                   # (tile_n, d_out)


def mha_pool(x, mask, p, h, tile_n=32):
    """x: (N, L, d_in) f32, mask: (N, L) f32 (1 = keep) or None -> (N, d_out) f32."""
    n, L, d_in = x.shape
    d_out = p["wq"].shape[1]
    a_dim = p["wa"].shape[1]

    # Pad the sequence axis to a multiple of 8 (sublane tiling). Padded
    # positions are masked so the result equals the unpadded computation.
    L_pad = _round_up(L, 8)
    if L_pad != L:
        if mask is None:
            mask = jnp.ones((n, L), jnp.float32)
        x = jnp.pad(x, ((0, 0), (0, L_pad - L), (0, 0)))
        mask = jnp.pad(mask, ((0, 0), (0, L_pad - L)))

    # Tile / pad the item axis.
    if n > tile_n:
        n_pad = _round_up(n, tile_n)            # tile_n (32) is a multiple of 8
    else:
        tile_n = n                              # single grid step, full-extent block
        n_pad = n
    if n_pad != n:
        x = jnp.pad(x, ((0, n_pad - n), (0, 0), (0, 0)))
        if mask is not None:
            mask = jnp.pad(mask, ((0, n_pad - n), (0, 0)))

    use_mask = mask is not None
    x_flat = x.reshape(n_pad * L_pad, d_in).astype(jnp.bfloat16)
    bf16 = jnp.bfloat16

    kernel = functools.partial(mha_pool_kernel, h=h, seq=L_pad, use_mask=use_mask)

    def wspec(shape):
        return pl.BlockSpec(shape, lambda i: (0, 0))

    in_specs = [pl.BlockSpec((tile_n * L_pad, d_in), lambda i: (i, 0))]
    inputs = [x_flat]
    if use_mask:
        in_specs.append(pl.BlockSpec((tile_n, L_pad), lambda i: (i, 0)))
        inputs.append(mask)
    in_specs += [
        wspec((d_in, d_out)), wspec((d_in, d_out)), wspec((d_in, d_out)),
        wspec((1, d_out)), wspec((1, d_out)), wspec((1, d_out)),
        wspec((d_out, d_out)), wspec((1, d_out)),
        wspec((d_out, a_dim)), wspec((1, a_dim)), wspec((1, a_dim)),
    ]
    inputs += [
        p["wq"].astype(bf16), p["wk"].astype(bf16), p["wv"].astype(bf16),
        p["bq"], p["bk"], p["bv"],
        p["wo"].astype(bf16), p["bo"],
        p["wa"].astype(bf16), p["ba"], p["va"],
    ]

    out = pl.pallas_call(
        kernel,
        out_shape=jax.ShapeDtypeStruct((n_pad, d_out), jnp.float32),
        grid=(n_pad // tile_n,),
        in_specs=in_specs,
        out_specs=pl.BlockSpec((tile_n, d_out), lambda i: (i, 0)),
        compiler_params=pltpu.CompilerParams(
            dimension_semantics=("parallel",),
            vmem_limit_bytes=32 * 1024 * 1024,
        ),
    )(*inputs)
    return out[:n]


# ---------------------------------------------------------------------------
# NRMS forward (glue: embedding gather, reshapes, mask construction, scoring).
# ---------------------------------------------------------------------------
def nrms_forward(params, history, targets, *, pad_idx, h):
    B, Hh, L = history.shape
    T = targets.shape[1]
    emb = params["embedding"]

    def encode_news(tokens):
        n_items = tokens.shape[0] * tokens.shape[1]
        flat = tokens.reshape(n_items, L)
        # TODO(synk): the embedding gather could be fused into the kernel via
        # scalar prefetch / manual DMA; kept as a plain XLA gather for now.
        x = emb[flat]                                    # (n_items, L, emb_dim)
        return mha_pool(x, None, params["news"], h)      # no word-level mask

    encoded_history = encode_news(history).reshape(B, Hh, -1)   # (B, Hh, 256)
    r = encode_news(targets).reshape(B, T, -1)                  # (B, T, 256)

    # news-level pad mask: 1 = real history entry, 0 = fully-padded entry.
    # The reference's (B, Hh, Hh) outer-product mask is rebuilt in-kernel.
    mask = 1.0 - jnp.all(history == pad_idx, axis=-1).astype(jnp.float32)   # (B, Hh)

    u = mha_pool(encoded_history, mask, params["user"], h)      # (B, 256)

    # Scoring (torch.bmm + LogSoftmax(dim=1)) in plain JAX — the work is tiny
    # and a dedicated pallas_call would be pure launch/DMA overhead.
    logits = jnp.einsum("btd,bd->bt", r, u)
    return jax.nn.log_softmax(logits, axis=1)                   # (B, T)


# ---------------------------------------------------------------------------
# Deterministic parameter init (synthetic weights; d_model_out = 256, h heads,
# additive-attention dim 128, embedding dim 128; `va` stored as a row vector).
# ---------------------------------------------------------------------------
def init_params(key, vocab_size, emb_dim=128, d_model=256, att_dim=128):
    ks = jax.random.split(key, 16)

    def w(k, shape, scale=0.05):
        return (scale * jax.random.normal(k, shape)).astype(jnp.float32)

    embedding = w(ks[0], (vocab_size + 2, emb_dim), 0.1)
    embedding = embedding.at[vocab_size + 1].set(0.0)   # padding row

    def mha_params(keys, d_in):
        return dict(
            wq=w(keys[0], (d_in, d_model)),
            wk=w(keys[1], (d_in, d_model)),
            wv=w(keys[2], (d_in, d_model)),
            bq=jnp.zeros((1, d_model), jnp.float32),
            bk=jnp.zeros((1, d_model), jnp.float32),
            bv=jnp.zeros((1, d_model), jnp.float32),
            wo=w(keys[3], (d_model, d_model)),
            bo=jnp.zeros((1, d_model), jnp.float32),
            wa=w(keys[4], (d_model, att_dim)),
            ba=jnp.zeros((1, att_dim), jnp.float32),
            va=w(keys[5], (1, att_dim)),
        )

    news = mha_params(ks[1:7], emb_dim)
    user = mha_params(ks[7:13], d_model)
    return dict(embedding=embedding, news=news, user=user)


if __name__ == "__main__":
    V = 50                      # len(nlp.vocab.vectors)
    PAD_IDX = V + 1
    H_HEADS = 4
    B, HIST, L, T = 2, 6, 8, 4  # batch, history size, words per news, targets

    key = jax.random.PRNGKey(0)
    kp, kh, kt = jax.random.split(key, 3)

    params = init_params(kp, V)

    history = jax.random.randint(kh, (B, HIST, L), 0, V, dtype=jnp.int32)
    # make some history entries fully padded to exercise the mask
    history = history.at[0, HIST - 1].set(PAD_IDX)
    history = history.at[1, HIST - 2:].set(PAD_IDX)
    targets = jax.random.randint(kt, (B, T, L), 0, V, dtype=jnp.int32)

    fwd = jax.jit(functools.partial(nrms_forward, pad_idx=PAD_IDX, h=H_HEADS))
    out = fwd(params, history, targets)
    out = jax.block_until_ready(out)

    assert out.shape == (B, T), out.shape
    assert bool(jnp.all(jnp.isfinite(out)))
    # rows of a LogSoftmax must exponentiate-sum to 1
    assert bool(jnp.allclose(jnp.exp(out).sum(axis=1), 1.0, atol=1e-4))
    print("KERNEL_OK")
</pallas_src>

<mosaic_0001>
module attributes {stable_mosaic.version = 11 : i64} {
  func.func @mha_pool_kernel(%arg0: i32, %arg1: memref<96x128xbf16, #tpu.memory_space<vmem>>, %arg2: memref<128x256xbf16, #tpu.memory_space<vmem>>, %arg3: memref<128x256xbf16, #tpu.memory_space<vmem>>, %arg4: memref<128x256xbf16, #tpu.memory_space<vmem>>, %arg5: memref<1x256xf32, #tpu.memory_space<vmem>>, %arg6: memref<1x256xf32, #tpu.memory_space<vmem>>, %arg7: memref<1x256xf32, #tpu.memory_space<vmem>>, %arg8: memref<256x256xbf16, #tpu.memory_space<vmem>>, %arg9: memref<1x256xf32, #tpu.memory_space<vmem>>, %arg10: memref<256x128xbf16, #tpu.memory_space<vmem>>, %arg11: memref<1x128xf32, #tpu.memory_space<vmem>>, %arg12: memref<1x128xf32, #tpu.memory_space<vmem>>, %arg13: memref<12x256xf32, #tpu.memory_space<vmem>>) attributes {dimension_semantics = [#tpu.dimension_semantics<parallel>], iteration_bounds = array<i64: 1>, scalar_prefetch = 0 : i64, scratch_operands = 0 : i64, tpu.core_type = #tpu.core_type<tc>, window_params = [{transform_indices = @transform_0, window_bounds = array<i64: 96, 128>}, {pipeline_mode = #tpu.pipeline_mode<synchronous>, transform_indices = @transform_1, window_bounds = array<i64: 128, 256>}, {pipeline_mode = #tpu.pipeline_mode<synchronous>, transform_indices = @transform_2, window_bounds = array<i64: 128, 256>}, {pipeline_mode = #tpu.pipeline_mode<synchronous>, transform_indices = @transform_3, window_bounds = array<i64: 128, 256>}, {pipeline_mode = #tpu.pipeline_mode<synchronous>, transform_indices = @transform_4, window_bounds = array<i64: 1, 256>}, {pipeline_mode = #tpu.pipeline_mode<synchronous>, transform_indices = @transform_5, window_bounds = array<i64: 1, 256>}, {pipeline_mode = #tpu.pipeline_mode<synchronous>, transform_indices = @transform_6, window_bounds = array<i64: 1, 256>}, {pipeline_mode = #tpu.pipeline_mode<synchronous>, transform_indices = @transform_7, window_bounds = array<i64: 256, 256>}, {pipeline_mode = #tpu.pipeline_mode<synchronous>, transform_indices = @transform_8, window_bounds = array<i64: 1, 256>}, {pipeline_mode = #tpu.pipeline_mode<synchronous>, transform_indices = @transform_9, window_bounds = array<i64: 256, 128>}, {pipeline_mode = #tpu.pipeline_mode<synchronous>, transform_indices = @transform_10, window_bounds = array<i64: 1, 128>}, {pipeline_mode = #tpu.pipeline_mode<synchronous>, transform_indices = @transform_11, window_bounds = array<i64: 1, 128>}, {transform_indices = @transform_12, window_bounds = array<i64: 12, 256>}]} {
    %c0 = arith.constant 0 : index
    %c0_0 = arith.constant 0 : index
    %0 = vector.load %arg1[%c0, %c0_0] : memref<96x128xbf16, #tpu.memory_space<vmem>>, vector<96x128xbf16>
    %c0_1 = arith.constant 0 : index
    %c0_2 = arith.constant 0 : index
    %1 = vector.load %arg2[%c0_1, %c0_2] : memref<128x256xbf16, #tpu.memory_space<vmem>>, vector<128x256xbf16>
    %cst = arith.constant dense<0.000000e+00> : vector<96x256xf32>
    %2 = tpu.matmul %0, %1, %cst {dimension_numbers = #tpu.dot_dimension_numbers<[1], [0], [0], [1], [0, 0, 1, 1], [], []>} : vector<96x128xbf16>, vector<128x256xbf16>, vector<96x256xf32> -> vector<96x256xf32>
    %c0_3 = arith.constant 0 : index
    %c0_4 = arith.constant 0 : index
    %3 = vector.load %arg5[%c0_3, %c0_4] : memref<1x256xf32, #tpu.memory_space<vmem>>, vector<1x256xf32>
    %4 = vector.broadcast %3 : vector<1x256xf32> to vector<96x256xf32>
    %5 = arith.addf %2, %4 : vector<96x256xf32>
    %c0_5 = arith.constant 0 : index
    %c0_6 = arith.constant 0 : index
    %6 = vector.load %arg3[%c0_5, %c0_6] : memref<128x256xbf16, #tpu.memory_space<vmem>>, vector<128x256xbf16>
    %cst_7 = arith.constant dense<0.000000e+00> : vector<96x256xf32>
    %7 = tpu.matmul %0, %6, %cst_7 {dimension_numbers = #tpu.dot_dimension_numbers<[1], [0], [0], [1], [0, 0, 1, 1], [], []>} : vector<96x128xbf16>, vector<128x256xbf16>, vector<96x256xf32> -> vector<96x256xf32>
    %c0_8 = arith.constant 0 : index
    %c0_9 = arith.constant 0 : index
    %8 = vector.load %arg6[%c0_8, %c0_9] : memref<1x256xf32, #tpu.memory_space<vmem>>, vector<1x256xf32>
    %9 = vector.broadcast %8 : vector<1x256xf32> to vector<96x256xf32>
    %10 = arith.addf %7, %9 : vector<96x256xf32>
    %c0_10 = arith.constant 0 : index
    %c0_11 = arith.constant 0 : index
    %11 = vector.load %arg4[%c0_10, %c0_11] : memref<128x256xbf16, #tpu.memory_space<vmem>>, vector<128x256xbf16>
    %cst_12 = arith.constant dense<0.000000e+00> : vector<96x256xf32>
    %12 = tpu.matmul %0, %11, %cst_12 {dimension_numbers = #tpu.dot_dimension_numbers<[1], [0], [0], [1], [0, 0, 1, 1], [], []>} : vector<96x128xbf16>, vector<128x256xbf16>, vector<96x256xf32> -> vector<96x256xf32>
    %c0_13 = arith.constant 0 : index
    %c0_14 = arith.constant 0 : index
    %13 = vector.load %arg7[%c0_13, %c0_14] : memref<1x256xf32, #tpu.memory_space<vmem>>, vector<1x256xf32>
    %14 = vector.broadcast %13 : vector<1x256xf32> to vector<96x256xf32>
    %15 = arith.addf %12, %14 : vector<96x256xf32>
    %cst_15 = arith.constant 0.000000e+00 : f32
    %16 = vector.broadcast %cst_15 : f32 to vector<96x256xf32>
    %17 = vector.extract_strided_slice %5 {offsets = [0, 0], sizes = [96, 64], strides = [1, 1]} : vector<96x256xf32> to vector<96x64xf32>
    %18 = vector.shape_cast %17 : vector<96x64xf32> to vector<12x8x64xf32>
    %19 = vector.extract_strided_slice %10 {offsets = [0, 0], sizes = [96, 64], strides = [1, 1]} : vector<96x256xf32> to vector<96x64xf32>
    %20 = vector.shape_cast %19 : vector<96x64xf32> to vector<12x8x64xf32>
    %21 = vector.extract_strided_slice %15 {offsets = [0, 0], sizes = [96, 64], strides = [1, 1]} : vector<96x256xf32> to vector<96x64xf32>
    %22 = vector.shape_cast %21 : vector<96x64xf32> to vector<12x8x64xf32>
    %cst_16 = arith.constant dense<0.000000e+00> : vector<12x8x8xf32>
    %23 = tpu.matmul %18, %20, %cst_16 {dimension_numbers = #tpu.dot_dimension_numbers<[2], [2], [1], [1], [0, 0, 0, 1, 1, 1], [0], [0]>} : vector<12x8x64xf32>, vector<12x8x64xf32>, vector<12x8x8xf32> -> vector<12x8x8xf32>
    %cst_17 = arith.constant 1.250000e-01 : f32
    %24 = vector.broadcast %cst_17 : f32 to vector<12x8x8xf32>
    %25 = arith.mulf %23, %24 : vector<12x8x8xf32>
    %cst_18 = arith.constant dense<0xFF800000> : vector<12x8xf32>
    %26 = vector.multi_reduction <maximumf>, %25, %cst_18 [2] : vector<12x8x8xf32> to vector<12x8xf32>
    %27 = vector.shape_cast %26 : vector<12x8xf32> to vector<12x8x1xf32>
    %28 = vector.broadcast %27 : vector<12x8x1xf32> to vector<12x8x8xf32>
    %29 = arith.subf %25, %28 : vector<12x8x8xf32>
    %30 = math.exp %29 : vector<12x8x8xf32>
    %cst_19 = arith.constant dense<0.000000e+00> : vector<12x8xf32>
    %31 = vector.multi_reduction <add>, %30, %cst_19 [2] : vector<12x8x8xf32> to vector<12x8xf32>
    %32 = vector.shape_cast %31 : vector<12x8xf32> to vector<12x8x1xf32>
    %33 = tpu.reciprocal %32 {approx = true} : vector<12x8x1xf32> -> vector<12x8x1xf32>
    %34 = vector.broadcast %33 : vector<12x8x1xf32> to vector<12x8x8xf32>
    %35 = arith.mulf %30, %34 : vector<12x8x8xf32>
    %cst_20 = arith.constant dense<0.000000e+00> : vector<12x8x64xf32>
    %36 = tpu.matmul %35, %22, %cst_20 {dimension_numbers = #tpu.dot_dimension_numbers<[2], [1], [1], [2], [0, 0, 0, 1, 1, 2], [0], [0]>} : vector<12x8x8xf32>, vector<12x8x64xf32>, vector<12x8x64xf32> -> vector<12x8x64xf32>
    %37 = vector.shape_cast %36 : vector<12x8x64xf32> to vector<96x64xf32>
    %38 = arith.truncf %37 : vector<96x64xf32> to vector<96x64xbf16>
    %c0_21 = arith.constant 0 : index
    %c0_22 = arith.constant 0 : index
    %39 = vector.load %arg8[%c0_21, %c0_22] : memref<256x256xbf16, #tpu.memory_space<vmem>>, vector<64x256xbf16>
    %cst_23 = arith.constant dense<0.000000e+00> : vector<96x256xf32>
    %40 = tpu.matmul %38, %39, %cst_23 {dimension_numbers = #tpu.dot_dimension_numbers<[1], [0], [0], [1], [0, 0, 1, 1], [], []>} : vector<96x64xbf16>, vector<64x256xbf16>, vector<96x256xf32> -> vector<96x256xf32>
    %41 = arith.addf %16, %40 : vector<96x256xf32>
    %42 = vector.extract_strided_slice %5 {offsets = [0, 64], sizes = [96, 64], strides = [1, 1]} : vector<96x256xf32> to vector<96x64xf32>
    %43 = vector.shape_cast %42 : vector<96x64xf32> to vector<12x8x64xf32>
    %44 = vector.extract_strided_slice %10 {offsets = [0, 64], sizes = [96, 64], strides = [1, 1]} : vector<96x256xf32> to vector<96x64xf32>
    %45 = vector.shape_cast %44 : vector<96x64xf32> to vector<12x8x64xf32>
    %46 = vector.extract_strided_slice %15 {offsets = [0, 64], sizes = [96, 64], strides = [1, 1]} : vector<96x256xf32> to vector<96x64xf32>
    %47 = vector.shape_cast %46 : vector<96x64xf32> to vector<12x8x64xf32>
    %cst_24 = arith.constant dense<0.000000e+00> : vector<12x8x8xf32>
    %48 = tpu.matmul %43, %45, %cst_24 {dimension_numbers = #tpu.dot_dimension_numbers<[2], [2], [1], [1], [0, 0, 0, 1, 1, 1], [0], [0]>} : vector<12x8x64xf32>, vector<12x8x64xf32>, vector<12x8x8xf32> -> vector<12x8x8xf32>
    %cst_25 = arith.constant 1.250000e-01 : f32
    %49 = vector.broadcast %cst_25 : f32 to vector<12x8x8xf32>
    %50 = arith.mulf %48, %49 : vector<12x8x8xf32>
    %cst_26 = arith.constant dense<0xFF800000> : vector<12x8xf32>
    %51 = vector.multi_reduction <maximumf>, %50, %cst_26 [2] : vector<12x8x8xf32> to vector<12x8xf32>
    %52 = vector.shape_cast %51 : vector<12x8xf32> to vector<12x8x1xf32>
    %53 = vector.broadcast %52 : vector<12x8x1xf32> to vector<12x8x8xf32>
    %54 = arith.subf %50, %53 : vector<12x8x8xf32>
    %55 = math.exp %54 : vector<12x8x8xf32>
    %cst_27 = arith.constant dense<0.000000e+00> : vector<12x8xf32>
    %56 = vector.multi_reduction <add>, %55, %cst_27 [2] : vector<12x8x8xf32> to vector<12x8xf32>
    %57 = vector.shape_cast %56 : vector<12x8xf32> to vector<12x8x1xf32>
    %58 = tpu.reciprocal %57 {approx = true} : vector<12x8x1xf32> -> vector<12x8x1xf32>
    %59 = vector.broadcast %58 : vector<12x8x1xf32> to vector<12x8x8xf32>
    %60 = arith.mulf %55, %59 : vector<12x8x8xf32>
    %cst_28 = arith.constant dense<0.000000e+00> : vector<12x8x64xf32>
    %61 = tpu.matmul %60, %47, %cst_28 {dimension_numbers = #tpu.dot_dimension_numbers<[2], [1], [1], [2], [0, 0, 0, 1, 1, 2], [0], [0]>} : vector<12x8x8xf32>, vector<12x8x64xf32>, vector<12x8x64xf32> -> vector<12x8x64xf32>
    %62 = vector.shape_cast %61 : vector<12x8x64xf32> to vector<96x64xf32>
    %63 = arith.truncf %62 : vector<96x64xf32> to vector<96x64xbf16>
    %c64 = arith.constant 64 : index
    %c0_29 = arith.constant 0 : index
    %64 = vector.load %arg8[%c64, %c0_29] : memref<256x256xbf16, #tpu.memory_space<vmem>>, vector<64x256xbf16>
    %cst_30 = arith.constant dense<0.000000e+00> : vector<96x256xf32>
    %65 = tpu.matmul %63, %64, %cst_30 {dimension_numbers = #tpu.dot_dimension_numbers<[1], [0], [0], [1], [0, 0, 1, 1], [], []>} : vector<96x64xbf16>, vector<64x256xbf16>, vector<96x256xf32> -> vector<96x256xf32>
    %66 = arith.addf %41, %65 : vector<96x256xf32>
    %67 = vector.extract_strided_slice %5 {offsets = [0, 128], sizes = [96, 64], strides = [1, 1]} : vector<96x256xf32> to vector<96x64xf32>
    %68 = vector.shape_cast %67 : vector<96x64xf32> to vector<12x8x64xf32>
    %69 = vector.extract_strided_slice %10 {offsets = [0, 128], sizes = [96, 64], strides = [1, 1]} : vector<96x256xf32> to vector<96x64xf32>
    %70 = vector.shape_cast %69 : vector<96x64xf32> to vector<12x8x64xf32>
    %71 = vector.extract_strided_slice %15 {offsets = [0, 128], sizes = [96, 64], strides = [1, 1]} : vector<96x256xf32> to vector<96x64xf32>
    %72 = vector.shape_cast %71 : vector<96x64xf32> to vector<12x8x64xf32>
    %cst_31 = arith.constant dense<0.000000e+00> : vector<12x8x8xf32>
    %73 = tpu.matmul %68, %70, %cst_31 {dimension_numbers = #tpu.dot_dimension_numbers<[2], [2], [1], [1], [0, 0, 0, 1, 1, 1], [0], [0]>} : vector<12x8x64xf32>, vector<12x8x64xf32>, vector<12x8x8xf32> -> vector<12x8x8xf32>
    %cst_32 = arith.constant 1.250000e-01 : f32
    %74 = vector.broadcast %cst_32 : f32 to vector<12x8x8xf32>
    %75 = arith.mulf %73, %74 : vector<12x8x8xf32>
    %cst_33 = arith.constant dense<0xFF800000> : vector<12x8xf32>
    %76 = vector.multi_reduction <maximumf>, %75, %cst_33 [2] : vector<12x8x8xf32> to vector<12x8xf32>
    %77 = vector.shape_cast %76 : vector<12x8xf32> to vector<12x8x1xf32>
    %78 = vector.broadcast %77 : vector<12x8x1xf32> to vector<12x8x8xf32>
    %79 = arith.subf %75, %78 : vector<12x8x8xf32>
    %80 = math.exp %79 : vector<12x8x8xf32>
    %cst_34 = arith.constant dense<0.000000e+00> : vector<12x8xf32>
    %81 = vector.multi_reduction <add>, %80, %cst_34 [2] : vector<12x8x8xf32> to vector<12x8xf32>
    %82 = vector.shape_cast %81 : vector<12x8xf32> to vector<12x8x1xf32>
    %83 = tpu.reciprocal %82 {approx = true} : vector<12x8x1xf32> -> vector<12x8x1xf32>
    %84 = vector.broadcast %83 : vector<12x8x1xf32> to vector<12x8x8xf32>
    %85 = arith.mulf %80, %84 : vector<12x8x8xf32>
    %cst_35 = arith.constant dense<0.000000e+00> : vector<12x8x64xf32>
    %86 = tpu.matmul %85, %72, %cst_35 {dimension_numbers = #tpu.dot_dimension_numbers<[2], [1], [1], [2], [0, 0, 0, 1, 1, 2], [0], [0]>} : vector<12x8x8xf32>, vector<12x8x64xf32>, vector<12x8x64xf32> -> vector<12x8x64xf32>
    %87 = vector.shape_cast %86 : vector<12x8x64xf32> to vector<96x64xf32>
    %88 = arith.truncf %87 : vector<96x64xf32> to vector<96x64xbf16>
    %c128 = arith.constant 128 : index
    %c0_36 = arith.constant 0 : index
    %89 = vector.load %arg8[%c128, %c0_36] : memref<256x256xbf16, #tpu.memory_space<vmem>>, vector<64x256xbf16>
    %cst_37 = arith.constant dense<0.000000e+00> : vector<96x256xf32>
    %90 = tpu.matmul %88, %89, %cst_37 {dimension_numbers = #tpu.dot_dimension_numbers<[1], [0], [0], [1], [0, 0, 1, 1], [], []>} : vector<96x64xbf16>, vector<64x256xbf16>, vector<96x256xf32> -> vector<96x256xf32>
    %91 = arith.addf %66, %90 : vector<96x256xf32>
    %92 = vector.extract_strided_slice %5 {offsets = [0, 192], sizes = [96, 64], strides = [1, 1]} : vector<96x256xf32> to vector<96x64xf32>
    %93 = vector.shape_cast %92 : vector<96x64xf32> to vector<12x8x64xf32>
    %94 = vector.extract_strided_slice %10 {offsets = [0, 192], sizes = [96, 64], strides = [1, 1]} : vector<96x256xf32> to vector<96x64xf32>
    %95 = vector.shape_cast %94 : vector<96x64xf32> to vector<12x8x64xf32>
    %96 = vector.extract_strided_slice %15 {offsets = [0, 192], sizes = [96, 64], strides = [1, 1]} : vector<96x256xf32> to vector<96x64xf32>
    %97 = vector.shape_cast %96 : vector<96x64xf32> to vector<12x8x64xf32>
    %cst_38 = arith.constant dense<0.000000e+00> : vector<12x8x8xf32>
    %98 = tpu.matmul %93, %95, %cst_38 {dimension_numbers = #tpu.dot_dimension_numbers<[2], [2], [1], [1], [0, 0, 0, 1, 1, 1], [0], [0]>} : vector<12x8x64xf32>, vector<12x8x64xf32>, vector<12x8x8xf32> -> vector<12x8x8xf32>
    %cst_39 = arith.constant 1.250000e-01 : f32
    %99 = vector.broadcast %cst_39 : f32 to vector<12x8x8xf32>
    %100 = arith.mulf %98, %99 : vector<12x8x8xf32>
    %cst_40 = arith.constant dense<0xFF800000> : vector<12x8xf32>
    %101 = vector.multi_reduction <maximumf>, %100, %cst_40 [2] : vector<12x8x8xf32> to vector<12x8xf32>
    %102 = vector.shape_cast %101 : vector<12x8xf32> to vector<12x8x1xf32>
    %103 = vector.broadcast %102 : vector<12x8x1xf32> to vector<12x8x8xf32>
    %104 = arith.subf %100, %103 : vector<12x8x8xf32>
    %105 = math.exp %104 : vector<12x8x8xf32>
    %cst_41 = arith.constant dense<0.000000e+00> : vector<12x8xf32>
    %106 = vector.multi_reduction <add>, %105, %cst_41 [2] : vector<12x8x8xf32> to vector<12x8xf32>
    %107 = vector.shape_cast %106 : vector<12x8xf32> to vector<12x8x1xf32>
    %108 = tpu.reciprocal %107 {approx = true} : vector<12x8x1xf32> -> vector<12x8x1xf32>
    %109 = vector.broadcast %108 : vector<12x8x1xf32> to vector<12x8x8xf32>
    %110 = arith.mulf %105, %109 : vector<12x8x8xf32>
    %cst_42 = arith.constant dense<0.000000e+00> : vector<12x8x64xf32>
    %111 = tpu.matmul %110, %97, %cst_42 {dimension_numbers = #tpu.dot_dimension_numbers<[2], [1], [1], [2], [0, 0, 0, 1, 1, 2], [0], [0]>} : vector<12x8x8xf32>, vector<12x8x64xf32>, vector<12x8x64xf32> -> vector<12x8x64xf32>
    %112 = vector.shape_cast %111 : vector<12x8x64xf32> to vector<96x64xf32>
    %113 = arith.truncf %112 : vector<96x64xf32> to vector<96x64xbf16>
    %c192 = arith.constant 192 : index
    %c0_43 = arith.constant 0 : index
    %114 = vector.load %arg8[%c192, %c0_43] : memref<256x256xbf16, #tpu.memory_space<vmem>>, vector<64x256xbf16>
    %cst_44 = arith.constant dense<0.000000e+00> : vector<96x256xf32>
    %115 = tpu.matmul %113, %114, %cst_44 {dimension_numbers = #tpu.dot_dimension_numbers<[1], [0], [0], [1], [0, 0, 1, 1], [], []>} : vector<96x64xbf16>, vector<64x256xbf16>, vector<96x256xf32> -> vector<96x256xf32>
    %116 = arith.addf %91, %115 : vector<96x256xf32>
    %c0_45 = arith.constant 0 : index
    %c0_46 = arith.constant 0 : index
    %117 = vector.load %arg9[%c0_45, %c0_46] : memref<1x256xf32, #tpu.memory_space<vmem>>, vector<1x256xf32>
    %118 = vector.broadcast %117 : vector<1x256xf32> to vector<96x256xf32>
    %119 = arith.addf %116, %118 : vector<96x256xf32>
    %120 = arith.truncf %119 : vector<96x256xf32> to vector<96x256xbf16>
    %c0_47 = arith.constant 0 : index
    %c0_48 = arith.constant 0 : index
    %121 = vector.load %arg10[%c0_47, %c0_48] : memref<256x128xbf16, #tpu.memory_space<vmem>>, vector<256x128xbf16>
    %cst_49 = arith.constant dense<0.000000e+00> : vector<96x128xf32>
    %122 = tpu.matmul %120, %121, %cst_49 {dimension_numbers = #tpu.dot_dimension_numbers<[1], [0], [0], [1], [0, 0, 1, 1], [], []>} : vector<96x256xbf16>, vector<256x128xbf16>, vector<96x128xf32> -> vector<96x128xf32>
    %c0_50 = arith.constant 0 : index
    %c0_51 = arith.constant 0 : index
    %123 = vector.load %arg11[%c0_50, %c0_51] : memref<1x128xf32, #tpu.memory_space<vmem>>, vector<1x128xf32>
    %124 = vector.broadcast %123 : vector<1x128xf32> to vector<96x128xf32>
    %125 = arith.addf %122, %124 : vector<96x128xf32>
    %126 = math.tanh %125 : vector<96x128xf32>
    %127 = vector.shape_cast %126 : vector<96x128xf32> to vector<12x8x128xf32>
    %c0_52 = arith.constant 0 : index
    %c0_53 = arith.constant 0 : index
    %128 = vector.load %arg12[%c0_52, %c0_53] : memref<1x128xf32, #tpu.memory_space<vmem>>, vector<1x128xf32>
    %129 = vector.shape_cast %128 : vector<1x128xf32> to vector<1x1x128xf32>
    %130 = vector.broadcast %129 : vector<1x1x128xf32> to vector<12x8x128xf32>
    %131 = arith.mulf %127, %130 : vector<12x8x128xf32>
    %cst_54 = arith.constant dense<0.000000e+00> : vector<12x8xf32>
    %132 = vector.multi_reduction <add>, %131, %cst_54 [2] : vector<12x8x128xf32> to vector<12x8xf32>
    %cst_55 = arith.constant dense<0xFF800000> : vector<12xf32>
    %133 = vector.multi_reduction <maximumf>, %132, %cst_55 [1] : vector<12x8xf32> to vector<12xf32>
    %134 = vector.shape_cast %133 : vector<12xf32> to vector<12x1xf32>
    %135 = vector.broadcast %134 : vector<12x1xf32> to vector<12x8xf32>
    %136 = arith.subf %132, %135 : vector<12x8xf32>
    %137 = math.exp %136 : vector<12x8xf32>
    %cst_56 = arith.constant dense<0.000000e+00> : vector<12xf32>
    %138 = vector.multi_reduction <add>, %137, %cst_56 [1] : vector<12x8xf32> to vector<12xf32>
    %139 = vector.shape_cast %138 : vector<12xf32> to vector<12x1xf32>
    %140 = tpu.reciprocal %139 {approx = true} : vector<12x1xf32> -> vector<12x1xf32>
    %141 = vector.broadcast %140 : vector<12x1xf32> to vector<12x8xf32>
    %142 = arith.mulf %137, %141 : vector<12x8xf32>
    %143 = vector.shape_cast %142 : vector<12x8xf32> to vector<12x8x1xf32>
    %144 = vector.shape_cast %119 : vector<96x256xf32> to vector<12x8x256xf32>
    %145 = vector.broadcast %143 : vector<12x8x1xf32> to vector<12x8x256xf32>
    %146 = arith.mulf %145, %144 : vector<12x8x256xf32>
    %cst_57 = arith.constant dense<0.000000e+00> : vector<12x256xf32>
    %147 = vector.multi_reduction <add>, %146, %cst_57 [1] : vector<12x8x256xf32> to vector<12x256xf32>
    %c0_58 = arith.constant 0 : index
    %c0_59 = arith.constant 0 : index
    %148 = vector.load %arg13[%c0_58, %c0_59] : memref<12x256xf32, #tpu.memory_space<vmem>>, vector<12x256xf32>
    tpu.vector_store %arg13[%c0_58, %c0_59], %147 {strides = array<i32>} : memref<12x256xf32, #tpu.memory_space<vmem>>, vector<12x256xf32>,
    return
  }
  func.func @transform_0(%arg0: i32) -> (i32, i32) {
    %c0_i32 = arith.constant 0 : i32
    %c0_i32_0 = arith.constant 0 : i32
    return %arg0, %c0_i32 : i32, i32
  }
  func.func @transform_1(%arg0: i32) -> (i32, i32) {
    %c0_i32 = arith.constant 0 : i32
    %c0_i32_0 = arith.constant 0 : i32
    %c0_i32_1 = arith.constant 0 : i32
    return %c0_i32, %c0_i32_0 : i32, i32
  }
  func.func @transform_2(%arg0: i32) -> (i32, i32) {
    %c0_i32 = arith.constant 0 : i32
    %c0_i32_0 = arith.constant 0 : i32
    %c0_i32_1 = arith.constant 0 : i32
    return %c0_i32, %c0_i32_0 : i32, i32
  }
  func.func @transform_3(%arg0: i32) -> (i32, i32) {
    %c0_i32 = arith.constant 0 : i32
    %c0_i32_0 = arith.constant 0 : i32
    %c0_i32_1 = arith.constant 0 : i32
    return %c0_i32, %c0_i32_0 : i32, i32
  }
  func.func @transform_4(%arg0: i32) -> (i32, i32) {
    %c0_i32 = arith.constant 0 : i32
    %c0_i32_0 = arith.constant 0 : i32
    %c0_i32_1 = arith.constant 0 : i32
    return %c0_i32, %c0_i32_0 : i32, i32
  }
  func.func @transform_5(%arg0: i32) -> (i32, i32) {
    %c0_i32 = arith.constant 0 : i32
    %c0_i32_0 = arith.constant 0 : i32
    %c0_i32_1 = arith.constant 0 : i32
    return %c0_i32, %c0_i32_0 : i32, i32
  }
  func.func @transform_6(%arg0: i32) -> (i32, i32) {
    %c0_i32 = arith.constant 0 : i32
    %c0_i32_0 = arith.constant 0 : i32
    %c0_i32_1 = arith.constant 0 : i32
    return %c0_i32, %c0_i32_0 : i32, i32
  }
  func.func @transform_7(%arg0: i32) -> (i32, i32) {
    %c0_i32 = arith.constant 0 : i32
    %c0_i32_0 = arith.constant 0 : i32
    %c0_i32_1 = arith.constant 0 : i32
    return %c0_i32, %c0_i32_0 : i32, i32
  }
  func.func @transform_8(%arg0: i32) -> (i32, i32) {
    %c0_i32 = arith.constant 0 : i32
    %c0_i32_0 = arith.constant 0 : i32
    %c0_i32_1 = arith.constant 0 : i32
    return %c0_i32, %c0_i32_0 : i32, i32
  }
  func.func @transform_9(%arg0: i32) -> (i32, i32) {
    %c0_i32 = arith.constant 0 : i32
    %c0_i32_0 = arith.constant 0 : i32
    %c0_i32_1 = arith.constant 0 : i32
    return %c0_i32, %c0_i32_0 : i32, i32
  }
  func.func @transform_10(%arg0: i32) -> (i32, i32) {
    %c0_i32 = arith.constant 0 : i32
    %c0_i32_0 = arith.constant 0 : i32
    %c0_i32_1 = arith.constant 0 : i32
    return %c0_i32, %c0_i32_0 : i32, i32
  }
  func.func @transform_11(%arg0: i32) -> (i32, i32) {
    %c0_i32 = arith.constant 0 : i32
    %c0_i32_0 = arith.constant 0 : i32
    %c0_i32_1 = arith.constant 0 : i32
    return %c0_i32, %c0_i32_0 : i32, i32
  }
  func.func @transform_12(%arg0: i32) -> (i32, i32) {
    %c0_i32 = arith.constant 0 : i32
    %c0_i32_0 = arith.constant 0 : i32
    return %arg0, %c0_i32 : i32, i32
  }
}

module attributes {stable_mosaic.version = 11 : i64} {
  func.func @mha_pool_kernel(%arg0: i32, %arg1: memref<64x128xbf16, #tpu.memory_space<vmem>>, %arg2: memref<128x256xbf16, #tpu.memory_space<vmem>>, %arg3: memref<128x256xbf16, #tpu.memory_space<vmem>>, %arg4: memref<128x256xbf16, #tpu.memory_space<vmem>>, %arg5: memref<1x256xf32, #tpu.memory_space<vmem>>, %arg6: memref<1x256xf32, #tpu.memory_space<vmem>>, %arg7: memref<1x256xf32, #tpu.memory_space<vmem>>, %arg8: memref<256x256xbf16, #tpu.memory_space<vmem>>, %arg9: memref<1x256xf32, #tpu.memory_space<vmem>>, %arg10: memref<256x128xbf16, #tpu.memory_space<vmem>>, %arg11: memref<1x128xf32, #tpu.memory_space<vmem>>, %arg12: memref<1x128xf32, #tpu.memory_space<vmem>>, %arg13: memref<8x256xf32, #tpu.memory_space<vmem>>) attributes {dimension_semantics = [#tpu.dimension_semantics<parallel>], iteration_bounds = array<i64: 1>, scalar_prefetch = 0 : i64, scratch_operands = 0 : i64, tpu.core_type = #tpu.core_type<tc>, window_params = [{transform_indices = @transform_0, window_bounds = array<i64: 64, 128>}, {pipeline_mode = #tpu.pipeline_mode<synchronous>, transform_indices = @transform_1, window_bounds = array<i64: 128, 256>}, {pipeline_mode = #tpu.pipeline_mode<synchronous>, transform_indices = @transform_2, window_bounds = array<i64: 128, 256>}, {pipeline_mode = #tpu.pipeline_mode<synchronous>, transform_indices = @transform_3, window_bounds = array<i64: 128, 256>}, {pipeline_mode = #tpu.pipeline_mode<synchronous>, transform_indices = @transform_4, window_bounds = array<i64: 1, 256>}, {pipeline_mode = #tpu.pipeline_mode<synchronous>, transform_indices = @transform_5, window_bounds = array<i64: 1, 256>}, {pipeline_mode = #tpu.pipeline_mode<synchronous>, transform_indices = @transform_6, window_bounds = array<i64: 1, 256>}, {pipeline_mode = #tpu.pipeline_mode<synchronous>, transform_indices = @transform_7, window_bounds = array<i64: 256, 256>}, {pipeline_mode = #tpu.pipeline_mode<synchronous>, transform_indices = @transform_8, window_bounds = array<i64: 1, 256>}, {pipeline_mode = #tpu.pipeline_mode<synchronous>, transform_indices = @transform_9, window_bounds = array<i64: 256, 128>}, {pipeline_mode = #tpu.pipeline_mode<synchronous>, transform_indices = @transform_10, window_bounds = array<i64: 1, 128>}, {pipeline_mode = #tpu.pipeline_mode<synchronous>, transform_indices = @transform_11, window_bounds = array<i64: 1, 128>}, {transform_indices = @transform_12, window_bounds = array<i64: 8, 256>}]} {
    %c0 = arith.constant 0 : index
    %c0_0 = arith.constant 0 : index
    %0 = vector.load %arg1[%c0, %c0_0] : memref<64x128xbf16, #tpu.memory_space<vmem>>, vector<64x128xbf16>
    %c0_1 = arith.constant 0 : index
    %c0_2 = arith.constant 0 : index
    %1 = vector.load %arg2[%c0_1, %c0_2] : memref<128x256xbf16, #tpu.memory_space<vmem>>, vector<128x256xbf16>
    %cst = arith.constant dense<0.000000e+00> : vector<64x256xf32>
    %2 = tpu.matmul %0, %1, %cst {dimension_numbers = #tpu.dot_dimension_numbers<[1], [0], [0], [1], [0, 0, 1, 1], [], []>} : vector<64x128xbf16>, vector<128x256xbf16>, vector<64x256xf32> -> vector<64x256xf32>
    %c0_3 = arith.constant 0 : index
    %c0_4 = arith.constant 0 : index
    %3 = vector.load %arg5[%c0_3, %c0_4] : memref<1x256xf32, #tpu.memory_space<vmem>>, vector<1x256xf32>
    %4 = vector.broadcast %3 : vector<1x256xf32> to vector<64x256xf32>
    %5 = arith.addf %2, %4 : vector<64x256xf32>
    %c0_5 = arith.constant 0 : index
    %c0_6 = arith.constant 0 : index
    %6 = vector.load %arg3[%c0_5, %c0_6] : memref<128x256xbf16, #tpu.memory_space<vmem>>, vector<128x256xbf16>
    %cst_7 = arith.constant dense<0.000000e+00> : vector<64x256xf32>
    %7 = tpu.matmul %0, %6, %cst_7 {dimension_numbers = #tpu.dot_dimension_numbers<[1], [0], [0], [1], [0, 0, 1, 1], [], []>} : vector<64x128xbf16>, vector<128x256xbf16>, vector<64x256xf32> -> vector<64x256xf32>
    %c0_8 = arith.constant 0 : index
    %c0_9 = arith.constant 0 : index
    %8 = vector.load %arg6[%c0_8, %c0_9] : memref<1x256xf32, #tpu.memory_space<vmem>>, vector<1x256xf32>
    %9 = vector.broadcast %8 : vector<1x256xf32> to vector<64x256xf32>
    %10 = arith.addf %7, %9 : vector<64x256xf32>
    %c0_10 = arith.constant 0 : index
    %c0_11 = arith.constant 0 : index
    %11 = vector.load %arg4[%c0_10, %c0_11] : memref<128x256xbf16, #tpu.memory_space<vmem>>, vector<128x256xbf16>
    %cst_12 = arith.constant dense<0.000000e+00> : vector<64x256xf32>
    %12 = tpu.matmul %0, %11, %cst_12 {dimension_numbers = #tpu.dot_dimension_numbers<[1], [0], [0], [1], [0, 0, 1, 1], [], []>} : vector<64x128xbf16>, vector<128x256xbf16>, vector<64x256xf32> -> vector<64x256xf32>
    %c0_13 = arith.constant 0 : index
    %c0_14 = arith.constant 0 : index
    %13 = vector.load %arg7[%c0_13, %c0_14] : memref<1x256xf32, #tpu.memory_space<vmem>>, vector<1x256xf32>
    %14 = vector.broadcast %13 : vector<1x256xf32> to vector<64x256xf32>
    %15 = arith.addf %12, %14 : vector<64x256xf32>
    %cst_15 = arith.constant 0.000000e+00 : f32
    %16 = vector.broadcast %cst_15 : f32 to vector<64x256xf32>
    %17 = vector.extract_strided_slice %5 {offsets = [0, 0], sizes = [64, 64], strides = [1, 1]} : vector<64x256xf32> to vector<64x64xf32>
    %18 = vector.shape_cast %17 : vector<64x64xf32> to vector<8x8x64xf32>
    %19 = vector.extract_strided_slice %10 {offsets = [0, 0], sizes = [64, 64], strides = [1, 1]} : vector<64x256xf32> to vector<64x64xf32>
    %20 = vector.shape_cast %19 : vector<64x64xf32> to vector<8x8x64xf32>
    %21 = vector.extract_strided_slice %15 {offsets = [0, 0], sizes = [64, 64], strides = [1, 1]} : vector<64x256xf32> to vector<64x64xf32>
    %22 = vector.shape_cast %21 : vector<64x64xf32> to vector<8x8x64xf32>
    %cst_16 = arith.constant dense<0.000000e+00> : vector<8x8x8xf32>
    %23 = tpu.matmul %18, %20, %cst_16 {dimension_numbers = #tpu.dot_dimension_numbers<[2], [2], [1], [1], [0, 0, 0, 1, 1, 1], [0], [0]>} : vector<8x8x64xf32>, vector<8x8x64xf32>, vector<8x8x8xf32> -> vector<8x8x8xf32>
    %cst_17 = arith.constant 1.250000e-01 : f32
    %24 = vector.broadcast %cst_17 : f32 to vector<8x8x8xf32>
    %25 = arith.mulf %23, %24 : vector<8x8x8xf32>
    %cst_18 = arith.constant dense<0xFF800000> : vector<8x8xf32>
    %26 = vector.multi_reduction <maximumf>, %25, %cst_18 [2] : vector<8x8x8xf32> to vector<8x8xf32>
    %27 = vector.shape_cast %26 : vector<8x8xf32> to vector<8x8x1xf32>
    %28 = vector.broadcast %27 : vector<8x8x1xf32> to vector<8x8x8xf32>
    %29 = arith.subf %25, %28 : vector<8x8x8xf32>
    %30 = math.exp %29 : vector<8x8x8xf32>
    %cst_19 = arith.constant dense<0.000000e+00> : vector<8x8xf32>
    %31 = vector.multi_reduction <add>, %30, %cst_19 [2] : vector<8x8x8xf32> to vector<8x8xf32>
    %32 = vector.shape_cast %31 : vector<8x8xf32> to vector<8x8x1xf32>
    %33 = tpu.reciprocal %32 {approx = true} : vector<8x8x1xf32> -> vector<8x8x1xf32>
    %34 = vector.broadcast %33 : vector<8x8x1xf32> to vector<8x8x8xf32>
    %35 = arith.mulf %30, %34 : vector<8x8x8xf32>
    %cst_20 = arith.constant dense<0.000000e+00> : vector<8x8x64xf32>
    %36 = tpu.matmul %35, %22, %cst_20 {dimension_numbers = #tpu.dot_dimension_numbers<[2], [1], [1], [2], [0, 0, 0, 1, 1, 2], [0], [0]>} : vector<8x8x8xf32>, vector<8x8x64xf32>, vector<8x8x64xf32> -> vector<8x8x64xf32>
    %37 = vector.shape_cast %36 : vector<8x8x64xf32> to vector<64x64xf32>
    %38 = arith.truncf %37 : vector<64x64xf32> to vector<64x64xbf16>
    %c0_21 = arith.constant 0 : index
    %c0_22 = arith.constant 0 : index
    %39 = vector.load %arg8[%c0_21, %c0_22] : memref<256x256xbf16, #tpu.memory_space<vmem>>, vector<64x256xbf16>
    %cst_23 = arith.constant dense<0.000000e+00> : vector<64x256xf32>
    %40 = tpu.matmul %38, %39, %cst_23 {dimension_numbers = #tpu.dot_dimension_numbers<[1], [0], [0], [1], [0, 0, 1, 1], [], []>} : vector<64x64xbf16>, vector<64x256xbf16>, vector<64x256xf32> -> vector<64x256xf32>
    %41 = arith.addf %16, %40 : vector<64x256xf32>
    %42 = vector.extract_strided_slice %5 {offsets = [0, 64], sizes = [64, 64], strides = [1, 1]} : vector<64x256xf32> to vector<64x64xf32>
    %43 = vector.shape_cast %42 : vector<64x64xf32> to vector<8x8x64xf32>
    %44 = vector.extract_strided_slice %10 {offsets = [0, 64], sizes = [64, 64], strides = [1, 1]} : vector<64x256xf32> to vector<64x64xf32>
    %45 = vector.shape_cast %44 : vector<64x64xf32> to vector<8x8x64xf32>
    %46 = vector.extract_strided_slice %15 {offsets = [0, 64], sizes = [64, 64], strides = [1, 1]} : vector<64x256xf32> to vector<64x64xf32>
    %47 = vector.shape_cast %46 : vector<64x64xf32> to vector<8x8x64xf32>
    %cst_24 = arith.constant dense<0.000000e+00> : vector<8x8x8xf32>
    %48 = tpu.matmul %43, %45, %cst_24 {dimension_numbers = #tpu.dot_dimension_numbers<[2], [2], [1], [1], [0, 0, 0, 1, 1, 1], [0], [0]>} : vector<8x8x64xf32>, vector<8x8x64xf32>, vector<8x8x8xf32> -> vector<8x8x8xf32>
    %cst_25 = arith.constant 1.250000e-01 : f32
    %49 = vector.broadcast %cst_25 : f32 to vector<8x8x8xf32>
    %50 = arith.mulf %48, %49 : vector<8x8x8xf32>
    %cst_26 = arith.constant dense<0xFF800000> : vector<8x8xf32>
    %51 = vector.multi_reduction <maximumf>, %50, %cst_26 [2] : vector<8x8x8xf32> to vector<8x8xf32>
    %52 = vector.shape_cast %51 : vector<8x8xf32> to vector<8x8x1xf32>
    %53 = vector.broadcast %52 : vector<8x8x1xf32> to vector<8x8x8xf32>
    %54 = arith.subf %50, %53 : vector<8x8x8xf32>
    %55 = math.exp %54 : vector<8x8x8xf32>
    %cst_27 = arith.constant dense<0.000000e+00> : vector<8x8xf32>
    %56 = vector.multi_reduction <add>, %55, %cst_27 [2] : vector<8x8x8xf32> to vector<8x8xf32>
    %57 = vector.shape_cast %56 : vector<8x8xf32> to vector<8x8x1xf32>
    %58 = tpu.reciprocal %57 {approx = true} : vector<8x8x1xf32> -> vector<8x8x1xf32>
    %59 = vector.broadcast %58 : vector<8x8x1xf32> to vector<8x8x8xf32>
    %60 = arith.mulf %55, %59 : vector<8x8x8xf32>
    %cst_28 = arith.constant dense<0.000000e+00> : vector<8x8x64xf32>
    %61 = tpu.matmul %60, %47, %cst_28 {dimension_numbers = #tpu.dot_dimension_numbers<[2], [1], [1], [2], [0, 0, 0, 1, 1, 2], [0], [0]>} : vector<8x8x8xf32>, vector<8x8x64xf32>, vector<8x8x64xf32> -> vector<8x8x64xf32>
    %62 = vector.shape_cast %61 : vector<8x8x64xf32> to vector<64x64xf32>
    %63 = arith.truncf %62 : vector<64x64xf32> to vector<64x64xbf16>
    %c64 = arith.constant 64 : index
    %c0_29 = arith.constant 0 : index
    %64 = vector.load %arg8[%c64, %c0_29] : memref<256x256xbf16, #tpu.memory_space<vmem>>, vector<64x256xbf16>
    %cst_30 = arith.constant dense<0.000000e+00> : vector<64x256xf32>
    %65 = tpu.matmul %63, %64, %cst_30 {dimension_numbers = #tpu.dot_dimension_numbers<[1], [0], [0], [1], [0, 0, 1, 1], [], []>} : vector<64x64xbf16>, vector<64x256xbf16>, vector<64x256xf32> -> vector<64x256xf32>
    %66 = arith.addf %41, %65 : vector<64x256xf32>
    %67 = vector.extract_strided_slice %5 {offsets = [0, 128], sizes = [64, 64], strides = [1, 1]} : vector<64x256xf32> to vector<64x64xf32>
    %68 = vector.shape_cast %67 : vector<64x64xf32> to vector<8x8x64xf32>
    %69 = vector.extract_strided_slice %10 {offsets = [0, 128], sizes = [64, 64], strides = [1, 1]} : vector<64x256xf32> to vector<64x64xf32>
    %70 = vector.shape_cast %69 : vector<64x64xf32> to vector<8x8x64xf32>
    %71 = vector.extract_strided_slice %15 {offsets = [0, 128], sizes = [64, 64], strides = [1, 1]} : vector<64x256xf32> to vector<64x64xf32>
    %72 = vector.shape_cast %71 : vector<64x64xf32> to vector<8x8x64xf32>
    %cst_31 = arith.constant dense<0.000000e+00> : vector<8x8x8xf32>
    %73 = tpu.matmul %68, %70, %cst_31 {dimension_numbers = #tpu.dot_dimension_numbers<[2], [2], [1], [1], [0, 0, 0, 1, 1, 1], [0], [0]>} : vector<8x8x64xf32>, vector<8x8x64xf32>, vector<8x8x8xf32> -> vector<8x8x8xf32>
    %cst_32 = arith.constant 1.250000e-01 : f32
    %74 = vector.broadcast %cst_32 : f32 to vector<8x8x8xf32>
    %75 = arith.mulf %73, %74 : vector<8x8x8xf32>
    %cst_33 = arith.constant dense<0xFF800000> : vector<8x8xf32>
    %76 = vector.multi_reduction <maximumf>, %75, %cst_33 [2] : vector<8x8x8xf32> to vector<8x8xf32>
    %77 = vector.shape_cast %76 : vector<8x8xf32> to vector<8x8x1xf32>
    %78 = vector.broadcast %77 : vector<8x8x1xf32> to vector<8x8x8xf32>
    %79 = arith.subf %75, %78 : vector<8x8x8xf32>
    %80 = math.exp %79 : vector<8x8x8xf32>
    %cst_34 = arith.constant dense<0.000000e+00> : vector<8x8xf32>
    %81 = vector.multi_reduction <add>, %80, %cst_34 [2] : vector<8x8x8xf32> to vector<8x8xf32>
    %82 = vector.shape_cast %81 : vector<8x8xf32> to vector<8x8x1xf32>
    %83 = tpu.reciprocal %82 {approx = true} : vector<8x8x1xf32> -> vector<8x8x1xf32>
    %84 = vector.broadcast %83 : vector<8x8x1xf32> to vector<8x8x8xf32>
    %85 = arith.mulf %80, %84 : vector<8x8x8xf32>
    %cst_35 = arith.constant dense<0.000000e+00> : vector<8x8x64xf32>
    %86 = tpu.matmul %85, %72, %cst_35 {dimension_numbers = #tpu.dot_dimension_numbers<[2], [1], [1], [2], [0, 0, 0, 1, 1, 2], [0], [0]>} : vector<8x8x8xf32>, vector<8x8x64xf32>, vector<8x8x64xf32> -> vector<8x8x64xf32>
    %87 = vector.shape_cast %86 : vector<8x8x64xf32> to vector<64x64xf32>
    %88 = arith.truncf %87 : vector<64x64xf32> to vector<64x64xbf16>
    %c128 = arith.constant 128 : index
    %c0_36 = arith.constant 0 : index
    %89 = vector.load %arg8[%c128, %c0_36] : memref<256x256xbf16, #tpu.memory_space<vmem>>, vector<64x256xbf16>
    %cst_37 = arith.constant dense<0.000000e+00> : vector<64x256xf32>
    %90 = tpu.matmul %88, %89, %cst_37 {dimension_numbers = #tpu.dot_dimension_numbers<[1], [0], [0], [1], [0, 0, 1, 1], [], []>} : vector<64x64xbf16>, vector<64x256xbf16>, vector<64x256xf32> -> vector<64x256xf32>
    %91 = arith.addf %66, %90 : vector<64x256xf32>
    %92 = vector.extract_strided_slice %5 {offsets = [0, 192], sizes = [64, 64], strides = [1, 1]} : vector<64x256xf32> to vector<64x64xf32>
    %93 = vector.shape_cast %92 : vector<64x64xf32> to vector<8x8x64xf32>
    %94 = vector.extract_strided_slice %10 {offsets = [0, 192], sizes = [64, 64], strides = [1, 1]} : vector<64x256xf32> to vector<64x64xf32>
    %95 = vector.shape_cast %94 : vector<64x64xf32> to vector<8x8x64xf32>
    %96 = vector.extract_strided_slice %15 {offsets = [0, 192], sizes = [64, 64], strides = [1, 1]} : vector<64x256xf32> to vector<64x64xf32>
    %97 = vector.shape_cast %96 : vector<64x64xf32> to vector<8x8x64xf32>
    %cst_38 = arith.constant dense<0.000000e+00> : vector<8x8x8xf32>
    %98 = tpu.matmul %93, %95, %cst_38 {dimension_numbers = #tpu.dot_dimension_numbers<[2], [2], [1], [1], [0, 0, 0, 1, 1, 1], [0], [0]>} : vector<8x8x64xf32>, vector<8x8x64xf32>, vector<8x8x8xf32> -> vector<8x8x8xf32>
    %cst_39 = arith.constant 1.250000e-01 : f32
    %99 = vector.broadcast %cst_39 : f32 to vector<8x8x8xf32>
    %100 = arith.mulf %98, %99 : vector<8x8x8xf32>
    %cst_40 = arith.constant dense<0xFF800000> : vector<8x8xf32>
    %101 = vector.multi_reduction <maximumf>, %100, %cst_40 [2] : vector<8x8x8xf32> to vector<8x8xf32>
    %102 = vector.shape_cast %101 : vector<8x8xf32> to vector<8x8x1xf32>
    %103 = vector.broadcast %102 : vector<8x8x1xf32> to vector<8x8x8xf32>
    %104 = arith.subf %100, %103 : vector<8x8x8xf32>
    %105 = math.exp %104 : vector<8x8x8xf32>
    %cst_41 = arith.constant dense<0.000000e+00> : vector<8x8xf32>
    %106 = vector.multi_reduction <add>, %105, %cst_41 [2] : vector<8x8x8xf32> to vector<8x8xf32>
    %107 = vector.shape_cast %106 : vector<8x8xf32> to vector<8x8x1xf32>
    %108 = tpu.reciprocal %107 {approx = true} : vector<8x8x1xf32> -> vector<8x8x1xf32>
    %109 = vector.broadcast %108 : vector<8x8x1xf32> to vector<8x8x8xf32>
    %110 = arith.mulf %105, %109 : vector<8x8x8xf32>
    %cst_42 = arith.constant dense<0.000000e+00> : vector<8x8x64xf32>
    %111 = tpu.matmul %110, %97, %cst_42 {dimension_numbers = #tpu.dot_dimension_numbers<[2], [1], [1], [2], [0, 0, 0, 1, 1, 2], [0], [0]>} : vector<8x8x8xf32>, vector<8x8x64xf32>, vector<8x8x64xf32> -> vector<8x8x64xf32>
    %112 = vector.shape_cast %111 : vector<8x8x64xf32> to vector<64x64xf32>
    %113 = arith.truncf %112 : vector<64x64xf32> to vector<64x64xbf16>
    %c192 = arith.constant 192 : index
    %c0_43 = arith.constant 0 : index
    %114 = vector.load %arg8[%c192, %c0_43] : memref<256x256xbf16, #tpu.memory_space<vmem>>, vector<64x256xbf16>
    %cst_44 = arith.constant dense<0.000000e+00> : vector<64x256xf32>
    %115 = tpu.matmul %113, %114, %cst_44 {dimension_numbers = #tpu.dot_dimension_numbers<[1], [0], [0], [1], [0, 0, 1, 1], [], []>} : vector<64x64xbf16>, vector<64x256xbf16>, vector<64x256xf32> -> vector<64x256xf32>
    %116 = arith.addf %91, %115 : vector<64x256xf32>
    %c0_45 = arith.constant 0 : index
    %c0_46 = arith.constant 0 : index
    %117 = vector.load %arg9[%c0_45, %c0_46] : memref<1x256xf32, #tpu.memory_space<vmem>>, vector<1x256xf32>
    %118 = vector.broadcast %117 : vector<1x256xf32> to vector<64x256xf32>
    %119 = arith.addf %116, %118 : vector<64x256xf32>
    %120 = arith.truncf %119 : vector<64x256xf32> to vector<64x256xbf16>
    %c0_47 = arith.constant 0 : index
    %c0_48 = arith.constant 0 : index
    %121 = vector.load %arg10[%c0_47, %c0_48] : memref<256x128xbf16, #tpu.memory_space<vmem>>, vector<256x128xbf16>
    %cst_49 = arith.constant dense<0.000000e+00> : vector<64x128xf32>
    %122 = tpu.matmul %120, %121, %cst_49 {dimension_numbers = #tpu.dot_dimension_numbers<[1], [0], [0], [1], [0, 0, 1, 1], [], []>} : vector<64x256xbf16>, vector<256x128xbf16>, vector<64x128xf32> -> vector<64x128xf32>
    %c0_50 = arith.constant 0 : index
    %c0_51 = arith.constant 0 : index
    %123 = vector.load %arg11[%c0_50, %c0_51] : memref<1x128xf32, #tpu.memory_space<vmem>>, vector<1x128xf32>
    %124 = vector.broadcast %123 : vector<1x128xf32> to vector<64x128xf32>
    %125 = arith.addf %122, %124 : vector<64x128xf32>
    %126 = math.tanh %125 : vector<64x128xf32>
    %127 = vector.shape_cast %126 : vector<64x128xf32> to vector<8x8x128xf32>
    %c0_52 = arith.constant 0 : index
    %c0_53 = arith.constant 0 : index
    %128 = vector.load %arg12[%c0_52, %c0_53] : memref<1x128xf32, #tpu.memory_space<vmem>>, vector<1x128xf32>
    %129 = vector.shape_cast %128 : vector<1x128xf32> to vector<1x1x128xf32>
    %130 = vector.broadcast %129 : vector<1x1x128xf32> to vector<8x8x128xf32>
    %131 = arith.mulf %127, %130 : vector<8x8x128xf32>
    %cst_54 = arith.constant dense<0.000000e+00> : vector<8x8xf32>
    %132 = vector.multi_reduction <add>, %131, %cst_54 [2] : vector<8x8x128xf32> to vector<8x8xf32>
    %cst_55 = arith.constant dense<0xFF800000> : vector<8xf32>
    %133 = vector.multi_reduction <maximumf>, %132, %cst_55 [1] : vector<8x8xf32> to vector<8xf32>
    %134 = vector.shape_cast %133 : vector<8xf32> to vector<8x1xf32>
    %135 = vector.broadcast %134 : vector<8x1xf32> to vector<8x8xf32>
    %136 = arith.subf %132, %135 : vector<8x8xf32>
    %137 = math.exp %136 : vector<8x8xf32>
    %cst_56 = arith.constant dense<0.000000e+00> : vector<8xf32>
    %138 = vector.multi_reduction <add>, %137, %cst_56 [1] : vector<8x8xf32> to vector<8xf32>
    %139 = vector.shape_cast %138 : vector<8xf32> to vector<8x1xf32>
    %140 = tpu.reciprocal %139 {approx = true} : vector<8x1xf32> -> vector<8x1xf32>
    %141 = vector.broadcast %140 : vector<8x1xf32> to vector<8x8xf32>
    %142 = arith.mulf %137, %141 : vector<8x8xf32>
    %143 = vector.shape_cast %142 : vector<8x8xf32> to vector<8x8x1xf32>
    %144 = vector.shape_cast %119 : vector<64x256xf32> to vector<8x8x256xf32>
    %145 = vector.broadcast %143 : vector<8x8x1xf32> to vector<8x8x256xf32>
    %146 = arith.mulf %145, %144 : vector<8x8x256xf32>
    %cst_57 = arith.constant dense<0.000000e+00> : vector<8x256xf32>
    %147 = vector.multi_reduction <add>, %146, %cst_57 [1] : vector<8x8x256xf32> to vector<8x256xf32>
    %c0_58 = arith.constant 0 : index
    %c0_59 = arith.constant 0 : index
    %148 = vector.load %arg13[%c0_58, %c0_59] : memref<8x256xf32, #tpu.memory_space<vmem>>, vector<8x256xf32>
    tpu.vector_store %arg13[%c0_58, %c0_59], %147 {strides = array<i32>} : memref<8x256xf32, #tpu.memory_space<vmem>>, vector<8x256xf32>,
    return
  }
  func.func @transform_0(%arg0: i32) -> (i32, i32) {
    %c0_i32 = arith.constant 0 : i32
    %c0_i32_0 = arith.constant 0 : i32
    return %arg0, %c0_i32 : i32, i32
  }
  func.func @transform_1(%arg0: i32) -> (i32, i32) {
    %c0_i32 = arith.constant 0 : i32
    %c0_i32_0 = arith.constant 0 : i32
    %c0_i32_1 = arith.constant 0 : i32
    return %c0_i32, %c0_i32_0 : i32, i32
  }
  func.func @transform_2(%arg0: i32) -> (i32, i32) {
    %c0_i32 = arith.constant 0 : i32
    %c0_i32_0 = arith.constant 0 : i32
    %c0_i32_1 = arith.constant 0 : i32
    return %c0_i32, %c0_i32_0 : i32, i32
  }
  func.func @transform_3(%arg0: i32) -> (i32, i32) {
    %c0_i32 = arith.constant 0 : i32
    %c0_i32_0 = arith.constant 0 : i32
    %c0_i32_1 = arith.constant 0 : i32
    return %c0_i32, %c0_i32_0 : i32, i32
  }
  func.func @transform_4(%arg0: i32) -> (i32, i32) {
    %c0_i32 = arith.constant 0 : i32
    %c0_i32_0 = arith.constant 0 : i32
    %c0_i32_1 = arith.constant 0 : i32
    return %c0_i32, %c0_i32_0 : i32, i32
  }
  func.func @transform_5(%arg0: i32) -> (i32, i32) {
    %c0_i32 = arith.constant 0 : i32
    %c0_i32_0 = arith.constant 0 : i32
    %c0_i32_1 = arith.constant 0 : i32
    return %c0_i32, %c0_i32_0 : i32, i32
  }
  func.func @transform_6(%arg0: i32) -> (i32, i32) {
    %c0_i32 = arith.constant 0 : i32
    %c0_i32_0 = arith.constant 0 : i32
    %c0_i32_1 = arith.constant 0 : i32
    return %c0_i32, %c0_i32_0 : i32, i32
  }
  func.func @transform_7(%arg0: i32) -> (i32, i32) {
    %c0_i32 = arith.constant 0 : i32
    %c0_i32_0 = arith.constant 0 : i32
    %c0_i32_1 = arith.constant 0 : i32
    return %c0_i32, %c0_i32_0 : i32, i32
  }
  func.func @transform_8(%arg0: i32) -> (i32, i32) {
    %c0_i32 = arith.constant 0 : i32
    %c0_i32_0 = arith.constant 0 : i32
    %c0_i32_1 = arith.constant 0 : i32
    return %c0_i32, %c0_i32_0 : i32, i32
  }
  func.func @transform_9(%arg0: i32) -> (i32, i32) {
    %c0_i32 = arith.constant 0 : i32
    %c0_i32_0 = arith.constant 0 : i32
    %c0_i32_1 = arith.constant 0 : i32
    return %c0_i32, %c0_i32_0 : i32, i32
  }
  func.func @transform_10(%arg0: i32) -> (i32, i32) {
    %c0_i32 = arith.constant 0 : i32
    %c0_i32_0 = arith.constant 0 : i32
    %c0_i32_1 = arith.constant 0 : i32
    return %c0_i32, %c0_i32_0 : i32, i32
  }
  func.func @transform_11(%arg0: i32) -> (i32, i32) {
    %c0_i32 = arith.constant 0 : i32
    %c0_i32_0 = arith.constant 0 : i32
    %c0_i32_1 = arith.constant 0 : i32
    return %c0_i32, %c0_i32_0 : i32, i32
  }
  func.func @transform_12(%arg0: i32) -> (i32, i32) {
    %c0_i32 = arith.constant 0 : i32
    %c0_i32_0 = arith.constant 0 : i32
    return %arg0, %c0_i32 : i32, i32
  }
}

module attributes {stable_mosaic.version = 11 : i64} {
  func.func @mha_pool_kernel(%arg0: i32, %arg1: memref<16x256xbf16, #tpu.memory_space<vmem>>, %arg2: memref<2x8xf32, #tpu.memory_space<vmem>>, %arg3: memref<256x256xbf16, #tpu.memory_space<vmem>>, %arg4: memref<256x256xbf16, #tpu.memory_space<vmem>>, %arg5: memref<256x256xbf16, #tpu.memory_space<vmem>>, %arg6: memref<1x256xf32, #tpu.memory_space<vmem>>, %arg7: memref<1x256xf32, #tpu.memory_space<vmem>>, %arg8: memref<1x256xf32, #tpu.memory_space<vmem>>, %arg9: memref<256x256xbf16, #tpu.memory_space<vmem>>, %arg10: memref<1x256xf32, #tpu.memory_space<vmem>>, %arg11: memref<256x128xbf16, #tpu.memory_space<vmem>>, %arg12: memref<1x128xf32, #tpu.memory_space<vmem>>, %arg13: memref<1x128xf32, #tpu.memory_space<vmem>>, %arg14: memref<2x256xf32, #tpu.memory_space<vmem>>) attributes {dimension_semantics = [#tpu.dimension_semantics<parallel>], iteration_bounds = array<i64: 1>, scalar_prefetch = 0 : i64, scratch_operands = 0 : i64, tpu.core_type = #tpu.core_type<tc>, window_params = [{transform_indices = @transform_0, window_bounds = array<i64: 16, 256>}, {transform_indices = @transform_1, window_bounds = array<i64: 2, 8>}, {pipeline_mode = #tpu.pipeline_mode<synchronous>, transform_indices = @transform_2, window_bounds = array<i64: 256, 256>}, {pipeline_mode = #tpu.pipeline_mode<synchronous>, transform_indices = @transform_3, window_bounds = array<i64: 256, 256>}, {pipeline_mode = #tpu.pipeline_mode<synchronous>, transform_indices = @transform_4, window_bounds = array<i64: 256, 256>}, {pipeline_mode = #tpu.pipeline_mode<synchronous>, transform_indices = @transform_5, window_bounds = array<i64: 1, 256>}, {pipeline_mode = #tpu.pipeline_mode<synchronous>, transform_indices = @transform_6, window_bounds = array<i64: 1, 256>}, {pipeline_mode = #tpu.pipeline_mode<synchronous>, transform_indices = @transform_7, window_bounds = array<i64: 1, 256>}, {pipeline_mode = #tpu.pipeline_mode<synchronous>, transform_indices = @transform_8, window_bounds = array<i64: 256, 256>}, {pipeline_mode = #tpu.pipeline_mode<synchronous>, transform_indices = @transform_9, window_bounds = array<i64: 1, 256>}, {pipeline_mode = #tpu.pipeline_mode<synchronous>, transform_indices = @transform_10, window_bounds = array<i64: 256, 128>}, {pipeline_mode = #tpu.pipeline_mode<synchronous>, transform_indices = @transform_11, window_bounds = array<i64: 1, 128>}, {pipeline_mode = #tpu.pipeline_mode<synchronous>, transform_indices = @transform_12, window_bounds = array<i64: 1, 128>}, {transform_indices = @transform_13, window_bounds = array<i64: 2, 256>}]} {
    %c0 = arith.constant 0 : index
    %c0_0 = arith.constant 0 : index
    %0 = vector.load %arg1[%c0, %c0_0] : memref<16x256xbf16, #tpu.memory_space<vmem>>, vector<16x256xbf16>
    %c0_1 = arith.constant 0 : index
    %c0_2 = arith.constant 0 : index
    %1 = vector.load %arg3[%c0_1, %c0_2] : memref<256x256xbf16, #tpu.memory_space<vmem>>, vector<256x256xbf16>
    %cst = arith.constant dense<0.000000e+00> : vector<16x256xf32>
    %2 = tpu.matmul %0, %1, %cst {dimension_numbers = #tpu.dot_dimension_numbers<[1], [0], [0], [1], [0, 0, 1, 1], [], []>} : vector<16x256xbf16>, vector<256x256xbf16>, vector<16x256xf32> -> vector<16x256xf32>
    %c0_3 = arith.constant 0 : index
    %c0_4 = arith.constant 0 : index
    %3 = vector.load %arg6[%c0_3, %c0_4] : memref<1x256xf32, #tpu.memory_space<vmem>>, vector<1x256xf32>
    %4 = vector.broadcast %3 : vector<1x256xf32> to vector<16x256xf32>
    %5 = arith.addf %2, %4 : vector<16x256xf32>
    %c0_5 = arith.constant 0 : index
    %c0_6 = arith.constant 0 : index
    %6 = vector.load %arg4[%c0_5, %c0_6] : memref<256x256xbf16, #tpu.memory_space<vmem>>, vector<256x256xbf16>
    %cst_7 = arith.constant dense<0.000000e+00> : vector<16x256xf32>
    %7 = tpu.matmul %0, %6, %cst_7 {dimension_numbers = #tpu.dot_dimension_numbers<[1], [0], [0], [1], [0, 0, 1, 1], [], []>} : vector<16x256xbf16>, vector<256x256xbf16>, vector<16x256xf32> -> vector<16x256xf32>
    %c0_8 = arith.constant 0 : index
    %c0_9 = arith.constant 0 : index
    %8 = vector.load %arg7[%c0_8, %c0_9] : memref<1x256xf32, #tpu.memory_space<vmem>>, vector<1x256xf32>
    %9 = vector.broadcast %8 : vector<1x256xf32> to vector<16x256xf32>
    %10 = arith.addf %7, %9 : vector<16x256xf32>
    %c0_10 = arith.constant 0 : index
    %c0_11 = arith.constant 0 : index
    %11 = vector.load %arg5[%c0_10, %c0_11] : memref<256x256xbf16, #tpu.memory_space<vmem>>, vector<256x256xbf16>
    %cst_12 = arith.constant dense<0.000000e+00> : vector<16x256xf32>
    %12 = tpu.matmul %0, %11, %cst_12 {dimension_numbers = #tpu.dot_dimension_numbers<[1], [0], [0], [1], [0, 0, 1, 1], [], []>} : vector<16x256xbf16>, vector<256x256xbf16>, vector<16x256xf32> -> vector<16x256xf32>
    %c0_13 = arith.constant 0 : index
    %c0_14 = arith.constant 0 : index
    %13 = vector.load %arg8[%c0_13, %c0_14] : memref<1x256xf32, #tpu.memory_space<vmem>>, vector<1x256xf32>
    %14 = vector.broadcast %13 : vector<1x256xf32> to vector<16x256xf32>
    %15 = arith.addf %12, %14 : vector<16x256xf32>
    %c0_15 = arith.constant 0 : index
    %c0_16 = arith.constant 0 : index
    %16 = vector.load %arg2[%c0_15, %c0_16] : memref<2x8xf32, #tpu.memory_space<vmem>>, vector<2x8xf32>
    %cst_17 = arith.constant 1.000000e+00 : f32
    %17 = vector.broadcast %cst_17 : f32 to vector<2x8xf32>
    %18 = arith.subf %17, %16 : vector<2x8xf32>
    %cst_18 = arith.constant -1.000000e+09 : f32
    %19 = vector.broadcast %cst_18 : f32 to vector<2x8xf32>
    %20 = arith.mulf %18, %19 : vector<2x8xf32>
    %21 = vector.shape_cast %20 : vector<2x8xf32> to vector<2x1x8xf32>
    %22 = vector.shape_cast %20 : vector<2x8xf32> to vector<2x8x1xf32>
    %23 = vector.broadcast %21 : vector<2x1x8xf32> to vector<2x8x8xf32>
    %24 = vector.broadcast %22 : vector<2x8x1xf32> to vector<2x8x8xf32>
    %25 = arith.addf %23, %24 : vector<2x8x8xf32>
    %cst_19 = arith.constant 0.000000e+00 : f32
    %26 = vector.broadcast %cst_19 : f32 to vector<16x256xf32>
    %27 = vector.extract_strided_slice %5 {offsets = [0, 0], sizes = [16, 64], strides = [1, 1]} : vector<16x256xf32> to vector<16x64xf32>
    %28 = vector.shape_cast %27 : vector<16x64xf32> to vector<2x8x64xf32>
    %29 = vector.extract_strided_slice %10 {offsets = [0, 0], sizes = [16, 64], strides = [1, 1]} : vector<16x256xf32> to vector<16x64xf32>
    %30 = vector.shape_cast %29 : vector<16x64xf32> to vector<2x8x64xf32>
    %31 = vector.extract_strided_slice %15 {offsets = [0, 0], sizes = [16, 64], strides = [1, 1]} : vector<16x256xf32> to vector<16x64xf32>
    %32 = vector.shape_cast %31 : vector<16x64xf32> to vector<2x8x64xf32>
    %cst_20 = arith.constant dense<0.000000e+00> : vector<2x8x8xf32>
    %33 = tpu.matmul %28, %30, %cst_20 {dimension_numbers = #tpu.dot_dimension_numbers<[2], [2], [1], [1], [0, 0, 0, 1, 1, 1], [0], [0]>} : vector<2x8x64xf32>, vector<2x8x64xf32>, vector<2x8x8xf32> -> vector<2x8x8xf32>
    %cst_21 = arith.constant 1.250000e-01 : f32
    %34 = vector.broadcast %cst_21 : f32 to vector<2x8x8xf32>
    %35 = arith.mulf %33, %34 : vector<2x8x8xf32>
    %36 = arith.addf %35, %25 : vector<2x8x8xf32>
    %cst_22 = arith.constant dense<0xFF800000> : vector<2x8xf32>
    %37 = vector.multi_reduction <maximumf>, %36, %cst_22 [2] : vector<2x8x8xf32> to vector<2x8xf32>
    %38 = vector.shape_cast %37 : vector<2x8xf32> to vector<2x8x1xf32>
    %39 = vector.broadcast %38 : vector<2x8x1xf32> to vector<2x8x8xf32>
    %40 = arith.subf %36, %39 : vector<2x8x8xf32>
    %41 = math.exp %40 : vector<2x8x8xf32>
    %cst_23 = arith.constant dense<0.000000e+00> : vector<2x8xf32>
    %42 = vector.multi_reduction <add>, %41, %cst_23 [2] : vector<2x8x8xf32> to vector<2x8xf32>
    %43 = vector.shape_cast %42 : vector<2x8xf32> to vector<2x8x1xf32>
    %44 = tpu.reciprocal %43 {approx = true} : vector<2x8x1xf32> -> vector<2x8x1xf32>
    %45 = vector.broadcast %44 : vector<2x8x1xf32> to vector<2x8x8xf32>
    %46 = arith.mulf %41, %45 : vector<2x8x8xf32>
    %cst_24 = arith.constant dense<0.000000e+00> : vector<2x8x64xf32>
    %47 = tpu.matmul %46, %32, %cst_24 {dimension_numbers = #tpu.dot_dimension_numbers<[2], [1], [1], [2], [0, 0, 0, 1, 1, 2], [0], [0]>} : vector<2x8x8xf32>, vector<2x8x64xf32>, vector<2x8x64xf32> -> vector<2x8x64xf32>
    %48 = vector.shape_cast %47 : vector<2x8x64xf32> to vector<16x64xf32>
    %49 = arith.truncf %48 : vector<16x64xf32> to vector<16x64xbf16>
    %c0_25 = arith.constant 0 : index
    %c0_26 = arith.constant 0 : index
    %50 = vector.load %arg9[%c0_25, %c0_26] : memref<256x256xbf16, #tpu.memory_space<vmem>>, vector<64x256xbf16>
    %cst_27 = arith.constant dense<0.000000e+00> : vector<16x256xf32>
    %51 = tpu.matmul %49, %50, %cst_27 {dimension_numbers = #tpu.dot_dimension_numbers<[1], [0], [0], [1], [0, 0, 1, 1], [], []>} : vector<16x64xbf16>, vector<64x256xbf16>, vector<16x256xf32> -> vector<16x256xf32>
    %52 = arith.addf %26, %51 : vector<16x256xf32>
    %53 = vector.extract_strided_slice %5 {offsets = [0, 64], sizes = [16, 64], strides = [1, 1]} : vector<16x256xf32> to vector<16x64xf32>
    %54 = vector.shape_cast %53 : vector<16x64xf32> to vector<2x8x64xf32>
    %55 = vector.extract_strided_slice %10 {offsets = [0, 64], sizes = [16, 64], strides = [1, 1]} : vector<16x256xf32> to vector<16x64xf32>
    %56 = vector.shape_cast %55 : vector<16x64xf32> to vector<2x8x64xf32>
    %57 = vector.extract_strided_slice %15 {offsets = [0, 64], sizes = [16, 64], strides = [1, 1]} : vector<16x256xf32> to vector<16x64xf32>
    %58 = vector.shape_cast %57 : vector<16x64xf32> to vector<2x8x64xf32>
    %cst_28 = arith.constant dense<0.000000e+00> : vector<2x8x8xf32>
    %59 = tpu.matmul %54, %56, %cst_28 {dimension_numbers = #tpu.dot_dimension_numbers<[2], [2], [1], [1], [0, 0, 0, 1, 1, 1], [0], [0]>} : vector<2x8x64xf32>, vector<2x8x64xf32>, vector<2x8x8xf32> -> vector<2x8x8xf32>
    %cst_29 = arith.constant 1.250000e-01 : f32
    %60 = vector.broadcast %cst_29 : f32 to vector<2x8x8xf32>
    %61 = arith.mulf %59, %60 : vector<2x8x8xf32>
    %62 = arith.addf %61, %25 : vector<2x8x8xf32>
    %cst_30 = arith.constant dense<0xFF800000> : vector<2x8xf32>
    %63 = vector.multi_reduction <maximumf>, %62, %cst_30 [2] : vector<2x8x8xf32> to vector<2x8xf32>
    %64 = vector.shape_cast %63 : vector<2x8xf32> to vector<2x8x1xf32>
    %65 = vector.broadcast %64 : vector<2x8x1xf32> to vector<2x8x8xf32>
    %66 = arith.subf %62, %65 : vector<2x8x8xf32>
    %67 = math.exp %66 : vector<2x8x8xf32>
    %cst_31 = arith.constant dense<0.000000e+00> : vector<2x8xf32>
    %68 = vector.multi_reduction <add>, %67, %cst_31 [2] : vector<2x8x8xf32> to vector<2x8xf32>
    %69 = vector.shape_cast %68 : vector<2x8xf32> to vector<2x8x1xf32>
    %70 = tpu.reciprocal %69 {approx = true} : vector<2x8x1xf32> -> vector<2x8x1xf32>
    %71 = vector.broadcast %70 : vector<2x8x1xf32> to vector<2x8x8xf32>
    %72 = arith.mulf %67, %71 : vector<2x8x8xf32>
    %cst_32 = arith.constant dense<0.000000e+00> : vector<2x8x64xf32>
    %73 = tpu.matmul %72, %58, %cst_32 {dimension_numbers = #tpu.dot_dimension_numbers<[2], [1], [1], [2], [0, 0, 0, 1, 1, 2], [0], [0]>} : vector<2x8x8xf32>, vector<2x8x64xf32>, vector<2x8x64xf32> -> vector<2x8x64xf32>
    %74 = vector.shape_cast %73 : vector<2x8x64xf32> to vector<16x64xf32>
    %75 = arith.truncf %74 : vector<16x64xf32> to vector<16x64xbf16>
    %c64 = arith.constant 64 : index
    %c0_33 = arith.constant 0 : index
    %76 = vector.load %arg9[%c64, %c0_33] : memref<256x256xbf16, #tpu.memory_space<vmem>>, vector<64x256xbf16>
    %cst_34 = arith.constant dense<0.000000e+00> : vector<16x256xf32>
    %77 = tpu.matmul %75, %76, %cst_34 {dimension_numbers = #tpu.dot_dimension_numbers<[1], [0], [0], [1], [0, 0, 1, 1], [], []>} : vector<16x64xbf16>, vector<64x256xbf16>, vector<16x256xf32> -> vector<16x256xf32>
    %78 = arith.addf %52, %77 : vector<16x256xf32>
    %79 = vector.extract_strided_slice %5 {offsets = [0, 128], sizes = [16, 64], strides = [1, 1]} : vector<16x256xf32> to vector<16x64xf32>
    %80 = vector.shape_cast %79 : vector<16x64xf32> to vector<2x8x64xf32>
    %81 = vector.extract_strided_slice %10 {offsets = [0, 128], sizes = [16, 64], strides = [1, 1]} : vector<16x256xf32> to vector<16x64xf32>
    %82 = vector.shape_cast %81 : vector<16x64xf32> to vector<2x8x64xf32>
    %83 = vector.extract_strided_slice %15 {offsets = [0, 128], sizes = [16, 64], strides = [1, 1]} : vector<16x256xf32> to vector<16x64xf32>
    %84 = vector.shape_cast %83 : vector<16x64xf32> to vector<2x8x64xf32>
    %cst_35 = arith.constant dense<0.000000e+00> : vector<2x8x8xf32>
    %85 = tpu.matmul %80, %82, %cst_35 {dimension_numbers = #tpu.dot_dimension_numbers<[2], [2], [1], [1], [0, 0, 0, 1, 1, 1], [0], [0]>} : vector<2x8x64xf32>, vector<2x8x64xf32>, vector<2x8x8xf32> -> vector<2x8x8xf32>
    %cst_36 = arith.constant 1.250000e-01 : f32
    %86 = vector.broadcast %cst_36 : f32 to vector<2x8x8xf32>
    %87 = arith.mulf %85, %86 : vector<2x8x8xf32>
    %88 = arith.addf %87, %25 : vector<2x8x8xf32>
    %cst_37 = arith.constant dense<0xFF800000> : vector<2x8xf32>
    %89 = vector.multi_reduction <maximumf>, %88, %cst_37 [2] : vector<2x8x8xf32> to vector<2x8xf32>
    %90 = vector.shape_cast %89 : vector<2x8xf32> to vector<2x8x1xf32>
    %91 = vector.broadcast %90 : vector<2x8x1xf32> to vector<2x8x8xf32>
    %92 = arith.subf %88, %91 : vector<2x8x8xf32>
    %93 = math.exp %92 : vector<2x8x8xf32>
    %cst_38 = arith.constant dense<0.000000e+00> : vector<2x8xf32>
    %94 = vector.multi_reduction <add>, %93, %cst_38 [2] : vector<2x8x8xf32> to vector<2x8xf32>
    %95 = vector.shape_cast %94 : vector<2x8xf32> to vector<2x8x1xf32>
    %96 = tpu.reciprocal %95 {approx = true} : vector<2x8x1xf32> -> vector<2x8x1xf32>
    %97 = vector.broadcast %96 : vector<2x8x1xf32> to vector<2x8x8xf32>
    %98 = arith.mulf %93, %97 : vector<2x8x8xf32>
    %cst_39 = arith.constant dense<0.000000e+00> : vector<2x8x64xf32>
    %99 = tpu.matmul %98, %84, %cst_39 {dimension_numbers = #tpu.dot_dimension_numbers<[2], [1], [1], [2], [0, 0, 0, 1, 1, 2], [0], [0]>} : vector<2x8x8xf32>, vector<2x8x64xf32>, vector<2x8x64xf32> -> vector<2x8x64xf32>
    %100 = vector.shape_cast %99 : vector<2x8x64xf32> to vector<16x64xf32>
    %101 = arith.truncf %100 : vector<16x64xf32> to vector<16x64xbf16>
    %c128 = arith.constant 128 : index
    %c0_40 = arith.constant 0 : index
    %102 = vector.load %arg9[%c128, %c0_40] : memref<256x256xbf16, #tpu.memory_space<vmem>>, vector<64x256xbf16>
    %cst_41 = arith.constant dense<0.000000e+00> : vector<16x256xf32>
    %103 = tpu.matmul %101, %102, %cst_41 {dimension_numbers = #tpu.dot_dimension_numbers<[1], [0], [0], [1], [0, 0, 1, 1], [], []>} : vector<16x64xbf16>, vector<64x256xbf16>, vector<16x256xf32> -> vector<16x256xf32>
    %104 = arith.addf %78, %103 : vector<16x256xf32>
    %105 = vector.extract_strided_slice %5 {offsets = [0, 192], sizes = [16, 64], strides = [1, 1]} : vector<16x256xf32> to vector<16x64xf32>
    %106 = vector.shape_cast %105 : vector<16x64xf32> to vector<2x8x64xf32>
    %107 = vector.extract_strided_slice %10 {offsets = [0, 192], sizes = [16, 64], strides = [1, 1]} : vector<16x256xf32> to vector<16x64xf32>
    %108 = vector.shape_cast %107 : vector<16x64xf32> to vector<2x8x64xf32>
    %109 = vector.extract_strided_slice %15 {offsets = [0, 192], sizes = [16, 64], strides = [1, 1]} : vector<16x256xf32> to vector<16x64xf32>
    %110 = vector.shape_cast %109 : vector<16x64xf32> to vector<2x8x64xf32>
    %cst_42 = arith.constant dense<0.000000e+00> : vector<2x8x8xf32>
    %111 = tpu.matmul %106, %108, %cst_42 {dimension_numbers = #tpu.dot_dimension_numbers<[2], [2], [1], [1], [0, 0, 0, 1, 1, 1], [0], [0]>} : vector<2x8x64xf32>, vector<2x8x64xf32>, vector<2x8x8xf32> -> vector<2x8x8xf32>
    %cst_43 = arith.constant 1.250000e-01 : f32
    %112 = vector.broadcast %cst_43 : f32 to vector<2x8x8xf32>
    %113 = arith.mulf %111, %112 : vector<2x8x8xf32>
    %114 = arith.addf %113, %25 : vector<2x8x8xf32>
    %cst_44 = arith.constant dense<0xFF800000> : vector<2x8xf32>
    %115 = vector.multi_reduction <maximumf>, %114, %cst_44 [2] : vector<2x8x8xf32> to vector<2x8xf32>
    %116 = vector.shape_cast %115 : vector<2x8xf32> to vector<2x8x1xf32>
    %117 = vector.broadcast %116 : vector<2x8x1xf32> to vector<2x8x8xf32>
    %118 = arith.subf %114, %117 : vector<2x8x8xf32>
    %119 = math.exp %118 : vector<2x8x8xf32>
    %cst_45 = arith.constant dense<0.000000e+00> : vector<2x8xf32>
    %120 = vector.multi_reduction <add>, %119, %cst_45 [2] : vector<2x8x8xf32> to vector<2x8xf32>
    %121 = vector.shape_cast %120 : vector<2x8xf32> to vector<2x8x1xf32>
    %122 = tpu.reciprocal %121 {approx = true} : vector<2x8x1xf32> -> vector<2x8x1xf32>
    %123 = vector.broadcast %122 : vector<2x8x1xf32> to vector<2x8x8xf32>
    %124 = arith.mulf %119, %123 : vector<2x8x8xf32>
    %cst_46 = arith.constant dense<0.000000e+00> : vector<2x8x64xf32>
    %125 = tpu.matmul %124, %110, %cst_46 {dimension_numbers = #tpu.dot_dimension_numbers<[2], [1], [1], [2], [0, 0, 0, 1, 1, 2], [0], [0]>} : vector<2x8x8xf32>, vector<2x8x64xf32>, vector<2x8x64xf32> -> vector<2x8x64xf32>
    %126 = vector.shape_cast %125 : vector<2x8x64xf32> to vector<16x64xf32>
    %127 = arith.truncf %126 : vector<16x64xf32> to vector<16x64xbf16>
    %c192 = arith.constant 192 : index
    %c0_47 = arith.constant 0 : index
    %128 = vector.load %arg9[%c192, %c0_47] : memref<256x256xbf16, #tpu.memory_space<vmem>>, vector<64x256xbf16>
    %cst_48 = arith.constant dense<0.000000e+00> : vector<16x256xf32>
    %129 = tpu.matmul %127, %128, %cst_48 {dimension_numbers = #tpu.dot_dimension_numbers<[1], [0], [0], [1], [0, 0, 1, 1], [], []>} : vector<16x64xbf16>, vector<64x256xbf16>, vector<16x256xf32> -> vector<16x256xf32>
    %130 = arith.addf %104, %129 : vector<16x256xf32>
    %c0_49 = arith.constant 0 : index
    %c0_50 = arith.constant 0 : index
    %131 = vector.load %arg10[%c0_49, %c0_50] : memref<1x256xf32, #tpu.memory_space<vmem>>, vector<1x256xf32>
    %132 = vector.broadcast %131 : vector<1x256xf32> to vector<16x256xf32>
    %133 = arith.addf %130, %132 : vector<16x256xf32>
    %134 = arith.truncf %133 : vector<16x256xf32> to vector<16x256xbf16>
    %c0_51 = arith.constant 0 : index
    %c0_52 = arith.constant 0 : index
    %135 = vector.load %arg11[%c0_51, %c0_52] : memref<256x128xbf16, #tpu.memory_space<vmem>>, vector<256x128xbf16>
    %cst_53 = arith.constant dense<0.000000e+00> : vector<16x128xf32>
    %136 = tpu.matmul %134, %135, %cst_53 {dimension_numbers = #tpu.dot_dimension_numbers<[1], [0], [0], [1], [0, 0, 1, 1], [], []>} : vector<16x256xbf16>, vector<256x128xbf16>, vector<16x128xf32> -> vector<16x128xf32>
    %c0_54 = arith.constant 0 : index
    %c0_55 = arith.constant 0 : index
    %137 = vector.load %arg12[%c0_54, %c0_55] : memref<1x128xf32, #tpu.memory_space<vmem>>, vector<1x128xf32>
    %138 = vector.broadcast %137 : vector<1x128xf32> to vector<16x128xf32>
    %139 = arith.addf %136, %138 : vector<16x128xf32>
    %140 = math.tanh %139 : vector<16x128xf32>
    %141 = vector.shape_cast %140 : vector<16x128xf32> to vector<2x8x128xf32>
    %c0_56 = arith.constant 0 : index
    %c0_57 = arith.constant 0 : index
    %142 = vector.load %arg13[%c0_56, %c0_57] : memref<1x128xf32, #tpu.memory_space<vmem>>, vector<1x128xf32>
    %143 = vector.shape_cast %142 : vector<1x128xf32> to vector<1x1x128xf32>
    %144 = vector.broadcast %143 : vector<1x1x128xf32> to vector<2x8x128xf32>
    %145 = arith.mulf %141, %144 : vector<2x8x128xf32>
    %cst_58 = arith.constant dense<0.000000e+00> : vector<2x8xf32>
    %146 = vector.multi_reduction <add>, %145, %cst_58 [2] : vector<2x8x128xf32> to vector<2x8xf32>
    %147 = arith.addf %146, %20 : vector<2x8xf32>
    %cst_59 = arith.constant dense<0xFF800000> : vector<2xf32>
    %148 = vector.multi_reduction <maximumf>, %147, %cst_59 [1] : vector<2x8xf32> to vector<2xf32>
    %149 = vector.shape_cast %148 : vector<2xf32> to vector<2x1xf32>
    %150 = vector.broadcast %149 : vector<2x1xf32> to vector<2x8xf32>
    %151 = arith.subf %147, %150 : vector<2x8xf32>
    %152 = math.exp %151 : vector<2x8xf32>
    %cst_60 = arith.constant dense<0.000000e+00> : vector<2xf32>
    %153 = vector.multi_reduction <add>, %152, %cst_60 [1] : vector<2x8xf32> to vector<2xf32>
    %154 = vector.shape_cast %153 : vector<2xf32> to vector<2x1xf32>
    %155 = tpu.reciprocal %154 {approx = true} : vector<2x1xf32> -> vector<2x1xf32>
    %156 = vector.broadcast %155 : vector<2x1xf32> to vector<2x8xf32>
    %157 = arith.mulf %152, %156 : vector<2x8xf32>
    %158 = vector.shape_cast %157 : vector<2x8xf32> to vector<2x8x1xf32>
    %159 = vector.shape_cast %133 : vector<16x256xf32> to vector<2x8x256xf32>
    %160 = vector.broadcast %158 : vector<2x8x1xf32> to vector<2x8x256xf32>
    %161 = arith.mulf %160, %159 : vector<2x8x256xf32>
    %cst_61 = arith.constant dense<0.000000e+00> : vector<2x256xf32>
    %162 = vector.multi_reduction <add>, %161, %cst_61 [1] : vector<2x8x256xf32> to vector<2x256xf32>
    %c0_62 = arith.constant 0 : index
    %c0_63 = arith.constant 0 : index
    %163 = vector.load %arg14[%c0_62, %c0_63] : memref<2x256xf32, #tpu.memory_space<vmem>>, vector<2x256xf32>
    tpu.vector_store %arg14[%c0_62, %c0_63], %162 {strides = array<i32>} : memref<2x256xf32, #tpu.memory_space<vmem>>, vector<2x256xf32>,
    return
  }
  func.func @transform_0(%arg0: i32) -> (i32, i32) {
    %c0_i32 = arith.constant 0 : i32
    %c0_i32_0 = arith.constant 0 : i32
    return %arg0, %c0_i32 : i32, i32
  }
  func.func @transform_1(%arg0: i32) -> (i32, i32) {
    %c0_i32 = arith.constant 0 : i32
    %c0_i32_0 = arith.constant 0 : i32
    return %arg0, %c0_i32 : i32, i32
  }
  func.func @transform_2(%arg0: i32) -> (i32, i32) {
    %c0_i32 = arith.constant 0 : i32
    %c0_i32_0 = arith.constant 0 : i32
    %c0_i32_1 = arith.constant 0 : i32
    return %c0_i32, %c0_i32_0 : i32, i32
  }
  func.func @transform_3(%arg0: i32) -> (i32, i32) {
    %c0_i32 = arith.constant 0 : i32
    %c0_i32_0 = arith.constant 0 : i32
    %c0_i32_1 = arith.constant 0 : i32
    return %c0_i32, %c0_i32_0 : i32, i32
  }
  func.func @transform_4(%arg0: i32) -> (i32, i32) {
    %c0_i32 = arith.constant 0 : i32
    %c0_i32_0 = arith.constant 0 : i32
    %c0_i32_1 = arith.constant 0 : i32
    return %c0_i32, %c0_i32_0 : i32, i32
  }
  func.func @transform_5(%arg0: i32) -> (i32, i32) {
    %c0_i32 = arith.constant 0 : i32
    %c0_i32_0 = arith.constant 0 : i32
    %c0_i32_1 = arith.constant 0 : i32
    return %c0_i32, %c0_i32_0 : i32, i32
  }
  func.func @transform_6(%arg0: i32) -> (i32, i32) {
    %c0_i32 = arith.constant 0 : i32
    %c0_i32_0 = arith.constant 0 : i32
    %c0_i32_1 = arith.constant 0 : i32
    return %c0_i32, %c0_i32_0 : i32, i32
  }
  func.func @transform_7(%arg0: i32) -> (i32, i32) {
    %c0_i32 = arith.constant 0 : i32
    %c0_i32_0 = arith.constant 0 : i32
    %c0_i32_1 = arith.constant 0 : i32
    return %c0_i32, %c0_i32_0 : i32, i32
  }
  func.func @transform_8(%arg0: i32) -> (i32, i32) {
    %c0_i32 = arith.constant 0 : i32
    %c0_i32_0 = arith.constant 0 : i32
    %c0_i32_1 = arith.constant 0 : i32
    return %c0_i32, %c0_i32_0 : i32, i32
  }
  func.func @transform_9(%arg0: i32) -> (i32, i32) {
    %c0_i32 = arith.constant 0 : i32
    %c0_i32_0 = arith.constant 0 : i32
    %c0_i32_1 = arith.constant 0 : i32
    return %c0_i32, %c0_i32_0 : i32, i32
  }
  func.func @transform_10(%arg0: i32) -> (i32, i32) {
    %c0_i32 = arith.constant 0 : i32
    %c0_i32_0 = arith.constant 0 : i32
    %c0_i32_1 = arith.constant 0 : i32
    return %c0_i32, %c0_i32_0 : i32, i32
  }
  func.func @transform_11(%arg0: i32) -> (i32, i32) {
    %c0_i32 = arith.constant 0 : i32
    %c0_i32_0 = arith.constant 0 : i32
    %c0_i32_1 = arith.constant 0 : i32
    return %c0_i32, %c0_i32_0 : i32, i32
  }
  func.func @transform_12(%arg0: i32) -> (i32, i32) {
    %c0_i32 = arith.constant 0 : i32
    %c0_i32_0 = arith.constant 0 : i32
    %c0_i32_1 = arith.constant 0 : i32
    return %c0_i32, %c0_i32_0 : i32, i32
  }
  func.func @transform_13(%arg0: i32) -> (i32, i32) {
    %c0_i32 = arith.constant 0 : i32
    %c0_i32_0 = arith.constant 0 : i32
    return %arg0, %c0_i32 : i32, i32
  }
}

</mosaic_0001>

<bundles_post_ra>
// kernel: nrms_forward.5
= control target key start
LH: loop header
LB: loop body
LE: loop exit
PB: predicated region body
PF: predicated region fallthrough
CT: control target
= control target key end

     0   :  { %vm3512_vm0 = vmmov 0   ;;  %vm850_vm1 = vcmask 523264   ;;  %vm1007_vm2 = vcmask 64512   ;;  %vm2805_vm3 = vcmask 1041409   ;;  %s4320_s3 = inlined_call_operand.vmem [shape: bf16[256,256], index: 3, kind: input, shape index: {}]   ;;  %s4321_s2 = inlined_call_operand.vmem [shape: bf16[256,256], index: 2, kind: input, shape index: {}]   ;;  %s4322_s0 = inlined_call_operand.vmem [shape: bf16[16,256], index: 0, kind: input, shape index: {}]   ;;  %s4323_s1 = inlined_call_operand.vmem [shape: f32[2,8], index: 1, kind: input, shape index: {}]   ;;  %s4324_s6 = inlined_call_operand.vmem [shape: f32[1,256], index: 6, kind: input, shape index: {}]   ;;  %s4325_s5 = inlined_call_operand.vmem [shape: f32[1,256], index: 5, kind: input, shape index: {}]   ;;  %s4326_s4 = inlined_call_operand.vmem [shape: bf16[256,256], index: 4, kind: input, shape index: {}]   ;;  %s4327_s7 = inlined_call_operand.vmem [shape: f32[1,256], index: 7, kind: input, shape index: {}]   ;;  %s4328_s8 = inlined_call_operand.vmem [shape: bf16[256,256], index: 8, kind: input, shape index: {}]   ;;  %s4329_s10 = inlined_call_operand.vmem [shape: bf16[256,128], index: 10, kind: input, shape index: {}]   ;;  %s4330_s9 = inlined_call_operand.vmem [shape: f32[1,256], index: 9, kind: input, shape index: {}]   ;;  %s4331_s11 = inlined_call_operand.vmem [shape: f32[1,128], index: 11, kind: input, shape index: {}]   ;;  %s4332_s12 = inlined_call_operand.vmem [shape: f32[1,128], index: 12, kind: input, shape index: {}]   ;;  %s4333_s13 = inlined_call_operand.vmem [shape: f32[2,256], index: 13, kind: output, shape index: {}]  }
   0x1   :  { %v3258_v0 = vld [vmem:[%s4320_s3 + $0x74] ss:$8 sps:$4 sm:$0xff]   ;;  %v3262_v2 = vld [vmem:[%s4320_s3 + $0x70] ss:$8 sps:$4 sm:$0xff]   ;;  %v3264_v4 = vld [vmem:[%s4320_s3 + $0x64] ss:$8 sps:$4 sm:$0xff]  }
   0x2   :  { %v3260_v1 = vld [vmem:[%s4321_s2 + $0x74] ss:$8 sps:$4 sm:$0xff]   ;;  %508 = vmatprep.subr.bf16.mxu1 %v3258_v0  ;;  %v3263_v3 = vld [vmem:[%s4321_s2 + $0x70] ss:$8 sps:$4 sm:$0xff]   ;;  %v3266_v5 = vld [vmem:[%s4321_s2 + $0x64] ss:$8 sps:$4 sm:$0xff]  }
   0x3   :  { %261 = vmatprep.subr.bf16.mxu0 %v3260_v1  ;;  %509 = vmatpush1.bf16.msra.mxu1 %v3262_v2  ;;  %v3268_v6 = vld [vmem:[%s4320_s3 + $0x60] ss:$8 sps:$4 sm:$0xff]   ;;  %v3270_v8 = vld [vmem:[%s4320_s3 + $0x54] ss:$8 sps:$4 sm:$0xff]   ;;  %v3274_v10 = vld [vmem:[%s4320_s3 + $0x50] ss:$8 sps:$4 sm:$0xff]  }
   0x4   :  { %262 = vmatpush1.bf16.msra.mxu0 %v3263_v3  ;;  %510 = vmatprep.subr.bf16.mxu1 %v3264_v4  ;;  %v3269_v7 = vld [vmem:[%s4321_s2 + $0x60] ss:$8 sps:$4 sm:$0xff]   ;;  %v3272_v9 = vld [vmem:[%s4321_s2 + $0x54] ss:$8 sps:$4 sm:$0xff]   ;;  %v3275_v11 = vld [vmem:[%s4321_s2 + $0x50] ss:$8 sps:$4 sm:$0xff]   ;;  %v81_v3 = vlaneseq }
   0x5   :  { %263 = vmatprep.subr.bf16.mxu0 %v3266_v5  ;;  %v3276_v12 = vld [vmem:[%s4320_s3 + $0x44] ss:$8 sps:$4 sm:$0xff]   ;;  %v3280_v14 = vld [vmem:[%s4320_s3 + $0x40] ss:$8 sps:$4 sm:$0xff]   ;;  %v3282_v16 = vld [vmem:[%s4320_s3 + $0x34] ss:$8 sps:$4 sm:$0xff]  }
   0x6   :  { %v3278_v13 = vld [vmem:[%s4321_s2 + $0x44] ss:$8 sps:$4 sm:$0xff]   ;;  %v3281_v15 = vld [vmem:[%s4321_s2 + $0x40] ss:$8 sps:$4 sm:$0xff]   ;;  %v3284_v17 = vld [vmem:[%s4321_s2 + $0x34] ss:$8 sps:$4 sm:$0xff]  }
   0x7   :  { %511 = vmatpush1.bf16.msra.mxu1 %v3268_v6  ;;  %v3286_v18 = vld [vmem:[%s4320_s3 + $0x30] ss:$8 sps:$4 sm:$0xff]   ;;  %v3288_v20 = vld [vmem:[%s4320_s3 + $0x24] ss:$8 sps:$4 sm:$0xff]   ;;  %v3292_v22 = vld [vmem:[%s4320_s3 + $0x20] ss:$8 sps:$4 sm:$0xff]  }
   0x8   :  { %264 = vmatpush1.bf16.msra.mxu0 %v3269_v7  ;;  %512 = vmatprep.subr.bf16.mxu1 %v3270_v8  ;;  %v3287_v19 = vld [vmem:[%s4321_s2 + $0x30] ss:$8 sps:$4 sm:$0xff]   ;;  %v3290_v21 = vld [vmem:[%s4321_s2 + $0x24] ss:$8 sps:$4 sm:$0xff]   ;;  %v3293_v23 = vld [vmem:[%s4321_s2 + $0x20] ss:$8 sps:$4 sm:$0xff]  }
   0x9   :  { %265 = vmatprep.subr.bf16.mxu0 %v3272_v9  ;;  %v3294_v24 = vld [vmem:[%s4320_s3 + $0x14] ss:$8 sps:$4 sm:$0xff]   ;;  %v3298_v26 = vld [vmem:[%s4320_s3 + $0x10] ss:$8 sps:$4 sm:$0xff]   ;;  %v3300_v28 = vld [vmem:[%s4320_s3 + $0x4] ss:$8 sps:$4 sm:$0xff]  }
   0xa   :  { %v3296_v25 = vld [vmem:[%s4321_s2 + $0x14] ss:$8 sps:$4 sm:$0xff]   ;;  %v3299_v27 = vld [vmem:[%s4321_s2 + $0x10] ss:$8 sps:$4 sm:$0xff]   ;;  %v3302_v29 = vld [vmem:[%s4321_s2 + $0x4] ss:$8 sps:$4 sm:$0xff]  }
   0xb   :  { %513 = vmatpush1.bf16.msra.mxu1 %v3274_v10  ;;  %v3304_v30 = vld [vmem:[%s4320_s3] ss:$8 sps:$4 sm:$0xff]   ;;  %v3306_v32 = vld [vmem:[%s4320_s3 + $0xf4] ss:$8 sps:$4 sm:$0xff]   ;;  %v3310_v34 = vld [vmem:[%s4320_s3 + $0xf0] ss:$8 sps:$4 sm:$0xff]  }
   0xc   :  { %266 = vmatpush1.bf16.msra.mxu0 %v3275_v11  ;;  %514 = vmatprep.subr.bf16.mxu1 %v3276_v12  ;;  %v3305_v31 = vld [vmem:[%s4321_s2] ss:$8 sps:$4 sm:$0xff]   ;;  %v3308_v33 = vld [vmem:[%s4321_s2 + $0xf4] ss:$8 sps:$4 sm:$0xff]   ;;  %v3311_v35 = vld [vmem:[%s4321_s2 + $0xf0] ss:$8 sps:$4 sm:$0xff]  }
   0xd   :  { %267 = vmatprep.subr.bf16.mxu0 %v3278_v13  ;;  %v3312_v36 = vld [vmem:[%s4320_s3 + $0xe4] ss:$8 sps:$4 sm:$0xff]   ;;  %v3316_v38 = vld [vmem:[%s4320_s3 + $0xe0] ss:$8 sps:$4 sm:$0xff]   ;;  %v3318_v40 = vld [vmem:[%s4320_s3 + $0xd4] ss:$8 sps:$4 sm:$0xff]  }
   0xe   :  { %v3314_v37 = vld [vmem:[%s4321_s2 + $0xe4] ss:$8 sps:$4 sm:$0xff]   ;;  %v3317_v39 = vld [vmem:[%s4321_s2 + $0xe0] ss:$8 sps:$4 sm:$0xff]   ;;  %v3320_v41 = vld [vmem:[%s4321_s2 + $0xd4] ss:$8 sps:$4 sm:$0xff]  }
   0xf   :  { %515 = vmatpush1.bf16.msra.mxu1 %v3280_v14  ;;  %v3322_v42 = vld [vmem:[%s4320_s3 + $0xd0] ss:$8 sps:$4 sm:$0xff]   ;;  %v3324_v44 = vld [vmem:[%s4320_s3 + $0xc4] ss:$8 sps:$4 sm:$0xff]   ;;  %v3328_v47 = vld [vmem:[%s4320_s3 + $0xc0] ss:$8 sps:$4 sm:$0xff]  }
  0x10   :  { %268 = vmatpush1.bf16.msra.mxu0 %v3281_v15  ;;  %516 = vmatprep.subr.bf16.mxu1 %v3282_v16  ;;  %v3323_v43 = vld [vmem:[%s4321_s2 + $0xd0] ss:$8 sps:$4 sm:$0xff]   ;;  %v3326_v45 = vld [vmem:[%s4321_s2 + $0xc4] ss:$8 sps:$4 sm:$0xff]   ;;  %v3329_v48 = vld [vmem:[%s4321_s2 + $0xc0] ss:$8 sps:$4 sm:$0xff]  }
  0x11   :  { %269 = vmatprep.subr.bf16.mxu0 %v3284_v17  ;;  %v3354_v46 = vld [vmem:[%s4322_s0 + $0x4] ss:$8 sps:$4 sm:$0xff]   ;;  %v3330_v49 = vld [vmem:[%s4320_s3 + $0xb4] ss:$8 sps:$4 sm:$0xff]   ;;  %v3334_v51 = vld [vmem:[%s4320_s3 + $0xb0] ss:$8 sps:$4 sm:$0xff]  }
  0x12   :  { %v3332_v50 = vld [vmem:[%s4321_s2 + $0xb4] ss:$8 sps:$4 sm:$0xff]   ;;  %540 = vmatprep.mubr.bf16.mxu1 %v3354_v46  ;;  %293 = vmatprep.mubr.bf16.mxu0 %v3354_v46  ;;  %v3335_v52 = vld [vmem:[%s4321_s2 + $0xb0] ss:$8 sps:$4 sm:$0xff]   ;;  %v3336_v53 = vld [vmem:[%s4320_s3 + $0xa4] ss:$8 sps:$4 sm:$0xff]  }
  0x13   :  { %517 = vmatpush1.bf16.msra.mxu1 %v3286_v18  ;;  %v3338_v54 = vld [vmem:[%s4321_s2 + $0xa4] ss:$8 sps:$4 sm:$0xff]   ;;  %v3340_v55 = vld [vmem:[%s4320_s3 + $0xa0] ss:$8 sps:$4 sm:$0xff]   ;;  %v3342_v57 = vld [vmem:[%s4320_s3 + $0x94] ss:$8 sps:$4 sm:$0xff]  }
  0x14   :  { %270 = vmatpush1.bf16.msra.mxu0 %v3287_v19  ;;  %518 = vmatprep.subr.bf16.mxu1 %v3288_v20  ;;  %v3341_v56 = vld [vmem:[%s4321_s2 + $0xa0] ss:$8 sps:$4 sm:$0xff]   ;;  %v3344_v58 = vld [vmem:[%s4321_s2 + $0x94] ss:$8 sps:$4 sm:$0xff]   ;;  %v3346_v59 = vld [vmem:[%s4320_s3 + $0x90] ss:$8 sps:$4 sm:$0xff]  }
  0x15   :  { %271 = vmatprep.subr.bf16.mxu0 %v3290_v21  ;;  %v3347_v60 = vld [vmem:[%s4321_s2 + $0x90] ss:$8 sps:$4 sm:$0xff]   ;;  %v3348_v61 = vld [vmem:[%s4320_s3 + $0x84] ss:$8 sps:$4 sm:$0xff]   ;;  %v3352_v63 = vld [vmem:[%s4320_s3 + $0x80] ss:$8 sps:$4 sm:$0xff]  }
  0x16   :  { %v3350_v62 = vld [vmem:[%s4321_s2 + $0x84] ss:$8 sps:$4 sm:$0xff]   ;;  %v3353_v0 = vld [vmem:[%s4321_s2 + $0x80] ss:$8 sps:$4 sm:$0xff]   ;;  %v3511_v2 = vmov 0.0   ;;  %v3793_v4 = vshrl.u32 %v81_v3, 7 }
  0x17   :  { %519 = vmatpush1.bf16.msra.mxu1 %v3292_v22  ;;  %v3785_v1 = vld [vmem:[%s4322_s0] ss:$8 sps:$4 sm:$0xff]   ;;  %vm2808_vm4 = vcmask 58368   ;;  %vm2928_vm5 = vcmask 1043459   ;;  %vm2930_vm6 = vcmask 1045509   ;;  %vm2932_vm7 = vcmask 1047559  }
  0x18   :  { %272 = vmatpush1.bf16.msra.mxu0 %v3293_v23  ;;  %520 = vmatprep.subr.bf16.mxu1 %v3294_v24  ;;  %v798_v5 = vld [vmem:[%s4323_s1] sm:$0x3]  ;;  %v3799_v7 = vsub.s32 0, %v3793_v4  ;;  %v3804_v9 = vsub.s32 1, %v3793_v4 }
  0x19   :  { %273 = vmatprep.subr.bf16.mxu0 %v3296_v25  ;;  %v799_v6 = vsub.f32 1.0, %v798_v5  ;;  %v3819_v12 = vld [vmem:[%s4324_s6] sm:$0x3] }
  0x1a   :  { %v79_v13 = vld [vmem:[%s4325_s5] sm:$0x3]  ;;  %v341_v14 = vrot.slane %v3819_v12, %v3799_v7 }
  0x1b   :  { %521 = vmatpush1.bf16.msra.mxu1 %v3298_v26  ;;  %v3801_v8 = vmul.f32 -1e+09, %v799_v6  ;;  %v84_v15 = vrot.slane %v79_v13, %v3799_v7  ;;  %v3828_v16 = vrot.slane %v79_v13, %v3804_v9 }
  0x1c   :  { %274 = vmatpush1.bf16.msra.mxu0 %v3299_v27  ;;  %522 = vmatprep.subr.bf16.mxu1 %v3300_v28  ;;  %v3357_v28 = vld [vmem:[%s4326_s4 + $0x70] ss:$8 sps:$4 sm:$0xff]  }
  0x1d   :  { %275 = vmatprep.subr.bf16.mxu0 %v3302_v29  ;;  %v3808_v10 = vrot.slane %v3801_v8, %v3799_v7  ;;  %v3813_v11 = vrot.slane %v3801_v8, %v3804_v9  ;;  %v3359_v29 = vld [vmem:[%s4326_s4 + $0x74] ss:$8 sps:$4 sm:$0xff]  }
  0x1f   :  { %523 = vmatpush1.bf16.msra.mxu1 %v3304_v30  ;;  %829 = vbcast.lane.b32.xlu0 %v3808_v10, 256  ;;  %v3362_v30 = vld [vmem:[%s4326_s4 + $0x64] ss:$8 sps:$4 sm:$0xff]  }
  0x20   :  { %276 = vmatpush1.bf16.msra.mxu0 %v3305_v31  ;;  %524 = vmatprep.subr.bf16.mxu1 %v3306_v32  ;;  %v3360_v31 = vld [vmem:[%s4326_s4 + $0x60] ss:$8 sps:$4 sm:$0xff]   ;;  %v3365_v32 = vld [vmem:[%s4326_s4 + $0x54] ss:$8 sps:$4 sm:$0xff]  }
  0x21   :  { %277 = vmatprep.subr.bf16.mxu0 %v3308_v33  ;;  %v3363_v33 = vld [vmem:[%s4326_s4 + $0x50] ss:$8 sps:$4 sm:$0xff]  }
  0x23   :  { %525 = vmatpush2.bf16.msra.mxu1 %v3310_v34  ;;  %836 = vbcast.lane.b32.xlu0 %v3813_v11, 256  ;;  %v3368_v34 = vld [vmem:[%s4326_s4 + $0x44] ss:$8 sps:$4 sm:$0xff]  }
  0x24   :  { %278 = vmatpush2.bf16.msra.mxu0 %v3311_v35  ;;  %526 = vmatprep.subr.bf16.mxu1 %v3312_v36  ;;  %v3366_v35 = vld [vmem:[%s4326_s4 + $0x40] ss:$8 sps:$4 sm:$0xff]   ;;  %v3371_v36 = vld [vmem:[%s4326_s4 + $0x34] ss:$8 sps:$4 sm:$0xff]  }
  0x25   :  { %279 = vmatprep.subr.bf16.mxu0 %v3314_v37  ;;  %v3369_v37 = vld [vmem:[%s4326_s4 + $0x30] ss:$8 sps:$4 sm:$0xff]  }
  0x27   :  { %527 = vmatpush2.bf16.msra.mxu1 %v3316_v38  ;;  %v3374_v38 = vld [vmem:[%s4326_s4 + $0x24] ss:$8 sps:$4 sm:$0xff]  }
  0x28   :  { %280 = vmatpush2.bf16.msra.mxu0 %v3317_v39  ;;  %528 = vmatprep.subr.bf16.mxu1 %v3318_v40  ;;  %v3372_v39 = vld [vmem:[%s4326_s4 + $0x20] ss:$8 sps:$4 sm:$0xff]   ;;  %v3377_v40 = vld [vmem:[%s4326_s4 + $0x14] ss:$8 sps:$4 sm:$0xff]  }
  0x29   :  { %281 = vmatprep.subr.bf16.mxu0 %v3320_v41  ;;  %v3375_v41 = vld [vmem:[%s4326_s4 + $0x10] ss:$8 sps:$4 sm:$0xff]  }
  0x2b   :  { %529 = vmatpush2.bf16.msra.mxu1 %v3322_v42  ;;  %v3380_v42 = vld [vmem:[%s4326_s4 + $0x4] ss:$8 sps:$4 sm:$0xff]  }
  0x2c   :  { %282 = vmatpush2.bf16.msra.mxu0 %v3323_v43  ;;  %530 = vmatprep.subr.bf16.mxu1 %v3324_v44  ;;  %v3378_v43 = vld [vmem:[%s4326_s4] ss:$8 sps:$4 sm:$0xff]   ;;  %v3383_v44 = vld [vmem:[%s4326_s4 + $0xf4] ss:$8 sps:$4 sm:$0xff]  }
  0x2d   :  { %283 = vmatprep.subr.bf16.mxu0 %v3326_v45  ;;  %v3381_v45 = vld [vmem:[%s4326_s4 + $0xf0] ss:$8 sps:$4 sm:$0xff]  }
  0x2f   :  { %531 = vmatpush2.bf16.msra.mxu1 %v3328_v47  ;;  %v3384_v47 = vld [vmem:[%s4326_s4 + $0xe0] ss:$8 sps:$4 sm:$0xff]  }
  0x30   :  { %284 = vmatpush2.bf16.msra.mxu0 %v3329_v48  ;;  %532 = vmatprep.subr.bf16.mxu1 %v3330_v49  ;;  %v3389_v48 = vld [vmem:[%s4326_s4 + $0xd4] ss:$8 sps:$4 sm:$0xff]   ;;  %v3387_v49 = vld [vmem:[%s4326_s4 + $0xd0] ss:$8 sps:$4 sm:$0xff]  }
  0x31   :  { %285 = vmatprep.subr.bf16.mxu0 %v3332_v50  ;;  %v3392_v50 = vld [vmem:[%s4326_s4 + $0xc4] ss:$8 sps:$4 sm:$0xff]  }
  0x33   :  { %533 = vmatpush2.bf16.msra.mxu1 %v3334_v51  ;;  %v3390_v51 = vld [vmem:[%s4326_s4 + $0xc0] ss:$8 sps:$4 sm:$0xff]  }
  0x34   :  { %286 = vmatpush2.bf16.msra.mxu0 %v3335_v52  ;;  %534 = vmatprep.subr.bf16.mxu1 %v3336_v53  ;;  %v3395_v52 = vld [vmem:[%s4326_s4 + $0xb4] ss:$8 sps:$4 sm:$0xff]   ;;  %v3393_v53 = vld [vmem:[%s4326_s4 + $0xb0] ss:$8 sps:$4 sm:$0xff]  }
  0x35   :  { %287 = vmatprep.subr.bf16.mxu0 %v3338_v54  ;;  %v3398_v54 = vld [vmem:[%s4326_s4 + $0xa4] ss:$8 sps:$4 sm:$0xff]  }
  0x37   :  { %535 = vmatpush2.bf16.msra.mxu1 %v3340_v55  ;;  %v3396_v55 = vld [vmem:[%s4326_s4 + $0xa0] ss:$8 sps:$4 sm:$0xff]  }
  0x38   :  { %288 = vmatpush2.bf16.msra.mxu0 %v3341_v56  ;;  %536 = vmatprep.subr.bf16.mxu1 %v3342_v57  ;;  %v3401_v56 = vld [vmem:[%s4326_s4 + $0x94] ss:$8 sps:$4 sm:$0xff]   ;;  %v3399_v57 = vld [vmem:[%s4326_s4 + $0x90] ss:$8 sps:$4 sm:$0xff]  }
  0x39   :  { %289 = vmatprep.subr.bf16.mxu0 %v3344_v58  ;;  %v3404_v58 = vld [vmem:[%s4326_s4 + $0x84] ss:$8 sps:$4 sm:$0xff]  }
  0x3b   :  { %537 = vmatpush2.bf16.msra.mxu1 %v3346_v59  ;;  %v3402_v59 = vld [vmem:[%s4326_s4 + $0x80] ss:$8 sps:$4 sm:$0xff]  }
  0x3c   :  { %290 = vmatpush2.bf16.msra.mxu0 %v3347_v60  ;;  %538 = vmatprep.subr.bf16.mxu1 %v3348_v61  ;;  %v3513_v60 = vmov 1966171168  }
  0x3d   :  { %291 = vmatprep.subr.bf16.mxu0 %v3350_v62  ;;  %v803_v61 = vunpack.c.l.s4 %v3513_v60 }
  0x3f   :  { %539 = vmatpush2.bf16.msra.mxu1 %v3352_v63  ;;  %v804_v62 = vunpack.c.0.s8 %v803_v61 }
  0x40   :  { %292 = vmatpush2.bf16.msra.mxu0 %v3353_v0  ;;  %3170 = vmatprep.subr.mxu1 %v3511_v2 }
  0x41   :  { %755 = vmatprep.subr.bf16.mxu0 %v3359_v29  ;;  %v807_v63 = vsub.s32 %v804_v62, %v3793_v4 }
  0x42   :  { %541 = vmatmul.mubr.bf16.vlgmr.msra.gmra.mxu1 %v3785_v1 }
  0x43   :  { %294 = vmatmul.mubr.bf16.vlgmr.msra.gmra.mxu0 %v3785_v1  ;;  %3172 = vmatprep.mubr.msk.f32.mxu1 %vm3512_vm0, %v3511_v2  ;;  %v808_v0 = vrot.slane %v3801_v8, %v807_v63 }
  0x44   :  { %787 = vmatprep.mubr.bf16.mxu0 %v3354_v46  ;;  %756 = vmatpush1.bf16.msra.mxu0 %v3357_v28  ;;  %v3386_v46 = vld [vmem:[%s4326_s4 + $0xe4] ss:$8 sps:$4 sm:$0xff]   ;;  %s3514_s4 = smov 64  }
  0x45   :  { %757 = vmatprep.subr.bf16.mxu0 %v3362_v30  ;;  %v816_v5 = vrot.slane %v808_v0, %v807_v63  ;;  %v809_v6 = vcombine.high %v808_v0, %v808_v0 }
  0x48   :  { %758 = vmatpush1.bf16.msra.mxu0 %v3360_v31 }
  0x49   :  { %759 = vmatprep.subr.bf16.mxu0 %v3365_v32 }
  0x4c   :  { %760 = vmatpush1.bf16.msra.mxu0 %v3363_v33 }
  0x4d   :  { %761 = vmatprep.subr.bf16.mxu0 %v3368_v34 }
  0x50   :  { %762 = vmatpush1.bf16.msra.mxu0 %v3366_v35 }
  0x51   :  { %763 = vmatprep.subr.bf16.mxu0 %v3371_v36 }
  0x54   :  { %764 = vmatpush1.bf16.msra.mxu0 %v3369_v37 }
  0x55   :  { %765 = vmatprep.subr.bf16.mxu0 %v3374_v38 }
  0x58   :  { %766 = vmatpush1.bf16.msra.mxu0 %v3372_v39 }
  0x59   :  { %767 = vmatprep.subr.bf16.mxu0 %v3377_v40 }
  0x5c   :  { %768 = vmatpush1.bf16.msra.mxu0 %v3375_v41 }
  0x5d   :  { %769 = vmatprep.subr.bf16.mxu0 %v3380_v42 }
  0x60   :  { %770 = vmatpush1.bf16.msra.mxu0 %v3378_v43 }
  0x61   :  { %771 = vmatprep.subr.bf16.mxu0 %v3383_v44 }
  0x64   :  { %772 = vmatpush2.bf16.msra.mxu0 %v3381_v45 }
  0x65   :  { %773 = vmatprep.subr.bf16.mxu0 %v3386_v46 }
  0x68   :  { %774 = vmatpush2.bf16.msra.mxu0 %v3384_v47 }
  0x69   :  { %775 = vmatprep.subr.bf16.mxu0 %v3389_v48 }
  0x6c   :  { %776 = vmatpush2.bf16.msra.mxu0 %v3387_v49 }
  0x6d   :  { %777 = vmatprep.subr.bf16.mxu0 %v3392_v50 }
  0x70   :  { %778 = vmatpush2.bf16.msra.mxu0 %v3390_v51 }
  0x71   :  { %779 = vmatprep.subr.bf16.mxu0 %v3395_v52 }
  0x74   :  { %780 = vmatpush2.bf16.msra.mxu0 %v3393_v53 }
  0x75   :  { %781 = vmatprep.subr.bf16.mxu0 %v3398_v54 }
  0x78   :  { %782 = vmatpush2.bf16.msra.mxu0 %v3396_v55 }
  0x79   :  { %783 = vmatprep.subr.bf16.mxu0 %v3401_v56 }
  0x7c   :  { %784 = vmatpush2.bf16.msra.mxu0 %v3399_v57 }
  0x7d   :  { %785 = vmatprep.subr.bf16.mxu0 %v3404_v58 }
  0x80   :  { %786 = vmatpush2.bf16.msra.mxu0 %v3402_v59 }
  0x81   :  { %3225 = vmatprep.subr.mxu0 %v3511_v2 }
  0x83   :  { %788 = vmatmul.mubr.bf16.vlgmr.msra.gmra.mxu0 %v3785_v1 }
  0x84   :  { %3227 = vmatprep.mubr.msk.f32.mxu0 %vm3512_vm0, %v3511_v2 }
  0x91   :  { %v830_v13 = vpop.permute.xlu0 %829 }
 0x102   :  { %v542_v17 = vpop.f32.mrf.mxu1 }
 0x103   :  { %v295_v18 = vpop.f32.mrf.mxu0  ;;  %v3830_v19 = vadd.f32 %v542_v17, %v341_v14 }
 0x104   :  { %v3832_v20 = vadd.f32 %v295_v18, %v84_v15  ;;  %v3834_v21 = vpop.f32.mrf.mxu1 }
 0x105   :  { %v297_v22 = vpop.f32.mrf.mxu0  ;;  %3171 = vmatpush3.xpose.msk.msra.mxu1 %vm850_vm1, %v3830_v19 }
 0x106   :  { %v3837_v23 = vadd.f32 %v297_v22, %v3828_v16  ;;  %v546_v24 = vpop.f32.mrf.mxu1  ;;  %3175 = vmatprep.subr.mxu1 %v3511_v2 }
 0x107   :  { %v3842_v25 = vadd.f32 %v546_v24, %v341_v14  ;;  %v299_v26 = vpop.f32.mrf.mxu0  ;;  %v841_v14 = vrot.slane %v816_v5, %v3799_v7  ;;  %v837_v24 = vpop.permute.xlu0 %836 }
 0x108   :  { %3173 = vmatmul.mubr.msk.f32.vlgmr.msra.gmra.mxu1 %vm850_vm1, %v3832_v20  ;;  %v3850_v27 = vadd.f32 %v299_v26, %v84_v15  ;;  %v823_v15 = vrot.slane %v809_v6, %v807_v63  ;;  %v3960_v17 = vpop.f32.mrf.mxu1 }
 0x109   :  { %3176 = vmatpush3.xpose.msk.msra.mxu1 %vm850_vm1, %v3842_v25  ;;  %3177 = vmatprep.mubr.msk.f32.mxu1 %vm3512_vm0, %v3511_v2  ;;  %v3962_v18 = vadd.f32 %v841_v14, %v830_v13 }
 0x10a   :  { %3180 = vmatprep.subr.mxu1 %v3511_v2  ;;  %v845_v1 = vrot.slane %v823_v15, %v3799_v7 }
 0x10c   :  { %3178 = vmatmul.mubr.msk.f32.vlgmr.msra.gmra.mxu1 %vm850_vm1, %v3850_v27  ;;  %v3965_v29 = vadd.f32 %v845_v1, %v837_v24 }
 0x10d   :  { %3182 = vmatprep.mubr.msk.f32.mxu1 %vm3512_vm0, %v3511_v2 }
 0x1c8   :  { %v923_v22 = vpop.f32.mrf.mxu1 }
 0x1c9   :  { %v1003_v26 = vmul.f32 0.125, %v923_v22 }
 0x1ca   :  { %v3174_v28 = vpop.f32.mrf.mxu1 }
 0x1cb   :  { %v1005_v8 = vadd.f32 %v1003_v26, %v3962_v18 }
 0x1cc   :  { %v999_v30 = vpop.f32.mrf.mxu1 }
 0x1cd   :  { %v1004_v31 = vmul.f32 0.125, %v999_v30  ;;  %v1008_v32 = vsel %vm1007_vm2, %v1005_v8, -inf }
 0x1ce   :  { %1009 = vmax.xlane.f32.xlu1 %v1008_v32  ;;  %v3179_v33 = vpop.f32.mrf.mxu1 }
 0x1cf   :  { %v1006_v34 = vadd.f32 %v1004_v31, %v3965_v29  ;;  %v345_v33 = vrot.slane %v3819_v12, %v3804_v9 }
 0x1d1   :  { %v1011_v35 = vsel %vm1007_vm2, %v1006_v34, -inf }
 0x1d2   :  { %1012 = vmax.xlane.f32.xlu1 %v1011_v35  ;;  %v4036_v35 = vadd.f32 %v3960_v17, %v345_v33 }
 0x1e3   :  { %1187 = vrot.lane.b32.xlu1 %v3830_v19, %s3514_s4 }
 0x1e7   :  { %1185 = vrot.lane.b32.xlu1 %v3832_v20, %s3514_s4  ;;  %v3979_v20 = vpop.f32.mrf.mxu0 }
 0x1e9   :  { %v789_v45 = vpop.f32.mrf.mxu0 }
 0x1eb   :  { %1265 = vrot.lane.b32.xlu1 %v3842_v25, %s3514_s4  ;;  %v583_v25 = vld [vmem:[%s4327_s7] sm:$0x3]  ;;  %v791_v46 = vpop.f32.mrf.mxu0 }
 0x1ec   :  { %v588_v47 = vrot.slane %v583_v25, %v3799_v7  ;;  %v592_v48 = vrot.slane %v583_v25, %v3804_v9 }
 0x1ed   :  { %v793_v49 = vpop.f32.mrf.mxu0 }
 0x1ee   :  { %v790_v50 = vadd.f32 %v789_v45, %v588_v47  ;;  %v3988_v51 = vadd.f32 %v791_v46, %v592_v48  ;;  %v3990_v52 = vadd.f32 %v793_v49, %v588_v47  ;;  %v3407_v46 = vld [vmem:[%s4328_s8 + $0x74] ss:$8 sps:$4 sm:$0xff]   ;;  %v3405_v49 = vld [vmem:[%s4328_s8 + $0x70] ss:$8 sps:$4 sm:$0xff]  }
 0x1ef   :  { %v795_v53 = vpop.f32.mrf.mxu0 }
 0x1f0   :  { %v3992_v54 = vadd.f32 %v795_v53, %v592_v48  ;;  %3181 = vmatpush3.msra.mxu1 %v790_v50  ;;  %v3408_v53 = vld [vmem:[%s4328_s8 + $0x60] ss:$8 sps:$4 sm:$0xff]  }
 0x1f1   :  { %3185 = vmatprep.subr.mxu1 %v3511_v2 }
 0x1f2   :  { %3226 = vmatpush3.msra.mxu0 %v3992_v54 }
 0x1f3   :  { %3230 = vmatprep.subr.mxu0 %v3511_v2 }
 0x257   :  { %v1010_v36 = vpop.xlane.xlu1 %1009 }
 0x258   :  { %v1014_v37 = vsub.f32 %v1005_v8, %v1010_v36 }
 0x25a   :  { %v1016_v38 = vmul.f32 1.442695, %v1014_v37 }
 0x25b   :  { %v1013_v39 = vpop.xlane.xlu1 %1012 }
 0x25c   :  { %3469 = vpow2.f32 %v1016_v38  ;;  %v1015_v40 = vsub.f32 %v1006_v34, %v1013_v39  ;;  %v4028_v34 = vadd.f32 %v3834_v21, %v345_v33 }
 0x25e   :  { %v1018_v41 = vmul.f32 1.442695, %v1015_v40 }
 0x25f   :  { %v1188_v55 = vpop.permute.xlu1 %1187 }
 0x260   :  { %3471 = vpow2.f32 %v1018_v41 }
 0x263   :  { %v1186_v56 = vpop.permute.xlu1 %1185 }
 0x267   :  { %v1266_v57 = vpop.permute.xlu1 %1265 }
 0x269   :  { %v3470_v42 = vpop.eup %3469 }
 0x26a   :  { %v1020_v43 = vsel %vm1007_vm2, %v3470_v42, 0.0 }
 0x26b   :  { %1021 = vadd.xlane.f32.xlu0 %v1020_v43 }
 0x26d   :  { %v3472_v44 = vpop.eup %3471 }
 0x26e   :  { %v1023_v19 = vsel %vm1007_vm2, %v3472_v44, 0.0 }
 0x26f   :  { %1024 = vadd.xlane.f32.xlu1 %v1023_v19 }
 0x280   :  { %1263 = vrot.lane.b32.xlu1 %v3850_v27, %s3514_s4 }
 0x2f4   :  { %v1022_v58 = vpop.xlane.xlu0 %1021 }
 0x2f5   :  { %3473 = vrcp.f32 %v1022_v58  ;;  %v3414_v58 = vld [vmem:[%s4328_s8 + $0x40] ss:$8 sps:$4 sm:$0xff]  }
 0x2f8   :  { %v1025_v27 = vpop.xlane.xlu1 %1024 }
 0x2f9   :  { %3475 = vrcp.f32 %v1025_v27  ;;  %v3419_v27 = vld [vmem:[%s4328_s8 + $0x34] ss:$8 sps:$4 sm:$0xff]  }
 0x2fc   :  { %v1264_v63 = vpop.permute.xlu1 %1263 }
 0x302   :  { %v3474_v59 = vpop.eup %3473 }
 0x303   :  { %v1028_v60 = vmul.f32 %v3474_v59, %v3470_v42  ;;  %v3515_v59 = vmov 0  }
 0x304   :  { %3256 = vset.pattern.permute.xlu0 %v3515_v59  ;;  %3257 = vset.pattern.permute.xlu1 %v3515_v59 }
 0x305   :  { %3183 = vmatmul.mubr.msk.f32.vlgmr.msra.gmra.mxu1 %vm1007_vm2, %v1028_v60 }
 0x306   :  { %v3476_v61 = vpop.eup %3475  ;;  %3186 = vmatpush3.msra.mxu1 %v3990_v52  ;;  %3187 = vmatprep.mubr.msk.f32.mxu1 %vm3512_vm0, %v3511_v2 }
 0x307   :  { %3190 = vmatprep.subr.mxu1 %v3511_v2  ;;  %v1029_v62 = vmul.f32 %v3476_v61, %v3472_v44 }
 0x309   :  { %3188 = vmatmul.mubr.msk.f32.vlgmr.msra.gmra.mxu1 %vm1007_vm2, %v1029_v62 }
 0x30a   :  { %3191 = vmatpush3.xpose.msk.msra.mxu1 %vm850_vm1, %v1188_v55  ;;  %3192 = vmatprep.mubr.msk.f32.mxu1 %vm3512_vm0, %v3511_v2  ;;  %v3413_v55 = vld [vmem:[%s4328_s8 + $0x54] ss:$8 sps:$4 sm:$0xff]  }
 0x30b   :  { %3195 = vmatprep.subr.mxu1 %v3511_v2 }
 0x30d   :  { %3193 = vmatmul.mubr.msk.f32.vlgmr.msra.gmra.mxu1 %vm850_vm1, %v1186_v56  ;;  %v3411_v56 = vld [vmem:[%s4328_s8 + $0x50] ss:$8 sps:$4 sm:$0xff]  }
 0x30e   :  { %3196 = vmatpush3.xpose.msk.msra.mxu1 %vm850_vm1, %v1266_v57  ;;  %3197 = vmatprep.mubr.msk.f32.mxu1 %vm3512_vm0, %v3511_v2  ;;  %v3416_v57 = vld [vmem:[%s4328_s8 + $0x44] ss:$8 sps:$4 sm:$0xff]  }
 0x30f   :  { %3200 = vmatprep.subr.mxu1 %v3511_v2 }
 0x311   :  { %3198 = vmatmul.mubr.msk.f32.vlgmr.msra.gmra.mxu1 %vm850_vm1, %v1264_v63  ;;  %v3417_v63 = vld [vmem:[%s4328_s8 + $0x30] ss:$8 sps:$4 sm:$0xff]  }
 0x312   :  { %3202 = vmatprep.mubr.msk.f32.mxu1 %vm3512_vm0, %v3511_v2 }
 0x3c5   :  { %v4015_v0 = vpop.f32.mrf.mxu1 }
 0x3c7   :  { %v3184_v5 = vpop.f32.mrf.mxu1 }
 0x3c9   :  { %v4017_v6 = vpop.f32.mrf.mxu1 }
 0x3ca   :  { %v1176_v13 = vpack.c.bf16 %v4017_v6, %v4015_v0  ;;  %v302_v0 = vadd.f32 %v3979_v20, %v3828_v16 }
 0x3cb   :  { %v3189_v14 = vpop.f32.mrf.mxu1 }
 0x3cc   :  { %v3422_v14 = vld [vmem:[%s4328_s8 + $0x24] ss:$8 sps:$4 sm:$0xff]  }
 0x3cd   :  { %v1259_v15 = vpop.f32.mrf.mxu1 }
 0x3ce   :  { %v1341_v1 = vmul.f32 0.125, %v1259_v15 }
 0x3cf   :  { %v3194_v22 = vpop.f32.mrf.mxu1 }
 0x3d0   :  { %v1343_v24 = vadd.f32 %v1341_v1, %v3962_v18  ;;  %v3420_v1 = vld [vmem:[%s4328_s8 + $0x20] ss:$8 sps:$4 sm:$0xff]   ;;  %v3425_v22 = vld [vmem:[%s4328_s8 + $0x14] ss:$8 sps:$4 sm:$0xff]  }
 0x3d1   :  { %v1337_v26 = vpop.f32.mrf.mxu1 }
 0x3d2   :  { %v1342_v28 = vmul.f32 0.125, %v1337_v26  ;;  %v1345_v8 = vsel %vm1007_vm2, %v1343_v24, -inf  ;;  %v3428_v26 = vld [vmem:[%s4328_s8 + $0x4] ss:$8 sps:$4 sm:$0xff]  }
 0x3d3   :  { %1346 = vmax.xlane.f32.xlu0 %v1345_v8  ;;  %v3199_v30 = vpop.f32.mrf.mxu1 }
 0x3d4   :  { %v1344_v31 = vadd.f32 %v1342_v28, %v3965_v29  ;;  %v3426_v28 = vld [vmem:[%s4328_s8] ss:$8 sps:$4 sm:$0xff]  }
 0x3d6   :  { %v1348_v32 = vsel %vm1007_vm2, %v1344_v31, -inf }
 0x3d7   :  { %1349 = vmax.xlane.f32.xlu1 %v1348_v32 }
 0x3e8   :  { %2127 = vrot.lane.b32.xlu1 %v4028_v34, %s3514_s4 }
 0x3e9   :  { %1368 = vrot.lane.b32.xlu0 %v790_v50, %s3514_s4 }
 0x3ec   :  { %2125 = vrot.lane.b32.xlu1 %v3837_v23, %s3514_s4 }
 0x3f0   :  { %2205 = vrot.lane.b32.xlu1 %v4036_v35, %s3514_s4 }
 0x45c   :  { %v1347_v36 = vpop.xlane.xlu0 %1346 }
 0x45d   :  { %v1351_v37 = vsub.f32 %v1343_v24, %v1347_v36  ;;  %v3423_v24 = vld [vmem:[%s4328_s8 + $0x10] ss:$8 sps:$4 sm:$0xff]  }
 0x45f   :  { %v1353_v12 = vmul.f32 1.442695, %v1351_v37 }
 0x460   :  { %v1369_v38 = vpop.permute.xlu0 %1368  ;;  %v1350_v21 = vpop.xlane.xlu1 %1349 }
 0x461   :  { %3477 = vpow2.f32 %v1353_v12  ;;  %v1352_v39 = vsub.f32 %v1344_v31, %v1350_v21  ;;  %3201 = vmatpush3.msra.mxu1 %v1369_v38 }
 0x462   :  { %3205 = vmatprep.subr.mxu1 %v3511_v2 }
 0x463   :  { %v1355_v40 = vmul.f32 1.442695, %v1352_v39 }
 0x465   :  { %3479 = vpow2.f32 %v1355_v40 }
 0x46e   :  { %v3478_v41 = vpop.eup %3477 }
 0x46f   :  { %v1357_v42 = vsel %vm1007_vm2, %v3478_v41, 0.0 }
 0x470   :  { %1358 = vadd.xlane.f32.xlu0 %v1357_v42 }
 0x472   :  { %v3480_v17 = vpop.eup %3479 }
 0x473   :  { %v1360_v43 = vsel %vm1007_vm2, %v3480_v17, 0.0 }
 0x474   :  { %1361 = vadd.xlane.f32.xlu0 %v1360_v43 }
 0x48a   :  { %1445 = vrot.lane.b32.xlu0 %v3990_v52, %s3514_s4  ;;  %v3410_v52 = vld [vmem:[%s4328_s8 + $0x64] ss:$8 sps:$4 sm:$0xff]  }
 0x4f9   :  { %v1359_v44 = vpop.xlane.xlu0 %1358 }
 0x4fa   :  { %3481 = vrcp.f32 %v1359_v44 }
 0x4fd   :  { %v1362_v19 = vpop.xlane.xlu0 %1361 }
 0x4fe   :  { %3483 = vrcp.f32 %v1362_v19 }
 0x501   :  { %v1446_v47 = vpop.permute.xlu0 %1445 }
 0x507   :  { %v3482_v45 = vpop.eup %3481 }
 0x508   :  { %v1365_v25 = vmul.f32 %v3482_v45, %v3478_v41 }
 0x50a   :  { %3203 = vmatmul.mubr.msk.f32.vlgmr.msra.gmra.mxu1 %vm1007_vm2, %v1365_v25 }
 0x50b   :  { %v3484_v48 = vpop.eup %3483  ;;  %3206 = vmatpush3.msra.mxu1 %v1446_v47  ;;  %3207 = vmatprep.mubr.msk.f32.mxu1 %vm3512_vm0, %v3511_v2 }
 0x50c   :  { %v1366_v50 = vmul.f32 %v3484_v48, %v3480_v17  ;;  %1581 = vmatprep.subr.bf16.mxu1 %v3407_v46  ;;  %v2128_v46 = vpop.permute.xlu1 %2127 }
 0x50e   :  { %3208 = vmatmul.mubr.msk.f32.vlgmr.msra.gmra.mxu1 %vm1007_vm2, %v1366_v50 }
 0x50f   :  { %1582 = vmatpush1.bf16.msra.mxu1 %v3405_v49  ;;  %1605 = vmatprep.mubr.bf16.mxu1 %v3515_v59 }
 0x510   :  { %1583 = vmatprep.subr.bf16.mxu1 %v3410_v52  ;;  %v2126_v47 = vpop.permute.xlu1 %2125 }
 0x513   :  { %1584 = vmatpush1.bf16.msra.mxu1 %v3408_v53 }
 0x514   :  { %1585 = vmatprep.subr.bf16.mxu1 %v3413_v55  ;;  %v2206_v48 = vpop.permute.xlu1 %2205 }
 0x517   :  { %1586 = vmatpush1.bf16.msra.mxu1 %v3411_v56 }
 0x518   :  { %1587 = vmatprep.subr.bf16.mxu1 %v3416_v57 }
 0x51b   :  { %1588 = vmatpush1.bf16.msra.mxu1 %v3414_v58 }
 0x51c   :  { %1667 = vmatprep.subr.bf16.mxu1 %v3419_v27 }
 0x5ca   :  { %v1440_v60 = vpop.f32.mrf.mxu1 }
 0x5cc   :  { %v3204_v61 = vpop.f32.mrf.mxu1 }
 0x5ce   :  { %v1517_v62 = vpop.f32.mrf.mxu1 }
 0x5cf   :  { %v1521_v5 = vpack.c.bf16 %v1517_v62, %v1440_v60 }
 0x5d0   :  { %v3209_v15 = vpop.f32.mrf.mxu1 }
 0x5d1   :  { %3058 = vmatmul.mubr.msk.bf16.vlgmr.msra.gmra.mxu1 %vm850_vm1, %v1521_v5 }
 0x5d2   :  { %1668 = vmatpush1.bf16.msra.mxu1 %v3417_v63  ;;  %1691 = vmatprep.mubr.bf16.mxu1 %v3515_v59 }
 0x5d3   :  { %1669 = vmatprep.subr.bf16.mxu1 %v3422_v14 }
 0x5d6   :  { %1670 = vmatpush1.bf16.msra.mxu1 %v3420_v1 }
 0x5d7   :  { %1671 = vmatprep.subr.bf16.mxu1 %v3425_v22 }
 0x5da   :  { %1672 = vmatpush1.bf16.msra.mxu1 %v3423_v24 }
 0x5db   :  { %1673 = vmatprep.subr.bf16.mxu1 %v3428_v26 }
 0x5de   :  { %1674 = vmatpush1.bf16.msra.mxu1 %v3426_v28 }
 0x5df   :  { %3210 = vmatprep.subr.mxu1 %v3511_v2 }
 0x5e1   :  { %3067 = vmatmul.mubr.msk.bf16.vlgmr.msra.gmra.mxu1 %vm850_vm1, %v1176_v13 }
 0x5e2   :  { %3211 = vmatpush3.xpose.msk.msra.mxu1 %vm850_vm1, %v4028_v34  ;;  %3212 = vmatprep.mubr.msk.f32.mxu1 %vm3512_vm0, %v3511_v2 }
 0x5e3   :  { %3215 = vmatprep.subr.mxu1 %v3511_v2 }
 0x5e9   :  { %3213 = vmatmul.mubr.msk.f32.vlgmr.msra.gmra.mxu1 %vm850_vm1, %v3837_v23 }
 0x5ea   :  { %3216 = vmatpush3.xpose.msk.msra.mxu1 %vm850_vm1, %v4036_v35  ;;  %3217 = vmatprep.mubr.msk.f32.mxu1 %vm3512_vm0, %v3511_v2 }
 0x5eb   :  { %3220 = vmatprep.subr.mxu1 %v3511_v2 }
 0x5ed   :  { %3218 = vmatmul.mubr.msk.f32.vlgmr.msra.gmra.mxu1 %vm850_vm1, %v302_v0 }
 0x5ee   :  { %3221 = vmatpush3.msra.mxu1 %v3988_v51  ;;  %3222 = vmatprep.mubr.msk.f32.mxu1 %vm3512_vm0, %v3511_v2 }
 0x691   :  { %v1607_v6 = vpop.f32.mrf.mxu1 }
 0x693   :  { %v1609_v23 = vpop.f32.mrf.mxu1 }
 0x695   :  { %v1611_v13 = vpop.f32.mrf.mxu1 }
 0x697   :  { %v1613_v8 = vpop.f32.mrf.mxu1 }
 0x6a1   :  { %v1693_v30 = vpop.f32.mrf.mxu1 }
 0x6a2   :  { %v4125_v31 = vadd.f32 %v1693_v30, %v1607_v6 }
 0x6a3   :  { %v1695_v32 = vpop.f32.mrf.mxu1 }
 0x6a4   :  { %v4127_v33 = vadd.f32 %v1695_v32, %v1609_v23 }
 0x6a5   :  { %v1697_v16 = vpop.f32.mrf.mxu1 }
 0x6a6   :  { %v4129_v20 = vadd.f32 %v1697_v16, %v1611_v13 }
 0x6a7   :  { %v1699_v34 = vpop.f32.mrf.mxu1 }
 0x6a8   :  { %v4131_v35 = vadd.f32 %v1699_v34, %v1613_v8 }
 0x6a9   :  { %v1774_v36 = vpop.f32.mrf.mxu1 }
 0x6aa   :  { %v1854_v38 = vmul.f32 0.125, %v1774_v36 }
 0x6ab   :  { %v3214_v37 = vpop.f32.mrf.mxu1 }
 0x6ac   :  { %v1856_v42 = vadd.f32 %v1854_v38, %v3962_v18  ;;  %v3429_v37 = vld [vmem:[%s4328_s8 + $0xb0] ss:$8 sps:$4 sm:$0xff]   ;;  %v3434_v38 = vld [vmem:[%s4328_s8 + $0xa4] ss:$8 sps:$4 sm:$0xff]  }
 0x6ad   :  { %v1850_v12 = vpop.f32.mrf.mxu1 }
 0x6ae   :  { %v1855_v21 = vmul.f32 0.125, %v1850_v12  ;;  %v1858_v17 = vsel %vm1007_vm2, %v1856_v42, -inf  ;;  %v3431_v12 = vld [vmem:[%s4328_s8 + $0xb4] ss:$8 sps:$4 sm:$0xff]  }
 0x6af   :  { %v3219_v39 = vpop.f32.mrf.mxu1  ;;  %2086 = vmatprep.subr.bf16.mxu1 %v3431_v12 }
 0x6b0   :  { %v1857_v40 = vadd.f32 %v1855_v21, %v3965_v29  ;;  %v3432_v21 = vld [vmem:[%s4328_s8 + $0xa0] ss:$8 sps:$4 sm:$0xff]   ;;  %v3435_v39 = vld [vmem:[%s4328_s8 + $0x90] ss:$8 sps:$4 sm:$0xff]  }
 0x6b2   :  { %v1861_v41 = vsel %vm1007_vm2, %v1857_v40, -inf }
 0x6b3   :  { %1862 = vmax.xlane.f32.xlu0 %v1861_v41  ;;  %v3438_v41 = vld [vmem:[%s4328_s8 + $0x80] ss:$8 sps:$4 sm:$0xff]  }
 0x6b7   :  { %1859 = vmax.xlane.f32.xlu0 %v1858_v17 }
 0x73c   :  { %v1863_v43 = vpop.xlane.xlu0 %1862 }
 0x73d   :  { %v1865_v44 = vsub.f32 %v1857_v40, %v1863_v43  ;;  %v3440_v40 = vld [vmem:[%s4328_s8 + $0x84] ss:$8 sps:$4 sm:$0xff]  }
 0x73f   :  { %v1868_v19 = vmul.f32 1.442695, %v1865_v44 }
 0x740   :  { %v1860_v55 = vpop.xlane.xlu0 %1859 }
 0x741   :  { %3485 = vpow2.f32 %v1868_v19  ;;  %v1864_v56 = vsub.f32 %v1856_v42, %v1860_v55  ;;  %v3443_v42 = vld [vmem:[%s4328_s8 + $0xf4] ss:$8 sps:$4 sm:$0xff]  }
 0x742   :  { %v3449_v55 = vld [vmem:[%s4328_s8 + $0xd4] ss:$8 sps:$4 sm:$0xff]  }
 0x743   :  { %v1866_v57 = vmul.f32 1.442695, %v1864_v56  ;;  %v3447_v56 = vld [vmem:[%s4328_s8 + $0xd0] ss:$8 sps:$4 sm:$0xff]  }
 0x74e   :  { %v3486_v45 = vpop.eup %3485 }
 0x74f   :  { %v1873_v25 = vsel %vm1007_vm2, %v3486_v45, 0.0 }
 0x750   :  { %1874 = vadd.xlane.f32.xlu1 %v1873_v25 }
 0x761   :  { %2203 = vrot.lane.b32.xlu1 %v302_v0, %s3514_s4 }
 0x7d9   :  { %v1875_v49 = vpop.xlane.xlu1 %1874 }
 0x7da   :  { %3487 = vrcp.f32 %v1875_v49  ;;  %v3441_v49 = vld [vmem:[%s4328_s8 + $0xf0] ss:$8 sps:$4 sm:$0xff]  }
 0x7db   :  { %3489 = vpow2.f32 %v1866_v57  ;;  %v3450_v57 = vld [vmem:[%s4328_s8 + $0xc0] ss:$8 sps:$4 sm:$0xff]  }
 0x7dd   :  { %v2204_v53 = vpop.permute.xlu1 %2203 }
 0x7e7   :  { %v3488_v50 = vpop.eup %3487 }
 0x7e8   :  { %v1879_v52 = vmul.f32 %v3488_v50, %v3486_v45  ;;  %v3490_v26 = vpop.eup %3489 }
 0x7e9   :  { %v1870_v28 = vsel %vm1007_vm2, %v3490_v26, 0.0 }
 0x7ea   :  { %3228 = vmatmul.mubr.msk.f32.vlgmr.msra.gmra.mxu0 %vm1007_vm2, %v1879_v52  ;;  %v3446_v52 = vld [vmem:[%s4328_s8 + $0xe4] ss:$8 sps:$4 sm:$0xff]  }
 0x7eb   :  { %3231 = vmatpush3.xpose.msk.msra.mxu0 %vm850_vm1, %v2128_v46  ;;  %3232 = vmatprep.mubr.msk.f32.mxu0 %vm3512_vm0, %v3511_v2 }
 0x7ec   :  { %3235 = vmatprep.subr.mxu0 %v3511_v2 }
 0x7ee   :  { %3233 = vmatmul.mubr.msk.f32.vlgmr.msra.gmra.mxu0 %vm850_vm1, %v2126_v47 }
 0x7ef   :  { %3236 = vmatpush3.xpose.msk.msra.mxu0 %vm850_vm1, %v2206_v48  ;;  %3237 = vmatprep.mubr.msk.f32.mxu0 %vm3512_vm0, %v3511_v2 }
 0x7f0   :  { %3240 = vmatprep.subr.mxu0 %v3511_v2 }
 0x7f2   :  { %3238 = vmatmul.mubr.msk.f32.vlgmr.msra.gmra.mxu0 %vm850_vm1, %v2204_v53 }
 0x7f3   :  { %3242 = vmatprep.mubr.msk.f32.mxu0 %vm3512_vm0, %v3511_v2 }
 0x8aa   :  { %v4152_v58 = vpop.f32.mrf.mxu0 }
 0x8ac   :  { %v3229_v27 = vpop.f32.mrf.mxu0 }
 0x8ad   :  { %v3454_v27 = vld [vmem:[%s4329_s10 + $0x38] sm:$0xff]  }
 0x8ae   :  { %v2199_v60 = vpop.f32.mrf.mxu0 }
 0x8af   :  { %v2281_v61 = vmul.f32 0.125, %v2199_v60  ;;  %v3455_v60 = vld [vmem:[%s4329_s10 + $0x70] sm:$0xff]  }
 0x8b0   :  { %v3234_v62 = vpop.f32.mrf.mxu0 }
 0x8b1   :  { %v2283_v63 = vadd.f32 %v2281_v61, %v3962_v18  ;;  %v3456_v61 = vld [vmem:[%s4329_s10 + $0x30] sm:$0xff]   ;;  %v3457_v62 = vld [vmem:[%s4329_s10 + $0x68] sm:$0xff]  }
 0x8b2   :  { %v2277_v5 = vpop.f32.mrf.mxu0 }
 0x8b3   :  { %v2282_v14 = vmul.f32 0.125, %v2277_v5  ;;  %v2285_v15 = vsel %vm1007_vm2, %v2283_v63, -inf  ;;  %v3459_v5 = vld [vmem:[%s4329_s10 + $0x60] sm:$0xff]  }
 0x8b4   :  { %2286 = vmax.xlane.f32.xlu1 %v2285_v15  ;;  %v3239_v1 = vpop.f32.mrf.mxu0  ;;  %v3461_v15 = vld [vmem:[%s4329_s10 + $0x58] sm:$0xff]  }
 0x8b5   :  { %v2284_v22 = vadd.f32 %v2282_v14, %v3965_v29  ;;  %v3460_v14 = vld [vmem:[%s4329_s10 + $0x20] sm:$0xff]   ;;  %v3462_v1 = vld [vmem:[%s4329_s10 + $0x18] sm:$0xff]  }
 0x8b7   :  { %v2288_v24 = vsel %vm1007_vm2, %v2284_v22, -inf }
 0x8b8   :  { %2289 = vmax.xlane.f32.xlu0 %v2288_v24 }
 0x8bc   :  { %1871 = vadd.xlane.f32.xlu0 %v1870_v28 }
 0x8c5   :  { %2385 = vrot.lane.b32.xlu1 %v3992_v54, %s3514_s4 }
 0x93d   :  { %v2287_v0 = vpop.xlane.xlu1 %2286 }
 0x93e   :  { %v2291_v18 = vsub.f32 %v2283_v63, %v2287_v0  ;;  %v3458_v63 = vld [vmem:[%s4329_s10 + $0x28] sm:$0xff]  }
 0x940   :  { %v2293_v6 = vmul.f32 1.442695, %v2291_v18  ;;  %v3463_v18 = vld [vmem:[%s4329_s10 + $0x50] sm:$0xff]  }
 0x941   :  { %v2290_v23 = vpop.xlane.xlu0 %2289  ;;  %v2386_v25 = vpop.permute.xlu1 %2385 }
 0x942   :  { %3491 = vpow2.f32 %v2293_v6  ;;  %v2292_v13 = vsub.f32 %v2284_v22, %v2290_v23  ;;  %v3464_v6 = vld [vmem:[%s4329_s10 + $0x10] sm:$0xff]   ;;  %v3465_v23 = vld [vmem:[%s4329_s10 + $0x48] sm:$0xff]  }
 0x944   :  { %v2295_v8 = vmul.f32 1.442695, %v2292_v13  ;;  %v3466_v13 = vld [vmem:[%s4329_s10 + $0x8] sm:$0xff]  }
 0x945   :  { %v1872_v30 = vpop.xlane.xlu0 %1871 }
 0x946   :  { %3493 = vpow2.f32 %v2295_v8  ;;  %v3467_v8 = vld [vmem:[%s4329_s10 + $0x40] sm:$0xff]  }
 0x947   :  { %3495 = vrcp.f32 %v1872_v30  ;;  %v3468_v30 = vld [vmem:[%s4329_s10] sm:$0xff]  }
 0x94f   :  { %v3492_v29 = vpop.eup %3491 }
 0x950   :  { %v2297_v32 = vsel %vm1007_vm2, %v3492_v29, 0.0 }
 0x951   :  { %2298 = vadd.xlane.f32.xlu0 %v2297_v32 }
 0x953   :  { %v3494_v16 = vpop.eup %3493 }
 0x954   :  { %v3496_v34 = vpop.eup %3495  ;;  %v2300_v36 = vsel %vm1007_vm2, %v3494_v16, 0.0 }
 0x955   :  { %2301 = vadd.xlane.f32.xlu0 %v2300_v36  ;;  %v1878_v54 = vmul.f32 %v3496_v34, %v3490_v26 }
 0x957   :  { %3223 = vmatmul.mubr.msk.f32.vlgmr.msra.gmra.mxu1 %vm1007_vm2, %v1878_v54 }
 0x958   :  { %2110 = vmatprep.mubr.bf16.mxu1 %v3515_v59  ;;  %2087 = vmatpush1.bf16.msra.mxu1 %v3429_v37 }
 0x959   :  { %2088 = vmatprep.subr.bf16.mxu1 %v3434_v38  ;;  %v2560_v38 = vld [vmem:[%s4330_s9] sm:$0x3] }
 0x95c   :  { %2089 = vmatpush1.bf16.msra.mxu1 %v3432_v21 }
 0x96b   :  { %2308 = vrot.lane.b32.xlu0 %v3988_v51, %s3514_s4  ;;  %v3437_v51 = vld [vmem:[%s4328_s8 + $0x94] ss:$8 sps:$4 sm:$0xff]  }
 0x96c   :  { %2090 = vmatprep.subr.bf16.mxu1 %v3437_v51 }
 0x96d   :  { %2091 = vmatpush1.bf16.msra.mxu1 %v3435_v39 }
 0x96e   :  { %2092 = vmatprep.subr.bf16.mxu1 %v3440_v40 }
 0x971   :  { %2093 = vmatpush1.bf16.msra.mxu1 %v3438_v41  ;;  %v2569_v41 = vrot.slane %v2560_v38, %v3804_v9 }
 0x972   :  { %2521 = vmatprep.subr.bf16.mxu1 %v3443_v42 }
 0x9da   :  { %v2299_v17 = vpop.xlane.xlu0 %2298 }
 0x9db   :  { %3497 = vrcp.f32 %v2299_v17 }
 0x9de   :  { %v2302_v43 = vpop.xlane.xlu0 %2301 }
 0x9df   :  { %3499 = vrcp.f32 %v2302_v43  ;;  %v2565_v43 = vrot.slane %v2560_v38, %v3799_v7 }
 0x9e2   :  { %v2309_v44 = vpop.permute.xlu0 %2308 }
 0x9e3   :  { %3241 = vmatpush3.msra.mxu0 %v2309_v44 }
 0x9e4   :  { %3245 = vmatprep.subr.mxu0 %v3511_v2 }
 0x9e8   :  { %v3498_v19 = vpop.eup %3497 }
 0x9e9   :  { %v2305_v45 = vmul.f32 %v3498_v19, %v3492_v29 }
 0x9eb   :  { %3243 = vmatmul.mubr.msk.f32.vlgmr.msra.gmra.mxu0 %vm1007_vm2, %v2305_v45 }
 0x9ec   :  { %v3500_v46 = vpop.eup %3499  ;;  %3246 = vmatpush3.msra.mxu0 %v2386_v25  ;;  %3247 = vmatprep.mubr.msk.f32.mxu0 %vm3512_vm0, %v3511_v2  ;;  %v3444_v2 = vld [vmem:[%s4328_s8 + $0xe0] ss:$8 sps:$4 sm:$0xff]  }
 0x9ed   :  { %v2306_v47 = vmul.f32 %v3500_v46, %v3494_v16 }
 0x9ef   :  { %3248 = vmatmul.mubr.msk.f32.vlgmr.msra.gmra.mxu0 %vm1007_vm2, %v2306_v47  ;;  %v3098_v47 = vld [vmem:[%s4331_s11] ss:$0 sm:$0xff] }
 0xa17   :  { %v1949_v48 = vpop.f32.mrf.mxu1 }
 0xa18   :  { %v2026_v50 = vpack.c.bf16 %v4152_v58, %v1949_v48  ;;  %v3453_v58 = vld [vmem:[%s4329_s10 + $0x78] sm:$0xff]  }
 0xa19   :  { %v3224_v53 = vpop.f32.mrf.mxu1  ;;  %3148 = vmatprep.subr.bf16.mxu0 %v3453_v58 }
 0xa1a   :  { %3082 = vmatmul.mubr.msk.bf16.vlgmr.msra.gmra.mxu1 %vm850_vm1, %v2026_v50  ;;  %3149 = vmatpush3.bf16.msra.mxu0 %v3454_v27 }
 0xa1b   :  { %2522 = vmatpush1.bf16.msra.mxu1 %v3441_v49  ;;  %2545 = vmatprep.mubr.bf16.mxu1 %v3515_v59  ;;  %v3452_v59 = vld [vmem:[%s4328_s8 + $0xc4] ss:$8 sps:$4 sm:$0xff]  }
 0xa1c   :  { %2523 = vmatprep.subr.bf16.mxu1 %v3446_v52  ;;  %3150 = vmatprep.subr.bf16.mxu0 %v3455_v60 }
 0xa1e   :  { %3151 = vmatpush3.bf16.msra.mxu0 %v3456_v61 }
 0xa1f   :  { %2524 = vmatpush1.bf16.msra.mxu1 %v3444_v2  ;;  %3152 = vmatprep.subr.bf16.mxu0 %v3457_v62 }
 0xa20   :  { %2525 = vmatprep.subr.bf16.mxu1 %v3449_v55 }
 0xa22   :  { %3153 = vmatpush3.bf16.msra.mxu0 %v3458_v63 }
 0xa23   :  { %2526 = vmatpush1.bf16.msra.mxu1 %v3447_v56  ;;  %3154 = vmatprep.subr.bf16.mxu0 %v3459_v5  ;;  %v3115_v56 = vld [vmem:[%s4332_s12] ss:$0 sm:$0xff] }
 0xa24   :  { %2527 = vmatprep.subr.bf16.mxu1 %v3452_v59 }
 0xa26   :  { %3155 = vmatpush3.bf16.msra.mxu0 %v3460_v14 }
 0xa27   :  { %2528 = vmatpush1.bf16.msra.mxu1 %v3450_v57  ;;  %3156 = vmatprep.subr.bf16.mxu0 %v3461_v15  ;;  %v2796_v15 = vand.u32 127, %v81_v3 }
 0xa2a   :  { %3157 = vmatpush3.bf16.msra.mxu0 %v3462_v1 }
 0xa2b   :  { %3158 = vmatprep.subr.bf16.mxu0 %v3463_v18 }
 0xa2e   :  { %3159 = vmatpush3.bf16.msra.mxu0 %v3464_v6 }
 0xa2f   :  { %3160 = vmatprep.subr.bf16.mxu0 %v3465_v23 }
 0xa32   :  { %3161 = vmatpush3.bf16.msra.mxu0 %v3466_v13 }
 0xa33   :  { %3162 = vmatprep.subr.bf16.mxu0 %v3467_v8 }
 0xa36   :  { %3163 = vmatpush3.bf16.msra.mxu0 %v3468_v30 }
 0xaab   :  { %v2380_v22 = vpop.f32.mrf.mxu0 }
 0xaad   :  { %v3244_v24 = vpop.f32.mrf.mxu0 }
 0xaaf   :  { %v2457_v26 = vpop.f32.mrf.mxu0 }
 0xab0   :  { %v2461_v28 = vpack.c.bf16 %v2457_v26, %v2380_v22  ;;  %v2799_v22 = vsub.s32 %v2796_v15, %v3793_v4 }
 0xab1   :  { %v3249_v0 = vpop.f32.mrf.mxu0 }
 0xab2   :  { %3097 = vmatmul.mubr.msk.bf16.vlgmr.msra.gmra.mxu1 %vm850_vm1, %v2461_v28 }
 0xada   :  { %v2112_v29 = vpop.f32.mrf.mxu1 }
 0xadb   :  { %v2121_v21 = vadd.f32 %v2112_v29, %v4125_v31 }
 0xadc   :  { %v2114_v32 = vpop.f32.mrf.mxu1 }
 0xadd   :  { %v2122_v37 = vadd.f32 %v2114_v32, %v4127_v33 }
 0xade   :  { %v2116_v16 = vpop.f32.mrf.mxu1 }
 0xadf   :  { %v2123_v12 = vadd.f32 %v2116_v16, %v4129_v20 }
 0xae0   :  { %v2118_v34 = vpop.f32.mrf.mxu1 }
 0xae1   :  { %v2124_v39 = vadd.f32 %v2118_v34, %v4131_v35 }
 0xb72   :  { %v2547_v36 = vpop.f32.mrf.mxu1 }
 0xb73   :  { %v2556_v17 = vadd.f32 %v2547_v36, %v2121_v21 }
 0xb74   :  { %v2549_v54 = vpop.f32.mrf.mxu1 }
 0xb75   :  { %v2557_v40 = vadd.f32 %v2549_v54, %v2122_v37  ;;  %v4287_v25 = vadd.f32 %v2565_v43, %v2556_v17 }
 0xb76   :  { %v2551_v51 = vpop.f32.mrf.mxu1 }
 0xb77   :  { %v2558_v42 = vadd.f32 %v2551_v51, %v2123_v12  ;;  %v4283_v20 = vadd.f32 %v2569_v41, %v2557_v40 }
 0xb78   :  { %v2553_v44 = vpop.f32.mrf.mxu1 }
 0xb79   :  { %v2559_v33 = vadd.f32 %v2553_v44, %v2124_v39  ;;  %v4281_v19 = vadd.f32 %v2565_v43, %v2558_v42 }
 0xb7b   :  { %v4285_v45 = vadd.f32 %v2569_v41, %v2559_v33  ;;  %v2576_v35 = vpack.c.bf16 %v4281_v19, %v4287_v25 }
 0xb7d   :  { %v2577_v31 = vpack.c.bf16 %v4285_v45, %v4283_v20 }
 0xb7f   :  { %2745 = vmatprep.mubr.bf16.mxu0 %v2577_v31 }
 0xb80   :  { %2746 = vmatmul.mubr.bf16.vlgmr.msra.gmra.mxu0 %v2576_v35 }
 0xc40   :  { %v3164_v46 = vpop.f32.mrf.mxu0 }
 0xc42   :  { %v3165_v48 = vpop.f32.mrf.mxu0 }
 0xc43   :  { %v3166_v49 = vadd.f32 %v3165_v48, %v3164_v46 }
 0xc44   :  { %v3167_v50 = vpop.f32.mrf.mxu0 }
 0xc45   :  { %v2748_v52 = vadd.f32 %v3166_v49, %v3098_v47 }
 0xc46   :  { %v3168_v53 = vpop.f32.mrf.mxu0 }
 0xc47   :  { %3501 = vtanh.f32 %v2748_v52  ;;  %v3169_v2 = vadd.f32 %v3168_v53, %v3167_v50 }
 0xc49   :  { %v2751_v55 = vadd.f32 %v3169_v2, %v3098_v47  ;;  %v3516_v47 = vmov 1983009808  }
 0xc4b   :  { %3503 = vtanh.f32 %v2751_v55 }
 0xc54   :  { %v3502_v57 = vpop.eup %3501 }
 0xc55   :  { %v2763_v59 = vmul.f32 %v3502_v57, %v3115_v56 }
 0xc57   :  { %2765 = vadd.xlane.f32.xlu0 %v2763_v59 }
 0xc58   :  { %v3504_v58 = vpop.eup %3503 }
 0xc59   :  { %v2764_v27 = vmul.f32 %v3504_v58, %v3115_v56 }
 0xc5b   :  { %2767 = vadd.xlane.f32.xlu1 %v2764_v27 }
 0xc6c   :  { %2781 = vbcast.lane.b32.xlu1 %v3813_v11, 256 }
 0xc6d   :  { %2774 = vbcast.lane.b32.xlu0 %v3808_v10, 256 }
 0xce0   :  { %v2766_v60 = vpop.xlane.xlu0 %2765 }
 0xce4   :  { %v2768_v61 = vpop.xlane.xlu1 %2767  ;;  %v2775_v62 = vpop.permute.xlu0 %2774 }
 0xce5   :  { %v2785_v63 = vadd.f32 %v2775_v62, %v2766_v60 }
 0xce7   :  { %2790 = vperm.xlu0 %3256, %v2785_v63  }
 0xce8   :  { %v2782_v5 = vpop.permute.xlu1 %2781 }
 0xce9   :  { %v2786_v14 = vadd.f32 %v2782_v5, %v2768_v61 }
 0xceb   :  { %2793 = vperm.xlu0 %3256, %v2786_v14  }
 0xd62   :  { %v2791_v1 = vpop.permute.xlu0 %2790 }
 0xd63   :  { %v2800_v26 = vrot.slane %v2791_v1, %v2799_v22 }
 0xd66   :  { %v2794_v24 = vpop.permute.xlu0 %2793 }
 0xd67   :  { %v2804_v28 = vrot.slane %v2794_v24, %v2799_v22 }
 0xd69   :  { %v2806_v10 = vsel %vm2805_vm3, %v2804_v28, %v2800_v26 }
 0xd6a   :  { %v2809_v11 = vsel %vm2808_vm4, %v2806_v10, -inf }
 0xd6b   :  { %2810 = vmax.xlane.f32.xlu0 %v2809_v11 }
 0xdf4   :  { %v2811_v0 = vpop.xlane.xlu0 %2810 }
 0xdf5   :  { %v2816_v18 = vrot.slane %v2811_v0, %v3799_v7  ;;  %v2820_v6 = vrot.slane %v2811_v0, %v3804_v9 }
 0xdf7   :  { %v2823_v23 = vsub.f32 %v2785_v63, %v2816_v18  ;;  %v2824_v3 = vsub.f32 %v2786_v14, %v2820_v6 }
 0xdf9   :  { %v2825_v13 = vmul.f32 1.442695, %v2823_v23  ;;  %v2827_v8 = vmul.f32 1.442695, %v2824_v3 }
 0xdfb   :  { %3505 = vpow2.f32 %v2825_v13 }
 0xdfc   :  { %3507 = vpow2.f32 %v2827_v8 }
 0xe08   :  { %v3506_v30 = vpop.eup %3505 }
 0xe09   :  { %2832 = vperm.xlu1 %3257, %v3506_v30   ;;  %v3508_v29 = vpop.eup %3507 }
 0xe0d   :  { %2835 = vperm.xlu1 %3257, %v3508_v29  }
 0xe84   :  { %v2833_v32 = vpop.permute.xlu1 %2832 }
 0xe85   :  { %v2840_v34 = vrot.slane %v2833_v32, %v2799_v22 }
 0xe88   :  { %v2836_v16 = vpop.permute.xlu1 %2835 }
 0xe89   :  { %v2844_v36 = vrot.slane %v2836_v16, %v2799_v22 }
 0xe8b   :  { %v2845_v54 = vsel %vm2805_vm3, %v2844_v36, %v2840_v34 }
 0xe8c   :  { %v2847_v37 = vsel %vm2808_vm4, %v2845_v54, 0.0 }
 0xe8d   :  { %2848 = vadd.xlane.f32.xlu1 %v2847_v37 }
 0xf16   :  { %v2849_v12 = vpop.xlane.xlu1 %2848 }
 0xf17   :  { %3509 = vrcp.f32 %v2849_v12 }
 0xf24   :  { %v3510_v38 = vpop.eup %3509 }
 0xf25   :  { %v2859_v21 = vrot.slane %v3510_v38, %v3804_v9  ;;  %v2855_v51 = vrot.slane %v3510_v38, %v3799_v7  ;;  %v2908_v7 = vunpack.c.l.s4 %v3516_v47 }
 0xf27   :  { %v2863_v39 = vmul.f32 %v3508_v29, %v2859_v21  ;;  %v2862_v40 = vmul.f32 %v3506_v30, %v2855_v51  ;;  %v2909_v56 = vunpack.c.0.s8 %v2908_v7 }
 0xf29   :  { %2871 = vperm.xlu0 %3256, %v2863_v39   ;;  %2866 = vperm.xlu1 %3257, %v2862_v40   ;;  %v2912_v61 = vsub.s32 %v2909_v56, %v3793_v4 }
 0xfa4   :  { %v2872_v41 = vpop.permute.xlu0 %2871  ;;  %v2867_v42 = vpop.permute.xlu1 %2866 }
 0xfa5   :  { %v2876_v17 = vmul.f32 %v2872_v41, %v4281_v19  ;;  %v2877_v43 = vmul.f32 %v2872_v41, %v4285_v45  ;;  %v2874_v44 = vmul.f32 %v2867_v42, %v4287_v25  ;;  %v2875_v33 = vmul.f32 %v2867_v42, %v4283_v20 }
 0xfa7   :  { %v2890_v31 = vrot.slane %v2876_v17, 4  ;;  %v2896_v35 = vrot.slane %v2877_v43, 4  ;;  %v2878_v46 = vrot.slane %v2874_v44, 4  ;;  %v2884_v9 = vrot.slane %v2875_v33, 4 }
 0xfa9   :  { %v2891_v48 = vadd.f32 %v2890_v31, %v2876_v17  ;;  %v2897_v49 = vadd.f32 %v2896_v35, %v2877_v43  ;;  %v2879_v50 = vadd.f32 %v2878_v46, %v2874_v44  ;;  %v2885_v52 = vadd.f32 %v2884_v9, %v2875_v33 }
 0xfab   :  { %v2892_v53 = vrot.slane %v2891_v48, 2  ;;  %v2898_v2 = vrot.slane %v2897_v49, 2  ;;  %v2880_v55 = vrot.slane %v2879_v50, 2  ;;  %v2886_v19 = vrot.slane %v2885_v52, 2 }
 0xfad   :  { %v2893_v45 = vadd.f32 %v2892_v53, %v2891_v48  ;;  %v2899_v57 = vadd.f32 %v2898_v2, %v2897_v49  ;;  %v2881_v25 = vadd.f32 %v2880_v55, %v2879_v50  ;;  %v2887_v59 = vadd.f32 %v2886_v19, %v2885_v52 }
 0xfaf   :  { %v2894_v20 = vrot.slane %v2893_v45, 1  ;;  %v2900_v58 = vrot.slane %v2899_v57, 1  ;;  %v2882_v27 = vrot.slane %v2881_v25, 1  ;;  %v2888_v60 = vrot.slane %v2887_v59, 1 }
 0xfb1   :  { %v2895_v62 = vadd.f32 %v2894_v20, %v2893_v45  ;;  %v2901_v63 = vadd.f32 %v2900_v58, %v2899_v57  ;;  %v2883_v5 = vadd.f32 %v2882_v27, %v2881_v25  ;;  %v2889_v14 = vadd.f32 %v2888_v60, %v2887_v59 }
 0xfb3   :  { %v2914_v15 = vcombine.low %v2895_v62, %v2901_v63  ;;  %v2906_v1 = vcombine.low %v2883_v5, %v2889_v14 }
 0xfb5   :  { %v2921_v22 = vrot.slane %v2914_v15, %v2912_v61  ;;  %v2913_v26 = vrot.slane %v2906_v1, %v2912_v61 }
 0xfb7   :  { %v2926_v24 = vrot.slane %v2921_v22, 7 }
 0xfb9   :  { %v2927_v28 = vsel %vm2805_vm3, %v2926_v24, %v2913_v26 }
 0xfba   :  { %v2929_v10 = vsel %vm2928_vm5, %v2926_v24, %v2927_v28 }
 0xfbb   :  { %v2931_v11 = vsel %vm2930_vm6, %v2926_v24, %v2929_v10 }
 0xfbc   :  { %v2933_v0 = vsel %vm2932_vm7, %v2926_v24, %v2931_v11 }
 0xfbd   :  { %2935 = vst [vmem:[%s4333_s13] sm:$0xf] %v2933_v0 }

// kernel: nrms_forward.4
= control target key start
LH: loop header
LB: loop body
LE: loop exit
PB: predicated region body
PF: predicated region fallthrough
CT: control target
= control target key end

     0   :  { %v9876_v1 = vmov 0   ;;  %v9882_v53 = vmov 0.0   ;;  %vm8190_vm0 = vmmov 0   ;;  %v9875_v54 = vlaneseq  ;;  %s9862_s2 = inlined_call_operand.vmem [shape: bf16[128,256], index: 2, kind: input, shape index: {}]   ;;  %s9863_s1 = inlined_call_operand.vmem [shape: bf16[128,256], index: 1, kind: input, shape index: {}]   ;;  %s9864_s0 = inlined_call_operand.vmem [shape: bf16[64,128], index: 0, kind: input, shape index: {}]   ;;  %s9865_s3 = inlined_call_operand.vmem [shape: bf16[128,256], index: 3, kind: input, shape index: {}]   ;;  %s9866_s5 = inlined_call_operand.vmem [shape: f32[1,256], index: 5, kind: input, shape index: {}]   ;;  %s9867_s4 = inlined_call_operand.vmem [shape: f32[1,256], index: 4, kind: input, shape index: {}]   ;;  %s9868_s6 = inlined_call_operand.vmem [shape: f32[1,256], index: 6, kind: input, shape index: {}]   ;;  %s9869_s7 = inlined_call_operand.vmem [shape: bf16[256,256], index: 7, kind: input, shape index: {}]   ;;  %s9870_s9 = inlined_call_operand.vmem [shape: bf16[256,128], index: 9, kind: input, shape index: {}]   ;;  %s9871_s8 = inlined_call_operand.vmem [shape: f32[1,256], index: 8, kind: input, shape index: {}]   ;;  %s9872_s10 = inlined_call_operand.vmem [shape: f32[1,128], index: 10, kind: input, shape index: {}]   ;;  %s9873_s11 = inlined_call_operand.vmem [shape: f32[1,128], index: 11, kind: input, shape index: {}]   ;;  %s9874_s12 = inlined_call_operand.vmem [shape: f32[8,256], index: 12, kind: output, shape index: {}]  }
   0x1   :  { %v7886_v0 = vld [vmem:[%s9862_s2 + $0x74] ss:$8 sps:$4 sm:$0xff]   ;;  %395 = vmatprep.mubr.bf16.mxu1 %v9876_v1  ;;  %214 = vmatprep.mubr.bf16.mxu0 %v9876_v1  ;;  %v7890_v3 = vld [vmem:[%s9862_s2 + $0x70] ss:$8 sps:$4 sm:$0xff]   ;;  %v7892_v5 = vld [vmem:[%s9862_s2 + $0x64] ss:$8 sps:$4 sm:$0xff]  }
   0x2   :  { %v7888_v2 = vld [vmem:[%s9863_s1 + $0x74] ss:$8 sps:$4 sm:$0xff]   ;;  %7885 = vset.pattern.permute.xlu0 %v9876_v1  ;;  %7884 = vset.pattern.permute.xlu1 %v9876_v1  ;;  %v7891_v4 = vld [vmem:[%s9863_s1 + $0x70] ss:$8 sps:$4 sm:$0xff]   ;;  %v7894_v6 = vld [vmem:[%s9863_s1 + $0x64] ss:$8 sps:$4 sm:$0xff]  }
   0x3   :  { %363 = vmatprep.subr.bf16.mxu1 %v7886_v0  ;;  %182 = vmatprep.subr.bf16.mxu0 %v7888_v2  ;;  %v7896_v7 = vld [vmem:[%s9862_s2 + $0x60] ss:$8 sps:$4 sm:$0xff]   ;;  %v7898_v9 = vld [vmem:[%s9862_s2 + $0x54] ss:$8 sps:$4 sm:$0xff]   ;;  %v7902_v11 = vld [vmem:[%s9862_s2 + $0x50] ss:$8 sps:$4 sm:$0xff]  }
   0x4   :  { %364 = vmatpush1.bf16.msra.mxu1 %v7890_v3  ;;  %183 = vmatpush1.bf16.msra.mxu0 %v7891_v4  ;;  %v7897_v8 = vld [vmem:[%s9863_s1 + $0x60] ss:$8 sps:$4 sm:$0xff]   ;;  %v7900_v10 = vld [vmem:[%s9863_s1 + $0x54] ss:$8 sps:$4 sm:$0xff]   ;;  %v7903_v12 = vld [vmem:[%s9863_s1 + $0x50] ss:$8 sps:$4 sm:$0xff]  }
   0x5   :  { %365 = vmatprep.subr.bf16.mxu1 %v7892_v5  ;;  %184 = vmatprep.subr.bf16.mxu0 %v7894_v6  ;;  %v7904_v13 = vld [vmem:[%s9862_s2 + $0x44] ss:$8 sps:$4 sm:$0xff]   ;;  %v7908_v15 = vld [vmem:[%s9862_s2 + $0x40] ss:$8 sps:$4 sm:$0xff]   ;;  %v7910_v17 = vld [vmem:[%s9862_s2 + $0x34] ss:$8 sps:$4 sm:$0xff]  }
   0x6   :  { %v7906_v14 = vld [vmem:[%s9863_s1 + $0x44] ss:$8 sps:$4 sm:$0xff]   ;;  %v7909_v16 = vld [vmem:[%s9863_s1 + $0x40] ss:$8 sps:$4 sm:$0xff]   ;;  %v7912_v18 = vld [vmem:[%s9863_s1 + $0x34] ss:$8 sps:$4 sm:$0xff]  }
   0x7   :  { %v7914_v19 = vld [vmem:[%s9862_s2 + $0x30] ss:$8 sps:$4 sm:$0xff]   ;;  %v7916_v21 = vld [vmem:[%s9862_s2 + $0x24] ss:$8 sps:$4 sm:$0xff]   ;;  %v7920_v23 = vld [vmem:[%s9862_s2 + $0x20] ss:$8 sps:$4 sm:$0xff]  }
   0x8   :  { %366 = vmatpush1.bf16.msra.mxu1 %v7896_v7  ;;  %185 = vmatpush1.bf16.msra.mxu0 %v7897_v8  ;;  %v7915_v20 = vld [vmem:[%s9863_s1 + $0x30] ss:$8 sps:$4 sm:$0xff]   ;;  %v7918_v22 = vld [vmem:[%s9863_s1 + $0x24] ss:$8 sps:$4 sm:$0xff]   ;;  %v7921_v24 = vld [vmem:[%s9863_s1 + $0x20] ss:$8 sps:$4 sm:$0xff]  }
   0x9   :  { %367 = vmatprep.subr.bf16.mxu1 %v7898_v9  ;;  %186 = vmatprep.subr.bf16.mxu0 %v7900_v10  ;;  %v7922_v25 = vld [vmem:[%s9862_s2 + $0x14] ss:$8 sps:$4 sm:$0xff]   ;;  %v7926_v27 = vld [vmem:[%s9862_s2 + $0x10] ss:$8 sps:$4 sm:$0xff]   ;;  %v7928_v29 = vld [vmem:[%s9862_s2 + $0x4] ss:$8 sps:$4 sm:$0xff]  }
   0xa   :  { %v7924_v26 = vld [vmem:[%s9863_s1 + $0x14] ss:$8 sps:$4 sm:$0xff]   ;;  %v7927_v28 = vld [vmem:[%s9863_s1 + $0x10] ss:$8 sps:$4 sm:$0xff]   ;;  %v7930_v30 = vld [vmem:[%s9863_s1 + $0x4] ss:$8 sps:$4 sm:$0xff]  }
   0xb   :  { %v7932_v31 = vld [vmem:[%s9862_s2] ss:$8 sps:$4 sm:$0xff]   ;;  %v7940_v33 = vld [vmem:[%s9865_s3 + $0x74] ss:$8 sps:$4 sm:$0xff]   ;;  %v7938_v35 = vld [vmem:[%s9865_s3 + $0x70] ss:$8 sps:$4 sm:$0xff]  }
   0xc   :  { %368 = vmatpush1.bf16.msra.mxu1 %v7902_v11  ;;  %187 = vmatpush1.bf16.msra.mxu0 %v7903_v12  ;;  %v7933_v32 = vld [vmem:[%s9863_s1] ss:$8 sps:$4 sm:$0xff]   ;;  %v7943_v36 = vld [vmem:[%s9865_s3 + $0x64] ss:$8 sps:$4 sm:$0xff]   ;;  %v7946_v38 = vld [vmem:[%s9865_s3 + $0x54] ss:$8 sps:$4 sm:$0xff]  }
   0xd   :  { %369 = vmatprep.subr.bf16.mxu1 %v7904_v13  ;;  %188 = vmatprep.subr.bf16.mxu0 %v7906_v14  ;;  %v8363_v34 = vld [vmem:[%s9864_s0] sm:$0xff]   ;;  %v7935_v39 = vld [vmem:[%s9864_s0 + $0x8] sm:$0xff]   ;;  %v7944_v40 = vld [vmem:[%s9865_s3 + $0x50] ss:$8 sps:$4 sm:$0xff]   ;;  %v8439_v55 = vshrl.u32 %v9875_v54, 7  ;;  %vm617_vm1 = vcmask 523264  }
   0xe   :  { %v7941_v37 = vld [vmem:[%s9865_s3 + $0x60] ss:$8 sps:$4 sm:$0xff]   ;;  %v7949_v41 = vld [vmem:[%s9865_s3 + $0x44] ss:$8 sps:$4 sm:$0xff]   ;;  %v7952_v43 = vld [vmem:[%s9865_s3 + $0x34] ss:$8 sps:$4 sm:$0xff]  }
   0xf   :  { %v7947_v42 = vld [vmem:[%s9865_s3 + $0x40] ss:$8 sps:$4 sm:$0xff]   ;;  %v7936_v44 = vld [vmem:[%s9864_s0 + $0x10] sm:$0xff]   ;;  %v7955_v46 = vld [vmem:[%s9865_s3 + $0x24] ss:$8 sps:$4 sm:$0xff]   ;;  %9887 = vst [vmem:[#allocation2_spill] sm:$0xff] %v8439_v55 }
  0x10   :  { %370 = vmatpush1.bf16.msra.mxu1 %v7908_v15  ;;  %189 = vmatpush1.bf16.msra.mxu0 %v7909_v16  ;;  %v7950_v45 = vld [vmem:[%s9865_s3 + $0x30] ss:$8 sps:$4 sm:$0xff]   ;;  %v7953_v47 = vld [vmem:[%s9865_s3 + $0x20] ss:$8 sps:$4 sm:$0xff]   ;;  %v7958_v48 = vld [vmem:[%s9865_s3 + $0x14] ss:$8 sps:$4 sm:$0xff]  }
  0x11   :  { %371 = vmatprep.subr.bf16.mxu1 %v7910_v17  ;;  %190 = vmatprep.subr.bf16.mxu0 %v7912_v18  ;;  %v7937_v49 = vld [vmem:[%s9864_s0 + $0x18] sm:$0xff]   ;;  %v7961_v51 = vld [vmem:[%s9865_s3 + $0x4] ss:$8 sps:$4 sm:$0xff]   ;;  %v7959_v52 = vld [vmem:[%s9865_s3] ss:$8 sps:$4 sm:$0xff]   ;;  %v8442_v56 = vsub.s32 0, %v8439_v55 }
  0x12   :  { %v7956_v50 = vld [vmem:[%s9865_s3 + $0x10] ss:$8 sps:$4 sm:$0xff]   ;;  %v271_v57 = vld [vmem:[%s9866_s5] sm:$0x3]  ;;  %v8460_v0 = vsub.s32 1, %v8439_v55  ;;  %vm1234_vm2 = vcmask 64512  }
  0x13   :  { %9888 = vst [vmem:[#allocation3_spill] sm:$0xff] %v8442_v56  ;;  %v66_v58 = vld [vmem:[%s9867_s4] sm:$0x3]  ;;  %v8451_v59 = vrot.slane %v271_v57, %v8442_v56  ;;  %vm6764_vm3 = vcmask 1041409   ;;  %vm6766_vm4 = vcmask 1042434   ;;  %vm6768_vm5 = vcmask 1043459  }
  0x14   :  { %372 = vmatpush1.bf16.msra.mxu1 %v7914_v19  ;;  %191 = vmatpush1.bf16.msra.mxu0 %v7915_v20  ;;  %v8454_v60 = vrot.slane %v66_v58, %v8442_v56  ;;  %9889 = vst [vmem:[#allocation4_spill] sm:$0xff] %v8460_v0  ;;  %v8473_v7 = vrot.slane %v66_v58, %v8460_v0  ;;  %vm6770_vm6 = vcmask 1044484   ;;  %vm6772_vm7 = vcmask 1045509  }
  0x15   :  { %373 = vmatprep.subr.bf16.mxu1 %v7916_v21  ;;  %192 = vmatprep.subr.bf16.mxu0 %v7918_v22  ;;  %v8511_v21 = vrot.slane %v271_v57, %v8460_v0  ;;  %vm6774_vm8 = vcmask 1046534   ;;  %vm6776_vm9 = vcmask 1047559  }
  0x18   :  { %374 = vmatpush1.bf16.msra.mxu1 %v7920_v23  ;;  %193 = vmatpush1.bf16.msra.mxu0 %v7921_v24 }
  0x19   :  { %375 = vmatprep.subr.bf16.mxu1 %v7922_v25  ;;  %194 = vmatprep.subr.bf16.mxu0 %v7924_v26 }
  0x1c   :  { %376 = vmatpush1.bf16.msra.mxu1 %v7926_v27  ;;  %195 = vmatpush1.bf16.msra.mxu0 %v7927_v28 }
  0x1d   :  { %377 = vmatprep.subr.bf16.mxu1 %v7928_v29  ;;  %196 = vmatprep.subr.bf16.mxu0 %v7930_v30 }
  0x20   :  { %378 = vmatpush1.bf16.msra.mxu1 %v7932_v31  ;;  %197 = vmatpush1.bf16.msra.mxu0 %v7933_v32 }
  0x21   :  { %7864 = vmatprep.subr.bf16.mxu1 %v7940_v33  ;;  %544 = vmatprep.subr.bf16.mxu0 %v7940_v33 }
  0x23   :  { %396 = vmatmul.mubr.bf16.vlgmr.msra.gmra.mxu1 %v8363_v34  ;;  %215 = vmatmul.mubr.bf16.vlgmr.msra.gmra.mxu0 %v8363_v34 }
  0x24   :  { %405 = vmatprep.mubr.bf16.mxu1 %v9876_v1  ;;  %224 = vmatprep.mubr.bf16.mxu0 %v9876_v1 }
  0x25   :  { %7872 = vmatpush1.bf16.msra.mxu1 %v7938_v35  ;;  %545 = vmatpush1.bf16.msra.mxu0 %v7938_v35 }
  0x26   :  { %7865 = vmatprep.subr.bf16.mxu1 %v7943_v36  ;;  %546 = vmatprep.subr.bf16.mxu0 %v7943_v36 }
  0x29   :  { %7873 = vmatpush1.bf16.msra.mxu1 %v7941_v37  ;;  %547 = vmatpush1.bf16.msra.mxu0 %v7941_v37 }
  0x2a   :  { %7866 = vmatprep.subr.bf16.mxu1 %v7946_v38  ;;  %548 = vmatprep.subr.bf16.mxu0 %v7946_v38 }
  0x2b   :  { %406 = vmatmul.mubr.bf16.gmra.mxu1 %v7935_v39  ;;  %225 = vmatmul.mubr.bf16.gmra.mxu0 %v7935_v39 }
  0x2c   :  { %415 = vmatprep.mubr.bf16.mxu1 %v9876_v1  ;;  %234 = vmatprep.mubr.bf16.mxu0 %v9876_v1 }
  0x2d   :  { %7874 = vmatpush1.bf16.msra.mxu1 %v7944_v40  ;;  %549 = vmatpush1.bf16.msra.mxu0 %v7944_v40 }
  0x2e   :  { %7867 = vmatprep.subr.bf16.mxu1 %v7949_v41  ;;  %550 = vmatprep.subr.bf16.mxu0 %v7949_v41 }
  0x31   :  { %7875 = vmatpush1.bf16.msra.mxu1 %v7947_v42  ;;  %551 = vmatpush1.bf16.msra.mxu0 %v7947_v42 }
  0x32   :  { %7868 = vmatprep.subr.bf16.mxu1 %v7952_v43  ;;  %552 = vmatprep.subr.bf16.mxu0 %v7952_v43 }
  0x33   :  { %416 = vmatmul.mubr.bf16.gmra.mxu1 %v7936_v44  ;;  %235 = vmatmul.mubr.bf16.gmra.mxu0 %v7936_v44 }
  0x34   :  { %425 = vmatprep.mubr.bf16.mxu1 %v9876_v1  ;;  %244 = vmatprep.mubr.bf16.mxu0 %v9876_v1 }
  0x35   :  { %7876 = vmatpush1.bf16.msra.mxu1 %v7950_v45  ;;  %553 = vmatpush1.bf16.msra.mxu0 %v7950_v45 }
  0x36   :  { %7869 = vmatprep.subr.bf16.mxu1 %v7955_v46  ;;  %554 = vmatprep.subr.bf16.mxu0 %v7955_v46 }
  0x39   :  { %7877 = vmatpush1.bf16.msra.mxu1 %v7953_v47  ;;  %555 = vmatpush1.bf16.msra.mxu0 %v7953_v47 }
  0x3a   :  { %7870 = vmatprep.subr.bf16.mxu1 %v7958_v48  ;;  %556 = vmatprep.subr.bf16.mxu0 %v7958_v48 }
  0x3b   :  { %426 = vmatmul.mubr.bf16.gmra.mxu1 %v7937_v49  ;;  %245 = vmatmul.mubr.bf16.gmra.mxu0 %v7937_v49 }
  0x3c   :  { %606 = vmatprep.mubr.bf16.mxu1 %v9876_v1  ;;  %576 = vmatprep.mubr.bf16.mxu0 %v9876_v1 }
  0x3d   :  { %7878 = vmatpush1.bf16.msra.mxu1 %v7956_v50  ;;  %557 = vmatpush1.bf16.msra.mxu0 %v7956_v50 }
  0x3e   :  { %7871 = vmatprep.subr.bf16.mxu1 %v7961_v51  ;;  %558 = vmatprep.subr.bf16.mxu0 %v7961_v51 }
  0x41   :  { %7879 = vmatpush1.bf16.msra.mxu1 %v7959_v52  ;;  %559 = vmatpush1.bf16.msra.mxu0 %v7959_v52 }
  0x42   :  { %7544 = vmatprep.subr.mxu1 %v9882_v53  ;;  %7584 = vmatprep.subr.mxu0 %v9882_v53 }
  0x44   :  { %607 = vmatmul.mubr.bf16.vlgmr.msra.gmra.mxu1 %v7937_v49  ;;  %577 = vmatmul.mubr.bf16.vlgmr.msra.gmra.mxu0 %v8363_v34 }
  0x45   :  { %586 = vmatprep.mubr.bf16.mxu0 %v9876_v1  ;;  %7546 = vmatprep.mubr.msk.f32.mxu1 %vm8190_vm0, %v9882_v53 }
  0x4c   :  { %587 = vmatmul.mubr.bf16.gmra.mxu0 %v7935_v39 }
  0x4d   :  { %596 = vmatprep.mubr.bf16.mxu0 %v9876_v1 }
  0x54   :  { %597 = vmatmul.mubr.bf16.gmra.mxu0 %v7936_v44 }
  0x55   :  { %7586 = vmatprep.mubr.msk.f32.mxu0 %vm8190_vm0, %v9882_v53 }
  0xe3   :  { %v397_v61 = vpop.f32.mrf.mxu1  ;;  %v216_v62 = vpop.f32.mrf.mxu0 }
  0xe4   :  { %v8457_v63 = vadd.f32 %v397_v61, %v8451_v59  ;;  %v8463_v2 = vadd.f32 %v216_v62, %v8454_v60 }
  0xe5   :  { %v8465_v3 = vpop.f32.mrf.mxu1  ;;  %v8467_v4 = vpop.f32.mrf.mxu0 }
  0xe6   :  { %7545 = vmatpush3.xpose.msk.msra.mxu1 %vm617_vm1, %v8457_v63 }
  0xe7   :  { %v401_v5 = vpop.f32.mrf.mxu1  ;;  %v220_v6 = vpop.f32.mrf.mxu0  ;;  %7549 = vmatprep.subr.mxu1 %v9882_v53 }
  0xe8   :  { %v8476_v8 = vadd.f32 %v401_v5, %v8451_v59  ;;  %v8490_v12 = vadd.f32 %v220_v6, %v8454_v60 }
  0xe9   :  { %v8478_v9 = vpop.f32.mrf.mxu1  ;;  %7547 = vmatmul.mubr.msk.f32.vlgmr.msra.gmra.mxu1 %vm617_vm1, %v8463_v2  ;;  %v222_v10 = vpop.f32.mrf.mxu0 }
  0xea   :  { %v8483_v11 = vadd.f32 %v222_v10, %v8473_v7  ;;  %7550 = vmatpush3.xpose.msk.msra.mxu1 %vm617_vm1, %v8476_v8  ;;  %7551 = vmatprep.mubr.msk.f32.mxu1 %vm8190_vm0, %v9882_v53 }
  0xeb   :  { %v407_v13 = vpop.f32.mrf.mxu1  ;;  %v226_v14 = vpop.f32.mrf.mxu0  ;;  %7554 = vmatprep.subr.mxu1 %v9882_v53 }
  0xec   :  { %v8494_v15 = vadd.f32 %v407_v13, %v8451_v59  ;;  %v8497_v16 = vadd.f32 %v226_v14, %v8454_v60 }
  0xed   :  { %v8499_v17 = vpop.f32.mrf.mxu1  ;;  %7552 = vmatmul.mubr.msk.f32.vlgmr.msra.gmra.mxu1 %vm617_vm1, %v8490_v12  ;;  %v8503_v18 = vpop.f32.mrf.mxu0 }
  0xee   :  { %7555 = vmatpush3.xpose.msk.msra.mxu1 %vm617_vm1, %v8494_v15  ;;  %7556 = vmatprep.mubr.msk.f32.mxu1 %vm8190_vm0, %v9882_v53 }
  0xef   :  { %v411_v19 = vpop.f32.mrf.mxu1  ;;  %v230_v20 = vpop.f32.mrf.mxu0  ;;  %7559 = vmatprep.subr.mxu1 %v9882_v53 }
  0xf0   :  { %v8514_v22 = vadd.f32 %v411_v19, %v8451_v59  ;;  %v8529_v27 = vadd.f32 %v230_v20, %v8454_v60 }
  0xf1   :  { %v413_v23 = vpop.f32.mrf.mxu1  ;;  %7557 = vmatmul.mubr.msk.f32.vlgmr.msra.gmra.mxu1 %vm617_vm1, %v8497_v16  ;;  %v232_v24 = vpop.f32.mrf.mxu0 }
  0xf2   :  { %v8519_v25 = vadd.f32 %v413_v23, %v8511_v21  ;;  %v8522_v26 = vadd.f32 %v232_v24, %v8473_v7  ;;  %7560 = vmatpush3.xpose.msk.msra.mxu1 %vm617_vm1, %v8514_v22  ;;  %7561 = vmatprep.mubr.msk.f32.mxu1 %vm8190_vm0, %v9882_v53 }
  0xf3   :  { %v417_v28 = vpop.f32.mrf.mxu1  ;;  %v236_v29 = vpop.f32.mrf.mxu0  ;;  %7564 = vmatprep.subr.mxu1 %v9882_v53 }
  0xf4   :  { %v8533_v30 = vadd.f32 %v417_v28, %v8451_v59  ;;  %v8536_v31 = vadd.f32 %v236_v29, %v8454_v60 }
  0xf5   :  { %v8538_v32 = vpop.f32.mrf.mxu1  ;;  %7562 = vmatmul.mubr.msk.f32.vlgmr.msra.gmra.mxu1 %vm617_vm1, %v8529_v27  ;;  %v8542_v33 = vpop.f32.mrf.mxu0 }
  0xf6   :  { %7565 = vmatpush3.xpose.msk.msra.mxu1 %vm617_vm1, %v8533_v30  ;;  %7566 = vmatprep.mubr.msk.f32.mxu1 %vm8190_vm0, %v9882_v53 }
  0xf7   :  { %v421_v34 = vpop.f32.mrf.mxu1  ;;  %v240_v35 = vpop.f32.mrf.mxu0  ;;  %7569 = vmatprep.subr.mxu1 %v9882_v53 }
  0xf8   :  { %v8550_v36 = vadd.f32 %v421_v34, %v8451_v59  ;;  %v8565_v41 = vadd.f32 %v240_v35, %v8454_v60 }
  0xf9   :  { %v423_v37 = vpop.f32.mrf.mxu1  ;;  %7567 = vmatmul.mubr.msk.f32.vlgmr.msra.gmra.mxu1 %vm617_vm1, %v8536_v31  ;;  %v242_v38 = vpop.f32.mrf.mxu0 }
  0xfa   :  { %v8555_v39 = vadd.f32 %v423_v37, %v8511_v21  ;;  %v8558_v40 = vadd.f32 %v242_v38, %v8473_v7  ;;  %7570 = vmatpush3.xpose.msk.msra.mxu1 %vm617_vm1, %v8550_v36  ;;  %7571 = vmatprep.mubr.msk.f32.mxu1 %vm8190_vm0, %v9882_v53 }
  0xfb   :  { %v427_v42 = vpop.f32.mrf.mxu1  ;;  %v246_v43 = vpop.f32.mrf.mxu0  ;;  %7574 = vmatprep.subr.mxu1 %v9882_v53 }
  0xfc   :  { %v8569_v44 = vadd.f32 %v427_v42, %v8451_v59  ;;  %v8572_v45 = vadd.f32 %v246_v43, %v8454_v60 }
  0xfd   :  { %v8574_v46 = vpop.f32.mrf.mxu1  ;;  %7572 = vmatmul.mubr.msk.f32.vlgmr.msra.gmra.mxu1 %vm617_vm1, %v8565_v41  ;;  %v248_v47 = vpop.f32.mrf.mxu0 }
  0xfe   :  { %v8579_v48 = vadd.f32 %v248_v47, %v8473_v7  ;;  %7575 = vmatpush3.xpose.msk.msra.mxu1 %vm617_vm1, %v8569_v44  ;;  %7576 = vmatprep.mubr.msk.f32.mxu1 %vm8190_vm0, %v9882_v53 }
  0xff   :  { %v431_v49 = vpop.f32.mrf.mxu1  ;;  %7579 = vmatprep.subr.mxu1 %v9882_v53  ;;  %v250_v51 = vpop.f32.mrf.mxu0 }
 0x100   :  { %9890 = vst [vmem:[#allocation5_spill] sm:$0xff] %v8579_v48  ;;  %v8587_v50 = vadd.f32 %v431_v49, %v8451_v59  ;;  %v8599_v58 = vadd.f32 %v250_v51, %v8454_v60 }
 0x101   :  { %v433_v52 = vpop.f32.mrf.mxu1  ;;  %7577 = vmatmul.mubr.msk.f32.vlgmr.msra.gmra.mxu1 %vm617_vm1, %v8572_v45 }
 0x102   :  { %v8592_v57 = vadd.f32 %v433_v52, %v8511_v21  ;;  %7580 = vmatpush3.xpose.msk.msra.mxu1 %vm617_vm1, %v8587_v50  ;;  %7581 = vmatprep.mubr.msk.f32.mxu1 %vm8190_vm0, %v9882_v53 }
 0x103   :  { %7589 = vmatprep.subr.mxu1 %v9882_v53 }
 0x104   :  { %v8606_v59 = vpop.f32.mrf.mxu1 }
 0x105   :  { %7582 = vmatmul.mubr.msk.f32.vlgmr.msra.gmra.mxu1 %vm617_vm1, %v8599_v58 }
 0x106   :  { %7591 = vmatprep.mubr.msk.f32.mxu1 %vm8190_vm0, %v9882_v53  ;;  %v8608_v61 = vpop.f32.mrf.mxu1 }
 0x107   :  { %9891 = vst [vmem:[#allocation6_spill] sm:$0xff] %v8608_v61 }
 0x108   :  { %v8610_v62 = vpop.f32.mrf.mxu1 }
 0x10a   :  { %v8612_v5 = vpop.f32.mrf.mxu1 }
 0x10b   :  { %9892 = vst [vmem:[#allocation7_spill] sm:$0xff] %v8612_v5 }
 0x1a9   :  { %v690_v6 = vpop.f32.mrf.mxu1 }
 0x1aa   :  { %v1226_v19 = vmul.f32 0.125, %v690_v6 }
 0x1ab   :  { %v7548_v10 = vpop.f32.mrf.mxu1 }
 0x1ac   :  { %v1235_v28 = vsel %vm1234_vm2, %v1226_v19, -inf }
 0x1ad   :  { %v766_v60 = vpop.f32.mrf.mxu1 }
 0x1ae   :  { %v1227_v13 = vmul.f32 0.125, %v766_v60 }
 0x1af   :  { %v7553_v14 = vpop.f32.mrf.mxu1 }
 0x1b0   :  { %v1238_v20 = vsel %vm1234_vm2, %v1227_v13, -inf }
 0x1b1   :  { %1239 = vmax.xlane.f32.xlu0 %v1238_v20  ;;  %v842_v23 = vpop.f32.mrf.mxu1 }
 0x1b2   :  { %v1228_v37 = vmul.f32 0.125, %v842_v23 }
 0x1b3   :  { %v7558_v24 = vpop.f32.mrf.mxu1 }
 0x1b4   :  { %v1241_v49 = vsel %vm1234_vm2, %v1228_v37, -inf }
 0x1b5   :  { %1236 = vmax.xlane.f32.xlu0 %v1235_v28  ;;  %v918_v29 = vpop.f32.mrf.mxu1 }
 0x1b6   :  { %v1229_v34 = vmul.f32 0.125, %v918_v29 }
 0x1b7   :  { %v7563_v35 = vpop.f32.mrf.mxu1 }
 0x1b8   :  { %v1244_v38 = vsel %vm1234_vm2, %v1229_v34, -inf }
 0x1b9   :  { %1245 = vmax.xlane.f32.xlu1 %v1244_v38  ;;  %v994_v42 = vpop.f32.mrf.mxu1 }
 0x1ba   :  { %v1230_v47 = vmul.f32 0.125, %v994_v42  ;;  %v8625_v42 = vld [vmem:[%s9868_s6] sm:$0x3]  ;;  %s8191_s6 = smov 64  }
 0x1bb   :  { %v7568_v43 = vpop.f32.mrf.mxu1 }
 0x1bc   :  { %v1247_v10 = vsel %vm1234_vm2, %v1230_v47, -inf  ;;  %v8627_v43 = vpop.f32.mrf.mxu0 }
 0x1bd   :  { %1242 = vmax.xlane.f32.xlu1 %v1241_v49  ;;  %v1070_v51 = vpop.f32.mrf.mxu1  ;;  %v8631_v49 = vrot.slane %v8625_v42, %v8442_v56 }
 0x1be   :  { %v1231_v52 = vmul.f32 0.125, %v1070_v51  ;;  %v578_v51 = vpop.f32.mrf.mxu0 }
 0x1bf   :  { %v7573_v6 = vpop.f32.mrf.mxu1 }
 0x1c0   :  { %v1250_v60 = vsel %vm1234_vm2, %v1231_v52, -inf  ;;  %v8634_v6 = vadd.f32 %v578_v51, %v8631_v49 }
 0x1c1   :  { %1248 = vmax.xlane.f32.xlu1 %v1247_v10  ;;  %1251 = vmax.xlane.f32.xlu0 %v1250_v60  ;;  %v1146_v14 = vpop.f32.mrf.mxu1 }
 0x1c2   :  { %v1232_v20 = vmul.f32 0.125, %v1146_v14  ;;  %7585 = vmatpush3.msra.mxu0 %v8634_v6 }
 0x1c3   :  { %v7578_v23 = vpop.f32.mrf.mxu1  ;;  %7594 = vmatprep.subr.mxu0 %v9882_v53 }
 0x1c4   :  { %v1253_v24 = vsel %vm1234_vm2, %v1232_v20, -inf }
 0x1c5   :  { %1254 = vmax.xlane.f32.xlu1 %v1253_v24  ;;  %v1222_v28 = vpop.f32.mrf.mxu1 }
 0x1c6   :  { %v1233_v29 = vmul.f32 0.125, %v1222_v28 }
 0x1c7   :  { %v7583_v35 = vpop.f32.mrf.mxu1 }
 0x1c8   :  { %v1256_v38 = vsel %vm1234_vm2, %v1233_v29, -inf }
 0x1c9   :  { %1257 = vmax.xlane.f32.xlu0 %v1256_v38 }
 0x23a   :  { %v1240_v10 = vpop.xlane.xlu0 %1239 }
 0x23b   :  { %v1260_v60 = vsub.f32 %v1227_v13, %v1240_v10 }
 0x23d   :  { %v1269_v14 = vmul.f32 1.442695, %v1260_v60 }
 0x23e   :  { %v1237_v23 = vpop.xlane.xlu0 %1236 }
 0x23f   :  { %8026 = vpow2.f32 %v1269_v14  ;;  %v1259_v24 = vsub.f32 %v1226_v19, %v1237_v23 }
 0x241   :  { %v1267_v28 = vmul.f32 1.442695, %v1259_v24  ;;  %v9893_v24 = vmov 0.0  }
 0x242   :  { %v1246_v35 = vpop.xlane.xlu1 %1245 }
 0x243   :  { %8028 = vpow2.f32 %v1267_v28  ;;  %v1262_v38 = vsub.f32 %v1229_v34, %v1246_v35 }
 0x245   :  { %v1273_v54 = vmul.f32 1.442695, %v1262_v38 }
 0x246   :  { %v1243_v1 = vpop.xlane.xlu1 %1242 }
 0x247   :  { %8030 = vpow2.f32 %v1273_v54  ;;  %v1261_v55 = vsub.f32 %v1228_v37, %v1243_v1 }
 0x249   :  { %v1271_v51 = vmul.f32 1.442695, %v1261_v55 }
 0x24a   :  { %v1249_v56 = vpop.xlane.xlu1 %1248  ;;  %v1252_v61 = vpop.xlane.xlu0 %1251 }
 0x24b   :  { %8032 = vpow2.f32 %v1271_v51  ;;  %v1263_v5 = vsub.f32 %v1230_v47, %v1249_v56  ;;  %v1264_v53 = vsub.f32 %v1231_v52, %v1252_v61 }
 0x24c   :  { %v8638_v48 = vpop.eup %8026 }
 0x24d   :  { %v1275_v13 = vmul.f32 1.442695, %v1263_v5  ;;  %v1277_v10 = vmul.f32 1.442695, %v1264_v53  ;;  %v1286_v19 = vsel %vm1234_vm2, %v8638_v48, 0.0  ;;  %v8648_v53 = vpop.f32.mrf.mxu0 }
 0x24e   :  { %v1255_v60 = vpop.xlane.xlu1 %1254  ;;  %1287 = vadd.xlane.f32.xlu0 %v1286_v19 }
 0x24f   :  { %8034 = vpow2.f32 %v1275_v13  ;;  %v1265_v34 = vsub.f32 %v1232_v20, %v1255_v60  ;;  %v582_v52 = vpop.f32.mrf.mxu0 }
 0x250   :  { %v8642_v14 = vpop.eup %8028  ;;  %8036 = vpow2.f32 %v1277_v10  ;;  %v8657_v23 = vadd.f32 %v582_v52, %v8631_v49 }
 0x251   :  { %v1279_v1 = vmul.f32 1.442695, %v1265_v34  ;;  %v1283_v54 = vsel %vm1234_vm2, %v8642_v14, 0.0 }
 0x252   :  { %1284 = vadd.xlane.f32.xlu1 %v1283_v54  ;;  %v1258_v55 = vpop.xlane.xlu0 %1257  ;;  %7590 = vmatpush3.msra.mxu1 %v8657_v23 }
 0x253   :  { %8038 = vpow2.f32 %v1279_v1  ;;  %v1266_v56 = vsub.f32 %v1233_v29, %v1258_v55  ;;  %7599 = vmatprep.subr.mxu1 %v9893_v24 }
 0x254   :  { %v8646_v61 = vpop.eup %8030 }
 0x255   :  { %v1281_v5 = vmul.f32 1.442695, %v1266_v56  ;;  %v1292_v37 = vsel %vm1234_vm2, %v8646_v61, 0.0 }
 0x256   :  { %1293 = vadd.xlane.f32.xlu0 %v1292_v37 }
 0x257   :  { %8040 = vpow2.f32 %v1281_v5 }
 0x258   :  { %v8652_v47 = vpop.eup %8032 }
 0x259   :  { %v1289_v20 = vsel %vm1234_vm2, %v8652_v47, 0.0 }
 0x25a   :  { %1290 = vadd.xlane.f32.xlu1 %v1289_v20 }
 0x25c   :  { %v8660_v29 = vpop.eup %8034 }
 0x25d   :  { %v8663_v28 = vpop.eup %8036  ;;  %v1295_v35 = vsel %vm1234_vm2, %v8660_v29, 0.0 }
 0x25e   :  { %1296 = vadd.xlane.f32.xlu1 %v1295_v35  ;;  %v1298_v38 = vsel %vm1234_vm2, %v8663_v28, 0.0 }
 0x25f   :  { %1299 = vadd.xlane.f32.xlu0 %v1298_v38 }
 0x260   :  { %v8669_v51 = vpop.eup %8038 }
 0x261   :  { %v1301_v13 = vsel %vm1234_vm2, %v8669_v51, 0.0 }
 0x262   :  { %1302 = vadd.xlane.f32.xlu1 %v1301_v13 }
 0x264   :  { %v8673_v10 = vpop.eup %8040 }
 0x265   :  { %v1304_v19 = vsel %vm1234_vm2, %v8673_v10, 0.0 }
 0x266   :  { %1305 = vadd.xlane.f32.xlu0 %v1304_v19 }
 0x273   :  { %1997 = vrot.lane.b32.xlu1 %v8490_v12, %s8191_s6 }
 0x277   :  { %1921 = vrot.lane.b32.xlu1 %v8457_v63, %s8191_s6  ;;  %v8709_v63 = vpop.f32.mrf.mxu0 }
 0x27b   :  { %2155 = vrot.lane.b32.xlu1 %v8514_v22, %s8191_s6 }
 0x27c   :  { %1999 = vrot.lane.b32.xlu0 %v8476_v8, %s8191_s6 }
 0x27f   :  { %2153 = vrot.lane.b32.xlu1 %v8529_v27, %s8191_s6 }
 0x280   :  { %1919 = vrot.lane.b32.xlu0 %v8463_v2, %s8191_s6  ;;  %v588_v2 = vpop.f32.mrf.mxu0 }
 0x281   :  { %v8723_v34 = vadd.f32 %v588_v2, %v8631_v49 }
 0x282   :  { %v8711_v8 = vpop.f32.mrf.mxu0 }
 0x283   :  { %2309 = vrot.lane.b32.xlu1 %v8565_v41, %s8191_s6 }
 0x284   :  { %2311 = vrot.lane.b32.xlu0 %v8550_v36, %s8191_s6 }
 0x287   :  { %2467 = vrot.lane.b32.xlu1 %v8587_v50, %s8191_s6 }
 0x288   :  { %2077 = vrot.lane.b32.xlu0 %v8494_v15, %s8191_s6  ;;  %v592_v15 = vpop.f32.mrf.mxu0 }
 0x289   :  { %v8716_v41 = vadd.f32 %v592_v15, %v8631_v49 }
 0x28a   :  { %v8713_v22 = vpop.f32.mrf.mxu0 }
 0x28b   :  { %2465 = vrot.lane.b32.xlu1 %v8599_v58, %s8191_s6 }
 0x28c   :  { %2075 = vrot.lane.b32.xlu0 %v8497_v16, %s8191_s6 }
 0x28f   :  { %2231 = vrot.lane.b32.xlu1 %v8536_v31, %s8191_s6 }
 0x290   :  { %2233 = vrot.lane.b32.xlu0 %v8533_v30, %s8191_s6  ;;  %v598_v30 = vpop.f32.mrf.mxu0 }
 0x291   :  { %v8741_v20 = vadd.f32 %v598_v30, %v8631_v49 }
 0x293   :  { %2387 = vrot.lane.b32.xlu1 %v8572_v45, %s8191_s6  ;;  %v8719_v45 = vpop.f32.mrf.mxu0 }
 0x294   :  { %2389 = vrot.lane.b32.xlu0 %v8569_v44, %s8191_s6  ;;  %9894 = vst [vmem:[#allocation8_spill] sm:$0xff] %v8719_v45 }
 0x2d7   :  { %v1288_v12 = vpop.xlane.xlu0 %1287 }
 0x2d8   :  { %8042 = vrcp.f32 %v1288_v12 }
 0x2db   :  { %v1285_v16 = vpop.xlane.xlu1 %1284 }
 0x2dc   :  { %8044 = vrcp.f32 %v1285_v16 }
 0x2df   :  { %v1294_v27 = vpop.xlane.xlu0 %1293 }
 0x2e0   :  { %8046 = vrcp.f32 %v1294_v27  ;;  %v8761_v27 = vadd.f32 %v8610_v62, %v8631_v49 }
 0x2e3   :  { %v1291_v31 = vpop.xlane.xlu1 %1290 }
 0x2e4   :  { %8048 = vrcp.f32 %v1291_v31 }
 0x2e5   :  { %v8043_v36 = vpop.eup %8042 }
 0x2e6   :  { %v1316_v44 = vmul.f32 %v8043_v36, %v8638_v48  ;;  %v602_v48 = vpop.f32.mrf.mxu0 }
 0x2e7   :  { %v1297_v50 = vpop.xlane.xlu1 %1296  ;;  %v8733_v56 = vadd.f32 %v602_v48, %v8631_v49 }
 0x2e8   :  { %8050 = vrcp.f32 %v1297_v50  ;;  %v1300_v58 = vpop.xlane.xlu0 %1299  ;;  %7592 = vmatmul.mubr.msk.f32.vlgmr.msra.gmra.mxu1 %vm1234_vm2, %v1316_v44 }
 0x2e9   :  { %v8045_v60 = vpop.eup %8044  ;;  %8052 = vrcp.f32 %v1300_v58  ;;  %7600 = vmatpush3.msra.mxu1 %v8716_v41  ;;  %7601 = vmatprep.mubr.msk.f32.mxu1 %vm8190_vm0, %v9893_v24 }
 0x2ea   :  { %v1315_v1 = vmul.f32 %v8045_v60, %v8642_v14  ;;  %7609 = vmatprep.subr.mxu1 %v9893_v24 }
 0x2eb   :  { %v1303_v54 = vpop.xlane.xlu1 %1302 }
 0x2ec   :  { %8054 = vrcp.f32 %v1303_v54  ;;  %7587 = vmatmul.mubr.msk.f32.vlgmr.msra.gmra.mxu0 %vm1234_vm2, %v1315_v1  ;;  %v8823_v54 = vpop.f32.mrf.mxu0 }
 0x2ed   :  { %v8047_v55 = vpop.eup %8046  ;;  %7595 = vmatpush3.msra.mxu0 %v8723_v34  ;;  %7596 = vmatprep.mubr.msk.f32.mxu0 %vm8190_vm0, %v9893_v24 }
 0x2ee   :  { %v1318_v5 = vmul.f32 %v8047_v55, %v8646_v61  ;;  %7604 = vmatprep.subr.mxu0 %v9893_v24 }
 0x2ef   :  { %v1998_v14 = vpop.permute.xlu1 %1997  ;;  %v1306_v37 = vpop.xlane.xlu0 %1305 }
 0x2f0   :  { %8056 = vrcp.f32 %v1306_v37  ;;  %7602 = vmatmul.mubr.msk.f32.vlgmr.msra.gmra.mxu1 %vm1234_vm2, %v1318_v5 }
 0x2f1   :  { %v8049_v52 = vpop.eup %8048  ;;  %7610 = vmatpush3.msra.mxu1 %v8733_v56  ;;  %7611 = vmatprep.mubr.msk.f32.mxu1 %vm8190_vm0, %v9893_v24 }
 0x2f2   :  { %v1317_v35 = vmul.f32 %v8049_v52, %v8652_v47  ;;  %7619 = vmatprep.subr.mxu1 %v9893_v24  ;;  %v8756_v47 = vadd.f32 %v8606_v59, %v8631_v49 }
 0x2f3   :  { %v1922_v61 = vpop.permute.xlu1 %1921  ;;  %v2000_v38 = vpop.permute.xlu0 %1999 }
 0x2f4   :  { %7597 = vmatmul.mubr.msk.f32.vlgmr.msra.gmra.mxu0 %vm1234_vm2, %v1317_v35 }
 0x2f5   :  { %v8051_v13 = vpop.eup %8050  ;;  %7605 = vmatpush3.msra.mxu0 %v8741_v20  ;;  %7606 = vmatprep.mubr.msk.f32.mxu0 %vm8190_vm0, %v9893_v24 }
 0x2f6   :  { %v8053_v19 = vpop.eup %8052  ;;  %7614 = vmatprep.subr.mxu0 %v9893_v24  ;;  %v1319_v2 = vmul.f32 %v8051_v13, %v8660_v29 }
 0x2f7   :  { %v2156_v12 = vpop.permute.xlu1 %2155  ;;  %v1920_v15 = vpop.permute.xlu0 %1919  ;;  %v1320_v16 = vmul.f32 %v8053_v19, %v8663_v28 }
 0x2f8   :  { %7607 = vmatmul.mubr.msk.f32.vlgmr.msra.gmra.mxu0 %vm1234_vm2, %v1319_v2 }
 0x2f9   :  { %v8055_v30 = vpop.eup %8054  ;;  %7612 = vmatmul.mubr.msk.f32.vlgmr.msra.gmra.mxu1 %vm1234_vm2, %v1320_v16  ;;  %7615 = vmatpush3.msra.mxu0 %v8756_v47 }
 0x2fa   :  { %7620 = vmatpush3.msra.mxu1 %v8761_v27  ;;  %7616 = vmatprep.mubr.msk.f32.mxu0 %vm8190_vm0, %v9893_v24  ;;  %v1321_v59 = vmul.f32 %v8055_v30, %v8669_v51 }
 0x2fb   :  { %7624 = vmatprep.subr.mxu0 %v9893_v24  ;;  %v2154_v29 = vpop.permute.xlu1 %2153  ;;  %v2312_v28 = vpop.permute.xlu0 %2311  ;;  %7621 = vmatprep.mubr.msk.f32.mxu1 %vm8190_vm0, %v9893_v24 }
 0x2fc   :  { %7617 = vmatmul.mubr.msk.f32.vlgmr.msra.gmra.mxu0 %vm1234_vm2, %v1321_v59  ;;  %7629 = vmatprep.subr.mxu1 %v9893_v24 }
 0x2fd   :  { %v8057_v62 = vpop.eup %8056  ;;  %7625 = vmatpush3.xpose.msk.msra.mxu0 %vm617_vm1, %v1922_v61  ;;  %7626 = vmatprep.mubr.msk.f32.mxu0 %vm8190_vm0, %v9893_v24 }
 0x2fe   :  { %7634 = vmatprep.subr.mxu0 %v9893_v24  ;;  %v1322_v49 = vmul.f32 %v8057_v62, %v8673_v10 }
 0x2ff   :  { %v2310_v51 = vpop.permute.xlu1 %2309  ;;  %v2078_v31 = vpop.permute.xlu0 %2077 }
 0x300   :  { %7622 = vmatmul.mubr.msk.f32.vlgmr.msra.gmra.mxu1 %vm1234_vm2, %v1322_v49  ;;  %7627 = vmatmul.mubr.msk.f32.vlgmr.msra.gmra.mxu0 %vm617_vm1, %v1920_v15 }
 0x301   :  { %7630 = vmatpush3.xpose.msk.msra.mxu1 %vm617_vm1, %v2000_v38  ;;  %7635 = vmatpush3.xpose.msk.msra.mxu0 %vm617_vm1, %v2078_v31 }
 0x302   :  { %7631 = vmatprep.mubr.msk.f32.mxu1 %vm8190_vm0, %v9893_v24  ;;  %7636 = vmatprep.mubr.msk.f32.mxu0 %vm8190_vm0, %v9893_v24 }
 0x303   :  { %v2468_v36 = vpop.permute.xlu1 %2467  ;;  %7639 = vmatprep.subr.mxu1 %v9893_v24  ;;  %v2076_v10 = vpop.permute.xlu0 %2075  ;;  %7644 = vmatprep.subr.mxu0 %v9893_v24 }
 0x304   :  { %7632 = vmatmul.mubr.msk.f32.vlgmr.msra.gmra.mxu1 %vm617_vm1, %v1998_v14  ;;  %7637 = vmatmul.mubr.msk.f32.vlgmr.msra.gmra.mxu0 %vm617_vm1, %v2076_v10 }
 0x305   :  { %7640 = vmatpush3.xpose.msk.msra.mxu1 %vm617_vm1, %v2156_v12  ;;  %7641 = vmatprep.mubr.msk.f32.mxu1 %vm8190_vm0, %v9893_v24 }
 0x306   :  { %7649 = vmatprep.subr.mxu1 %v9893_v24  ;;  %7646 = vmatprep.mubr.msk.f32.mxu0 %vm8190_vm0, %v9893_v24 }
 0x307   :  { %v2466_v44 = vpop.permute.xlu1 %2465  ;;  %v2234_v50 = vpop.permute.xlu0 %2233 }
 0x308   :  { %7642 = vmatmul.mubr.msk.f32.vlgmr.msra.gmra.mxu1 %vm617_vm1, %v2154_v29  ;;  %7645 = vmatpush3.xpose.msk.msra.mxu0 %vm617_vm1, %v2234_v50 }
 0x309   :  { %7650 = vmatpush3.xpose.msk.msra.mxu1 %vm617_vm1, %v2312_v28  ;;  %7651 = vmatprep.mubr.msk.f32.mxu1 %vm8190_vm0, %v9893_v24 }
 0x30a   :  { %7654 = vmatprep.subr.mxu0 %v9893_v24  ;;  %7659 = vmatprep.subr.mxu1 %v9893_v24 }
 0x30b   :  { %v2232_v58 = vpop.permute.xlu1 %2231  ;;  %v2390_v60 = vpop.permute.xlu0 %2389 }
 0x30c   :  { %7647 = vmatmul.mubr.msk.f32.vlgmr.msra.gmra.mxu0 %vm617_vm1, %v2232_v58  ;;  %7652 = vmatmul.mubr.msk.f32.vlgmr.msra.gmra.mxu1 %vm617_vm1, %v2310_v51 }
 0x30d   :  { %7655 = vmatpush3.xpose.msk.msra.mxu0 %vm617_vm1, %v2390_v60  ;;  %7660 = vmatpush3.xpose.msk.msra.mxu1 %vm617_vm1, %v2468_v36 }
 0x30e   :  { %7656 = vmatprep.mubr.msk.f32.mxu0 %vm8190_vm0, %v9893_v24  ;;  %7661 = vmatprep.mubr.msk.f32.mxu1 %vm8190_vm0, %v9893_v24 }
 0x30f   :  { %v2388_v1 = vpop.permute.xlu1 %2387  ;;  %7669 = vmatprep.subr.mxu1 %v9893_v24  ;;  %7664 = vmatprep.subr.mxu0 %v9893_v24 }
 0x310   :  { %7657 = vmatmul.mubr.msk.f32.vlgmr.msra.gmra.mxu0 %vm617_vm1, %v2388_v1  ;;  %7662 = vmatmul.mubr.msk.f32.vlgmr.msra.gmra.mxu1 %vm617_vm1, %v2466_v44 }
 0x311   :  { %7671 = vmatprep.mubr.msk.f32.mxu1 %vm8190_vm0, %v9893_v24  ;;  %7666 = vmatprep.mubr.msk.f32.mxu0 %vm8190_vm0, %v9893_v24 }
 0x3a8   :  { %v8821_v48 = vpop.f32.mrf.mxu1 }
 0x3aa   :  { %v7593_v55 = vpop.f32.mrf.mxu1 }
 0x3ac   :  { %v8825_v5 = vpop.f32.mrf.mxu0 }
 0x3ae   :  { %v7588_v37 = vpop.f32.mrf.mxu0 }
 0x3b0   :  { %v8829_v52 = vpop.f32.mrf.mxu1 }
 0x3b2   :  { %v7603_v35 = vpop.f32.mrf.mxu1 }
 0x3b4   :  { %v8831_v61 = vpop.f32.mrf.mxu0 }
 0x3b6   :  { %v7598_v13 = vpop.f32.mrf.mxu0 }
 0x3b8   :  { %v8835_v19 = vpop.f32.mrf.mxu0 }
 0x3b9   :  { %v8837_v2 = vpop.f32.mrf.mxu1 }
 0x3ba   :  { %v7608_v15 = vpop.f32.mrf.mxu0 }
 0x3bb   :  { %v7613_v16 = vpop.f32.mrf.mxu1 }
 0x3bc   :  { %v8841_v30 = vpop.f32.mrf.mxu0 }
 0x3be   :  { %v7618_v59 = vpop.f32.mrf.mxu0 }
 0x3c0   :  { %v8843_v29 = vpop.f32.mrf.mxu1  ;;  %v1993_v28 = vpop.f32.mrf.mxu0 }
 0x3c1   :  { %v2543_v49 = vmul.f32 0.125, %v1993_v28 }
 0x3c2   :  { %v7623_v51 = vpop.f32.mrf.mxu1  ;;  %v7628_v31 = vpop.f32.mrf.mxu0 }
 0x3c3   :  { %v2551_v36 = vsel %vm1234_vm2, %v2543_v49, -inf }
 0x3c4   :  { %2552 = vmax.xlane.f32.xlu1 %v2551_v36  ;;  %v2071_v10 = vpop.f32.mrf.mxu1  ;;  %v2149_v44 = vpop.f32.mrf.mxu0 }
 0x3c5   :  { %v2544_v50 = vmul.f32 0.125, %v2071_v10  ;;  %v2545_v31 = vmul.f32 0.125, %v2149_v44 }
 0x3c6   :  { %v7633_v58 = vpop.f32.mrf.mxu1  ;;  %v7638_v60 = vpop.f32.mrf.mxu0 }
 0x3c7   :  { %v2554_v1 = vsel %vm1234_vm2, %v2544_v50, -inf }
 0x3c8   :  { %2555 = vmax.xlane.f32.xlu0 %v2554_v1  ;;  %v2227_v55 = vpop.f32.mrf.mxu1 }
 0x3c9   :  { %v2546_v37 = vmul.f32 0.125, %v2227_v55 }
 0x3ca   :  { %v7643_v35 = vpop.f32.mrf.mxu1 }
 0x3cb   :  { %v2560_v13 = vsel %vm1234_vm2, %v2546_v37, -inf }
 0x3cc   :  { %v2305_v15 = vpop.f32.mrf.mxu0  ;;  %2561 = vmax.xlane.f32.xlu0 %v2560_v13  ;;  %v2383_v16 = vpop.f32.mrf.mxu1  ;;  %v2557_v13 = vsel %vm1234_vm2, %v2545_v31, -inf }
 0x3cd   :  { %v2548_v59 = vmul.f32 0.125, %v2383_v16  ;;  %v2547_v55 = vmul.f32 0.125, %v2305_v15 }
 0x3ce   :  { %v7648_v28 = vpop.f32.mrf.mxu0  ;;  %v7653_v51 = vpop.f32.mrf.mxu1 }
 0x3cf   :  { %v2566_v36 = vsel %vm1234_vm2, %v2548_v59, -inf  ;;  %v2563_v44 = vsel %vm1234_vm2, %v2547_v55, -inf }
 0x3d0   :  { %v2461_v10 = vpop.f32.mrf.mxu0  ;;  %2567 = vmax.xlane.f32.xlu0 %v2566_v36  ;;  %v2539_v58 = vpop.f32.mrf.mxu1 }
 0x3d1   :  { %v8851_v60 = vmul.f32 0.125, %v2461_v10  ;;  %v2550_v35 = vmul.f32 0.125, %v2539_v58 }
 0x3d2   :  { %v7658_v1 = vpop.f32.mrf.mxu0  ;;  %v7663_v62 = vpop.f32.mrf.mxu1 }
 0x3d3   :  { %v2569_v12 = vsel %vm1234_vm2, %v8851_v60, -inf  ;;  %v2572_v16 = vsel %vm1234_vm2, %v2550_v35, -inf }
 0x3d4   :  { %2570 = vmax.xlane.f32.xlu1 %v2569_v12  ;;  %2558 = vmax.xlane.f32.xlu0 %v2557_v13 }
 0x3d8   :  { %2564 = vmax.xlane.f32.xlu0 %v2563_v44  ;;  %2573 = vmax.xlane.f32.xlu1 %v2572_v16 }
 0x3e9   :  { %2717 = vrot.lane.b32.xlu1 %v8657_v23, %s8191_s6 }
 0x44d   :  { %v2553_v28 = vpop.xlane.xlu1 %2552 }
 0x44e   :  { %v2575_v62 = vsub.f32 %v2543_v49, %v2553_v28 }
 0x450   :  { %v2583_v15 = vmul.f32 1.442695, %v2575_v62 }
 0x451   :  { %v2556_v51 = vpop.xlane.xlu0 %2555 }
 0x452   :  { %8058 = vpow2.f32 %v2583_v15  ;;  %v2576_v36 = vsub.f32 %v2544_v50, %v2556_v51 }
 0x454   :  { %v2585_v10 = vmul.f32 1.442695, %v2576_v36 }
 0x455   :  { %v2562_v58 = vpop.xlane.xlu0 %2561 }
 0x456   :  { %8060 = vpow2.f32 %v2585_v10  ;;  %v2578_v1 = vsub.f32 %v2546_v37, %v2562_v58 }
 0x458   :  { %v2589_v16 = vmul.f32 1.442695, %v2578_v1 }
 0x459   :  { %v2568_v12 = vpop.xlane.xlu0 %2567 }
 0x45a   :  { %v2580_v15 = vsub.f32 %v2548_v59, %v2568_v12 }
 0x45c   :  { %v2593_v51 = vmul.f32 1.442695, %v2580_v15 }
 0x45d   :  { %v2571_v13 = vpop.xlane.xlu1 %2570  ;;  %v2559_v38 = vpop.xlane.xlu0 %2558 }
 0x45e   :  { %v2577_v14 = vsub.f32 %v2545_v31, %v2559_v38  ;;  %v2581_v1 = vsub.f32 %v8851_v60, %v2571_v13 }
 0x45f   :  { %v8860_v45 = vpop.eup %8058 }
 0x460   :  { %v2587_v44 = vmul.f32 1.442695, %v2577_v14  ;;  %v2599_v23 = vsel %vm1234_vm2, %v8860_v45, 0.0 }
 0x461   :  { %2600 = vadd.xlane.f32.xlu1 %v2599_v23  ;;  %v2574_v49 = vpop.xlane.xlu1 %2573  ;;  %v2565_v58 = vpop.xlane.xlu0 %2564 }
 0x462   :  { %8062 = vpow2.f32 %v2587_v44  ;;  %v2582_v36 = vsub.f32 %v2550_v35, %v2574_v49 }
 0x463   :  { %v8061_v28 = vpop.eup %8060  ;;  %8064 = vpow2.f32 %v2589_v16 }
 0x464   :  { %v2602_v50 = vsel %vm1234_vm2, %v8061_v28, 0.0  ;;  %8066 = vpow2.f32 %v2593_v51  ;;  %v2597_v10 = vmul.f32 1.442695, %v2582_v36 }
 0x465   :  { %2603 = vadd.xlane.f32.xlu0 %v2602_v50  ;;  %v2718_v62 = vpop.permute.xlu1 %2717 }
 0x466   :  { %7670 = vmatpush3.msra.mxu1 %v2718_v62  ;;  %8068 = vpow2.f32 %v2597_v10 }
 0x467   :  { %7679 = vmatprep.subr.mxu1 %v9893_v24 }
 0x46f   :  { %v8866_v38 = vpop.eup %8062 }
 0x470   :  { %v2605_v14 = vsel %vm1234_vm2, %v8866_v38, 0.0  ;;  %v8065_v37 = vpop.eup %8064 }
 0x471   :  { %2606 = vadd.xlane.f32.xlu0 %v2605_v14  ;;  %v2608_v31 = vsel %vm1234_vm2, %v8065_v37, 0.0  ;;  %v8880_v23 = vpop.eup %8066 }
 0x472   :  { %2871 = vrot.lane.b32.xlu1 %v8716_v41, %s8191_s6  ;;  %v2579_v41 = vsub.f32 %v2547_v55, %v2565_v58 }
 0x473   :  { %v8884_v59 = vpop.eup %8068 }
 0x474   :  { %v2591_v44 = vmul.f32 1.442695, %v2579_v41 }
 0x475   :  { %2609 = vadd.xlane.f32.xlu0 %v2608_v31 }
 0x476   :  { %3025 = vrot.lane.b32.xlu1 %v8733_v56, %s8191_s6  ;;  %v2595_v56 = vmul.f32 1.442695, %v2581_v1  ;;  %8070 = vpow2.f32 %v2591_v44 }
 0x478   :  { %8072 = vpow2.f32 %v2595_v56 }
 0x47a   :  { %3179 = vrot.lane.b32.xlu1 %v8761_v27, %s8191_s6  ;;  %v2614_v27 = vsel %vm1234_vm2, %v8880_v23, 0.0 }
 0x483   :  { %v8888_v35 = vpop.eup %8070 }
 0x484   :  { %v2611_v60 = vsel %vm1234_vm2, %v8888_v35, 0.0 }
 0x485   :  { %v8892_v55 = vpop.eup %8072 }
 0x486   :  { %v2617_v12 = vsel %vm1234_vm2, %v8892_v55, 0.0 }
 0x48b   :  { %2640 = vrot.lane.b32.xlu0 %v8634_v6, %s8191_s6  ;;  %v2620_v6 = vsel %vm1234_vm2, %v8884_v59, 0.0 }
 0x49e   :  { %2615 = vadd.xlane.f32.xlu1 %v2614_v27  ;;  %v7964_v27 = vld [vmem:[%s9869_s7 + $0x34] ss:$8 sps:$4 sm:$0xff]  }
 0x4a2   :  { %2621 = vadd.xlane.f32.xlu1 %v2620_v6 }
 0x4aa   :  { %2612 = vadd.xlane.f32.xlu0 %v2611_v60  ;;  %v7962_v60 = vld [vmem:[%s9869_s7 + $0x30] ss:$8 sps:$4 sm:$0xff]  }
 0x4ae   :  { %2618 = vadd.xlane.f32.xlu0 %v2617_v12  ;;  %v7967_v12 = vld [vmem:[%s9869_s7 + $0x24] ss:$8 sps:$4 sm:$0xff]  }
 0x4b3   :  { %2794 = vrot.lane.b32.xlu1 %v8723_v34, %s8191_s6 }
 0x4b7   :  { %3102 = vrot.lane.b32.xlu1 %v8756_v47, %s8191_s6 }
 0x4c4   :  { %2948 = vrot.lane.b32.xlu0 %v8741_v20, %s8191_s6 }
 0x4ea   :  { %v2601_v16 = vpop.xlane.xlu1 %2600 }
 0x4ee   :  { %v2604_v13 = vpop.xlane.xlu0 %2603  ;;  %v2872_v14 = vpop.permute.xlu1 %2871 }
 0x4ef   :  { %8074 = vrcp.f32 %v2604_v13 }
 0x4f0   :  { %8076 = vrcp.f32 %v2601_v16  ;;  %v7965_v16 = vld [vmem:[%s9869_s7 + $0x20] ss:$8 sps:$4 sm:$0xff]  }
 0x4f2   :  { %v3026_v51 = vpop.permute.xlu1 %3025 }
 0x4fa   :  { %v2607_v49 = vpop.xlane.xlu0 %2606 }
 0x4fc   :  { %v8075_v50 = vpop.eup %8074 }
 0x4fd   :  { %v2632_v62 = vmul.f32 %v8075_v50, %v8061_v28  ;;  %v8077_v15 = vpop.eup %8076  ;;  %v7968_v50 = vld [vmem:[%s9869_s7 + $0x10] ss:$8 sps:$4 sm:$0xff]  }
 0x4fe   :  { %v2610_v31 = vpop.xlane.xlu0 %2609  ;;  %v2631_v20 = vmul.f32 %v8077_v15, %v8860_v45  ;;  %v3180_v45 = vpop.permute.xlu1 %3179  ;;  %v7976_v15 = vld [vmem:[%s9869_s7 + $0x74] ss:$8 sps:$4 sm:$0xff]  }
 0x4ff   :  { %7672 = vmatmul.mubr.msk.f32.vlgmr.msra.gmra.mxu1 %vm1234_vm2, %v2632_v62  ;;  %8078 = vrcp.f32 %v2610_v31  ;;  %v7973_v31 = vld [vmem:[%s9869_s7 + $0x4] ss:$8 sps:$4 sm:$0xff]  }
 0x500   :  { %7680 = vmatpush3.msra.mxu1 %v2872_v14  ;;  %7681 = vmatprep.mubr.msk.f32.mxu1 %vm8190_vm0, %v9893_v24  ;;  %8080 = vrcp.f32 %v2607_v49  ;;  %v9895_v49 = vmov 0  }
 0x501   :  { %7689 = vmatprep.subr.mxu1 %v9893_v24 }
 0x502   :  { %v2641_v34 = vpop.permute.xlu0 %2640 }
 0x503   :  { %7665 = vmatpush3.msra.mxu0 %v2641_v34 }
 0x504   :  { %7667 = vmatmul.mubr.msk.f32.vlgmr.msra.gmra.mxu0 %vm1234_vm2, %v2631_v20  ;;  %7674 = vmatprep.subr.mxu0 %v9893_v24  ;;  %v7971_v20 = vld [vmem:[%s9869_s7] ss:$8 sps:$4 sm:$0xff]  }
 0x505   :  { %7676 = vmatprep.mubr.msk.f32.mxu0 %vm8190_vm0, %v9893_v24 }
 0x50c   :  { %v8079_v47 = vpop.eup %8078 }
 0x50d   :  { %v2634_v28 = vmul.f32 %v8079_v47, %v8065_v37  ;;  %v8081_v58 = vpop.eup %8080 }
 0x50e   :  { %v2633_v1 = vmul.f32 %v8081_v58, %v8866_v38  ;;  %v7985_v58 = vld [vmem:[%s9869_s7 + $0x44] ss:$8 sps:$4 sm:$0xff]  }
 0x50f   :  { %7682 = vmatmul.mubr.msk.f32.vlgmr.msra.gmra.mxu1 %vm1234_vm2, %v2634_v28 }
 0x510   :  { %7690 = vmatpush3.msra.mxu1 %v3026_v51  ;;  %7691 = vmatprep.mubr.msk.f32.mxu1 %vm8190_vm0, %v9893_v24  ;;  %v7979_v51 = vld [vmem:[%s9869_s7 + $0x64] ss:$8 sps:$4 sm:$0xff]  }
 0x511   :  { %7699 = vmatprep.subr.mxu1 %v9893_v24 }
 0x527   :  { %v2616_v36 = vpop.xlane.xlu1 %2615 }
 0x528   :  { %8082 = vrcp.f32 %v2616_v36  ;;  %v8973_v36 = vadd.f32 %v8478_v9, %v8511_v21  ;;  %v7980_v9 = vld [vmem:[%s9869_s7 + $0x50] ss:$8 sps:$4 sm:$0xff]  }
 0x52b   :  { %v2622_v10 = vpop.xlane.xlu1 %2621 }
 0x52c   :  { %8084 = vrcp.f32 %v2622_v10  ;;  %v9896_v10 = vpack.c.bf16 %v8821_v48, %v8825_v5  ;;  %v7983_v48 = vld [vmem:[%s9869_s7 + $0x40] ss:$8 sps:$4 sm:$0xff]   ;;  %v9897_v5 = vpack.c.bf16 %v8829_v52, %v8831_v61  ;;  %v9031_v52 = vrot.slane %v8625_v42, %v8460_v0 }
 0x52d   :  { %v9039_v61 = vadd.f32 %v8627_v43, %v8473_v7 }
 0x52f   :  { %v2795_v41 = vpop.permute.xlu1 %2794 }
 0x530   :  { %7675 = vmatpush3.msra.mxu0 %v2795_v41  ;;  %v9898_v41 = vpack.c.bf16 %v8837_v2, %v8835_v19  ;;  %v9044_v19 = vadd.f32 %v8709_v63, %v9031_v52 }
 0x531   :  { %7677 = vmatmul.mubr.msk.f32.vlgmr.msra.gmra.mxu0 %vm1234_vm2, %v2633_v1  ;;  %7684 = vmatprep.subr.mxu0 %v9893_v24  ;;  %v9899_v1 = vpack.c.bf16 %v8843_v29, %v8841_v30  ;;  %v9054_v29 = vadd.f32 %v8465_v3, %v8511_v21 }
 0x532   :  { %7686 = vmatprep.mubr.msk.f32.mxu0 %vm8190_vm0, %v9893_v24 }
 0x533   :  { %v2613_v37 = vpop.xlane.xlu0 %2612  ;;  %v3103_v34 = vpop.permute.xlu1 %3102 }
 0x534   :  { %8086 = vrcp.f32 %v2613_v37 }
 0x535   :  { %v8083_v44 = vpop.eup %8082 }
 0x536   :  { %v2636_v56 = vmul.f32 %v8083_v44, %v8880_v23 }
 0x537   :  { %v2619_v6 = vpop.xlane.xlu0 %2618 }
 0x538   :  { %7692 = vmatmul.mubr.msk.f32.vlgmr.msra.gmra.mxu1 %vm1234_vm2, %v2636_v56  ;;  %8088 = vrcp.f32 %v2619_v6 }
 0x539   :  { %v8085_v38 = vpop.eup %8084  ;;  %7700 = vmatpush3.msra.mxu1 %v3180_v45  ;;  %7701 = vmatprep.mubr.msk.f32.mxu1 %vm8190_vm0, %v9893_v24  ;;  %v7977_v45 = vld [vmem:[%s9869_s7 + $0x60] ss:$8 sps:$4 sm:$0xff]  }
 0x53a   :  { %3452 = vmatprep.subr.bf16.mxu1 %v7964_v27  ;;  %v2638_v23 = vmul.f32 %v8085_v38, %v8884_v59  ;;  %v7970_v59 = vld [vmem:[%s9869_s7 + $0x14] ss:$8 sps:$4 sm:$0xff]  }
 0x53b   :  { %v2949_v13 = vpop.permute.xlu0 %2948 }
 0x53c   :  { %7702 = vmatmul.mubr.msk.f32.vlgmr.msra.gmra.mxu1 %vm1234_vm2, %v2638_v23  ;;  %7685 = vmatpush3.msra.mxu0 %v2949_v13 }
 0x53d   :  { %3453 = vmatpush1.bf16.msra.mxu1 %v7962_v60  ;;  %7694 = vmatprep.subr.mxu0 %v9893_v24 }
 0x53e   :  { %3454 = vmatprep.subr.bf16.mxu1 %v7967_v12  ;;  %3476 = vmatprep.mubr.bf16.mxu1 %v9895_v49 }
 0x541   :  { %3455 = vmatpush1.bf16.msra.mxu1 %v7965_v16  ;;  %v8087_v62 = vpop.eup %8086 }
 0x542   :  { %3456 = vmatprep.subr.bf16.mxu1 %v7970_v59  ;;  %v2635_v14 = vmul.f32 %v8087_v62, %v8888_v35  ;;  %v7974_v35 = vld [vmem:[%s9869_s7 + $0x70] ss:$8 sps:$4 sm:$0xff]  }
 0x544   :  { %7687 = vmatmul.mubr.msk.f32.vlgmr.msra.gmra.mxu0 %vm1234_vm2, %v2635_v14 }
 0x545   :  { %3457 = vmatpush1.bf16.msra.mxu1 %v7968_v50  ;;  %v8089_v47 = vpop.eup %8088  ;;  %7695 = vmatpush3.msra.mxu0 %v3103_v34 }
 0x546   :  { %7696 = vmatprep.mubr.msk.f32.mxu0 %vm8190_vm0, %v9893_v24  ;;  %3458 = vmatprep.subr.bf16.mxu1 %v7973_v31  ;;  %v2637_v28 = vmul.f32 %v8089_v47, %v8892_v55  ;;  %v7982_v55 = vld [vmem:[%s9869_s7 + $0x54] ss:$8 sps:$4 sm:$0xff]   ;;  %v9080_v47 = vadd.f32 %v8467_v4, %v8473_v7  ;;  %v9098_v4 = vadd.f32 %v8503_v18, %v8473_v7 }
 0x547   :  { %3327 = vmatprep.subr.bf16.mxu0 %v7976_v15  ;;  %v9117_v18 = vadd.f32 %v8542_v33, %v8473_v7  ;;  %v9139_v33 = vadd.f32 %v8648_v53, %v9031_v52 }
 0x548   :  { %7697 = vmatmul.mubr.msk.f32.vlgmr.msra.gmra.mxu0 %vm1234_vm2, %v2637_v28  ;;  %v9086_v28 = vadd.f32 %v8499_v17, %v8511_v21  ;;  %v9105_v17 = vadd.f32 %v8538_v32, %v8511_v21  ;;  %v9124_v32 = vadd.f32 %v8574_v46, %v8511_v21  ;;  %v9901_v46 = vld [vmem:[#allocation5_spill] sm:$0xff] }
 0x549   :  { %3459 = vmatpush1.bf16.msra.mxu1 %v7971_v20  ;;  %3328 = vmatpush1.bf16.msra.mxu0 %v7974_v35 }
 0x54a   :  { %7709 = vmatprep.subr.mxu1 %v9893_v24  ;;  %3329 = vmatprep.subr.bf16.mxu0 %v7979_v51 }
 0x54b   :  { %3351 = vmatprep.mubr.bf16.mxu0 %v9895_v49 }
 0x54c   :  { %7282 = vmatmul.mubr.msk.bf16.vlgmr.msra.gmra.mxu1 %vm617_vm1, %v9896_v10 }
 0x54d   :  { %7710 = vmatpush3.xpose.msk.msra.mxu1 %vm617_vm1, %v8973_v36  ;;  %3486 = vmatprep.mubr.bf16.mxu1 %v9895_v49 }
 0x54e   :  { %7719 = vmatprep.subr.mxu1 %v9893_v24  ;;  %3330 = vmatpush1.bf16.msra.mxu0 %v7977_v45 }
 0x54f   :  { %3331 = vmatprep.subr.bf16.mxu0 %v7982_v55 }
 0x552   :  { %3332 = vmatpush1.bf16.msra.mxu0 %v7980_v9 }
 0x553   :  { %3333 = vmatprep.subr.bf16.mxu0 %v7985_v58 }
 0x554   :  { %7283 = vmatmul.mubr.msk.bf16.gmra.mxu1 %vm617_vm1, %v9897_v5 }
 0x555   :  { %3496 = vmatprep.mubr.bf16.mxu1 %v9895_v49 }
 0x556   :  { %3334 = vmatpush1.bf16.msra.mxu0 %v7983_v48 }
 0x557   :  { %7704 = vmatprep.subr.mxu0 %v9893_v24 }
 0x55c   :  { %7284 = vmatmul.mubr.msk.bf16.gmra.mxu1 %vm617_vm1, %v9898_v41 }
 0x55d   :  { %3506 = vmatprep.mubr.bf16.mxu1 %v9895_v49 }
 0x564   :  { %7285 = vmatmul.mubr.msk.bf16.gmra.mxu1 %vm617_vm1, %v9899_v1 }
 0x565   :  { %7711 = vmatprep.mubr.msk.f32.mxu1 %vm8190_vm0, %v9893_v24 }
 0x56c   :  { %7712 = vmatmul.mubr.msk.f32.vlgmr.msra.gmra.mxu1 %vm617_vm1, %v8483_v11 }
 0x56d   :  { %7720 = vmatpush3.xpose.msk.msra.mxu1 %vm617_vm1, %v8519_v25  ;;  %7721 = vmatprep.mubr.msk.f32.mxu1 %vm8190_vm0, %v9893_v24 }
 0x56e   :  { %7729 = vmatprep.subr.mxu1 %v9893_v24 }
 0x570   :  { %7722 = vmatmul.mubr.msk.f32.vlgmr.msra.gmra.mxu1 %vm617_vm1, %v8522_v26 }
 0x571   :  { %7730 = vmatpush3.xpose.msk.msra.mxu1 %vm617_vm1, %v8555_v39  ;;  %7731 = vmatprep.mubr.msk.f32.mxu1 %vm8190_vm0, %v9893_v24 }
 0x572   :  { %7739 = vmatprep.subr.mxu1 %v9893_v24 }
 0x574   :  { %7732 = vmatmul.mubr.msk.f32.vlgmr.msra.gmra.mxu1 %vm617_vm1, %v8558_v40 }
 0x575   :  { %7740 = vmatpush3.xpose.msk.msra.mxu1 %vm617_vm1, %v8592_v57  ;;  %7741 = vmatprep.mubr.msk.f32.mxu1 %vm8190_vm0, %v9893_v24 }
 0x576   :  { %7749 = vmatprep.subr.mxu1 %v9893_v24 }
 0x578   :  { %7742 = vmatmul.mubr.msk.f32.vlgmr.msra.gmra.mxu1 %vm617_vm1, %v9039_v61 }
 0x579   :  { %7750 = vmatpush3.msra.mxu1 %v9044_v19  ;;  %7751 = vmatprep.mubr.msk.f32.mxu1 %vm8190_vm0, %v9893_v24 }
 0x57a   :  { %7759 = vmatprep.subr.mxu1 %v9893_v24 }
 0x5bf   :  { %v2789_v42 = vpop.f32.mrf.mxu1 }
 0x5c1   :  { %v7673_v2 = vpop.f32.mrf.mxu1 }
 0x5c4   :  { %v2712_v43 = vpop.f32.mrf.mxu0 }
 0x5c5   :  { %v3255_v30 = vpack.c.bf16 %v2789_v42, %v2712_v43 }
 0x5c6   :  { %v7668_v63 = vpop.f32.mrf.mxu0 }
 0x5c7   :  { %7270 = vmatmul.mubr.msk.bf16.vlgmr.msra.gmra.mxu0 %vm617_vm1, %v3255_v30 }
 0x5c8   :  { %7705 = vmatpush3.xpose.msk.msra.mxu0 %vm617_vm1, %v9054_v29  ;;  %3361 = vmatprep.mubr.bf16.mxu0 %v9895_v49 }
 0x5c9   :  { %7714 = vmatprep.subr.mxu0 %v9893_v24 }
 0x5cf   :  { %v2943_v37 = vpop.f32.mrf.mxu1 }
 0x5d1   :  { %v7683_v44 = vpop.f32.mrf.mxu1 }
 0x5f1   :  { %v2866_v56 = vpop.f32.mrf.mxu0 }
 0x5f2   :  { %v3256_v27 = vpack.c.bf16 %v2943_v37, %v2866_v56 }
 0x5f3   :  { %v7678_v6 = vpop.f32.mrf.mxu0 }
 0x5f4   :  { %7271 = vmatmul.mubr.msk.bf16.gmra.mxu0 %vm617_vm1, %v3256_v27 }
 0x5f5   :  { %3371 = vmatprep.mubr.bf16.mxu0 %v9895_v49 }
 0x5f8   :  { %v3097_v3 = vpop.f32.mrf.mxu1 }
 0x5fa   :  { %v7693_v38 = vpop.f32.mrf.mxu1 }
 0x5fc   :  { %v3251_v60 = vpop.f32.mrf.mxu1 }
 0x5fe   :  { %v7703_v23 = vpop.f32.mrf.mxu1 }
 0x604   :  { %v3020_v12 = vpop.f32.mrf.mxu0 }
 0x605   :  { %v3257_v13 = vpack.c.bf16 %v3097_v3, %v3020_v12 }
 0x606   :  { %v7688_v16 = vpop.f32.mrf.mxu0 }
 0x607   :  { %7272 = vmatmul.mubr.msk.bf16.gmra.mxu0 %vm617_vm1, %v3257_v13 }
 0x608   :  { %v3174_v59 = vpop.f32.mrf.mxu0  ;;  %3381 = vmatprep.mubr.bf16.mxu0 %v9895_v49 }
 0x609   :  { %v3258_v14 = vpack.c.bf16 %v3251_v60, %v3174_v59 }
 0x60a   :  { %v7698_v50 = vpop.f32.mrf.mxu0 }
 0x60c   :  { %v9065_v62 = vpop.f32.mrf.mxu1 }
 0x60e   :  { %v9067_v31 = vpop.f32.mrf.mxu1 }
 0x60f   :  { %7273 = vmatmul.mubr.msk.bf16.gmra.mxu0 %vm617_vm1, %v3258_v14 }
 0x610   :  { %v9070_v15 = vpop.f32.mrf.mxu1  ;;  %7706 = vmatprep.mubr.msk.f32.mxu0 %vm8190_vm0, %v9893_v24 }
 0x612   :  { %v9074_v34 = vpop.f32.mrf.mxu1 }
 0x614   :  { %v9076_v20 = vpop.f32.mrf.mxu1 }
 0x616   :  { %v9082_v35 = vpop.f32.mrf.mxu1 }
 0x617   :  { %7707 = vmatmul.mubr.msk.f32.vlgmr.msra.gmra.mxu0 %vm617_vm1, %v9080_v47 }
 0x618   :  { %v9088_v51 = vpop.f32.mrf.mxu1  ;;  %7715 = vmatpush3.xpose.msk.msra.mxu0 %vm617_vm1, %v9086_v28  ;;  %7716 = vmatprep.mubr.msk.f32.mxu0 %vm8190_vm0, %v9893_v24 }
 0x619   :  { %7724 = vmatprep.subr.mxu0 %v9893_v24 }
 0x61a   :  { %v9100_v45 = vpop.f32.mrf.mxu1 }
 0x61b   :  { %7717 = vmatmul.mubr.msk.f32.vlgmr.msra.gmra.mxu0 %vm617_vm1, %v9098_v4 }
 0x61c   :  { %v9107_v55 = vpop.f32.mrf.mxu1  ;;  %7725 = vmatpush3.xpose.msk.msra.mxu0 %vm617_vm1, %v9105_v17  ;;  %7726 = vmatprep.mubr.msk.f32.mxu0 %vm8190_vm0, %v9893_v24 }
 0x61d   :  { %7734 = vmatprep.subr.mxu0 %v9893_v24 }
 0x61e   :  { %v9119_v10 = vpop.f32.mrf.mxu1 }
 0x61f   :  { %7727 = vmatmul.mubr.msk.f32.vlgmr.msra.gmra.mxu0 %vm617_vm1, %v9117_v18 }
 0x620   :  { %v9126_v9 = vpop.f32.mrf.mxu1  ;;  %7735 = vmatpush3.xpose.msk.msra.mxu0 %vm617_vm1, %v9124_v32  ;;  %7736 = vmatprep.mubr.msk.f32.mxu0 %vm8190_vm0, %v9893_v24 }
 0x621   :  { %7744 = vmatprep.subr.mxu0 %v9893_v24 }
 0x622   :  { %v9134_v7 = vpop.f32.mrf.mxu1 }
 0x623   :  { %7737 = vmatmul.mubr.msk.f32.vlgmr.msra.gmra.mxu0 %vm617_vm1, %v9901_v46 }
 0x624   :  { %v9141_v21 = vpop.f32.mrf.mxu1  ;;  %7745 = vmatpush3.msra.mxu0 %v9139_v33  ;;  %7746 = vmatprep.mubr.msk.f32.mxu0 %vm8190_vm0, %v9893_v24 }
 0x625   :  { %9900 = vst [vmem:[#allocation9_spill] sm:$0xff] %v9141_v21  ;;  %7754 = vmatprep.subr.mxu0 %v9893_v24 }
 0x626   :  { %v9148_v58 = vpop.f32.mrf.mxu1 }
 0x627   :  { %9902 = vst [vmem:[#allocation5_spill] sm:$0xff] %v9148_v58 }
 0x628   :  { %v9151_v48 = vpop.f32.mrf.mxu1 }
 0x629   :  { %9903 = vst [vmem:[#allocation10_spill] sm:$0xff] %v9151_v48 }
 0x62a   :  { %v9153_v5 = vpop.f32.mrf.mxu1 }
 0x62b   :  { %9904 = vst [vmem:[#allocation11_spill] sm:$0xff] %v9153_v5 }
 0x62c   :  { %v3665_v53 = vpop.f32.mrf.mxu1 }
 0x62d   :  { %v4126_v41 = vmul.f32 0.125, %v3665_v53 }
 0x62e   :  { %v7713_v1 = vpop.f32.mrf.mxu1 }
 0x62f   :  { %v4136_v42 = vsel %vm1234_vm2, %v4126_v41, -inf }
 0x630   :  { %4137 = vmax.xlane.f32.xlu0 %v4136_v42  ;;  %v3817_v2 = vpop.f32.mrf.mxu1 }
 0x631   :  { %v4128_v43 = vmul.f32 0.125, %v3817_v2 }
 0x632   :  { %v7723_v30 = vpop.f32.mrf.mxu1 }
 0x633   :  { %v4142_v63 = vsel %vm1234_vm2, %v4128_v43, -inf }
 0x634   :  { %4143 = vmax.xlane.f32.xlu1 %v4142_v63  ;;  %v3969_v37 = vpop.f32.mrf.mxu1 }
 0x635   :  { %v4130_v44 = vmul.f32 0.125, %v3969_v37 }
 0x636   :  { %v7733_v56 = vpop.f32.mrf.mxu1 }
 0x637   :  { %v4148_v27 = vsel %vm1234_vm2, %v4130_v44, -inf }
 0x638   :  { %4149 = vmax.xlane.f32.xlu0 %v4148_v27  ;;  %v4121_v6 = vpop.f32.mrf.mxu1 }
 0x639   :  { %v4132_v3 = vmul.f32 0.125, %v4121_v6 }
 0x63a   :  { %v7743_v38 = vpop.f32.mrf.mxu1 }
 0x63b   :  { %v4154_v60 = vsel %vm1234_vm2, %v4132_v3, -inf }
 0x63c   :  { %4155 = vmax.xlane.f32.xlu0 %v4154_v60 }
 0x687   :  { %v9159_v23 = vpop.f32.mrf.mxu0 }
 0x689   :  { %v9161_v12 = vpop.f32.mrf.mxu0 }
 0x68b   :  { %v9163_v13 = vpop.f32.mrf.mxu0 }
 0x68d   :  { %v9165_v16 = vpop.f32.mrf.mxu0 }
 0x6b4   :  { %v9167_v50 = vpop.f32.mrf.mxu0 }
 0x6b6   :  { %v9169_v42 = vpop.f32.mrf.mxu0 }
 0x6b8   :  { %v9171_v37 = vpop.f32.mrf.mxu0 }
 0x6b9   :  { %v4138_v59 = vpop.xlane.xlu0 %4137 }
 0x6ba   :  { %v4158_v14 = vsub.f32 %v4126_v41, %v4138_v59  ;;  %v9173_v6 = vpop.f32.mrf.mxu0 }
 0x6bc   :  { %v4167_v53 = vmul.f32 1.442695, %v4158_v14 }
 0x6bd   :  { %v4144_v1 = vpop.xlane.xlu1 %4143 }
 0x6be   :  { %8090 = vpow2.f32 %v4167_v53  ;;  %v4160_v2 = vsub.f32 %v4128_v43, %v4144_v1 }
 0x6c0   :  { %v4171_v30 = vmul.f32 1.442695, %v4160_v2 }
 0x6c1   :  { %v4150_v63 = vpop.xlane.xlu0 %4149 }
 0x6c2   :  { %8092 = vpow2.f32 %v4171_v30  ;;  %v4162_v56 = vsub.f32 %v4130_v44, %v4150_v63 }
 0x6c4   :  { %v4175_v27 = vmul.f32 1.442695, %v4162_v56 }
 0x6c6   :  { %8094 = vpow2.f32 %v4175_v27 }
 0x6c7   :  { %v9175_v38 = vpop.f32.mrf.mxu0 }
 0x6c9   :  { %v9177_v60 = vpop.f32.mrf.mxu0 }
 0x6cb   :  { %v9179_v41 = vpop.eup %8090  ;;  %v9181_v59 = vpop.f32.mrf.mxu0 }
 0x6cc   :  { %v4184_v43 = vsel %vm1234_vm2, %v9179_v41, 0.0 }
 0x6cd   :  { %4185 = vadd.xlane.f32.xlu0 %v4184_v43  ;;  %v9185_v14 = vpop.f32.mrf.mxu0 }
 0x6cf   :  { %v9187_v53 = vpop.eup %8092  ;;  %v9189_v44 = vpop.f32.mrf.mxu0 }
 0x6d0   :  { %v4190_v1 = vsel %vm1234_vm2, %v9187_v53, 0.0 }
 0x6d1   :  { %4191 = vadd.xlane.f32.xlu1 %v4190_v1  ;;  %v9193_v2 = vpop.f32.mrf.mxu0 }
 0x6d2   :  { %9905 = vst [vmem:[#allocation12_spill] sm:$0xff] %v9193_v2 }
 0x6d3   :  { %v9195_v30 = vpop.eup %8094  ;;  %v9197_v63 = vpop.f32.mrf.mxu0 }
 0x6d4   :  { %v4196_v56 = vsel %vm1234_vm2, %v9195_v30, 0.0 }
 0x6d5   :  { %4197 = vadd.xlane.f32.xlu0 %v4196_v56  ;;  %v9201_v27 = vpop.f32.mrf.mxu0  ;;  %v4156_v56 = vpop.xlane.xlu0 %4155 }
 0x6d7   :  { %v3589_v43 = vpop.f32.mrf.mxu0 }
 0x6d9   :  { %v7708_v5 = vpop.f32.mrf.mxu0 }
 0x6da   :  { %v4164_v5 = vsub.f32 %v4132_v3, %v4156_v56 }
 0x6db   :  { %v3741_v0 = vpop.f32.mrf.mxu0 }
 0x6dd   :  { %v7718_v48 = vpop.f32.mrf.mxu0 }
 0x6de   :  { %v9265_v48 = vadd.f32 %v8823_v54, %v9031_v52 }
 0x6df   :  { %v3893_v58 = vpop.f32.mrf.mxu0 }
 0x6e1   :  { %v7728_v21 = vpop.f32.mrf.mxu0 }
 0x6e2   :  { %4958 = vrot.lane.b32.xlu1 %v9080_v47, %s8191_s6  ;;  %v4179_v21 = vmul.f32 1.442695, %v4164_v5  ;;  %v9228_v47 = vmul.f32 0.125, %v3893_v58 }
 0x6e3   :  { %v4045_v1 = vpop.f32.mrf.mxu0 }
 0x6e4   :  { %8096 = vpow2.f32 %v4179_v21 }
 0x6e5   :  { %v7738_v2 = vpop.f32.mrf.mxu0 }
 0x6e6   :  { %5038 = vrot.lane.b32.xlu1 %v8973_v36, %s8191_s6 }
 0x6eb   :  { %4960 = vrot.lane.b32.xlu0 %v9054_v29, %s8191_s6 }
 0x6ef   :  { %5116 = vrot.lane.b32.xlu0 %v9086_v28, %s8191_s6  ;;  %v4145_v28 = vsel %vm1234_vm2, %v9228_v47, -inf }
 0x6f1   :  { %v8097_v36 = vpop.eup %8096 }
 0x6f2   :  { %v4202_v29 = vsel %vm1234_vm2, %v8097_v36, 0.0 }
 0x6f3   :  { %5194 = vrot.lane.b32.xlu0 %v8519_v25, %s8191_s6  ;;  %v9224_v25 = vmul.f32 0.125, %v3589_v43 }
 0x6f7   :  { %5272 = vrot.lane.b32.xlu0 %v9105_v17, %s8191_s6 }
 0x6fb   :  { %5350 = vrot.lane.b32.xlu0 %v8555_v39, %s8191_s6  ;;  %v4133_v39 = vsel %vm1234_vm2, %v9224_v25, -inf }
 0x6ff   :  { %5428 = vrot.lane.b32.xlu0 %v9124_v32, %s8191_s6 }
 0x703   :  { %5506 = vrot.lane.b32.xlu0 %v8592_v57, %s8191_s6  ;;  %v9234_v57 = vmul.f32 0.125, %v4045_v1 }
 0x70a   :  { %4203 = vadd.xlane.f32.xlu1 %v4202_v29 }
 0x71b   :  { %5036 = vrot.lane.b32.xlu1 %v8483_v11, %s8191_s6  ;;  %v4151_v11 = vsel %vm1234_vm2, %v9234_v57, -inf }
 0x71f   :  { %5114 = vrot.lane.b32.xlu1 %v9098_v4, %s8191_s6 }
 0x722   :  { %4134 = vmax.xlane.f32.xlu0 %v4133_v39 }
 0x723   :  { %5192 = vrot.lane.b32.xlu1 %v8522_v26, %s8191_s6  ;;  %v9248_v26 = vmul.f32 0.125, %v3741_v0 }
 0x725   :  { %v4139_v17 = vsel %vm1234_vm2, %v9248_v26, -inf }
 0x726   :  { %4146 = vmax.xlane.f32.xlu0 %v4145_v28 }
 0x727   :  { %5270 = vrot.lane.b32.xlu1 %v9117_v18, %s8191_s6 }
 0x72a   :  { %4152 = vmax.xlane.f32.xlu0 %v4151_v11 }
 0x72b   :  { %5348 = vrot.lane.b32.xlu1 %v8558_v40, %s8191_s6 }
 0x72f   :  { %5426 = vrot.lane.b32.xlu1 %v9901_v46, %s8191_s6  ;;  %v9255_v46 = vadd.f32 %v8713_v22, %v9031_v52 }
 0x733   :  { %5504 = vrot.lane.b32.xlu1 %v9039_v61, %s8191_s6 }
 0x756   :  { %v4186_v4 = vpop.xlane.xlu0 %4185 }
 0x757   :  { %8098 = vrcp.f32 %v4186_v4  ;;  %4140 = vmax.xlane.f32.xlu1 %v4139_v17 }
 0x75a   :  { %v4192_v18 = vpop.xlane.xlu1 %4191 }
 0x75b   :  { %8100 = vrcp.f32 %v4192_v18 }
 0x75e   :  { %v4198_v32 = vpop.xlane.xlu0 %4197 }
 0x75f   :  { %8102 = vrcp.f32 %v4198_v32 }
 0x762   :  { %v4961_v54 = vpop.permute.xlu0 %4960 }
 0x764   :  { %v8099_v58 = vpop.eup %8098 }
 0x765   :  { %v4214_v40 = vmul.f32 %v8099_v58, %v9179_v41  ;;  %v9906_v41 = vld [vmem:[#allocation7_spill] sm:$0xff] }
 0x766   :  { %v9275_v2 = vadd.f32 %v9906_v41, %v9031_v52  ;;  %v5117_v43 = vpop.permute.xlu0 %5116 }
 0x767   :  { %7752 = vmatmul.mubr.msk.f32.vlgmr.msra.gmra.mxu1 %vm1234_vm2, %v4214_v40 }
 0x768   :  { %v8101_v0 = vpop.eup %8100  ;;  %7760 = vmatpush3.msra.mxu1 %v9255_v46  ;;  %7761 = vmatprep.mubr.msk.f32.mxu1 %vm8190_vm0, %v9893_v24 }
 0x769   :  { %7769 = vmatprep.subr.mxu1 %v9893_v24  ;;  %v4216_v61 = vmul.f32 %v8101_v0, %v9187_v53  ;;  %v4959_v53 = vpop.permute.xlu1 %4958 }
 0x76a   :  { %v5195_v56 = vpop.permute.xlu0 %5194 }
 0x76b   :  { %7762 = vmatmul.mubr.msk.f32.vlgmr.msra.gmra.mxu1 %vm1234_vm2, %v4216_v61 }
 0x76c   :  { %v8103_v22 = vpop.eup %8102  ;;  %7770 = vmatpush3.msra.mxu1 %v9265_v48  ;;  %7771 = vmatprep.mubr.msk.f32.mxu1 %vm8190_vm0, %v9893_v24 }
 0x76d   :  { %7779 = vmatprep.subr.mxu1 %v9893_v24  ;;  %v4218_v3 = vmul.f32 %v8103_v22, %v9195_v30  ;;  %v5039_v1 = vpop.permute.xlu1 %5038 }
 0x76e   :  { %v5273_v30 = vpop.permute.xlu0 %5272 }
 0x76f   :  { %7772 = vmatmul.mubr.msk.f32.vlgmr.msra.gmra.mxu1 %vm1234_vm2, %v4218_v3 }
 0x770   :  { %7780 = vmatpush3.msra.mxu1 %v9275_v2  ;;  %7781 = vmatprep.mubr.msk.f32.mxu1 %vm8190_vm0, %v9893_v24 }
 0x771   :  { %7784 = vmatprep.subr.mxu1 %v9893_v24 }
 0x772   :  { %v5351_v21 = vpop.permute.xlu0 %5350 }
 0x776   :  { %v5429_v28 = vpop.permute.xlu0 %5428 }
 0x77a   :  { %v5507_v17 = vpop.permute.xlu0 %5506 }
 0x793   :  { %v4204_v5 = vpop.xlane.xlu1 %4203 }
 0x794   :  { %8104 = vrcp.f32 %v4204_v5 }
 0x797   :  { %v5037_v29 = vpop.permute.xlu1 %5036 }
 0x79b   :  { %v5115_v4 = vpop.permute.xlu1 %5114 }
 0x7a1   :  { %v8105_v39 = vpop.eup %8104 }
 0x7a2   :  { %v4220_v11 = vmul.f32 %v8105_v39, %v8097_v36  ;;  %v5193_v36 = vpop.permute.xlu1 %5192 }
 0x7a4   :  { %7782 = vmatmul.mubr.msk.f32.vlgmr.msra.gmra.mxu1 %vm1234_vm2, %v4220_v11 }
 0x7a5   :  { %7785 = vmatpush3.xpose.msk.msra.mxu1 %vm617_vm1, %v4961_v54  ;;  %7786 = vmatprep.mubr.msk.f32.mxu1 %vm8190_vm0, %v9893_v24 }
 0x7a6   :  { %7789 = vmatprep.subr.mxu1 %v9893_v24  ;;  %v5271_v61 = vpop.permute.xlu1 %5270 }
 0x7a8   :  { %7787 = vmatmul.mubr.msk.f32.vlgmr.msra.gmra.mxu1 %vm617_vm1, %v4959_v53 }
 0x7a9   :  { %7790 = vmatpush3.xpose.msk.msra.mxu1 %vm617_vm1, %v5039_v1  ;;  %7791 = vmatprep.mubr.msk.f32.mxu1 %vm8190_vm0, %v9893_v24 }
 0x7aa   :  { %7794 = vmatprep.subr.mxu1 %v9893_v24 }
 0x7ab   :  { %v4135_v18 = vpop.xlane.xlu0 %4134 }
 0x7ac   :  { %v4157_v32 = vsub.f32 %v9224_v25, %v4135_v18  ;;  %7792 = vmatmul.mubr.msk.f32.vlgmr.msra.gmra.mxu1 %vm617_vm1, %v5037_v29 }
 0x7ad   :  { %7795 = vmatpush3.xpose.msk.msra.mxu1 %vm617_vm1, %v5117_v43  ;;  %7796 = vmatprep.mubr.msk.f32.mxu1 %vm8190_vm0, %v9893_v24 }
 0x7ae   :  { %v4165_v58 = vmul.f32 1.442695, %v4157_v32  ;;  %7799 = vmatprep.subr.mxu1 %v9893_v24 }
 0x7af   :  { %v4147_v40 = vpop.xlane.xlu0 %4146 }
 0x7b0   :  { %8106 = vpow2.f32 %v4165_v58  ;;  %v4161_v0 = vsub.f32 %v9228_v47, %v4147_v40  ;;  %7797 = vmatmul.mubr.msk.f32.vlgmr.msra.gmra.mxu1 %vm617_vm1, %v5115_v4  ;;  %v5349_v47 = vpop.permute.xlu1 %5348 }
 0x7b1   :  { %7800 = vmatpush3.xpose.msk.msra.mxu1 %vm617_vm1, %v5195_v56  ;;  %7801 = vmatprep.mubr.msk.f32.mxu1 %vm8190_vm0, %v9893_v24 }
 0x7b2   :  { %v4173_v25 = vmul.f32 1.442695, %v4161_v0  ;;  %7804 = vmatprep.subr.mxu1 %v9893_v24 }
 0x7b3   :  { %v4153_v1 = vpop.xlane.xlu0 %4152 }
 0x7b4   :  { %8108 = vpow2.f32 %v4173_v25  ;;  %7802 = vmatmul.mubr.msk.f32.vlgmr.msra.gmra.mxu1 %vm617_vm1, %v5193_v36  ;;  %v5427_v3 = vpop.permute.xlu1 %5426  ;;  %v4163_v56 = vsub.f32 %v9234_v57, %v4153_v1 }
 0x7b5   :  { %7805 = vmatpush3.xpose.msk.msra.mxu1 %vm617_vm1, %v5273_v30  ;;  %7806 = vmatprep.mubr.msk.f32.mxu1 %vm8190_vm0, %v9893_v24 }
 0x7b6   :  { %7809 = vmatprep.subr.mxu1 %v9893_v24 }
 0x7b8   :  { %7807 = vmatmul.mubr.msk.f32.vlgmr.msra.gmra.mxu1 %vm617_vm1, %v5271_v61  ;;  %v5505_v43 = vpop.permute.xlu1 %5504  ;;  %v9350_v61 = vadd.f32 %v8711_v8, %v9031_v52 }
 0x7b9   :  { %7810 = vmatpush3.xpose.msk.msra.mxu1 %vm617_vm1, %v5351_v21  ;;  %7811 = vmatprep.mubr.msk.f32.mxu1 %vm8190_vm0, %v9893_v24  ;;  %v4177_v21 = vmul.f32 1.442695, %v4163_v56 }
 0x7ba   :  { %7814 = vmatprep.subr.mxu1 %v9893_v24 }
 0x7bc   :  { %7812 = vmatmul.mubr.msk.f32.vlgmr.msra.gmra.mxu1 %vm617_vm1, %v5349_v47 }
 0x7bd   :  { %v8107_v22 = vpop.eup %8106  ;;  %7815 = vmatpush3.xpose.msk.msra.mxu1 %vm617_vm1, %v5429_v28  ;;  %7816 = vmatprep.mubr.msk.f32.mxu1 %vm8190_vm0, %v9893_v24 }
 0x7be   :  { %7819 = vmatprep.subr.mxu1 %v9893_v24  ;;  %v4181_v41 = vsel %vm1234_vm2, %v8107_v22, 0.0 }
 0x7bf   :  { %4182 = vadd.xlane.f32.xlu0 %v4181_v41 }
 0x7c0   :  { %7817 = vmatmul.mubr.msk.f32.vlgmr.msra.gmra.mxu1 %vm617_vm1, %v5427_v3 }
 0x7c1   :  { %v9321_v54 = vpop.eup %8108  ;;  %7820 = vmatpush3.xpose.msk.msra.mxu1 %vm617_vm1, %v5507_v17  ;;  %7821 = vmatprep.mubr.msk.f32.mxu1 %vm8190_vm0, %v9893_v24 }
 0x7c2   :  { %v4193_v53 = vsel %vm1234_vm2, %v9321_v54, 0.0  ;;  %7824 = vmatprep.subr.mxu1 %v9893_v24 }
 0x7c3   :  { %4194 = vadd.xlane.f32.xlu0 %v4193_v53 }
 0x7c4   :  { %7822 = vmatmul.mubr.msk.f32.vlgmr.msra.gmra.mxu1 %vm617_vm1, %v5505_v43 }
 0x7c5   :  { %7826 = vmatprep.mubr.msk.f32.mxu1 %vm8190_vm0, %v9893_v24 }
 0x7e0   :  { %v4141_v5 = vpop.xlane.xlu1 %4140 }
 0x7e1   :  { %v4159_v30 = vsub.f32 %v9248_v26, %v4141_v5 }
 0x7e3   :  { %v4169_v29 = vmul.f32 1.442695, %v4159_v30 }
 0x7e5   :  { %8110 = vpow2.f32 %v4169_v29 }
 0x7e6   :  { %8112 = vpow2.f32 %v4177_v21 }
 0x7f2   :  { %v9334_v39 = vpop.eup %8110 }
 0x7f3   :  { %v4187_v28 = vsel %vm1234_vm2, %v9334_v39, 0.0  ;;  %v9338_v11 = vpop.eup %8112 }
 0x7f4   :  { %4188 = vadd.xlane.f32.xlu1 %v4187_v28  ;;  %v4199_v4 = vsel %vm1234_vm2, %v9338_v11, 0.0 }
 0x7f8   :  { %4200 = vadd.xlane.f32.xlu1 %v4199_v4 }
 0x827   :  { %v9342_v57 = vpop.f32.mrf.mxu1 }
 0x829   :  { %v7753_v17 = vpop.f32.mrf.mxu1 }
 0x82b   :  { %v9344_v26 = vpop.f32.mrf.mxu1 }
 0x82d   :  { %v7763_v36 = vpop.f32.mrf.mxu1 }
 0x82f   :  { %v9346_v18 = vpop.f32.mrf.mxu1 }
 0x831   :  { %v7773_v32 = vpop.f32.mrf.mxu1 }
 0x848   :  { %v4183_v58 = vpop.xlane.xlu0 %4182 }
 0x849   :  { %8114 = vrcp.f32 %v4183_v58 }
 0x856   :  { %v8115_v40 = vpop.eup %8114 }
 0x857   :  { %v4213_v0 = vmul.f32 %v8115_v40, %v8107_v22 }
 0x859   :  { %7747 = vmatmul.mubr.msk.f32.vlgmr.msra.gmra.mxu0 %vm1234_vm2, %v4213_v0 }
 0x85a   :  { %7755 = vmatpush3.msra.mxu0 %v9350_v61  ;;  %7756 = vmatprep.mubr.msk.f32.mxu0 %vm8190_vm0, %v9893_v24 }
 0x85b   :  { %7764 = vmatprep.subr.mxu0 %v9893_v24 }
 0x864   :  { %v9357_v25 = vpop.f32.mrf.mxu1 }
 0x866   :  { %v7783_v47 = vpop.f32.mrf.mxu1 }
 0x868   :  { %v5032_v3 = vpop.f32.mrf.mxu1 }
 0x869   :  { %v9359_v41 = vmul.f32 0.125, %v5032_v3  ;;  %v4195_v3 = vpop.xlane.xlu0 %4194 }
 0x86a   :  { %v7788_v22 = vpop.f32.mrf.mxu1 }
 0x86b   :  { %v5590_v8 = vsel %vm1234_vm2, %v9359_v41, -inf }
 0x86c   :  { %5591 = vmax.xlane.f32.xlu0 %v5590_v8  ;;  %v5110_v53 = vpop.f32.mrf.mxu1 }
 0x86d   :  { %v9363_v43 = vmul.f32 0.125, %v5110_v53 }
 0x86e   :  { %v7793_v1 = vpop.f32.mrf.mxu1 }
 0x86f   :  { %v5593_v56 = vsel %vm1234_vm2, %v9363_v43, -inf }
 0x870   :  { %5594 = vmax.xlane.f32.xlu1 %v5593_v56  ;;  %v5188_v5 = vpop.f32.mrf.mxu1 }
 0x871   :  { %v9367_v30 = vmul.f32 0.125, %v5188_v5 }
 0x872   :  { %v7798_v21 = vpop.f32.mrf.mxu1 }
 0x873   :  { %v5596_v29 = vsel %vm1234_vm2, %v9367_v30, -inf }
 0x874   :  { %5597 = vmax.xlane.f32.xlu0 %v5596_v29  ;;  %v5266_v28 = vpop.f32.mrf.mxu1 }
 0x875   :  { %v9371_v4 = vmul.f32 0.125, %v5266_v28 }
 0x876   :  { %v7803_v17 = vpop.f32.mrf.mxu1 }
 0x877   :  { %v5599_v36 = vsel %vm1234_vm2, %v9371_v4, -inf }
 0x878   :  { %5600 = vmax.xlane.f32.xlu1 %v5599_v36  ;;  %v5344_v32 = vpop.f32.mrf.mxu1 }
 0x879   :  { %v9375_v58 = vmul.f32 0.125, %v5344_v32 }
 0x87a   :  { %v7808_v40 = vpop.f32.mrf.mxu1 }
 0x87b   :  { %v5602_v0 = vsel %vm1234_vm2, %v9375_v58, -inf }
 0x87c   :  { %5603 = vmax.xlane.f32.xlu0 %v5602_v0  ;;  %v5422_v47 = vpop.f32.mrf.mxu1 }
 0x87d   :  { %v9379_v22 = vmul.f32 0.125, %v5422_v47  ;;  %v4189_v8 = vpop.xlane.xlu1 %4188  ;;  %v9907_v47 = vld [vmem:[#allocation8_spill] sm:$0xff] }
 0x87e   :  { %8116 = vrcp.f32 %v4189_v8  ;;  %v7813_v53 = vpop.f32.mrf.mxu1 }
 0x87f   :  { %v5605_v1 = vsel %vm1234_vm2, %v9379_v22, -inf  ;;  %8118 = vrcp.f32 %v4195_v3  ;;  %v9390_v3 = vadd.f32 %v9907_v47, %v9031_v52 }
 0x880   :  { %5606 = vmax.xlane.f32.xlu1 %v5605_v1  ;;  %v5500_v56 = vpop.f32.mrf.mxu1  ;;  %v9908_v1 = vld [vmem:[#allocation6_spill] sm:$0xff] }
 0x881   :  { %v9383_v5 = vmul.f32 0.125, %v5500_v56  ;;  %v4201_v21 = vpop.xlane.xlu1 %4200  ;;  %v9403_v56 = vadd.f32 %v9908_v1, %v9031_v52  ;;  %v7991_v52 = vld [vmem:[%s9869_s7 + $0xa4] ss:$8 sps:$4 sm:$0xff]  }
 0x882   :  { %v7818_v29 = vpop.f32.mrf.mxu1  ;;  %8120 = vrcp.f32 %v4201_v21 }
 0x883   :  { %v5608_v28 = vsel %vm1234_vm2, %v9383_v5, -inf  ;;  %v7994_v29 = vld [vmem:[%s9869_s7 + $0x94] ss:$8 sps:$4 sm:$0xff]  }
 0x884   :  { %5609 = vmax.xlane.f32.xlu0 %v5608_v28  ;;  %v5578_v17 = vpop.f32.mrf.mxu1  ;;  %v7997_v28 = vld [vmem:[%s9869_s7 + $0x84] ss:$8 sps:$4 sm:$0xff]  }
 0x886   :  { %v7823_v36 = vpop.f32.mrf.mxu1 }
 0x887   :  { %v7995_v36 = vld [vmem:[%s9869_s7 + $0x80] ss:$8 sps:$4 sm:$0xff]  }
 0x88b   :  { %v8117_v32 = vpop.eup %8116 }
 0x88c   :  { %v4215_v40 = vmul.f32 %v8117_v32, %v9334_v39  ;;  %v8119_v0 = vpop.eup %8118  ;;  %v7988_v39 = vld [vmem:[%s9869_s7 + $0xb4] ss:$8 sps:$4 sm:$0xff]  }
 0x88d   :  { %v4217_v8 = vmul.f32 %v8119_v0, %v9321_v54  ;;  %v7986_v54 = vld [vmem:[%s9869_s7 + $0xb0] ss:$8 sps:$4 sm:$0xff]  }
 0x88e   :  { %7757 = vmatmul.mubr.msk.f32.vlgmr.msra.gmra.mxu0 %vm1234_vm2, %v4215_v40 }
 0x88f   :  { %7765 = vmatpush3.msra.mxu0 %v9390_v3  ;;  %7766 = vmatprep.mubr.msk.f32.mxu0 %vm8190_vm0, %v9893_v24  ;;  %v8121_v53 = vpop.eup %8120 }
 0x890   :  { %7774 = vmatprep.subr.mxu0 %v9893_v24  ;;  %v4219_v21 = vmul.f32 %v8121_v53, %v9338_v11  ;;  %v7992_v11 = vld [vmem:[%s9869_s7 + $0x90] ss:$8 sps:$4 sm:$0xff]  }
 0x891   :  { %5756 = vrot.lane.b32.xlu1 %v9044_v19, %s8191_s6  ;;  %v7989_v19 = vld [vmem:[%s9869_s7 + $0xa0] ss:$8 sps:$4 sm:$0xff]  }
 0x892   :  { %7767 = vmatmul.mubr.msk.f32.vlgmr.msra.gmra.mxu0 %vm1234_vm2, %v4217_v8 }
 0x893   :  { %7775 = vmatpush3.msra.mxu0 %v9403_v56  ;;  %7776 = vmatprep.mubr.msk.f32.mxu0 %vm8190_vm0, %v9893_v24 }
 0x894   :  { %4877 = vmatprep.subr.bf16.mxu0 %v7988_v39 }
 0x896   :  { %7777 = vmatmul.mubr.msk.f32.vlgmr.msra.gmra.mxu0 %vm1234_vm2, %v4219_v21 }
 0x897   :  { %4878 = vmatpush1.bf16.msra.mxu0 %v7986_v54  ;;  %4901 = vmatprep.mubr.bf16.mxu0 %v9895_v49 }
 0x898   :  { %4879 = vmatprep.subr.bf16.mxu0 %v7991_v52 }
 0x89a   :  { %5679 = vrot.lane.b32.xlu0 %v9139_v33, %s8191_s6  ;;  %v5589_v33 = vmul.f32 0.125, %v5578_v17 }
 0x89b   :  { %4880 = vmatpush1.bf16.msra.mxu0 %v7989_v19 }
 0x89c   :  { %4881 = vmatprep.subr.bf16.mxu0 %v7994_v29  ;;  %v5611_v32 = vsel %vm1234_vm2, %v5589_v33, -inf }
 0x89f   :  { %4882 = vmatpush1.bf16.msra.mxu0 %v7992_v11 }
 0x8a0   :  { %4883 = vmatprep.subr.bf16.mxu0 %v7997_v28 }
 0x8a3   :  { %4884 = vmatpush1.bf16.msra.mxu0 %v7995_v36 }
 0x8a4   :  { %7839 = vmatprep.subr.mxu0 %v9893_v24 }
 0x8b5   :  { %5612 = vmax.xlane.f32.xlu1 %v5611_v32 }
 0x8c6   :  { %5910 = vrot.lane.b32.xlu1 %v9255_v46, %s8191_s6 }
 0x8f5   :  { %v5592_v40 = vpop.xlane.xlu0 %5591 }
 0x8f6   :  { %v5614_v0 = vsub.f32 %v9359_v41, %v5592_v40 }
 0x8f8   :  { %v5622_v47 = vmul.f32 1.442695, %v5614_v0 }
 0x8f9   :  { %v5595_v8 = vpop.xlane.xlu1 %5594 }
 0x8fa   :  { %8122 = vpow2.f32 %v5622_v47  ;;  %v5615_v39 = vsub.f32 %v9363_v43, %v5595_v8 }
 0x8fc   :  { %v5624_v53 = vmul.f32 1.442695, %v5615_v39 }
 0x8fd   :  { %v5598_v21 = vpop.xlane.xlu0 %5597 }
 0x8fe   :  { %8124 = vpow2.f32 %v5624_v53  ;;  %v5616_v0 = vsub.f32 %v9367_v30, %v5598_v21 }
 0x900   :  { %v5626_v47 = vmul.f32 1.442695, %v5616_v0 }
 0x901   :  { %v5601_v1 = vpop.xlane.xlu1 %5600 }
 0x902   :  { %v5617_v54 = vsub.f32 %v9371_v4, %v5601_v1 }
 0x904   :  { %v5628_v17 = vmul.f32 1.442695, %v5617_v54 }
 0x905   :  { %v5604_v19 = vpop.xlane.xlu0 %5603 }
 0x906   :  { %8126 = vpow2.f32 %v5628_v17  ;;  %v5618_v8 = vsub.f32 %v9375_v58, %v5604_v19 }
 0x907   :  { %v9444_v52 = vpop.eup %8122  ;;  %8128 = vpow2.f32 %v5626_v47 }
 0x908   :  { %v5638_v46 = vsel %vm1234_vm2, %v9444_v52, 0.0  ;;  %v5630_v39 = vmul.f32 1.442695, %v5618_v8 }
 0x909   :  { %5639 = vadd.xlane.f32.xlu0 %v5638_v46  ;;  %v5607_v53 = vpop.xlane.xlu1 %5606 }
 0x90a   :  { %8130 = vpow2.f32 %v5630_v39 }
 0x90b   :  { %v9448_v41 = vpop.eup %8124 }
 0x90c   :  { %v5641_v43 = vsel %vm1234_vm2, %v9448_v41, 0.0 }
 0x90d   :  { %v5610_v29 = vpop.xlane.xlu0 %5609  ;;  %5642 = vadd.xlane.f32.xlu1 %v5641_v43  ;;  %v5757_v30 = vpop.permute.xlu1 %5756 }
 0x90e   :  { %v5620_v54 = vsub.f32 %v9383_v5, %v5610_v29 }
 0x910   :  { %v5634_v17 = vmul.f32 1.442695, %v5620_v54 }
 0x911   :  { %v5680_v11 = vpop.permute.xlu0 %5679 }
 0x912   :  { %7825 = vmatpush3.msra.mxu1 %v5680_v11 }
 0x913   :  { %v9452_v4 = vpop.eup %8126  ;;  %7829 = vmatprep.subr.mxu1 %v9893_v24 }
 0x914   :  { %v5647_v28 = vsel %vm1234_vm2, %v9452_v4, 0.0 }
 0x915   :  { %5648 = vadd.xlane.f32.xlu1 %v5647_v28 }
 0x919   :  { %v4290_v36 = vpop.f32.mrf.mxu0 }
 0x91a   :  { %v4805_v32 = vpack.c.bf16 %v9342_v57, %v4290_v36  ;;  %v5619_v57 = vsub.f32 %v9379_v22, %v5607_v53 }
 0x91b   :  { %v7748_v40 = vpop.f32.mrf.mxu0 }
 0x91c   :  { %7318 = vmatmul.mubr.msk.bf16.vlgmr.msra.gmra.mxu0 %vm617_vm1, %v4805_v32  ;;  %v5632_v1 = vmul.f32 1.442695, %v5619_v57 }
 0x91d   :  { %4911 = vmatprep.mubr.bf16.mxu0 %v9895_v49 }
 0x91e   :  { %8132 = vpow2.f32 %v5632_v1 }
 0x91f   :  { %5833 = vrot.lane.b32.xlu0 %v9350_v61, %s8191_s6  ;;  %v9468_v61 = vpop.eup %8128  ;;  %8134 = vpow2.f32 %v5634_v17 }
 0x920   :  { %v9472_v21 = vpop.eup %8130 }
 0x921   :  { %v5650_v22 = vsel %vm1234_vm2, %v9472_v21, 0.0 }
 0x926   :  { %6064 = vrot.lane.b32.xlu1 %v9265_v48, %s8191_s6  ;;  %v5644_v48 = vsel %vm1234_vm2, %v9468_v61, 0.0 }
 0x92b   :  { %v9477_v43 = vpop.eup %8132 }
 0x92c   :  { %v5653_v29 = vsel %vm1234_vm2, %v9477_v43, 0.0  ;;  %v9481_v11 = vpop.eup %8134 }
 0x93e   :  { %5645 = vadd.xlane.f32.xlu0 %v5644_v48  ;;  %v5613_v58 = vpop.xlane.xlu1 %5612 }
 0x93f   :  { %v5621_v46 = vsub.f32 %v5589_v33, %v5613_v58  ;;  %v5656_v33 = vsel %vm1234_vm2, %v9481_v11, 0.0 }
 0x941   :  { %v5636_v19 = vmul.f32 1.442695, %v5621_v46 }
 0x942   :  { %5651 = vadd.xlane.f32.xlu0 %v5650_v22  ;;  %v5911_v5 = vpop.permute.xlu1 %5910 }
 0x943   :  { %8136 = vpow2.f32 %v5636_v19  ;;  %7840 = vmatpush3.msra.mxu0 %v5911_v5 }
 0x944   :  { %7849 = vmatprep.subr.mxu0 %v9893_v24 }
 0x94a   :  { %5654 = vadd.xlane.f32.xlu1 %v5653_v29 }
 0x94e   :  { %v4436_v28 = vpop.f32.mrf.mxu0  ;;  %5657 = vadd.xlane.f32.xlu1 %v5656_v33 }
 0x94f   :  { %v4806_v36 = vpack.c.bf16 %v9344_v26, %v4436_v28  ;;  %v8000_v28 = vld [vmem:[%s9869_s7 + $0xf4] ss:$8 sps:$4 sm:$0xff]  }
 0x950   :  { %v9486_v32 = vpop.eup %8136  ;;  %v7758_v40 = vpop.f32.mrf.mxu0 }
 0x951   :  { %7319 = vmatmul.mubr.msk.bf16.gmra.mxu0 %vm617_vm1, %v4806_v36  ;;  %v5659_v0 = vsel %vm1234_vm2, %v9486_v32, 0.0 }
 0x952   :  { %v4582_v47 = vpop.f32.mrf.mxu0  ;;  %5660 = vadd.xlane.f32.xlu1 %v5659_v0  ;;  %4921 = vmatprep.mubr.bf16.mxu0 %v9895_v49 }
 0x953   :  { %v4807_v53 = vpack.c.bf16 %v9346_v18, %v4582_v47  ;;  %v3481_v47 = vadd.f32 %v9067_v31, %v9161_v12 }
 0x954   :  { %v7768_v8 = vpop.f32.mrf.mxu0 }
 0x956   :  { %v4728_v39 = vpop.f32.mrf.mxu0 }
 0x957   :  { %v4808_v26 = vpack.c.bf16 %v9357_v25, %v4728_v39 }
 0x958   :  { %v7778_v57 = vpop.f32.mrf.mxu0  ;;  %5987 = vrot.lane.b32.xlu0 %v9390_v3, %s8191_s6 }
 0x959   :  { %7320 = vmatmul.mubr.msk.bf16.gmra.mxu0 %vm617_vm1, %v4807_v53  ;;  %v3485_v57 = vadd.f32 %v9074_v34, %v9165_v16 }
 0x95a   :  { %4931 = vmatprep.mubr.bf16.mxu0 %v9895_v49 }
 0x95c   :  { %6141 = vrot.lane.b32.xlu0 %v9403_v56, %s8191_s6 }
 0x961   :  { %7321 = vmatmul.mubr.msk.bf16.gmra.mxu0 %vm617_vm1, %v4808_v26 }
 0x962   :  { %7841 = vmatprep.mubr.msk.f32.mxu0 %vm8190_vm0, %v9893_v24 }
 0x963   :  { %6218 = vrot.lane.b32.xlu1 %v9275_v2, %s8191_s6 }
 0x992   :  { %v5640_v18 = vpop.xlane.xlu0 %5639 }
 0x993   :  { %8138 = vrcp.f32 %v5640_v18 }
 0x996   :  { %v5643_v3 = vpop.xlane.xlu1 %5642  ;;  %v5834_v56 = vpop.permute.xlu0 %5833 }
 0x997   :  { %8140 = vrcp.f32 %v5643_v3 }
 0x99e   :  { %v5649_v1 = vpop.xlane.xlu1 %5648 }
 0x99f   :  { %8142 = vrcp.f32 %v5649_v1 }
 0x9a0   :  { %v8139_v54 = vpop.eup %8138 }
 0x9a1   :  { %v5670_v17 = vmul.f32 %v8139_v54, %v9444_v52  ;;  %v8004_v54 = vld [vmem:[%s9869_s7 + $0xd0] ss:$8 sps:$4 sm:$0xff]  }
 0x9a3   :  { %7827 = vmatmul.mubr.msk.f32.vlgmr.msra.gmra.mxu1 %vm1234_vm2, %v5670_v17  ;;  %v8009_v17 = vld [vmem:[%s9869_s7 + $0xc4] ss:$8 sps:$4 sm:$0xff]  }
 0x9a4   :  { %v8141_v25 = vpop.eup %8140  ;;  %7830 = vmatpush3.msra.mxu1 %v5757_v30  ;;  %7831 = vmatprep.mubr.msk.f32.mxu1 %vm8190_vm0, %v9893_v24  ;;  %v6065_v30 = vpop.permute.xlu1 %6064 }
 0x9a5   :  { %7834 = vmatprep.subr.mxu1 %v9893_v24  ;;  %v5671_v2 = vmul.f32 %v8141_v25, %v9448_v41  ;;  %v3489_v25 = vadd.f32 %v9076_v20, %v9167_v50  ;;  %v3499_v20 = vadd.f32 %v9107_v55, %v9175_v38  ;;  %v9909_v38 = vld [vmem:[#allocation9_spill] sm:$0xff] }
 0x9a7   :  { %7832 = vmatmul.mubr.msk.f32.vlgmr.msra.gmra.mxu1 %vm1234_vm2, %v5671_v2 }
 0x9a8   :  { %7835 = vmatpush3.msra.mxu1 %v5834_v56  ;;  %7836 = vmatprep.mubr.msk.f32.mxu1 %vm8190_vm0, %v9893_v24  ;;  %v3491_v56 = vadd.f32 %v9082_v35, %v9169_v42  ;;  %v3501_v42 = vadd.f32 %v9119_v10, %v9177_v60  ;;  %v9910_v60 = vld [vmem:[#allocation12_spill] sm:$0xff] }
 0x9a9   :  { %7844 = vmatprep.subr.mxu1 %v9893_v24 }
 0x9ac   :  { %v8143_v52 = vpop.eup %8142 }
 0x9ad   :  { %v5673_v48 = vmul.f32 %v8143_v52, %v9452_v4 }
 0x9af   :  { %7842 = vmatmul.mubr.msk.f32.vlgmr.msra.gmra.mxu0 %vm1234_vm2, %v5673_v48 }
 0x9b0   :  { %7850 = vmatpush3.msra.mxu0 %v6065_v30  ;;  %7851 = vmatprep.mubr.msk.f32.mxu0 %vm8190_vm0, %v9893_v24  ;;  %v3493_v30 = vadd.f32 %v9088_v51, %v9171_v37  ;;  %v3503_v37 = vadd.f32 %v9126_v9, %v9181_v59  ;;  %v9912_v59 = vld [vmem:[#allocation10_spill] sm:$0xff] }
 0x9b1   :  { %7859 = vmatprep.subr.mxu0 %v9893_v24 }
 0x9c7   :  { %v5646_v41 = vpop.xlane.xlu0 %5645 }
 0x9c8   :  { %8144 = vrcp.f32 %v5646_v41 }
 0x9cb   :  { %v5652_v58 = vpop.xlane.xlu0 %5651 }
 0x9cc   :  { %8146 = vrcp.f32 %v5652_v58 }
 0x9cf   :  { %v5988_v5 = vpop.permute.xlu0 %5987 }
 0x9d3   :  { %v5655_v46 = vpop.xlane.xlu1 %5654  ;;  %v6142_v40 = vpop.permute.xlu0 %6141 }
 0x9d4   :  { %8148 = vrcp.f32 %v5655_v46  ;;  %v3495_v46 = vadd.f32 %v9100_v45, %v9173_v6  ;;  %v3505_v6 = vadd.f32 %v9134_v7, %v9185_v14 }
 0x9d5   :  { %v8145_v19 = vpop.eup %8144 }
 0x9d6   :  { %v5672_v22 = vmul.f32 %v8145_v19, %v9468_v61  ;;  %v3479_v61 = vadd.f32 %v9065_v62, %v9159_v23  ;;  %v3483_v62 = vadd.f32 %v9070_v15, %v9163_v13  ;;  %v7998_v15 = vld [vmem:[%s9869_s7 + $0xf0] ss:$8 sps:$4 sm:$0xff]   ;;  %v8003_v13 = vld [vmem:[%s9869_s7 + $0xe4] ss:$8 sps:$4 sm:$0xff]  }
 0x9d7   :  { %v5658_v4 = vpop.xlane.xlu1 %5657 }
 0x9d8   :  { %8150 = vrcp.f32 %v5658_v4  ;;  %7837 = vmatmul.mubr.msk.f32.vlgmr.msra.gmra.mxu1 %vm1234_vm2, %v5672_v22 }
 0x9d9   :  { %v8147_v29 = vpop.eup %8146  ;;  %7845 = vmatpush3.msra.mxu1 %v5988_v5  ;;  %7846 = vmatprep.mubr.msk.f32.mxu1 %vm8190_vm0, %v9893_v24 }
 0x9da   :  { %v5674_v33 = vmul.f32 %v8147_v29, %v9472_v21  ;;  %7854 = vmatprep.subr.mxu1 %v9893_v24 }
 0x9db   :  { %v5661_v36 = vpop.xlane.xlu1 %5660 }
 0x9dc   :  { %8152 = vrcp.f32 %v5661_v36  ;;  %v4903_v0 = vpop.f32.mrf.mxu0  ;;  %7847 = vmatmul.mubr.msk.f32.vlgmr.msra.gmra.mxu1 %vm1234_vm2, %v5674_v33  ;;  %v3509_v33 = vadd.f32 %v9909_v38, %v9189_v44  ;;  %v8010_v44 = vld [vmem:[%s9870_s9 + $0x78] sm:$0xff]  }
 0x9dd   :  { %v9534_v8 = vadd.f32 %v4903_v0, %v3479_v61  ;;  %7855 = vmatpush3.msra.mxu1 %v6142_v40  ;;  %7856 = vmatprep.mubr.msk.f32.mxu1 %vm8190_vm0, %v9893_v24  ;;  %v9911_v61 = vld [vmem:[#allocation5_spill] sm:$0xff]  ;;  %v3513_v0 = vadd.f32 %v9912_v59, %v9197_v63  ;;  %v8013_v63 = vld [vmem:[%s9870_s9 + $0x30] sm:$0xff]  }
 0x9de   :  { %v4905_v21 = vpop.f32.mrf.mxu0  ;;  %6366 = vmatprep.subr.bf16.mxu1 %v8000_v28  ;;  %v3511_v36 = vadd.f32 %v9911_v61, %v9910_v60  ;;  %v9913_v61 = vld [vmem:[#allocation4_spill] sm:$0xff] }
 0x9df   :  { %v9540_v23 = vadd.f32 %v4905_v21, %v3481_v47  ;;  %v6219_v3 = vpop.permute.xlu1 %6218  ;;  %v8011_v21 = vld [vmem:[%s9870_s9 + $0x38] sm:$0xff]  }
 0x9e0   :  { %v4907_v39 = vpop.f32.mrf.mxu0 }
 0x9e1   :  { %v8149_v53 = vpop.eup %8148  ;;  %v9544_v26 = vadd.f32 %v4907_v39, %v3483_v62  ;;  %v8012_v62 = vld [vmem:[%s9870_s9 + $0x70] sm:$0xff]   ;;  %v8014_v39 = vld [vmem:[%s9870_s9 + $0x68] sm:$0xff]  }
 0x9e2   :  { %v4909_v31 = vpop.f32.mrf.mxu0  ;;  %v5675_v12 = vmul.f32 %v8149_v53, %v9477_v43  ;;  %v8001_v43 = vld [vmem:[%s9869_s7 + $0xe0] ss:$8 sps:$4 sm:$0xff]  }
 0x9e3   :  { %v9547_v18 = vadd.f32 %v4909_v31, %v3485_v57  ;;  %v8015_v53 = vld [vmem:[%s9870_s9 + $0x28] sm:$0xff]   ;;  %v8016_v57 = vld [vmem:[%s9870_s9 + $0x60] sm:$0xff]  }
 0x9e4   :  { %7852 = vmatmul.mubr.msk.f32.vlgmr.msra.gmra.mxu0 %vm1234_vm2, %v5675_v12  ;;  %v8017_v31 = vld [vmem:[%s9870_s9 + $0x20] sm:$0xff]   ;;  %v8018_v12 = vld [vmem:[%s9870_s9 + $0x58] sm:$0xff]  }
 0x9e5   :  { %v8151_v1 = vpop.eup %8150  ;;  %7860 = vmatpush3.msra.mxu0 %v6219_v3  ;;  %7861 = vmatprep.mubr.msk.f32.mxu0 %vm8190_vm0, %v9893_v24  ;;  %v8019_v3 = vld [vmem:[%s9870_s9 + $0x18] sm:$0xff]  }
 0x9e6   :  { %v5676_v34 = vmul.f32 %v8151_v1, %v9481_v11  ;;  %v8006_v11 = vld [vmem:[%s9869_s7 + $0xd4] ss:$8 sps:$4 sm:$0xff]   ;;  %7504 = vmatprep.subr.bf16.mxu0 %v8010_v44 }
 0x9e8   :  { %7857 = vmatmul.mubr.msk.f32.vlgmr.msra.gmra.mxu1 %vm1234_vm2, %v5676_v34 }
 0x9e9   :  { %v8153_v16 = vpop.eup %8152  ;;  %6367 = vmatpush1.bf16.msra.mxu1 %v7998_v15  ;;  %6390 = vmatprep.mubr.bf16.mxu1 %v9895_v49 }
 0x9ea   :  { %v5677_v24 = vmul.f32 %v8153_v16, %v9486_v32  ;;  %6368 = vmatprep.subr.bf16.mxu1 %v8003_v13  ;;  %v8007_v32 = vld [vmem:[%s9869_s7 + $0xc0] ss:$8 sps:$4 sm:$0xff]  }
 0x9ec   :  { %7862 = vmatmul.mubr.msk.f32.vlgmr.msra.gmra.mxu0 %vm1234_vm2, %v5677_v24 }
 0x9ed   :  { %6369 = vmatpush1.bf16.msra.mxu1 %v8001_v43  ;;  %7505 = vmatpush3.bf16.msra.mxu0 %v8011_v21 }
 0x9ee   :  { %6370 = vmatprep.subr.bf16.mxu1 %v8006_v11  ;;  %7506 = vmatprep.subr.bf16.mxu0 %v8012_v62 }
 0x9f1   :  { %6371 = vmatpush1.bf16.msra.mxu1 %v8004_v54  ;;  %7507 = vmatpush3.bf16.msra.mxu0 %v8013_v63 }
 0x9f2   :  { %6372 = vmatprep.subr.bf16.mxu1 %v8009_v17  ;;  %7508 = vmatprep.subr.bf16.mxu0 %v8014_v39 }
 0x9f5   :  { %6373 = vmatpush1.bf16.msra.mxu1 %v8007_v32  ;;  %7509 = vmatpush3.bf16.msra.mxu0 %v8015_v53 }
 0x9f6   :  { %7510 = vmatprep.subr.bf16.mxu0 %v8016_v57 }
 0x9f9   :  { %7511 = vmatpush3.bf16.msra.mxu0 %v8017_v31 }
 0x9fa   :  { %7512 = vmatprep.subr.bf16.mxu0 %v8018_v12 }
 0x9fd   :  { %7513 = vmatpush3.bf16.msra.mxu0 %v8019_v3 }
 0xa11   :  { %v4913_v2 = vpop.f32.mrf.mxu0 }
 0xa12   :  { %v9582_v52 = vadd.f32 %v4913_v2, %v3489_v25 }
 0xa13   :  { %v4915_v48 = vpop.f32.mrf.mxu0 }
 0xa14   :  { %v9586_v41 = vadd.f32 %v4915_v48, %v3491_v56 }
 0xa15   :  { %v4917_v58 = vpop.f32.mrf.mxu0 }
 0xa16   :  { %v9590_v19 = vadd.f32 %v4917_v58, %v3493_v30 }
 0xa17   :  { %v4919_v22 = vpop.f32.mrf.mxu0 }
 0xa18   :  { %v9594_v50 = vadd.f32 %v4919_v22, %v3495_v46  ;;  %v8020_v22 = vld [vmem:[%s9870_s9 + $0x50] sm:$0xff]  }
 0xa19   :  { %v4923_v35 = vpop.f32.mrf.mxu0  ;;  %7514 = vmatprep.subr.bf16.mxu0 %v8020_v22 }
 0xa1a   :  { %v9598_v5 = vadd.f32 %v4923_v35, %v3499_v20  ;;  %v8021_v35 = vld [vmem:[%s9870_s9 + $0x10] sm:$0xff]  }
 0xa1b   :  { %v4925_v51 = vpop.f32.mrf.mxu0  ;;  %7515 = vmatpush3.bf16.msra.mxu0 %v8021_v35 }
 0xa1c   :  { %v9602_v4 = vadd.f32 %v4925_v51, %v3501_v42 }
 0xa1d   :  { %v4927_v45 = vpop.f32.mrf.mxu0 }
 0xa1e   :  { %v9606_v29 = vadd.f32 %v4927_v45, %v3503_v37  ;;  %v8023_v37 = vld [vmem:[%s9870_s9 + $0x8] sm:$0xff]   ;;  %v8024_v45 = vld [vmem:[%s9870_s9 + $0x40] sm:$0xff]  }
 0xa1f   :  { %v4929_v55 = vpop.f32.mrf.mxu0 }
 0xa20   :  { %v9610_v28 = vadd.f32 %v4929_v55, %v3505_v6  ;;  %v8025_v6 = vld [vmem:[%s9870_s9] sm:$0xff]  }
 0xa21   :  { %v4933_v10 = vpop.f32.mrf.mxu0 }
 0xa22   :  { %v9614_v40 = vadd.f32 %v4933_v10, %v3509_v33  ;;  %v6447_v33 = vld [vmem:[%s9871_s8] sm:$0x3] }
 0xa23   :  { %v4935_v9 = vpop.f32.mrf.mxu0 }
 0xa24   :  { %v9618_v47 = vadd.f32 %v4935_v9, %v3511_v36  ;;  %v6456_v36 = vrot.slane %v6447_v33, %v9913_v61 }
 0xa25   :  { %v4937_v7 = vpop.f32.mrf.mxu0 }
 0xa26   :  { %v9620_v14 = vadd.f32 %v4937_v7, %v3513_v0  ;;  %v9914_v0 = vld [vmem:[#allocation3_spill] sm:$0xff] }
 0xa27   :  { %v9654_v43 = vpop.f32.mrf.mxu0  ;;  %v6452_v7 = vrot.slane %v6447_v33, %v9914_v0 }
 0xa63   :  { %v5751_v1 = vpop.f32.mrf.mxu1 }
 0xa65   :  { %v7828_v15 = vpop.f32.mrf.mxu1 }
 0xa67   :  { %v5828_v34 = vpop.f32.mrf.mxu1 }
 0xa68   :  { %v6294_v13 = vpack.c.bf16 %v5828_v34, %v5751_v1 }
 0xa69   :  { %v7833_v16 = vpop.f32.mrf.mxu1 }
 0xa6a   :  { %7354 = vmatmul.mubr.msk.bf16.vlgmr.msra.gmra.mxu1 %vm617_vm1, %v6294_v13 }
 0xa6b   :  { %6400 = vmatprep.mubr.bf16.mxu1 %v9895_v49 }
 0xa6f   :  { %v5982_v24 = vpop.f32.mrf.mxu0 }
 0xa71   :  { %v7843_v11 = vpop.f32.mrf.mxu0 }
 0xa98   :  { %v5905_v54 = vpop.f32.mrf.mxu1 }
 0xa99   :  { %v6295_v17 = vpack.c.bf16 %v5982_v24, %v5905_v54 }
 0xa9a   :  { %v7838_v32 = vpop.f32.mrf.mxu1 }
 0xa9b   :  { %7355 = vmatmul.mubr.msk.bf16.gmra.mxu1 %vm617_vm1, %v6295_v17 }
 0xa9c   :  { %v6059_v25 = vpop.f32.mrf.mxu1  ;;  %6410 = vmatprep.mubr.bf16.mxu1 %v9895_v49 }
 0xa9e   :  { %v7848_v2 = vpop.f32.mrf.mxu1 }
 0xaa4   :  { %v6136_v56 = vpop.f32.mrf.mxu0 }
 0xaa5   :  { %v6296_v48 = vpack.c.bf16 %v6136_v56, %v6059_v25 }
 0xaa6   :  { %v7853_v30 = vpop.f32.mrf.mxu0 }
 0xaa7   :  { %7356 = vmatmul.mubr.msk.bf16.gmra.mxu1 %vm617_vm1, %v6296_v48 }
 0xaa8   :  { %v6213_v58 = vpop.f32.mrf.mxu1  ;;  %6420 = vmatprep.mubr.bf16.mxu1 %v9895_v49  ;;  %v8022_v49 = vld [vmem:[%s9870_s9 + $0x48] sm:$0xff]  }
 0xaa9   :  { %7516 = vmatprep.subr.bf16.mxu0 %v8022_v49 }
 0xaaa   :  { %v7858_v46 = vpop.f32.mrf.mxu1  ;;  %7517 = vmatpush3.bf16.msra.mxu0 %v8023_v37 }
 0xaab   :  { %7518 = vmatprep.subr.bf16.mxu0 %v8024_v45 }
 0xaac   :  { %v6290_v20 = vpop.f32.mrf.mxu0 }
 0xaad   :  { %v6297_v42 = vpack.c.bf16 %v6290_v20, %v6213_v58  ;;  %v9915_v20 = vld [vmem:[#allocation11_spill] sm:$0xff] }
 0xaae   :  { %v7863_v51 = vpop.f32.mrf.mxu0  ;;  %7519 = vmatpush3.bf16.msra.mxu0 %v8025_v6 }
 0xaaf   :  { %7357 = vmatmul.mubr.msk.bf16.gmra.mxu1 %vm617_vm1, %v6297_v42 }
 0xb2a   :  { %v6392_v55 = vpop.f32.mrf.mxu1 }
 0xb2b   :  { %v6431_v59 = vadd.f32 %v6392_v55, %v9534_v8 }
 0xb2c   :  { %v6394_v38 = vpop.f32.mrf.mxu1 }
 0xb2d   :  { %v6432_v60 = vadd.f32 %v6394_v38, %v9540_v23  ;;  %v9694_v53 = vadd.f32 %v6452_v7, %v6431_v59 }
 0xb2e   :  { %v6396_v10 = vpop.f32.mrf.mxu1 }
 0xb2f   :  { %v6433_v9 = vadd.f32 %v6396_v10, %v9544_v26  ;;  %v9690_v63 = vadd.f32 %v6456_v36, %v6432_v60 }
 0xb30   :  { %v6398_v44 = vpop.f32.mrf.mxu1 }
 0xb31   :  { %v6434_v21 = vadd.f32 %v6398_v44, %v9547_v18  ;;  %v9688_v62 = vadd.f32 %v6452_v7, %v6433_v9  ;;  %v7375_v44 = vld [vmem:[%s9873_s11] ss:$0 sm:$0xff] }
 0xb33   :  { %v9692_v39 = vadd.f32 %v6456_v36, %v6434_v21  ;;  %v6475_v26 = vpack.c.bf16 %v9688_v62, %v9694_v53 }
 0xb35   :  { %v6476_v23 = vpack.c.bf16 %v9692_v39, %v9690_v63 }
 0xb37   :  { %6650 = vmatprep.mubr.bf16.mxu0 %v6476_v23 }
 0xb38   :  { %6651 = vmatmul.mubr.bf16.vlgmr.msra.gmra.mxu0 %v6475_v26 }
 0xb5b   :  { %v6402_v8 = vpop.f32.mrf.mxu1 }
 0xb5c   :  { %v6435_v3 = vadd.f32 %v6402_v8, %v9582_v52 }
 0xb5d   :  { %v6404_v57 = vpop.f32.mrf.mxu1 }
 0xb5e   :  { %v6436_v18 = vadd.f32 %v6404_v57, %v9586_v41  ;;  %v9710_v24 = vadd.f32 %v6452_v7, %v6435_v3 }
 0xb5f   :  { %v6406_v31 = vpop.f32.mrf.mxu1 }
 0xb60   :  { %v6437_v12 = vadd.f32 %v6406_v31, %v9590_v19  ;;  %v9706_v13 = vadd.f32 %v6456_v36, %v6436_v18 }
 0xb61   :  { %v6408_v1 = vpop.f32.mrf.mxu1 }
 0xb62   :  { %v6438_v15 = vadd.f32 %v6408_v1, %v9594_v50  ;;  %v9704_v34 = vadd.f32 %v6452_v7, %v6437_v12 }
 0xb64   :  { %v9708_v16 = vadd.f32 %v6456_v36, %v6438_v15  ;;  %v6477_v41 = vpack.c.bf16 %v9704_v34, %v9710_v24 }
 0xb66   :  { %v6478_v11 = vpack.c.bf16 %v9708_v16, %v9706_v13 }
 0xb67   :  { %v6412_v19 = vpop.f32.mrf.mxu1 }
 0xb68   :  { %6658 = vmatprep.mubr.bf16.mxu0 %v6478_v11  ;;  %v6439_v32 = vadd.f32 %v6412_v19, %v9598_v5 }
 0xb69   :  { %v6414_v52 = vpop.f32.mrf.mxu1  ;;  %6659 = vmatmul.mubr.bf16.gmra.mxu0 %v6477_v41 }
 0xb6a   :  { %v6440_v50 = vadd.f32 %v6414_v52, %v9602_v4  ;;  %v9726_v46 = vadd.f32 %v6452_v7, %v6439_v32  ;;  %v3515_v4 = vadd.f32 %v9915_v20, %v9201_v27 }
 0xb6b   :  { %v6416_v54 = vpop.f32.mrf.mxu1 }
 0xb6c   :  { %v6441_v17 = vadd.f32 %v6416_v54, %v9606_v29  ;;  %v9722_v30 = vadd.f32 %v6456_v36, %v6440_v50  ;;  %v4957_v35 = vadd.f32 %v9654_v43, %v3515_v4 }
 0xb6d   :  { %v6418_v25 = vpop.f32.mrf.mxu1 }
 0xb6e   :  { %v6442_v2 = vadd.f32 %v6418_v25, %v9610_v28  ;;  %v9720_v56 = vadd.f32 %v6452_v7, %v6441_v17 }
 0xb6f   :  { %v6422_v48 = vpop.f32.mrf.mxu1 }
 0xb70   :  { %v9724_v58 = vadd.f32 %v6456_v36, %v6442_v2  ;;  %v6479_v5 = vpack.c.bf16 %v9720_v56, %v9726_v46  ;;  %v6443_v49 = vadd.f32 %v6422_v48, %v9614_v40 }
 0xb71   :  { %v6424_v22 = vpop.f32.mrf.mxu1 }
 0xb72   :  { %v6480_v29 = vpack.c.bf16 %v9724_v58, %v9722_v30  ;;  %v6444_v42 = vadd.f32 %v6424_v22, %v9618_v47  ;;  %v9744_v38 = vadd.f32 %v6452_v7, %v6443_v49 }
 0xb73   :  { %v6426_v28 = vpop.f32.mrf.mxu1 }
 0xb74   :  { %v6445_v51 = vadd.f32 %v6426_v28, %v9620_v14  ;;  %6666 = vmatprep.mubr.bf16.mxu0 %v6480_v29  ;;  %v9740_v6 = vadd.f32 %v6456_v36, %v6444_v42  ;;  %v7358_v14 = vld [vmem:[%s9872_s10] ss:$0 sm:$0xff] }
 0xb75   :  { %v6428_v37 = vpop.f32.mrf.mxu1  ;;  %6667 = vmatmul.mubr.bf16.gmra.mxu0 %v6479_v5 }
 0xb76   :  { %v6446_v45 = vadd.f32 %v6428_v37, %v4957_v35  ;;  %v9738_v27 = vadd.f32 %v6452_v7, %v6445_v51 }
 0xb78   :  { %v9742_v55 = vadd.f32 %v6456_v36, %v6446_v45  ;;  %v6481_v47 = vpack.c.bf16 %v9738_v27, %v9744_v38 }
 0xb7a   :  { %v6482_v43 = vpack.c.bf16 %v9742_v55, %v9740_v6 }
 0xb7c   :  { %6674 = vmatprep.mubr.bf16.mxu0 %v6482_v43 }
 0xb7d   :  { %6675 = vmatmul.mubr.bf16.gmra.mxu0 %v6481_v47 }
 0xbf8   :  { %v7520_v40 = vpop.f32.mrf.mxu0 }
 0xbfa   :  { %v7521_v33 = vpop.f32.mrf.mxu0 }
 0xbfb   :  { %v7522_v10 = vadd.f32 %v7521_v33, %v7520_v40 }
 0xbfc   :  { %v7523_v60 = vpop.f32.mrf.mxu0 }
 0xbfd   :  { %v6653_v36 = vadd.f32 %v7522_v10, %v7358_v14 }
 0xbfe   :  { %v7524_v9 = vpop.f32.mrf.mxu0 }
 0xbff   :  { %8154 = vtanh.f32 %v6653_v36  ;;  %v7525_v59 = vadd.f32 %v7524_v9, %v7523_v60 }
 0xc01   :  { %v6656_v7 = vadd.f32 %v7525_v59, %v7358_v14  ;;  %v9916_v59 = vlaneseq }
 0xc03   :  { %8156 = vtanh.f32 %v6656_v7  ;;  %v6731_v7 = vand.u32 127, %v9916_v59 }
 0xc0c   :  { %v8155_v21 = vpop.eup %8154 }
 0xc0d   :  { %v6698_v23 = vmul.f32 %v8155_v21, %v7375_v44 }
 0xc0f   :  { %6706 = vadd.xlane.f32.xlu0 %v6698_v23 }
 0xc10   :  { %v8157_v26 = vpop.eup %8156 }
 0xc11   :  { %v6699_v8 = vmul.f32 %v8157_v26, %v7375_v44 }
 0xc13   :  { %6708 = vadd.xlane.f32.xlu1 %v6699_v8 }
 0xc29   :  { %v7526_v57 = vpop.f32.mrf.mxu0 }
 0xc2b   :  { %v7527_v31 = vpop.f32.mrf.mxu0 }
 0xc2c   :  { %v7528_v18 = vadd.f32 %v7527_v31, %v7526_v57 }
 0xc2d   :  { %v7529_v12 = vpop.f32.mrf.mxu0 }
 0xc2e   :  { %v6661_v3 = vadd.f32 %v7528_v18, %v7358_v14 }
 0xc2f   :  { %v7530_v1 = vpop.f32.mrf.mxu0 }
 0xc30   :  { %8158 = vtanh.f32 %v6661_v3  ;;  %v7531_v15 = vadd.f32 %v7530_v1, %v7529_v12 }
 0xc32   :  { %v6664_v11 = vadd.f32 %v7531_v15, %v7358_v14 }
 0xc34   :  { %8160 = vtanh.f32 %v6664_v11 }
 0xc35   :  { %v7532_v41 = vpop.f32.mrf.mxu0 }
 0xc37   :  { %v7533_v19 = vpop.f32.mrf.mxu0 }
 0xc38   :  { %v7534_v52 = vadd.f32 %v7533_v19, %v7532_v41 }
 0xc39   :  { %v7535_v54 = vpop.f32.mrf.mxu0 }
 0xc3a   :  { %v6669_v50 = vadd.f32 %v7534_v52, %v7358_v14 }
 0xc3b   :  { %v7536_v17 = vpop.f32.mrf.mxu0 }
 0xc3c   :  { %8162 = vtanh.f32 %v6669_v50  ;;  %v7537_v32 = vadd.f32 %v7536_v17, %v7535_v54 }
 0xc3d   :  { %v8159_v25 = vpop.eup %8158  ;;  %v7538_v2 = vpop.f32.mrf.mxu0 }
 0xc3e   :  { %v6672_v48 = vadd.f32 %v7537_v32, %v7358_v14  ;;  %v6700_v22 = vmul.f32 %v8159_v25, %v7375_v44 }
 0xc3f   :  { %v7539_v20 = vpop.f32.mrf.mxu0 }
 0xc40   :  { %8164 = vtanh.f32 %v6672_v48  ;;  %v7540_v4 = vadd.f32 %v7539_v20, %v7538_v2  ;;  %6710 = vadd.xlane.f32.xlu0 %v6700_v22 }
 0xc41   :  { %v8161_v29 = vpop.eup %8160  ;;  %v7541_v5 = vpop.f32.mrf.mxu0 }
 0xc42   :  { %v6677_v28 = vadd.f32 %v7540_v4, %v7358_v14  ;;  %v6701_v35 = vmul.f32 %v8161_v29, %v7375_v44 }
 0xc43   :  { %v7542_v42 = vpop.f32.mrf.mxu0 }
 0xc44   :  { %8166 = vtanh.f32 %v6677_v28  ;;  %v7543_v51 = vadd.f32 %v7542_v42, %v7541_v5  ;;  %6712 = vadd.xlane.f32.xlu0 %v6701_v35 }
 0xc46   :  { %v6680_v49 = vadd.f32 %v7543_v51, %v7358_v14  ;;  %v9917_v14 = vld [vmem:[#allocation2_spill] sm:$0xff] }
 0xc47   :  { %v9758_v26 = vsub.s32 %v6731_v7, %v9917_v14  ;;  %v6793_v22 = vsub.s32 2, %v9917_v14  ;;  %v6797_v20 = vsub.s32 3, %v9917_v14  ;;  %v6801_v35 = vsub.s32 4, %v9917_v14 }
 0xc48   :  { %8168 = vtanh.f32 %v6680_v49 }
 0xc49   :  { %v8163_v37 = vpop.eup %8162 }
 0xc4a   :  { %v6702_v45 = vmul.f32 %v8163_v37, %v7375_v44 }
 0xc4c   :  { %6714 = vadd.xlane.f32.xlu0 %v6702_v45 }
 0xc4d   :  { %v8165_v43 = vpop.eup %8164 }
 0xc4e   :  { %v6703_v47 = vmul.f32 %v8165_v43, %v7375_v44 }
 0xc50   :  { %6716 = vadd.xlane.f32.xlu1 %v6703_v47  ;;  %v6805_v47 = vsub.s32 5, %v9917_v14 }
 0xc51   :  { %v8167_v40 = vpop.eup %8166 }
 0xc52   :  { %v6704_v33 = vmul.f32 %v8167_v40, %v7375_v44 }
 0xc54   :  { %6718 = vadd.xlane.f32.xlu0 %v6704_v33 }
 0xc55   :  { %v8169_v10 = vpop.eup %8168 }
 0xc56   :  { %v6705_v60 = vmul.f32 %v8169_v10, %v7375_v44 }
 0xc58   :  { %6720 = vadd.xlane.f32.xlu1 %v6705_v60  ;;  %v6809_v60 = vsub.s32 6, %v9917_v14 }
 0xc98   :  { %v6707_v36 = vpop.xlane.xlu0 %6706 }
 0xc99   :  { %v6735_v12 = vrot.slane %v6707_v36, %v9758_v26 }
 0xc9c   :  { %v6709_v23 = vpop.xlane.xlu1 %6708 }
 0xc9d   :  { %v6739_v57 = vrot.slane %v6709_v23, %v9758_v26 }
 0xc9f   :  { %v6765_v15 = vsel %vm6764_vm3, %v6739_v57, %v6735_v12 }
 0xcc9   :  { %v6711_v9 = vpop.xlane.xlu0 %6710 }
 0xcca   :  { %v6743_v31 = vrot.slane %v6711_v9, %v9758_v26 }
 0xccc   :  { %v6767_v41 = vsel %vm6766_vm4, %v6743_v31, %v6765_v15 }
 0xccd   :  { %v6713_v21 = vpop.xlane.xlu0 %6712 }
 0xcce   :  { %v6747_v44 = vrot.slane %v6713_v21, %v9758_v26 }
 0xcd0   :  { %v6769_v52 = vsel %vm6768_vm5, %v6747_v44, %v6767_v41 }
 0xcd5   :  { %v6715_v8 = vpop.xlane.xlu0 %6714 }
 0xcd6   :  { %v6751_v3 = vrot.slane %v6715_v8, %v9758_v26 }
 0xcd8   :  { %v6771_v54 = vsel %vm6770_vm6, %v6751_v3, %v6769_v52 }
 0xcd9   :  { %v6717_v18 = vpop.xlane.xlu1 %6716 }
 0xcda   :  { %v6755_v11 = vrot.slane %v6717_v18, %v9758_v26 }
 0xcdc   :  { %v6773_v17 = vsel %vm6772_vm7, %v6755_v11, %v6771_v54 }
 0xcdd   :  { %v6719_v1 = vpop.xlane.xlu0 %6718 }
 0xcde   :  { %v6759_v19 = vrot.slane %v6719_v1, %v9758_v26 }
 0xce0   :  { %v6775_v25 = vsel %vm6774_vm8, %v6759_v19, %v6773_v17 }
 0xce1   :  { %v6721_v50 = vpop.xlane.xlu1 %6720 }
 0xce2   :  { %v6763_v32 = vrot.slane %v6721_v50, %v9758_v26 }
 0xce4   :  { %v6777_v2 = vsel %vm6776_vm9, %v6763_v32, %v6775_v25 }
 0xce5   :  { %v6779_v48 = vsel %vm1234_vm2, %v6777_v2, -inf }
 0xce6   :  { %6780 = vmax.xlane.f32.xlu0 %v6779_v48 }
 0xd6f   :  { %v6781_v4 = vpop.xlane.xlu0 %6780 }
 0xd70   :  { %v6786_v29 = vrot.slane %v6781_v4, %v9914_v0  ;;  %v6790_v5 = vrot.slane %v6781_v4, %v9913_v61  ;;  %v6794_v28 = vrot.slane %v6781_v4, %v6793_v22  ;;  %v6798_v42 = vrot.slane %v6781_v4, %v6797_v20 }
 0xd71   :  { %v6802_v40 = vrot.slane %v6781_v4, %v6801_v35  ;;  %v6806_v59 = vrot.slane %v6781_v4, %v6805_v47 }
 0xd72   :  { %v6823_v51 = vsub.f32 %v6707_v36, %v6786_v29  ;;  %v6824_v49 = vsub.f32 %v6709_v23, %v6790_v5  ;;  %v6825_v37 = vsub.f32 %v6711_v9, %v6794_v28  ;;  %v6826_v33 = vsub.f32 %v6713_v21, %v6798_v42 }
 0xd73   :  { %v6827_v7 = vsub.f32 %v6715_v8, %v6802_v40  ;;  %v6813_v9 = vsub.s32 7, %v9917_v14  ;;  %v6810_v23 = vrot.slane %v6781_v4, %v6809_v60  ;;  %v6828_v57 = vsub.f32 %v6717_v18, %v6806_v59 }
 0xd74   :  { %v6831_v45 = vmul.f32 1.442695, %v6823_v51  ;;  %v6833_v43 = vmul.f32 1.442695, %v6824_v49  ;;  %v6835_v10 = vmul.f32 1.442695, %v6825_v37 }
 0xd75   :  { %v6837_v36 = vmul.f32 1.442695, %v6826_v33  ;;  %v6839_v31 = vmul.f32 1.442695, %v6827_v7  ;;  %v6814_v21 = vrot.slane %v6781_v4, %v6813_v9  ;;  %v6829_v12 = vsub.f32 %v6719_v1, %v6810_v23 }
 0xd76   :  { %8170 = vpow2.f32 %v6831_v45  ;;  %v6841_v44 = vmul.f32 1.442695, %v6828_v57 }
 0xd77   :  { %8172 = vpow2.f32 %v6833_v43  ;;  %v6830_v8 = vsub.f32 %v6721_v50, %v6814_v21  ;;  %v6843_v11 = vmul.f32 1.442695, %v6829_v12 }
 0xd78   :  { %8174 = vpow2.f32 %v6835_v10 }
 0xd79   :  { %8176 = vpow2.f32 %v6837_v36  ;;  %v6845_v19 = vmul.f32 1.442695, %v6830_v8 }
 0xd7a   :  { %8178 = vpow2.f32 %v6839_v31 }
 0xd7b   :  { %8180 = vpow2.f32 %v6841_v44 }
 0xd7c   :  { %8182 = vpow2.f32 %v6843_v11 }
 0xd7d   :  { %8184 = vpow2.f32 %v6845_v19 }
 0xd83   :  { %v8171_v3 = vpop.eup %8170 }
 0xd84   :  { %v8173_v15 = vpop.eup %8172  ;;  %6856 = vperm.xlu1 %7884, %v8171_v3  }
 0xd85   :  { %6859 = vperm.xlu0 %7885, %v8173_v15   ;;  %v8175_v41 = vpop.eup %8174 }
 0xd86   :  { %v8177_v18 = vpop.eup %8176 }
 0xd87   :  { %v8179_v52 = vpop.eup %8178 }
 0xd88   :  { %6862 = vperm.xlu1 %7884, %v8175_v41   ;;  %v8181_v54 = vpop.eup %8180 }
 0xd89   :  { %v8183_v1 = vpop.eup %8182 }
 0xd8a   :  { %v8185_v17 = vpop.eup %8184 }
 0xd8c   :  { %6865 = vperm.xlu1 %7884, %v8177_v18  }
 0xd90   :  { %6868 = vperm.xlu1 %7884, %v8179_v52  }
 0xd94   :  { %6871 = vperm.xlu1 %7884, %v8181_v54  }
 0xd98   :  { %6874 = vperm.xlu1 %7884, %v8183_v1  }
 0xd9c   :  { %6877 = vperm.xlu1 %7884, %v8185_v17  }
 0xdff   :  { %v6857_v32 = vpop.permute.xlu1 %6856 }
 0xe00   :  { %v6860_v48 = vpop.permute.xlu0 %6859  ;;  %v6882_v5 = vrot.slane %v6857_v32, %v9758_v26 }
 0xe01   :  { %v6886_v29 = vrot.slane %v6860_v48, %v9758_v26 }
 0xe03   :  { %v6863_v25 = vpop.permute.xlu1 %6862  ;;  %v6911_v37 = vsel %vm6764_vm3, %v6886_v29, %v6882_v5 }
 0xe04   :  { %v6890_v28 = vrot.slane %v6863_v25, %v9758_v26 }
 0xe06   :  { %v6912_v43 = vsel %vm6766_vm4, %v6890_v28, %v6911_v37 }
 0xe07   :  { %v6866_v50 = vpop.permute.xlu1 %6865 }
 0xe08   :  { %v6894_v42 = vrot.slane %v6866_v50, %v9758_v26 }
 0xe0a   :  { %v6913_v33 = vsel %vm6768_vm5, %v6894_v42, %v6912_v43 }
 0xe0b   :  { %v6869_v2 = vpop.permute.xlu1 %6868 }
 0xe0c   :  { %v6898_v51 = vrot.slane %v6869_v2, %v9758_v26 }
 0xe0e   :  { %v6914_v10 = vsel %vm6770_vm6, %v6898_v51, %v6913_v33 }
 0xe0f   :  { %v6872_v4 = vpop.permute.xlu1 %6871 }
 0xe10   :  { %v6902_v45 = vrot.slane %v6872_v4, %v9758_v26 }
 0xe12   :  { %v6915_v7 = vsel %vm6772_vm7, %v6902_v45, %v6914_v10 }
 0xe13   :  { %v6875_v49 = vpop.permute.xlu1 %6874 }
 0xe14   :  { %v6906_v40 = vrot.slane %v6875_v49, %v9758_v26 }
 0xe16   :  { %v6916_v23 = vsel %vm6774_vm8, %v6906_v40, %v6915_v7 }
 0xe17   :  { %v6878_v59 = vpop.permute.xlu1 %6877 }
 0xe18   :  { %v6910_v36 = vrot.slane %v6878_v59, %v9758_v26 }
 0xe1a   :  { %v6917_v57 = vsel %vm6776_vm9, %v6910_v36, %v6916_v23 }
 0xe1b   :  { %v6919_v31 = vsel %vm1234_vm2, %v6917_v57, 0.0 }
 0xe1c   :  { %6920 = vadd.xlane.f32.xlu1 %v6919_v31 }
 0xea5   :  { %v6921_v21 = vpop.xlane.xlu1 %6920 }
 0xea6   :  { %8186 = vrcp.f32 %v6921_v21 }
 0xeb3   :  { %v8187_v12 = vpop.eup %8186 }
 0xeb4   :  { %v6927_v44 = vrot.slane %v8187_v12, %v9914_v0  ;;  %v6931_v11 = vrot.slane %v8187_v12, %v9913_v61  ;;  %v6935_v26 = vrot.slane %v8187_v12, %v6793_v22  ;;  %v6939_v25 = vrot.slane %v8187_v12, %v6797_v20 }
 0xeb5   :  { %v6943_v2 = vrot.slane %v8187_v12, %v6801_v35  ;;  %v6947_v61 = vrot.slane %v8187_v12, %v6805_v47  ;;  %v6951_v22 = vrot.slane %v8187_v12, %v6809_v60  ;;  %v6955_v20 = vrot.slane %v8187_v12, %v6813_v9 }
 0xeb6   :  { %v6964_v8 = vmul.f32 %v8171_v3, %v6927_v44  ;;  %v6965_v19 = vmul.f32 %v8173_v15, %v6931_v11  ;;  %v6966_v32 = vmul.f32 %v8175_v41, %v6935_v26  ;;  %v6967_v50 = vmul.f32 %v8177_v18, %v6939_v25 }
 0xeb7   :  { %v6968_v0 = vmul.f32 %v8179_v52, %v6943_v2  ;;  %v6969_v3 = vmul.f32 %v8181_v54, %v6947_v61  ;;  %v6970_v15 = vmul.f32 %v8183_v1, %v6951_v22  ;;  %v6971_v41 = vmul.f32 %v8185_v17, %v6955_v20 }
 0xeb8   :  { %6974 = vperm.xlu0 %7885, %v6964_v8  }
 0xebc   :  { %6979 = vperm.xlu0 %7885, %v6965_v19  }
 0xec0   :  { %6984 = vperm.xlu0 %7885, %v6966_v32  }
 0xec4   :  { %6989 = vperm.xlu0 %7885, %v6967_v50  }
 0xec8   :  { %6994 = vperm.xlu0 %7885, %v6968_v0  }
 0xecc   :  { %6999 = vperm.xlu0 %7885, %v6969_v3  }
 0xed0   :  { %7004 = vperm.xlu0 %7885, %v6970_v15  }
 0xed4   :  { %7009 = vperm.xlu0 %7885, %v6971_v41  }
 0xf33   :  { %v6975_v18 = vpop.permute.xlu0 %6974 }
 0xf34   :  { %v7012_v35 = vmul.f32 %v6975_v18, %v9694_v53  ;;  %v7013_v52 = vmul.f32 %v6975_v18, %v9690_v63 }
 0xf36   :  { %v7028_v48 = vrot.slane %v7012_v35, 4  ;;  %v7034_v47 = vrot.slane %v7013_v52, 4 }
 0xf37   :  { %v6980_v4 = vpop.permute.xlu0 %6979 }
 0xf38   :  { %v7014_v54 = vmul.f32 %v6980_v4, %v9688_v62  ;;  %v7015_v60 = vmul.f32 %v6980_v4, %v9692_v39  ;;  %v7029_v29 = vadd.f32 %v7028_v48, %v7012_v35  ;;  %v7035_v1 = vadd.f32 %v7034_v47, %v7013_v52 }
 0xf3a   :  { %v7040_v5 = vrot.slane %v7014_v54, 4  ;;  %v7046_v14 = vrot.slane %v7015_v60, 4  ;;  %v7030_v42 = vrot.slane %v7029_v29, 2  ;;  %v7036_v53 = vrot.slane %v7035_v1, 2 }
 0xf3b   :  { %v6985_v9 = vpop.permute.xlu0 %6984 }
 0xf3c   :  { %v7016_v17 = vmul.f32 %v6985_v9, %v9710_v24  ;;  %v7017_v28 = vmul.f32 %v6985_v9, %v9706_v13  ;;  %v7041_v51 = vadd.f32 %v7040_v5, %v7014_v54  ;;  %v7047_v63 = vadd.f32 %v7046_v14, %v7015_v60 }
 0xf3d   :  { %v7031_v43 = vadd.f32 %v7030_v42, %v7029_v29  ;;  %v7037_v40 = vadd.f32 %v7036_v53, %v7035_v1 }
 0xf3e   :  { %v7052_v37 = vrot.slane %v7016_v17, 4  ;;  %v7058_v45 = vrot.slane %v7017_v28, 4  ;;  %v7042_v33 = vrot.slane %v7041_v51, 2  ;;  %v7048_v10 = vrot.slane %v7047_v63, 2 }
 0xf3f   :  { %v6990_v49 = vpop.permute.xlu0 %6989  ;;  %v7038_v8 = vrot.slane %v7037_v40, 1 }
 0xf40   :  { %v7018_v62 = vmul.f32 %v6990_v49, %v9704_v34  ;;  %v7019_v39 = vmul.f32 %v6990_v49, %v9708_v16  ;;  %v7053_v23 = vadd.f32 %v7052_v37, %v7016_v17  ;;  %v7059_v57 = vadd.f32 %v7058_v45, %v7017_v28 }
 0xf41   :  { %v7032_v34 = vrot.slane %v7031_v43, 1  ;;  %v7043_v16 = vadd.f32 %v7042_v33, %v7041_v51  ;;  %v7049_v11 = vadd.f32 %v7048_v10, %v7047_v63  ;;  %v7039_v15 = vadd.f32 %v7038_v8, %v7037_v40 }
 0xf42   :  { %v7064_v59 = vrot.slane %v7018_v62, 4  ;;  %v7070_v7 = vrot.slane %v7019_v39, 4  ;;  %v7060_v2 = vrot.slane %v7059_v57, 2 }
 0xf43   :  { %v6995_v24 = vpop.permute.xlu0 %6994  ;;  %v7033_v22 = vadd.f32 %v7032_v34, %v7031_v43  ;;  %v7044_v20 = vrot.slane %v7043_v16, 1  ;;  %v7050_v41 = vrot.slane %v7049_v11, 1 }
 0xf44   :  { %v7020_v13 = vmul.f32 %v6995_v24, %v9726_v46  ;;  %v7021_v36 = vmul.f32 %v6995_v24, %v9722_v30  ;;  %v7065_v31 = vadd.f32 %v7064_v59, %v7018_v62  ;;  %v7071_v21 = vadd.f32 %v7070_v7, %v7019_v39 }
 0xf45   :  { %v7054_v46 = vrot.slane %v7053_v23, 2  ;;  %v7061_v54 = vadd.f32 %v7060_v2, %v7059_v57  ;;  %v7045_v14 = vadd.f32 %v7044_v20, %v7043_v16  ;;  %v7051_v9 = vadd.f32 %v7050_v41, %v7049_v11 }
 0xf46   :  { %v7076_v12 = vrot.slane %v7020_v13, 4  ;;  %v7082_v44 = vrot.slane %v7021_v36, 4  ;;  %v7066_v30 = vrot.slane %v7065_v31, 2  ;;  %v7072_v0 = vrot.slane %v7071_v21, 2 }
 0xf47   :  { %v7000_v19 = vpop.permute.xlu0 %6999  ;;  %v7055_v4 = vadd.f32 %v7054_v46, %v7053_v23  ;;  %v7062_v39 = vrot.slane %v7061_v54, 1 }
 0xf48   :  { %v7077_v26 = vadd.f32 %v7076_v12, %v7020_v13  ;;  %v7083_v32 = vadd.f32 %v7082_v44, %v7021_v36  ;;  %v7022_v25 = vmul.f32 %v7000_v19, %v9720_v56  ;;  %v7023_v50 = vmul.f32 %v7000_v19, %v9724_v58 }
 0xf49   :  { %v7067_v60 = vadd.f32 %v7066_v30, %v7065_v31  ;;  %v7073_v29 = vadd.f32 %v7072_v0, %v7071_v21 }
 0xf4a   :  { %v7088_v61 = vrot.slane %v7022_v25, 4  ;;  %v7094_v3 = vrot.slane %v7023_v50, 4  ;;  %v7078_v35 = vrot.slane %v7077_v26, 2  ;;  %v7084_v52 = vrot.slane %v7083_v32, 2 }
 0xf4b   :  { %v7005_v18 = vpop.permute.xlu0 %7004  ;;  %v7068_v43 = vrot.slane %v7067_v60, 1  ;;  %v7074_v40 = vrot.slane %v7073_v29, 1 }
 0xf4c   :  { %v7089_v48 = vadd.f32 %v7088_v61, %v7022_v25  ;;  %v7095_v47 = vadd.f32 %v7094_v3, %v7023_v50  ;;  %v7024_v56 = vmul.f32 %v7005_v18, %v9744_v38  ;;  %v7025_v58 = vmul.f32 %v7005_v18, %v9740_v6 }
 0xf4d   :  { %v7079_v53 = vadd.f32 %v7078_v35, %v7077_v26  ;;  %v7085_v51 = vadd.f32 %v7084_v52, %v7083_v32  ;;  %v7056_v6 = vrot.slane %v7055_v4, 1  ;;  %v7069_v34 = vadd.f32 %v7068_v43, %v7067_v60 }
 0xf4e   :  { %v7090_v1 = vrot.slane %v7089_v48, 2  ;;  %v7096_v5 = vrot.slane %v7095_v47, 2  ;;  %v7100_v17 = vrot.slane %v7024_v56, 4  ;;  %v7106_v28 = vrot.slane %v7025_v58, 4 }
 0xf4f   :  { %v7010_v42 = vpop.permute.xlu0 %7009  ;;  %v7080_v24 = vrot.slane %v7079_v53, 1  ;;  %v7086_v13 = vrot.slane %v7085_v51, 1  ;;  %v7057_v44 = vadd.f32 %v7056_v6, %v7055_v4  ;;  %v7140_v26 = vsel %vm6764_vm3, %v7045_v14, %v7033_v22 }
 0xf50   :  { %v7091_v63 = vadd.f32 %v7090_v1, %v7089_v48  ;;  %v7097_v49 = vadd.f32 %v7096_v5, %v7095_v47  ;;  %v7101_v37 = vadd.f32 %v7100_v17, %v7024_v56  ;;  %v7107_v45 = vadd.f32 %v7106_v28, %v7025_v58 }
 0xf51   :  { %v7026_v62 = vmul.f32 %v7010_v42, %v9738_v27  ;;  %v7027_v38 = vmul.f32 %v7010_v42, %v9742_v55  ;;  %v7063_v27 = vadd.f32 %v7062_v39, %v7061_v54  ;;  %v7075_v55 = vadd.f32 %v7074_v40, %v7073_v29 }
 0xf52   :  { %v7102_v33 = vrot.slane %v7101_v37, 2  ;;  %v7108_v10 = vrot.slane %v7107_v45, 2  ;;  %v7092_v36 = vrot.slane %v7091_v63, 1  ;;  %v7098_v23 = vrot.slane %v7097_v49, 1 }
 0xf53   :  { %v7112_v59 = vrot.slane %v7026_v62, 4  ;;  %v7118_v7 = vrot.slane %v7027_v38, 4  ;;  %v7147_v32 = vsel %vm6764_vm3, %v7051_v9, %v7039_v15  ;;  %v7081_v25 = vadd.f32 %v7080_v24, %v7079_v53 }
 0xf54   :  { %v7103_v57 = vadd.f32 %v7102_v33, %v7101_v37  ;;  %v7109_v31 = vadd.f32 %v7108_v10, %v7107_v45  ;;  %v7087_v50 = vadd.f32 %v7086_v13, %v7085_v51  ;;  %v7093_v46 = vadd.f32 %v7092_v36, %v7091_v63 }
 0xf55   :  { %v7113_v21 = vadd.f32 %v7112_v59, %v7026_v62  ;;  %v7119_v12 = vadd.f32 %v7118_v7, %v7027_v38  ;;  %v7099_v2 = vadd.f32 %v7098_v23, %v7097_v49  ;;  %v7141_v61 = vsel %vm6766_vm4, %v7057_v44, %v7140_v26 }
 0xf56   :  { %v7104_v8 = vrot.slane %v7103_v57, 1  ;;  %v7110_v16 = vrot.slane %v7109_v31, 1  ;;  %v7148_v3 = vsel %vm6766_vm4, %v7063_v27, %v7147_v32  ;;  %v7142_v18 = vsel %vm6768_vm5, %v7069_v34, %v7141_v61 }
 0xf57   :  { %v7114_v11 = vrot.slane %v7113_v21, 2  ;;  %v7120_v19 = vrot.slane %v7119_v12, 2  ;;  %v7149_v35 = vsel %vm6768_vm5, %v7075_v55, %v7148_v3  ;;  %v7143_v15 = vsel %vm6770_vm6, %v7081_v25, %v7142_v18 }
 0xf58   :  { %v7105_v20 = vadd.f32 %v7104_v8, %v7103_v57  ;;  %v7111_v41 = vadd.f32 %v7110_v16, %v7109_v31  ;;  %v7150_v48 = vsel %vm6770_vm6, %v7087_v50, %v7149_v35  ;;  %v7144_v47 = vsel %vm6772_vm7, %v7093_v46, %v7143_v15 }
 0xf59   :  { %v7115_v30 = vadd.f32 %v7114_v11, %v7113_v21  ;;  %v7121_v0 = vadd.f32 %v7120_v19, %v7119_v12  ;;  %v7151_v4 = vsel %vm6772_vm7, %v7099_v2, %v7150_v48 }
 0xf5a   :  { %v7145_v58 = vsel %vm6774_vm8, %v7105_v20, %v7144_v47  ;;  %v7152_v60 = vsel %vm6774_vm8, %v7111_v41, %v7151_v4 }
 0xf5b   :  { %v7116_v52 = vrot.slane %v7115_v30, 1  ;;  %v7122_v22 = vrot.slane %v7121_v0, 1 }
 0xf5d   :  { %v7117_v54 = vadd.f32 %v7116_v52, %v7115_v30  ;;  %v7123_v56 = vadd.f32 %v7122_v22, %v7121_v0 }
 0xf5f   :  { %v7146_v29 = vsel %vm6776_vm9, %v7117_v54, %v7145_v58  ;;  %v7153_v1 = vsel %vm6776_vm9, %v7123_v56, %v7152_v60 }
 0xf60   :  { %7156 = vst [vmem:[%s9874_s12] sm:$0xff] %v7146_v29  ;;  %7157 = vst [vmem:[%s9874_s12 + $0x8] sm:$0xff] %v7153_v1 }

// kernel: nrms_forward.3
= control target key start
LH: loop header
LB: loop body
LE: loop exit
PB: predicated region body
PF: predicated region fallthrough
CT: control target
= control target key end

     0   :  { %v14334_v1 = vmov 0   ;;  %v14336_v55 = vmov 0.0   ;;  %vm11662_vm0 = vmmov 0   ;;  %v14333_v56 = vlaneseq  ;;  %s14320_s2 = inlined_call_operand.vmem [shape: bf16[128,256], index: 2, kind: input, shape index: {}]   ;;  %s14321_s1 = inlined_call_operand.vmem [shape: bf16[128,256], index: 1, kind: input, shape index: {}]   ;;  %s14322_s0 = inlined_call_operand.vmem [shape: bf16[96,128], index: 0, kind: input, shape index: {}]   ;;  %s14323_s3 = inlined_call_operand.vmem [shape: bf16[128,256], index: 3, kind: input, shape index: {}]   ;;  %s14324_s5 = inlined_call_operand.vmem [shape: f32[1,256], index: 5, kind: input, shape index: {}]   ;;  %s14325_s4 = inlined_call_operand.vmem [shape: f32[1,256], index: 4, kind: input, shape index: {}]   ;;  %s14326_s6 = inlined_call_operand.vmem [shape: f32[1,256], index: 6, kind: input, shape index: {}]   ;;  %s14327_s7 = inlined_call_operand.vmem [shape: bf16[256,256], index: 7, kind: input, shape index: {}]   ;;  %s14328_s9 = inlined_call_operand.vmem [shape: bf16[256,128], index: 9, kind: input, shape index: {}]   ;;  %s14329_s8 = inlined_call_operand.vmem [shape: f32[1,256], index: 8, kind: input, shape index: {}]   ;;  %s14330_s10 = inlined_call_operand.vmem [shape: f32[1,128], index: 10, kind: input, shape index: {}]   ;;  %s14331_s11 = inlined_call_operand.vmem [shape: f32[1,128], index: 11, kind: input, shape index: {}]   ;;  %s14332_s12 = inlined_call_operand.vmem [shape: f32[12,256], index: 12, kind: output, shape index: {}]  }
   0x1   :  { %v11272_v0 = vld [vmem:[%s14320_s2 + $0x74] ss:$8 sps:$4 sm:$0xff]   ;;  %431 = vmatprep.mubr.bf16.mxu1 %v14334_v1  ;;  %230 = vmatprep.mubr.bf16.mxu0 %v14334_v1  ;;  %v11276_v3 = vld [vmem:[%s14320_s2 + $0x70] ss:$8 sps:$4 sm:$0xff]   ;;  %v11278_v5 = vld [vmem:[%s14320_s2 + $0x64] ss:$8 sps:$4 sm:$0xff]  }
   0x2   :  { %v11274_v2 = vld [vmem:[%s14321_s1 + $0x74] ss:$8 sps:$4 sm:$0xff]   ;;  %11271 = vset.pattern.permute.xlu1 %v14334_v1  ;;  %11270 = vset.pattern.permute.xlu0 %v14334_v1  ;;  %v11277_v4 = vld [vmem:[%s14321_s1 + $0x70] ss:$8 sps:$4 sm:$0xff]   ;;  %v11280_v6 = vld [vmem:[%s14321_s1 + $0x64] ss:$8 sps:$4 sm:$0xff]  }
   0x3   :  { %399 = vmatprep.subr.bf16.mxu1 %v11272_v0  ;;  %198 = vmatprep.subr.bf16.mxu0 %v11274_v2  ;;  %v11282_v7 = vld [vmem:[%s14320_s2 + $0x60] ss:$8 sps:$4 sm:$0xff]   ;;  %v11284_v9 = vld [vmem:[%s14320_s2 + $0x54] ss:$8 sps:$4 sm:$0xff]   ;;  %v11288_v11 = vld [vmem:[%s14320_s2 + $0x50] ss:$8 sps:$4 sm:$0xff]  }
   0x4   :  { %400 = vmatpush1.bf16.msra.mxu1 %v11276_v3  ;;  %199 = vmatpush1.bf16.msra.mxu0 %v11277_v4  ;;  %v11283_v8 = vld [vmem:[%s14321_s1 + $0x60] ss:$8 sps:$4 sm:$0xff]   ;;  %v11286_v10 = vld [vmem:[%s14321_s1 + $0x54] ss:$8 sps:$4 sm:$0xff]   ;;  %v11289_v12 = vld [vmem:[%s14321_s1 + $0x50] ss:$8 sps:$4 sm:$0xff]  }
   0x5   :  { %401 = vmatprep.subr.bf16.mxu1 %v11278_v5  ;;  %200 = vmatprep.subr.bf16.mxu0 %v11280_v6  ;;  %v11290_v13 = vld [vmem:[%s14320_s2 + $0x44] ss:$8 sps:$4 sm:$0xff]   ;;  %v11294_v15 = vld [vmem:[%s14320_s2 + $0x40] ss:$8 sps:$4 sm:$0xff]   ;;  %v11296_v17 = vld [vmem:[%s14320_s2 + $0x34] ss:$8 sps:$4 sm:$0xff]  }
   0x6   :  { %v11292_v14 = vld [vmem:[%s14321_s1 + $0x44] ss:$8 sps:$4 sm:$0xff]   ;;  %v11295_v16 = vld [vmem:[%s14321_s1 + $0x40] ss:$8 sps:$4 sm:$0xff]   ;;  %v11298_v18 = vld [vmem:[%s14321_s1 + $0x34] ss:$8 sps:$4 sm:$0xff]  }
   0x7   :  { %v11300_v19 = vld [vmem:[%s14320_s2 + $0x30] ss:$8 sps:$4 sm:$0xff]   ;;  %v11302_v21 = vld [vmem:[%s14320_s2 + $0x24] ss:$8 sps:$4 sm:$0xff]   ;;  %v11306_v23 = vld [vmem:[%s14320_s2 + $0x20] ss:$8 sps:$4 sm:$0xff]  }
   0x8   :  { %402 = vmatpush1.bf16.msra.mxu1 %v11282_v7  ;;  %201 = vmatpush1.bf16.msra.mxu0 %v11283_v8  ;;  %v11301_v20 = vld [vmem:[%s14321_s1 + $0x30] ss:$8 sps:$4 sm:$0xff]   ;;  %v11304_v22 = vld [vmem:[%s14321_s1 + $0x24] ss:$8 sps:$4 sm:$0xff]   ;;  %v11307_v24 = vld [vmem:[%s14321_s1 + $0x20] ss:$8 sps:$4 sm:$0xff]  }
   0x9   :  { %403 = vmatprep.subr.bf16.mxu1 %v11284_v9  ;;  %202 = vmatprep.subr.bf16.mxu0 %v11286_v10  ;;  %v11308_v25 = vld [vmem:[%s14320_s2 + $0x14] ss:$8 sps:$4 sm:$0xff]   ;;  %v11312_v27 = vld [vmem:[%s14320_s2 + $0x10] ss:$8 sps:$4 sm:$0xff]   ;;  %v11314_v29 = vld [vmem:[%s14320_s2 + $0x4] ss:$8 sps:$4 sm:$0xff]  }
   0xa   :  { %v11310_v26 = vld [vmem:[%s14321_s1 + $0x14] ss:$8 sps:$4 sm:$0xff]   ;;  %v11313_v28 = vld [vmem:[%s14321_s1 + $0x10] ss:$8 sps:$4 sm:$0xff]   ;;  %v11316_v30 = vld [vmem:[%s14321_s1 + $0x4] ss:$8 sps:$4 sm:$0xff]  }
   0xb   :  { %v11318_v31 = vld [vmem:[%s14320_s2] ss:$8 sps:$4 sm:$0xff]   ;;  %v11328_v33 = vld [vmem:[%s14323_s3 + $0x74] ss:$8 sps:$4 sm:$0xff]   ;;  %v11326_v35 = vld [vmem:[%s14323_s3 + $0x70] ss:$8 sps:$4 sm:$0xff]  }
   0xc   :  { %404 = vmatpush1.bf16.msra.mxu1 %v11288_v11  ;;  %203 = vmatpush1.bf16.msra.mxu0 %v11289_v12  ;;  %v11319_v32 = vld [vmem:[%s14321_s1] ss:$8 sps:$4 sm:$0xff]   ;;  %v11331_v36 = vld [vmem:[%s14323_s3 + $0x64] ss:$8 sps:$4 sm:$0xff]   ;;  %v11334_v38 = vld [vmem:[%s14323_s3 + $0x54] ss:$8 sps:$4 sm:$0xff]  }
   0xd   :  { %405 = vmatprep.subr.bf16.mxu1 %v11290_v13  ;;  %204 = vmatprep.subr.bf16.mxu0 %v11292_v14  ;;  %v11835_v34 = vld [vmem:[%s14322_s0] sm:$0xff]   ;;  %v11856_v39 = vld [vmem:[%s14322_s0 + $0x8] sm:$0xff]   ;;  %v11332_v40 = vld [vmem:[%s14323_s3 + $0x50] ss:$8 sps:$4 sm:$0xff]   ;;  %v11928_v57 = vshrl.u32 %v14333_v56, 7  ;;  %vm693_vm1 = vcmask 523264  }
   0xe   :  { %v11329_v37 = vld [vmem:[%s14323_s3 + $0x60] ss:$8 sps:$4 sm:$0xff]   ;;  %v11337_v41 = vld [vmem:[%s14323_s3 + $0x44] ss:$8 sps:$4 sm:$0xff]   ;;  %v11340_v43 = vld [vmem:[%s14323_s3 + $0x34] ss:$8 sps:$4 sm:$0xff]  }
   0xf   :  { %v11335_v42 = vld [vmem:[%s14323_s3 + $0x40] ss:$8 sps:$4 sm:$0xff]   ;;  %v11322_v44 = vld [vmem:[%s14322_s0 + $0x10] sm:$0xff]   ;;  %v11343_v46 = vld [vmem:[%s14323_s3 + $0x24] ss:$8 sps:$4 sm:$0xff]   ;;  %14346 = vst [vmem:[#allocation2_spill] sm:$0xff] %v11928_v57 }
  0x10   :  { %406 = vmatpush1.bf16.msra.mxu1 %v11294_v15  ;;  %205 = vmatpush1.bf16.msra.mxu0 %v11295_v16  ;;  %v11338_v45 = vld [vmem:[%s14323_s3 + $0x30] ss:$8 sps:$4 sm:$0xff]   ;;  %v11341_v47 = vld [vmem:[%s14323_s3 + $0x20] ss:$8 sps:$4 sm:$0xff]   ;;  %v11346_v48 = vld [vmem:[%s14323_s3 + $0x14] ss:$8 sps:$4 sm:$0xff]  }
  0x11   :  { %407 = vmatprep.subr.bf16.mxu1 %v11296_v17  ;;  %206 = vmatprep.subr.bf16.mxu0 %v11298_v18  ;;  %v11323_v49 = vld [vmem:[%s14322_s0 + $0x18] sm:$0xff]   ;;  %v11349_v51 = vld [vmem:[%s14323_s3 + $0x4] ss:$8 sps:$4 sm:$0xff]   ;;  %v11347_v52 = vld [vmem:[%s14323_s3] ss:$8 sps:$4 sm:$0xff]   ;;  %v11931_v58 = vsub.s32 0, %v11928_v57 }
  0x12   :  { %v11344_v50 = vld [vmem:[%s14323_s3 + $0x10] ss:$8 sps:$4 sm:$0xff]   ;;  %v11324_v53 = vld [vmem:[%s14322_s0 + $0x20] sm:$0xff]   ;;  %v11325_v54 = vld [vmem:[%s14322_s0 + $0x28] sm:$0xff]   ;;  %vm1618_vm2 = vcmask 64512   ;;  %vm9656_vm3 = vcmask 1041409  }
  0x13   :  { %14347 = vst [vmem:[#allocation3_spill] sm:$0xff] %v11931_v58  ;;  %v307_v59 = vld [vmem:[%s14324_s5] sm:$0x3]  ;;  %vm9658_vm4 = vcmask 1042434   ;;  %vm9660_vm5 = vcmask 1043459   ;;  %vm9662_vm6 = vcmask 1044484  }
  0x14   :  { %408 = vmatpush1.bf16.msra.mxu1 %v11300_v19  ;;  %207 = vmatpush1.bf16.msra.mxu0 %v11301_v20  ;;  %v11939_v60 = vld [vmem:[%s14325_s4] sm:$0x3]  ;;  %v11942_v61 = vrot.slane %v307_v59, %v11931_v58  ;;  %s11663_s4 = smov 64   ;;  %vm9664_vm7 = vcmask 1045509   ;;  %vm9666_vm8 = vcmask 1046534   ;;  %vm9668_vm9 = vcmask 1047559  }
  0x15   :  { %409 = vmatprep.subr.bf16.mxu1 %v11302_v21  ;;  %208 = vmatprep.subr.bf16.mxu0 %v11304_v22  ;;  %v11946_v62 = vrot.slane %v11939_v60, %v11931_v58  ;;  %vm9678_vm10 = vcmask 60416  }
  0x18   :  { %410 = vmatpush1.bf16.msra.mxu1 %v11306_v23  ;;  %209 = vmatpush1.bf16.msra.mxu0 %v11307_v24 }
  0x19   :  { %411 = vmatprep.subr.bf16.mxu1 %v11308_v25  ;;  %210 = vmatprep.subr.bf16.mxu0 %v11310_v26 }
  0x1c   :  { %412 = vmatpush1.bf16.msra.mxu1 %v11312_v27  ;;  %211 = vmatpush1.bf16.msra.mxu0 %v11313_v28 }
  0x1d   :  { %413 = vmatprep.subr.bf16.mxu1 %v11314_v29  ;;  %212 = vmatprep.subr.bf16.mxu0 %v11316_v30 }
  0x20   :  { %414 = vmatpush1.bf16.msra.mxu1 %v11318_v31  ;;  %213 = vmatpush1.bf16.msra.mxu0 %v11319_v32 }
  0x21   :  { %11250 = vmatprep.subr.bf16.mxu1 %v11328_v33  ;;  %600 = vmatprep.subr.bf16.mxu0 %v11328_v33 }
  0x23   :  { %432 = vmatmul.mubr.bf16.vlgmr.msra.gmra.mxu1 %v11835_v34  ;;  %231 = vmatmul.mubr.bf16.vlgmr.msra.gmra.mxu0 %v11835_v34 }
  0x24   :  { %441 = vmatprep.mubr.bf16.mxu1 %v14334_v1  ;;  %240 = vmatprep.mubr.bf16.mxu0 %v14334_v1 }
  0x25   :  { %11258 = vmatpush1.bf16.msra.mxu1 %v11326_v35  ;;  %601 = vmatpush1.bf16.msra.mxu0 %v11326_v35 }
  0x26   :  { %11251 = vmatprep.subr.bf16.mxu1 %v11331_v36  ;;  %602 = vmatprep.subr.bf16.mxu0 %v11331_v36 }
  0x29   :  { %11259 = vmatpush1.bf16.msra.mxu1 %v11329_v37  ;;  %603 = vmatpush1.bf16.msra.mxu0 %v11329_v37 }
  0x2a   :  { %11252 = vmatprep.subr.bf16.mxu1 %v11334_v38  ;;  %604 = vmatprep.subr.bf16.mxu0 %v11334_v38 }
  0x2b   :  { %442 = vmatmul.mubr.bf16.gmra.mxu1 %v11856_v39  ;;  %241 = vmatmul.mubr.bf16.gmra.mxu0 %v11856_v39 }
  0x2c   :  { %451 = vmatprep.mubr.bf16.mxu1 %v14334_v1  ;;  %250 = vmatprep.mubr.bf16.mxu0 %v14334_v1 }
  0x2d   :  { %11260 = vmatpush1.bf16.msra.mxu1 %v11332_v40  ;;  %605 = vmatpush1.bf16.msra.mxu0 %v11332_v40 }
  0x2e   :  { %11253 = vmatprep.subr.bf16.mxu1 %v11337_v41  ;;  %606 = vmatprep.subr.bf16.mxu0 %v11337_v41 }
  0x31   :  { %11261 = vmatpush1.bf16.msra.mxu1 %v11335_v42  ;;  %607 = vmatpush1.bf16.msra.mxu0 %v11335_v42 }
  0x32   :  { %11254 = vmatprep.subr.bf16.mxu1 %v11340_v43  ;;  %608 = vmatprep.subr.bf16.mxu0 %v11340_v43 }
  0x33   :  { %452 = vmatmul.mubr.bf16.gmra.mxu1 %v11322_v44  ;;  %251 = vmatmul.mubr.bf16.gmra.mxu0 %v11322_v44 }
  0x34   :  { %461 = vmatprep.mubr.bf16.mxu1 %v14334_v1  ;;  %260 = vmatprep.mubr.bf16.mxu0 %v14334_v1 }
  0x35   :  { %11262 = vmatpush1.bf16.msra.mxu1 %v11338_v45  ;;  %609 = vmatpush1.bf16.msra.mxu0 %v11338_v45 }
  0x36   :  { %11255 = vmatprep.subr.bf16.mxu1 %v11343_v46  ;;  %610 = vmatprep.subr.bf16.mxu0 %v11343_v46 }
  0x39   :  { %11263 = vmatpush1.bf16.msra.mxu1 %v11341_v47  ;;  %611 = vmatpush1.bf16.msra.mxu0 %v11341_v47 }
  0x3a   :  { %11256 = vmatprep.subr.bf16.mxu1 %v11346_v48  ;;  %612 = vmatprep.subr.bf16.mxu0 %v11346_v48 }
  0x3b   :  { %462 = vmatmul.mubr.bf16.gmra.mxu1 %v11323_v49  ;;  %261 = vmatmul.mubr.bf16.gmra.mxu0 %v11323_v49 }
  0x3c   :  { %471 = vmatprep.mubr.bf16.mxu1 %v14334_v1  ;;  %270 = vmatprep.mubr.bf16.mxu0 %v14334_v1 }
  0x3d   :  { %11264 = vmatpush1.bf16.msra.mxu1 %v11344_v50  ;;  %613 = vmatpush1.bf16.msra.mxu0 %v11344_v50 }
  0x3e   :  { %11257 = vmatprep.subr.bf16.mxu1 %v11349_v51  ;;  %614 = vmatprep.subr.bf16.mxu0 %v11349_v51 }
  0x41   :  { %11265 = vmatpush1.bf16.msra.mxu1 %v11347_v52  ;;  %615 = vmatpush1.bf16.msra.mxu0 %v11347_v52 }
  0x42   :  { %10770 = vmatprep.subr.mxu1 %v14336_v55  ;;  %10830 = vmatprep.subr.mxu0 %v14336_v55 }
  0x43   :  { %472 = vmatmul.mubr.bf16.gmra.mxu1 %v11324_v53  ;;  %271 = vmatmul.mubr.bf16.gmra.mxu0 %v11324_v53 }
  0x44   :  { %481 = vmatprep.mubr.bf16.mxu1 %v14334_v1  ;;  %280 = vmatprep.mubr.bf16.mxu0 %v14334_v1 }
  0x4b   :  { %482 = vmatmul.mubr.bf16.gmra.mxu1 %v11325_v54  ;;  %281 = vmatmul.mubr.bf16.gmra.mxu0 %v11325_v54 }
  0x4c   :  { %682 = vmatprep.mubr.bf16.mxu1 %v14334_v1  ;;  %632 = vmatprep.mubr.bf16.mxu0 %v14334_v1 }
  0x53   :  { %683 = vmatmul.mubr.bf16.vlgmr.msra.gmra.mxu1 %v11325_v54  ;;  %633 = vmatmul.mubr.bf16.vlgmr.msra.gmra.mxu0 %v11835_v34 }
  0x54   :  { %642 = vmatprep.mubr.bf16.mxu0 %v14334_v1  ;;  %10772 = vmatprep.mubr.msk.f32.mxu1 %vm11662_vm0, %v14336_v55 }
  0x5b   :  { %643 = vmatmul.mubr.bf16.gmra.mxu0 %v11856_v39 }
  0x5c   :  { %652 = vmatprep.mubr.bf16.mxu0 %v14334_v1 }
  0x63   :  { %653 = vmatmul.mubr.bf16.gmra.mxu0 %v11322_v44  ;;  %v12064_v44 = vsub.s32 1, %v11928_v57 }
  0x64   :  { %662 = vmatprep.mubr.bf16.mxu0 %v14334_v1 }
  0x65   :  { %14351 = vst [vmem:[#allocation7_spill] sm:$0xff] %v12064_v44  ;;  %v12085_v51 = vrot.slane %v11939_v60, %v12064_v44 }
  0x6b   :  { %663 = vmatmul.mubr.bf16.gmra.mxu0 %v11323_v49 }
  0x6c   :  { %672 = vmatprep.mubr.bf16.mxu0 %v14334_v1 }
  0x73   :  { %673 = vmatmul.mubr.bf16.gmra.mxu0 %v11324_v53 }
  0x74   :  { %10832 = vmatprep.mubr.msk.f32.mxu0 %vm11662_vm0, %v14336_v55 }
  0xe3   :  { %v433_v63 = vpop.f32.mrf.mxu1  ;;  %v232_v0 = vpop.f32.mrf.mxu0 }
  0xe4   :  { %v11949_v2 = vadd.f32 %v433_v63, %v11942_v61  ;;  %v11952_v3 = vadd.f32 %v232_v0, %v11946_v62 }
  0xe5   :  { %v11954_v4 = vpop.f32.mrf.mxu1  ;;  %v11956_v5 = vpop.f32.mrf.mxu0 }
  0xe6   :  { %10771 = vmatpush3.xpose.msk.msra.mxu1 %vm693_vm1, %v11949_v2 }
  0xe7   :  { %v437_v6 = vpop.f32.mrf.mxu1  ;;  %v236_v7 = vpop.f32.mrf.mxu0  ;;  %10775 = vmatprep.subr.mxu1 %v14336_v55 }
  0xe8   :  { %v11962_v8 = vadd.f32 %v437_v6, %v11942_v61  ;;  %v11975_v11 = vadd.f32 %v236_v7, %v11946_v62 }
  0xe9   :  { %v11964_v9 = vpop.f32.mrf.mxu1  ;;  %10773 = vmatmul.mubr.msk.f32.vlgmr.msra.gmra.mxu1 %vm693_vm1, %v11952_v3  ;;  %v11968_v10 = vpop.f32.mrf.mxu0 }
  0xea   :  { %10776 = vmatpush3.xpose.msk.msra.mxu1 %vm693_vm1, %v11962_v8  ;;  %10777 = vmatprep.mubr.msk.f32.mxu1 %vm11662_vm0, %v14336_v55 }
  0xeb   :  { %v443_v12 = vpop.f32.mrf.mxu1  ;;  %v242_v13 = vpop.f32.mrf.mxu0  ;;  %10780 = vmatprep.subr.mxu1 %v14336_v55 }
  0xec   :  { %v11979_v14 = vadd.f32 %v443_v12, %v11942_v61  ;;  %v11982_v15 = vadd.f32 %v242_v13, %v11946_v62 }
  0xed   :  { %v11984_v16 = vpop.f32.mrf.mxu1  ;;  %10778 = vmatmul.mubr.msk.f32.vlgmr.msra.gmra.mxu1 %vm693_vm1, %v11975_v11  ;;  %v11988_v17 = vpop.f32.mrf.mxu0 }
  0xee   :  { %10781 = vmatpush3.xpose.msk.msra.mxu1 %vm693_vm1, %v11979_v14  ;;  %10782 = vmatprep.mubr.msk.f32.mxu1 %vm11662_vm0, %v14336_v55 }
  0xef   :  { %v447_v18 = vpop.f32.mrf.mxu1  ;;  %v246_v19 = vpop.f32.mrf.mxu0  ;;  %10785 = vmatprep.subr.mxu1 %v14336_v55 }
  0xf0   :  { %v11996_v20 = vadd.f32 %v447_v18, %v11942_v61  ;;  %v12009_v23 = vadd.f32 %v246_v19, %v11946_v62 }
  0xf1   :  { %v11998_v21 = vpop.f32.mrf.mxu1  ;;  %10783 = vmatmul.mubr.msk.f32.vlgmr.msra.gmra.mxu1 %vm693_vm1, %v11982_v15  ;;  %v12002_v22 = vpop.f32.mrf.mxu0 }
  0xf2   :  { %10786 = vmatpush3.xpose.msk.msra.mxu1 %vm693_vm1, %v11996_v20  ;;  %10787 = vmatprep.mubr.msk.f32.mxu1 %vm11662_vm0, %v14336_v55 }
  0xf3   :  { %v453_v24 = vpop.f32.mrf.mxu1  ;;  %v252_v25 = vpop.f32.mrf.mxu0  ;;  %10790 = vmatprep.subr.mxu1 %v14336_v55 }
  0xf4   :  { %v12013_v26 = vadd.f32 %v453_v24, %v11942_v61  ;;  %v12016_v27 = vadd.f32 %v252_v25, %v11946_v62 }
  0xf5   :  { %v12018_v28 = vpop.f32.mrf.mxu1  ;;  %10788 = vmatmul.mubr.msk.f32.vlgmr.msra.gmra.mxu1 %vm693_vm1, %v12009_v23  ;;  %v12022_v29 = vpop.f32.mrf.mxu0 }
  0xf6   :  { %14348 = vst [vmem:[#allocation4_spill] sm:$0xff] %v12022_v29  ;;  %10791 = vmatpush3.xpose.msk.msra.mxu1 %vm693_vm1, %v12013_v26  ;;  %10792 = vmatprep.mubr.msk.f32.mxu1 %vm11662_vm0, %v14336_v55 }
  0xf7   :  { %v457_v30 = vpop.f32.mrf.mxu1  ;;  %v256_v31 = vpop.f32.mrf.mxu0  ;;  %10795 = vmatprep.subr.mxu1 %v14336_v55 }
  0xf8   :  { %v12030_v32 = vadd.f32 %v457_v30, %v11942_v61  ;;  %v12043_v35 = vadd.f32 %v256_v31, %v11946_v62 }
  0xf9   :  { %v12032_v33 = vpop.f32.mrf.mxu1  ;;  %10793 = vmatmul.mubr.msk.f32.vlgmr.msra.gmra.mxu1 %vm693_vm1, %v12016_v27  ;;  %v12036_v34 = vpop.f32.mrf.mxu0 }
  0xfa   :  { %10796 = vmatpush3.xpose.msk.msra.mxu1 %vm693_vm1, %v12030_v32  ;;  %10797 = vmatprep.mubr.msk.f32.mxu1 %vm11662_vm0, %v14336_v55 }
  0xfb   :  { %v463_v36 = vpop.f32.mrf.mxu1  ;;  %v262_v37 = vpop.f32.mrf.mxu0  ;;  %10800 = vmatprep.subr.mxu1 %v14336_v55 }
  0xfc   :  { %v12047_v38 = vadd.f32 %v463_v36, %v11942_v61  ;;  %v12050_v39 = vadd.f32 %v262_v37, %v11946_v62 }
  0xfd   :  { %v12052_v40 = vpop.f32.mrf.mxu1  ;;  %10798 = vmatmul.mubr.msk.f32.vlgmr.msra.gmra.mxu1 %vm693_vm1, %v12043_v35  ;;  %v12056_v41 = vpop.f32.mrf.mxu0 }
  0xfe   :  { %14349 = vst [vmem:[#allocation5_spill] sm:$0xff] %v12052_v40  ;;  %14350 = vst [vmem:[#allocation6_spill] sm:$0xff] %v12056_v41  ;;  %10801 = vmatpush3.xpose.msk.msra.mxu1 %vm693_vm1, %v12047_v38  ;;  %10802 = vmatprep.mubr.msk.f32.mxu1 %vm11662_vm0, %v14336_v55 }
  0xff   :  { %v467_v42 = vpop.f32.mrf.mxu1  ;;  %v266_v43 = vpop.f32.mrf.mxu0  ;;  %10805 = vmatprep.subr.mxu1 %v14336_v55 }
 0x100   :  { %v12067_v45 = vadd.f32 %v467_v42, %v11942_v61  ;;  %v12080_v48 = vadd.f32 %v266_v43, %v11946_v62 }
 0x101   :  { %v12069_v46 = vpop.f32.mrf.mxu1  ;;  %10803 = vmatmul.mubr.msk.f32.vlgmr.msra.gmra.mxu1 %vm693_vm1, %v12050_v39  ;;  %v12073_v47 = vpop.f32.mrf.mxu0 }
 0x102   :  { %14352 = vst [vmem:[#allocation8_spill] sm:$0xff] %v12069_v46  ;;  %14353 = vst [vmem:[#allocation9_spill] sm:$0xff] %v12073_v47  ;;  %10806 = vmatpush3.xpose.msk.msra.mxu1 %vm693_vm1, %v12067_v45  ;;  %10807 = vmatprep.mubr.msk.f32.mxu1 %vm11662_vm0, %v14336_v55 }
 0x103   :  { %v473_v49 = vpop.f32.mrf.mxu1  ;;  %v272_v50 = vpop.f32.mrf.mxu0  ;;  %10810 = vmatprep.subr.mxu1 %v14336_v55 }
 0x104   :  { %v12088_v52 = vadd.f32 %v473_v49, %v11942_v61  ;;  %v12091_v53 = vadd.f32 %v272_v50, %v11946_v62 }
 0x105   :  { %v12093_v54 = vpop.f32.mrf.mxu1  ;;  %10808 = vmatmul.mubr.msk.f32.vlgmr.msra.gmra.mxu1 %vm693_vm1, %v12080_v48  ;;  %v274_v59 = vpop.f32.mrf.mxu0 }
 0x106   :  { %14354 = vst [vmem:[#allocation10_spill] sm:$0xff] %v12093_v54  ;;  %v12098_v63 = vadd.f32 %v274_v59, %v12085_v51  ;;  %10811 = vmatpush3.xpose.msk.msra.mxu1 %vm693_vm1, %v12088_v52  ;;  %10812 = vmatprep.mubr.msk.f32.mxu1 %vm11662_vm0, %v14336_v55 }
 0x107   :  { %v477_v60 = vpop.f32.mrf.mxu1  ;;  %v276_v0 = vpop.f32.mrf.mxu0  ;;  %10815 = vmatprep.subr.mxu1 %v14336_v55 }
 0x108   :  { %14355 = vst [vmem:[#allocation11_spill] sm:$0xff] %v12098_v63  ;;  %v12106_v6 = vadd.f32 %v477_v60, %v11942_v61  ;;  %v12119_v13 = vadd.f32 %v276_v0, %v11946_v62 }
 0x109   :  { %v12108_v7 = vpop.f32.mrf.mxu1  ;;  %10813 = vmatmul.mubr.msk.f32.vlgmr.msra.gmra.mxu1 %vm693_vm1, %v12091_v53  ;;  %v12112_v12 = vpop.f32.mrf.mxu0 }
 0x10a   :  { %14356 = vst [vmem:[#allocation12_spill] sm:$0xff] %v12108_v7  ;;  %14357 = vst [vmem:[#allocation13_spill] sm:$0xff] %v12112_v12  ;;  %10816 = vmatpush3.xpose.msk.msra.mxu1 %vm693_vm1, %v12106_v6  ;;  %10817 = vmatprep.mubr.msk.f32.mxu1 %vm11662_vm0, %v14336_v55 }
 0x10b   :  { %v483_v18 = vpop.f32.mrf.mxu1  ;;  %v282_v19 = vpop.f32.mrf.mxu0  ;;  %10820 = vmatprep.subr.mxu1 %v14336_v55 }
 0x10c   :  { %v12123_v24 = vadd.f32 %v483_v18, %v11942_v61  ;;  %v12126_v25 = vadd.f32 %v282_v19, %v11946_v62 }
 0x10d   :  { %v12128_v30 = vpop.f32.mrf.mxu1  ;;  %10818 = vmatmul.mubr.msk.f32.vlgmr.msra.gmra.mxu1 %vm693_vm1, %v12119_v13  ;;  %v284_v31 = vpop.f32.mrf.mxu0 }
 0x10e   :  { %14358 = vst [vmem:[#allocation14_spill] sm:$0xff] %v12128_v30  ;;  %v12133_v36 = vadd.f32 %v284_v31, %v12085_v51  ;;  %10821 = vmatpush3.xpose.msk.msra.mxu1 %vm693_vm1, %v12123_v24  ;;  %10822 = vmatprep.mubr.msk.f32.mxu1 %vm11662_vm0, %v14336_v55 }
 0x10f   :  { %v487_v37 = vpop.f32.mrf.mxu1  ;;  %10825 = vmatprep.subr.mxu1 %v14336_v55  ;;  %v286_v43 = vpop.f32.mrf.mxu0 }
 0x110   :  { %14359 = vst [vmem:[#allocation15_spill] sm:$0xff] %v12133_v36  ;;  %v12141_v42 = vadd.f32 %v487_v37, %v11942_v61  ;;  %v12150_v49 = vadd.f32 %v286_v43, %v11946_v62 }
 0x111   :  { %10823 = vmatmul.mubr.msk.f32.vlgmr.msra.gmra.mxu1 %vm693_vm1, %v12126_v25  ;;  %v12157_v61 = vpop.f32.mrf.mxu1 }
 0x112   :  { %10826 = vmatpush3.xpose.msk.msra.mxu1 %vm693_vm1, %v12141_v42  ;;  %10827 = vmatprep.mubr.msk.f32.mxu1 %vm11662_vm0, %v14336_v55  ;;  %14360 = vst [vmem:[#allocation16_spill] sm:$0xff] %v12157_v61 }
 0x113   :  { %10835 = vmatprep.subr.mxu1 %v14336_v55  ;;  %v12159_v50 = vpop.f32.mrf.mxu1 }
 0x115   :  { %10828 = vmatmul.mubr.msk.f32.vlgmr.msra.gmra.mxu1 %vm693_vm1, %v12150_v49  ;;  %v12161_v59 = vpop.f32.mrf.mxu1 }
 0x116   :  { %10837 = vmatprep.mubr.msk.f32.mxu1 %vm11662_vm0, %v14336_v55  ;;  %14361 = vst [vmem:[#allocation17_spill] sm:$0xff] %v12161_v59 }
 0x117   :  { %v12163_v60 = vpop.f32.mrf.mxu1 }
 0x119   :  { %v12165_v0 = vpop.f32.mrf.mxu1 }
 0x11a   :  { %14362 = vst [vmem:[#allocation18_spill] sm:$0xff] %v12165_v0 }
 0x1a9   :  { %v766_v62 = vpop.f32.mrf.mxu1 }
 0x1aa   :  { %v12169_v43 = vmul.f32 0.125, %v766_v62 }
 0x1ab   :  { %v10774_v18 = vpop.f32.mrf.mxu1 }
 0x1ac   :  { %v1619_v59 = vsel %vm1618_vm2, %v12169_v43, -inf }
 0x1ad   :  { %v842_v19 = vpop.f32.mrf.mxu1 }
 0x1ae   :  { %v12167_v31 = vmul.f32 0.125, %v842_v19 }
 0x1af   :  { %v10779_v37 = vpop.f32.mrf.mxu1 }
 0x1b0   :  { %v1622_v56 = vsel %vm1618_vm2, %v12167_v31, -inf }
 0x1b1   :  { %1623 = vmax.xlane.f32.xlu0 %v1622_v56  ;;  %v918_v1 = vpop.f32.mrf.mxu1 }
 0x1b2   :  { %v12173_v55 = vmul.f32 0.125, %v918_v1 }
 0x1b3   :  { %v10784_v57 = vpop.f32.mrf.mxu1 }
 0x1b4   :  { %v1625_v18 = vsel %vm1618_vm2, %v12173_v55, -inf }
 0x1b5   :  { %1620 = vmax.xlane.f32.xlu0 %v1619_v59  ;;  %1626 = vmax.xlane.f32.xlu1 %v1625_v18  ;;  %v994_v19 = vpop.f32.mrf.mxu1 }
 0x1b6   :  { %v12179_v37 = vmul.f32 0.125, %v994_v19 }
 0x1b7   :  { %v10789_v62 = vpop.f32.mrf.mxu1 }
 0x1b8   :  { %v1628_v0 = vsel %vm1618_vm2, %v12179_v37, -inf }
 0x1b9   :  { %1629 = vmax.xlane.f32.xlu1 %v1628_v0  ;;  %v1070_v56 = vpop.f32.mrf.mxu1 }
 0x1ba   :  { %v12183_v1 = vmul.f32 0.125, %v1070_v56 }
 0x1bb   :  { %v10794_v57 = vpop.f32.mrf.mxu1 }
 0x1bc   :  { %v1631_v36 = vsel %vm1618_vm2, %v12183_v1, -inf }
 0x1bd   :  { %1632 = vmax.xlane.f32.xlu1 %v1631_v36  ;;  %v1146_v63 = vpop.f32.mrf.mxu1 }
 0x1be   :  { %v12187_v30 = vmul.f32 0.125, %v1146_v63 }
 0x1bf   :  { %v10799_v59 = vpop.f32.mrf.mxu1 }
 0x1c0   :  { %v1634_v18 = vsel %vm1618_vm2, %v12187_v30, -inf }
 0x1c1   :  { %1635 = vmax.xlane.f32.xlu0 %v1634_v18  ;;  %v1222_v19 = vpop.f32.mrf.mxu1 }
 0x1c2   :  { %v12191_v62 = vmul.f32 0.125, %v1222_v19 }
 0x1c3   :  { %v10804_v0 = vpop.f32.mrf.mxu1 }
 0x1c4   :  { %v1637_v56 = vsel %vm1618_vm2, %v12191_v62, -inf }
 0x1c5   :  { %1638 = vmax.xlane.f32.xlu1 %v1637_v56  ;;  %v1298_v57 = vpop.f32.mrf.mxu1 }
 0x1c6   :  { %v12195_v54 = vmul.f32 0.125, %v1298_v57 }
 0x1c7   :  { %v10809_v36 = vpop.f32.mrf.mxu1 }
 0x1c8   :  { %v1640_v63 = vsel %vm1618_vm2, %v12195_v54, -inf }
 0x1c9   :  { %1641 = vmax.xlane.f32.xlu0 %v1640_v63  ;;  %v1374_v59 = vpop.f32.mrf.mxu1 }
 0x1ca   :  { %v12199_v41 = vmul.f32 0.125, %v1374_v59 }
 0x1cb   :  { %v10814_v18 = vpop.f32.mrf.mxu1 }
 0x1cc   :  { %v1643_v19 = vsel %vm1618_vm2, %v12199_v41, -inf }
 0x1cd   :  { %1644 = vmax.xlane.f32.xlu1 %v1643_v19  ;;  %v1450_v0 = vpop.f32.mrf.mxu1 }
 0x1ce   :  { %v12203_v40 = vmul.f32 0.125, %v1450_v0 }
 0x1cf   :  { %v10819_v56 = vpop.f32.mrf.mxu1 }
 0x1d0   :  { %v1646_v57 = vsel %vm1618_vm2, %v12203_v40, -inf  ;;  %v508_v56 = vld [vmem:[%s14326_s6] sm:$0x3] }
 0x1d1   :  { %1647 = vmax.xlane.f32.xlu0 %v1646_v57  ;;  %v1526_v36 = vpop.f32.mrf.mxu1  ;;  %v12226_v57 = vpop.f32.mrf.mxu0 }
 0x1d2   :  { %v12207_v29 = vmul.f32 0.125, %v1526_v36  ;;  %14363 = vst [vmem:[#allocation19_spill] sm:$0xff] %v12226_v57  ;;  %v12229_v36 = vrot.slane %v508_v56, %v11931_v58 }
 0x1d3   :  { %v10824_v63 = vpop.f32.mrf.mxu1 }
 0x1d4   :  { %v1649_v59 = vsel %vm1618_vm2, %v12207_v29, -inf  ;;  %v634_v63 = vpop.f32.mrf.mxu0 }
 0x1d5   :  { %1650 = vmax.xlane.f32.xlu1 %v1649_v59  ;;  %v1602_v18 = vpop.f32.mrf.mxu1  ;;  %v14365_v59 = vmov 0.0  }
 0x1d6   :  { %v12211_v61 = vmul.f32 0.125, %v1602_v18 }
 0x1d7   :  { %v10829_v19 = vpop.f32.mrf.mxu1 }
 0x1d8   :  { %v1652_v0 = vsel %vm1618_vm2, %v12211_v61, -inf }
 0x1d9   :  { %1653 = vmax.xlane.f32.xlu0 %v1652_v0 }
 0x1e6   :  { %2719 = vrot.lane.b32.xlu1 %v11975_v11, %s11663_s4  ;;  %v12232_v11 = vadd.f32 %v634_v63, %v12229_v36 }
 0x1e8   :  { %10831 = vmatpush3.msra.mxu0 %v12232_v11 }
 0x1e9   :  { %10840 = vmatprep.subr.mxu0 %v14365_v59 }
 0x1ea   :  { %2643 = vrot.lane.b32.xlu1 %v11949_v2, %s11663_s4  ;;  %v12234_v2 = vpop.f32.mrf.mxu0 }
 0x1eb   :  { %14364 = vst [vmem:[#allocation20_spill] sm:$0xff] %v12234_v2 }
 0x1ee   :  { %2877 = vrot.lane.b32.xlu1 %v11996_v20, %s11663_s4  ;;  %v638_v20 = vpop.f32.mrf.mxu0 }
 0x1ef   :  { %2721 = vrot.lane.b32.xlu0 %v11962_v8, %s11663_s4  ;;  %v12239_v8 = vadd.f32 %v638_v20, %v12229_v36 }
 0x1f1   :  { %10836 = vmatpush3.msra.mxu1 %v12239_v8 }
 0x1f2   :  { %10845 = vmatprep.subr.mxu1 %v14365_v59 }
 0x23a   :  { %v1624_v18 = vpop.xlane.xlu0 %1623 }
 0x23b   :  { %v1656_v19 = vsub.f32 %v12167_v31, %v1624_v18 }
 0x23d   :  { %v1669_v0 = vmul.f32 1.442695, %v1656_v19 }
 0x23e   :  { %v1621_v56 = vpop.xlane.xlu0 %1620  ;;  %v1627_v63 = vpop.xlane.xlu1 %1626 }
 0x23f   :  { %11414 = vpow2.f32 %v1669_v0  ;;  %v1655_v58 = vsub.f32 %v12169_v43, %v1621_v56  ;;  %v1657_v2 = vsub.f32 %v12173_v55, %v1627_v63 }
 0x241   :  { %v1667_v57 = vmul.f32 1.442695, %v1655_v58  ;;  %v1671_v12 = vmul.f32 1.442695, %v1657_v2 }
 0x242   :  { %v1630_v7 = vpop.xlane.xlu1 %1629 }
 0x243   :  { %11416 = vpow2.f32 %v1667_v57  ;;  %v1658_v20 = vsub.f32 %v12179_v37, %v1630_v7 }
 0x244   :  { %11418 = vpow2.f32 %v1671_v12 }
 0x245   :  { %v1673_v47 = vmul.f32 1.442695, %v1658_v20 }
 0x246   :  { %v1633_v46 = vpop.xlane.xlu1 %1632 }
 0x247   :  { %11420 = vpow2.f32 %v1673_v47  ;;  %v1659_v31 = vsub.f32 %v12183_v1, %v1633_v46 }
 0x249   :  { %v1675_v18 = vmul.f32 1.442695, %v1659_v31 }
 0x24a   :  { %v1636_v19 = vpop.xlane.xlu0 %1635 }
 0x24b   :  { %11422 = vpow2.f32 %v1675_v18  ;;  %v1660_v0 = vsub.f32 %v12187_v30, %v1636_v19 }
 0x24c   :  { %v12249_v43 = vpop.eup %11414 }
 0x24d   :  { %v1677_v55 = vmul.f32 1.442695, %v1660_v0  ;;  %v1694_v58 = vsel %vm1618_vm2, %v12249_v43, 0.0 }
 0x24e   :  { %v1639_v57 = vpop.xlane.xlu1 %1638  ;;  %1695 = vadd.xlane.f32.xlu0 %v1694_v58 }
 0x24f   :  { %11424 = vpow2.f32 %v1677_v55  ;;  %v1661_v7 = vsub.f32 %v12191_v62, %v1639_v57 }
 0x250   :  { %v12254_v12 = vpop.eup %11416 }
 0x251   :  { %v1679_v47 = vmul.f32 1.442695, %v1661_v7  ;;  %v1691_v46 = vsel %vm1618_vm2, %v12254_v12, 0.0  ;;  %v12258_v37 = vpop.eup %11418 }
 0x252   :  { %v1642_v30 = vpop.xlane.xlu0 %1641  ;;  %1692 = vadd.xlane.f32.xlu1 %v1691_v46  ;;  %v1697_v63 = vsel %vm1618_vm2, %v12258_v37, 0.0 }
 0x253   :  { %11426 = vpow2.f32 %v1679_v47  ;;  %v1662_v1 = vsub.f32 %v12195_v54, %v1642_v30 }
 0x254   :  { %v12261_v2 = vpop.eup %11420 }
 0x255   :  { %v1681_v56 = vmul.f32 1.442695, %v1662_v1  ;;  %v1700_v62 = vsel %vm1618_vm2, %v12261_v2, 0.0 }
 0x256   :  { %v1645_v20 = vpop.xlane.xlu1 %1644  ;;  %1698 = vadd.xlane.f32.xlu1 %v1697_v63  ;;  %1701 = vadd.xlane.f32.xlu0 %v1700_v62 }
 0x257   :  { %11428 = vpow2.f32 %v1681_v56  ;;  %v1663_v31 = vsub.f32 %v12199_v41, %v1645_v20 }
 0x258   :  { %v12268_v18 = vpop.eup %11422 }
 0x259   :  { %v1683_v19 = vmul.f32 1.442695, %v1663_v31  ;;  %v1703_v54 = vsel %vm1618_vm2, %v12268_v18, 0.0 }
 0x25a   :  { %v1648_v0 = vpop.xlane.xlu0 %1647  ;;  %1704 = vadd.xlane.f32.xlu1 %v1703_v54 }
 0x25b   :  { %11430 = vpow2.f32 %v1683_v19  ;;  %v1664_v55 = vsub.f32 %v12203_v40, %v1648_v0 }
 0x25c   :  { %v12273_v58 = vpop.eup %11424 }
 0x25d   :  { %v1685_v57 = vmul.f32 1.442695, %v1664_v55  ;;  %v1706_v7 = vsel %vm1618_vm2, %v12273_v58, 0.0 }
 0x25e   :  { %v1651_v47 = vpop.xlane.xlu1 %1650  ;;  %1707 = vadd.xlane.f32.xlu0 %v1706_v7 }
 0x25f   :  { %11432 = vpow2.f32 %v1685_v57  ;;  %v1665_v41 = vsub.f32 %v12207_v29, %v1651_v47 }
 0x260   :  { %v12278_v46 = vpop.eup %11426 }
 0x261   :  { %v1687_v30 = vmul.f32 1.442695, %v1665_v41  ;;  %v1709_v1 = vsel %vm1618_vm2, %v12278_v46, 0.0 }
 0x262   :  { %1710 = vadd.xlane.f32.xlu1 %v1709_v1  ;;  %v1654_v56 = vpop.xlane.xlu0 %1653 }
 0x263   :  { %11434 = vpow2.f32 %v1687_v30  ;;  %v1666_v40 = vsub.f32 %v12211_v61, %v1654_v56 }
 0x264   :  { %v12283_v63 = vpop.eup %11428 }
 0x265   :  { %v1689_v62 = vmul.f32 1.442695, %v1666_v40  ;;  %v1712_v20 = vsel %vm1618_vm2, %v12283_v63, 0.0 }
 0x266   :  { %1713 = vadd.xlane.f32.xlu0 %v1712_v20 }
 0x267   :  { %11436 = vpow2.f32 %v1689_v62 }
 0x268   :  { %v12287_v29 = vpop.eup %11430 }
 0x269   :  { %v1715_v31 = vsel %vm1618_vm2, %v12287_v29, 0.0 }
 0x26a   :  { %1716 = vadd.xlane.f32.xlu1 %v1715_v31 }
 0x26c   :  { %v12291_v19 = vpop.eup %11432 }
 0x26d   :  { %v1718_v54 = vsel %vm1618_vm2, %v12291_v19, 0.0 }
 0x26e   :  { %1719 = vadd.xlane.f32.xlu0 %v1718_v54 }
 0x270   :  { %v12295_v61 = vpop.eup %11434 }
 0x271   :  { %v1721_v0 = vsel %vm1618_vm2, %v12295_v61, 0.0 }
 0x272   :  { %1722 = vadd.xlane.f32.xlu1 %v1721_v0 }
 0x274   :  { %v12299_v55 = vpop.eup %11436 }
 0x275   :  { %v1724_v57 = vsel %vm1618_vm2, %v12299_v55, 0.0 }
 0x276   :  { %1725 = vadd.xlane.f32.xlu0 %v1724_v57 }
 0x283   :  { %2875 = vrot.lane.b32.xlu1 %v12009_v23, %s11663_s4 }
 0x287   :  { %3031 = vrot.lane.b32.xlu1 %v12043_v35, %s11663_s4 }
 0x28b   :  { %3189 = vrot.lane.b32.xlu1 %v12067_v45, %s11663_s4 }
 0x28c   :  { %2641 = vrot.lane.b32.xlu0 %v11952_v3, %s11663_s4  ;;  %v12327_v3 = vpop.f32.mrf.mxu0 }
 0x28f   :  { %3187 = vrot.lane.b32.xlu1 %v12080_v48, %s11663_s4 }
 0x290   :  { %3033 = vrot.lane.b32.xlu0 %v12030_v32, %s11663_s4 }
 0x293   :  { %3343 = vrot.lane.b32.xlu1 %v12119_v13, %s11663_s4 }
 0x294   :  { %2799 = vrot.lane.b32.xlu0 %v11979_v14, %s11663_s4  ;;  %v644_v14 = vpop.f32.mrf.mxu0 }
 0x295   :  { %v12372_v30 = vadd.f32 %v644_v14, %v12229_v36 }
 0x297   :  { %3501 = vrot.lane.b32.xlu1 %v12141_v42, %s11663_s4 }
 0x298   :  { %2797 = vrot.lane.b32.xlu0 %v11982_v15, %s11663_s4  ;;  %v12337_v15 = vpop.f32.mrf.mxu0 }
 0x299   :  { %14366 = vst [vmem:[#allocation21_spill] sm:$0xff] %v12337_v15 }
 0x29a   :  { %v648_v23 = vpop.f32.mrf.mxu0 }
 0x29b   :  { %3499 = vrot.lane.b32.xlu1 %v12150_v49, %s11663_s4 }
 0x29c   :  { %3345 = vrot.lane.b32.xlu0 %v12106_v6, %s11663_s4  ;;  %v12355_v32 = vpop.f32.mrf.mxu0 }
 0x29f   :  { %3109 = vrot.lane.b32.xlu1 %v12050_v39, %s11663_s4  ;;  %v12359_v39 = vpop.permute.xlu0 %2721 }
 0x2a0   :  { %2955 = vrot.lane.b32.xlu0 %v12013_v26, %s11663_s4  ;;  %v649_v26 = vadd.f32 %v648_v23, %v12229_v36 }
 0x2a3   :  { %3265 = vrot.lane.b32.xlu1 %v12091_v53, %s11663_s4 }
 0x2a4   :  { %2953 = vrot.lane.b32.xlu0 %v12016_v27, %s11663_s4  ;;  %v12353_v27 = vpop.permute.xlu1 %2719 }
 0x2a7   :  { %3421 = vrot.lane.b32.xlu1 %v12126_v25, %s11663_s4 }
 0x2a8   :  { %3111 = vrot.lane.b32.xlu0 %v12047_v38, %s11663_s4  ;;  %v12357_v35 = vpop.permute.xlu1 %2643  ;;  %v654_v38 = vpop.f32.mrf.mxu0 }
 0x2a9   :  { %v12380_v62 = vadd.f32 %v654_v38, %v12229_v36 }
 0x2aa   :  { %v12361_v45 = vpop.f32.mrf.mxu0 }
 0x2ab   :  { %3799 = vrot.lane.b32.xlu1 %v12239_v8, %s11663_s4  ;;  %14367 = vst [vmem:[#allocation22_spill] sm:$0xff] %v12361_v45 }
 0x2ac   :  { %3267 = vrot.lane.b32.xlu0 %v12088_v52, %s11663_s4  ;;  %v12363_v48 = vpop.permute.xlu1 %2877  ;;  %v658_v53 = vpop.f32.mrf.mxu0 }
 0x2ae   :  { %v12365_v13 = vpop.f32.mrf.mxu0 }
 0x2af   :  { %3953 = vrot.lane.b32.xlu1 %v649_v26, %s11663_s4 }
 0x2b0   :  { %3423 = vrot.lane.b32.xlu0 %v12123_v24, %s11663_s4  ;;  %v664_v42 = vpop.f32.mrf.mxu0 }
 0x2b2   :  { %v12368_v7 = vpop.f32.mrf.mxu0 }
 0x2b3   :  { %14368 = vst [vmem:[#allocation23_spill] sm:$0xff] %v12368_v7 }
 0x2b4   :  { %3722 = vrot.lane.b32.xlu0 %v12232_v11, %s11663_s4  ;;  %v668_v56 = vpop.f32.mrf.mxu0 }
 0x2b6   :  { %v12390_v54 = vpop.f32.mrf.mxu0 }
 0x2d7   :  { %v1696_v52 = vpop.xlane.xlu0 %1695 }
 0x2d8   :  { %11438 = vrcp.f32 %v1696_v52  ;;  %v12409_v52 = vadd.f32 %v668_v56, %v12229_v36 }
 0x2db   :  { %v1693_v6 = vpop.xlane.xlu1 %1692 }
 0x2dc   :  { %11440 = vrcp.f32 %v1693_v6 }
 0x2df   :  { %v1699_v24 = vpop.xlane.xlu1 %1698  ;;  %v1702_v25 = vpop.xlane.xlu0 %1701 }
 0x2e0   :  { %11442 = vrcp.f32 %v1699_v24 }
 0x2e1   :  { %11444 = vrcp.f32 %v1702_v25 }
 0x2e3   :  { %v1705_v49 = vpop.xlane.xlu1 %1704 }
 0x2e4   :  { %11446 = vrcp.f32 %v1705_v49 }
 0x2e5   :  { %v11439_v11 = vpop.eup %11438 }
 0x2e6   :  { %v1740_v8 = vmul.f32 %v11439_v11, %v12249_v43 }
 0x2e7   :  { %v1708_v47 = vpop.xlane.xlu0 %1707 }
 0x2e8   :  { %11448 = vrcp.f32 %v1708_v47  ;;  %10838 = vmatmul.mubr.msk.f32.vlgmr.msra.gmra.mxu1 %vm1618_vm2, %v1740_v8 }
 0x2e9   :  { %v11441_v41 = vpop.eup %11440  ;;  %10846 = vmatpush3.msra.mxu1 %v649_v26  ;;  %10847 = vmatprep.mubr.msk.f32.mxu1 %vm11662_vm0, %v14365_v59  ;;  %v674_v26 = vpop.f32.mrf.mxu0 }
 0x2ea   :  { %v1739_v1 = vmul.f32 %v11441_v41, %v12254_v12  ;;  %10855 = vmatprep.subr.mxu1 %v14365_v59  ;;  %v12388_v12 = vadd.f32 %v658_v53, %v12229_v36  ;;  %v12420_v25 = vadd.f32 %v674_v26, %v12229_v36 }
 0x2eb   :  { %v1711_v43 = vpop.xlane.xlu1 %1710  ;;  %v12415_v53 = vpop.f32.mrf.mxu0 }
 0x2ec   :  { %11450 = vrcp.f32 %v1711_v43  ;;  %10833 = vmatmul.mubr.msk.f32.vlgmr.msra.gmra.mxu0 %vm1618_vm2, %v1739_v1  ;;  %14369 = vst [vmem:[#allocation24_spill] sm:$0xff] %v12415_v53 }
 0x2ed   :  { %v11443_v40 = vpop.eup %11442  ;;  %10841 = vmatpush3.msra.mxu0 %v12372_v30  ;;  %10842 = vmatprep.mubr.msk.f32.mxu0 %vm11662_vm0, %v14365_v59 }
 0x2ee   :  { %v11445_v20 = vpop.eup %11444  ;;  %v1741_v31 = vmul.f32 %v11443_v40, %v12258_v37  ;;  %10850 = vmatprep.subr.mxu0 %v14365_v59  ;;  %v12397_v37 = vadd.f32 %v664_v42, %v12229_v36 }
 0x2ef   :  { %v1714_v0 = vpop.xlane.xlu0 %1713  ;;  %v1742_v57 = vmul.f32 %v11445_v20, %v12261_v2 }
 0x2f0   :  { %11452 = vrcp.f32 %v1714_v0  ;;  %10843 = vmatmul.mubr.msk.f32.vlgmr.msra.gmra.mxu0 %vm1618_vm2, %v1741_v31 }
 0x2f1   :  { %v11447_v14 = vpop.eup %11446  ;;  %10848 = vmatmul.mubr.msk.f32.vlgmr.msra.gmra.mxu1 %vm1618_vm2, %v1742_v57  ;;  %10851 = vmatpush3.msra.mxu0 %v12380_v62 }
 0x2f2   :  { %10852 = vmatprep.mubr.msk.f32.mxu0 %vm11662_vm0, %v14365_v59  ;;  %v1743_v23 = vmul.f32 %v11447_v14, %v12268_v18  ;;  %10856 = vmatpush3.msra.mxu1 %v12388_v12 }
 0x2f3   :  { %v1717_v2 = vpop.xlane.xlu1 %1716  ;;  %10857 = vmatprep.mubr.msk.f32.mxu1 %vm11662_vm0, %v14365_v59  ;;  %10860 = vmatprep.subr.mxu0 %v14365_v59 }
 0x2f4   :  { %11454 = vrcp.f32 %v1717_v2  ;;  %10853 = vmatmul.mubr.msk.f32.vlgmr.msra.gmra.mxu0 %vm1618_vm2, %v1743_v23  ;;  %10865 = vmatprep.subr.mxu1 %v14365_v59 }
 0x2f5   :  { %v11449_v38 = vpop.eup %11448  ;;  %10861 = vmatpush3.msra.mxu0 %v12397_v37  ;;  %10862 = vmatprep.mubr.msk.f32.mxu0 %vm11662_vm0, %v14365_v59 }
 0x2f6   :  { %v1744_v18 = vmul.f32 %v11449_v38, %v12273_v58  ;;  %10870 = vmatprep.subr.mxu0 %v14365_v59  ;;  %v678_v58 = vpop.f32.mrf.mxu0 }
 0x2f7   :  { %v1720_v6 = vpop.xlane.xlu0 %1719  ;;  %v12430_v8 = vadd.f32 %v678_v58, %v12229_v36 }
 0x2f8   :  { %11456 = vrcp.f32 %v1720_v6  ;;  %10858 = vmatmul.mubr.msk.f32.vlgmr.msra.gmra.mxu1 %vm1618_vm2, %v1744_v18 }
 0x2f9   :  { %v11451_v24 = vpop.eup %11450  ;;  %10866 = vmatpush3.msra.mxu1 %v12409_v52  ;;  %10867 = vmatprep.mubr.msk.f32.mxu1 %vm11662_vm0, %v14365_v59 }
 0x2fa   :  { %v1745_v42 = vmul.f32 %v11451_v24, %v12278_v46  ;;  %10875 = vmatprep.subr.mxu1 %v14365_v59 }
 0x2fb   :  { %v1723_v49 = vpop.xlane.xlu1 %1722 }
 0x2fc   :  { %11458 = vrcp.f32 %v1723_v49  ;;  %10863 = vmatmul.mubr.msk.f32.vlgmr.msra.gmra.mxu0 %vm1618_vm2, %v1745_v42 }
 0x2fd   :  { %v11453_v11 = vpop.eup %11452  ;;  %10871 = vmatpush3.msra.mxu0 %v12420_v25  ;;  %10872 = vmatprep.mubr.msk.f32.mxu0 %vm11662_vm0, %v14365_v59 }
 0x2fe   :  { %v1746_v47 = vmul.f32 %v11453_v11, %v12283_v63  ;;  %10880 = vmatprep.subr.mxu0 %v14365_v59  ;;  %v12444_v63 = vadd.f32 %v12159_v50, %v12229_v36 }
 0x2ff   :  { %v2876_v46 = vpop.permute.xlu1 %2875  ;;  %v1726_v41 = vpop.xlane.xlu0 %1725 }
 0x300   :  { %11460 = vrcp.f32 %v1726_v41  ;;  %10868 = vmatmul.mubr.msk.f32.vlgmr.msra.gmra.mxu1 %vm1618_vm2, %v1746_v47  ;;  %v12537_v47 = vpop.f32.mrf.mxu0 }
 0x301   :  { %v11455_v1 = vpop.eup %11454  ;;  %10876 = vmatpush3.msra.mxu1 %v12430_v8  ;;  %10877 = vmatprep.mubr.msk.f32.mxu1 %vm11662_vm0, %v14365_v59 }
 0x302   :  { %v1747_v56 = vmul.f32 %v11455_v1, %v12287_v29  ;;  %10885 = vmatprep.subr.mxu1 %v14365_v59  ;;  %v12454_v29 = vadd.f32 %v12163_v60, %v12229_v36 }
 0x303   :  { %v3032_v43 = vpop.permute.xlu1 %3031  ;;  %v2642_v40 = vpop.permute.xlu0 %2641 }
 0x304   :  { %10873 = vmatmul.mubr.msk.f32.vlgmr.msra.gmra.mxu0 %vm1618_vm2, %v1747_v56 }
 0x305   :  { %v11457_v20 = vpop.eup %11456  ;;  %10881 = vmatpush3.msra.mxu0 %v12444_v63  ;;  %10882 = vmatprep.mubr.msk.f32.mxu0 %vm11662_vm0, %v14365_v59 }
 0x306   :  { %v1748_v31 = vmul.f32 %v11457_v20, %v12291_v19  ;;  %10890 = vmatprep.subr.mxu0 %v14365_v59 }
 0x307   :  { %v3190_v50 = vpop.permute.xlu1 %3189  ;;  %v3034_v0 = vpop.permute.xlu0 %3033 }
 0x308   :  { %10878 = vmatmul.mubr.msk.f32.vlgmr.msra.gmra.mxu1 %vm1618_vm2, %v1748_v31 }
 0x309   :  { %v11459_v57 = vpop.eup %11458  ;;  %10886 = vmatpush3.msra.mxu1 %v12454_v29  ;;  %10887 = vmatprep.mubr.msk.f32.mxu1 %vm11662_vm0, %v14365_v59 }
 0x30a   :  { %v1749_v14 = vmul.f32 %v11459_v57, %v12295_v61  ;;  %10895 = vmatprep.subr.mxu1 %v14365_v59 }
 0x30b   :  { %v3188_v19 = vpop.permute.xlu1 %3187  ;;  %v2800_v23 = vpop.permute.xlu0 %2799 }
 0x30c   :  { %10883 = vmatmul.mubr.msk.f32.vlgmr.msra.gmra.mxu0 %vm1618_vm2, %v1749_v14 }
 0x30d   :  { %v11461_v60 = vpop.eup %11460  ;;  %10891 = vmatpush3.xpose.msk.msra.mxu0 %vm693_vm1, %v12357_v35  ;;  %10892 = vmatprep.mubr.msk.f32.mxu0 %vm11662_vm0, %v14365_v59 }
 0x30e   :  { %10900 = vmatprep.subr.mxu0 %v14365_v59  ;;  %v1750_v36 = vmul.f32 %v11461_v60, %v12299_v55 }
 0x30f   :  { %v3344_v26 = vpop.permute.xlu1 %3343  ;;  %v2798_v2 = vpop.permute.xlu0 %2797 }
 0x310   :  { %10888 = vmatmul.mubr.msk.f32.vlgmr.msra.gmra.mxu1 %vm1618_vm2, %v1750_v36  ;;  %10893 = vmatmul.mubr.msk.f32.vlgmr.msra.gmra.mxu0 %vm693_vm1, %v2642_v40 }
 0x311   :  { %10896 = vmatpush3.xpose.msk.msra.mxu1 %vm693_vm1, %v12359_v39  ;;  %10901 = vmatpush3.xpose.msk.msra.mxu0 %vm693_vm1, %v2800_v23 }
 0x312   :  { %10897 = vmatprep.mubr.msk.f32.mxu1 %vm11662_vm0, %v14365_v59  ;;  %10902 = vmatprep.mubr.msk.f32.mxu0 %vm11662_vm0, %v14365_v59 }
 0x313   :  { %v3502_v61 = vpop.permute.xlu1 %3501  ;;  %10905 = vmatprep.subr.mxu1 %v14365_v59  ;;  %v3346_v55 = vpop.permute.xlu0 %3345  ;;  %10910 = vmatprep.subr.mxu0 %v14365_v59 }
 0x314   :  { %10898 = vmatmul.mubr.msk.f32.vlgmr.msra.gmra.mxu1 %vm693_vm1, %v12353_v27  ;;  %10903 = vmatmul.mubr.msk.f32.vlgmr.msra.gmra.mxu0 %vm693_vm1, %v2798_v2 }
 0x315   :  { %10906 = vmatpush3.xpose.msk.msra.mxu1 %vm693_vm1, %v12363_v48  ;;  %10907 = vmatprep.mubr.msk.f32.mxu1 %vm11662_vm0, %v14365_v59 }
 0x316   :  { %10915 = vmatprep.subr.mxu1 %v14365_v59  ;;  %10912 = vmatprep.mubr.msk.f32.mxu0 %vm11662_vm0, %v14365_v59 }
 0x317   :  { %v3500_v35 = vpop.permute.xlu1 %3499  ;;  %v2956_v39 = vpop.permute.xlu0 %2955 }
 0x318   :  { %10908 = vmatmul.mubr.msk.f32.vlgmr.msra.gmra.mxu1 %vm693_vm1, %v2876_v46  ;;  %10911 = vmatpush3.xpose.msk.msra.mxu0 %vm693_vm1, %v2956_v39 }
 0x319   :  { %10916 = vmatpush3.xpose.msk.msra.mxu1 %vm693_vm1, %v3034_v0  ;;  %10917 = vmatprep.mubr.msk.f32.mxu1 %vm11662_vm0, %v14365_v59 }
 0x31a   :  { %10925 = vmatprep.subr.mxu1 %v14365_v59  ;;  %10920 = vmatprep.subr.mxu0 %v14365_v59 }
 0x31b   :  { %v3110_v27 = vpop.permute.xlu1 %3109  ;;  %v2954_v48 = vpop.permute.xlu0 %2953 }
 0x31c   :  { %10913 = vmatmul.mubr.msk.f32.vlgmr.msra.gmra.mxu0 %vm693_vm1, %v2954_v48  ;;  %10918 = vmatmul.mubr.msk.f32.vlgmr.msra.gmra.mxu1 %vm693_vm1, %v3032_v43 }
 0x31d   :  { %10926 = vmatpush3.xpose.msk.msra.mxu1 %vm693_vm1, %v3190_v50  ;;  %10927 = vmatprep.mubr.msk.f32.mxu1 %vm11662_vm0, %v14365_v59 }
 0x31e   :  { %10935 = vmatprep.subr.mxu1 %v14365_v59  ;;  %10922 = vmatprep.mubr.msk.f32.mxu0 %vm11662_vm0, %v14365_v59 }
 0x31f   :  { %v3266_v38 = vpop.permute.xlu1 %3265  ;;  %v3112_v18 = vpop.permute.xlu0 %3111 }
 0x320   :  { %10921 = vmatpush3.xpose.msk.msra.mxu0 %vm693_vm1, %v3112_v18  ;;  %10928 = vmatmul.mubr.msk.f32.vlgmr.msra.gmra.mxu1 %vm693_vm1, %v3188_v19 }
 0x321   :  { %10936 = vmatpush3.xpose.msk.msra.mxu1 %vm693_vm1, %v3346_v55  ;;  %10930 = vmatprep.subr.mxu0 %v14365_v59 }
 0x322   :  { %10937 = vmatprep.mubr.msk.f32.mxu1 %vm11662_vm0, %v14365_v59  ;;  %10945 = vmatprep.subr.mxu1 %v14365_v59 }
 0x323   :  { %v3422_v6 = vpop.permute.xlu1 %3421  ;;  %10923 = vmatmul.mubr.msk.f32.vlgmr.msra.gmra.mxu0 %vm693_vm1, %v3110_v27  ;;  %v3268_v24 = vpop.permute.xlu0 %3267 }
 0x324   :  { %10931 = vmatpush3.xpose.msk.msra.mxu0 %vm693_vm1, %v3268_v24  ;;  %10938 = vmatmul.mubr.msk.f32.vlgmr.msra.gmra.mxu1 %vm693_vm1, %v3344_v26 }
 0x325   :  { %10946 = vmatpush3.xpose.msk.msra.mxu1 %vm693_vm1, %v3502_v61  ;;  %10932 = vmatprep.mubr.msk.f32.mxu0 %vm11662_vm0, %v14365_v59 }
 0x326   :  { %10940 = vmatprep.subr.mxu0 %v14365_v59  ;;  %10947 = vmatprep.mubr.msk.f32.mxu1 %vm11662_vm0, %v14365_v59 }
 0x327   :  { %10933 = vmatmul.mubr.msk.f32.vlgmr.msra.gmra.mxu0 %vm693_vm1, %v3266_v38  ;;  %v3424_v42 = vpop.permute.xlu0 %3423  ;;  %v3800_v58 = vpop.permute.xlu1 %3799  ;;  %10955 = vmatprep.subr.mxu1 %v14365_v59 }
 0x328   :  { %10941 = vmatpush3.xpose.msk.msra.mxu0 %vm693_vm1, %v3424_v42  ;;  %10948 = vmatmul.mubr.msk.f32.vlgmr.msra.gmra.mxu1 %vm693_vm1, %v3500_v35 }
 0x329   :  { %10942 = vmatprep.mubr.msk.f32.mxu0 %vm11662_vm0, %v14365_v59  ;;  %10950 = vmatprep.subr.mxu0 %v14365_v59 }
 0x32a   :  { %10956 = vmatpush3.msra.mxu1 %v3800_v58  ;;  %10957 = vmatprep.mubr.msk.f32.mxu1 %vm11662_vm0, %v14365_v59 }
 0x32b   :  { %10943 = vmatmul.mubr.msk.f32.vlgmr.msra.gmra.mxu0 %vm693_vm1, %v3422_v6  ;;  %v3723_v49 = vpop.permute.xlu0 %3722  ;;  %10965 = vmatprep.subr.mxu1 %v14365_v59 }
 0x32c   :  { %10951 = vmatpush3.msra.mxu0 %v3723_v49  ;;  %10952 = vmatprep.mubr.msk.f32.mxu0 %vm11662_vm0, %v14365_v59 }
 0x32d   :  { %10960 = vmatprep.subr.mxu0 %v14365_v59 }
 0x3a8   :  { %v12535_v11 = vpop.f32.mrf.mxu1 }
 0x3aa   :  { %v10839_v46 = vpop.f32.mrf.mxu1 }
 0x3ac   :  { %v12539_v41 = vpop.f32.mrf.mxu0 }
 0x3ae   :  { %v10834_v56 = vpop.f32.mrf.mxu0 }
 0x3b0   :  { %v12543_v43 = vpop.f32.mrf.mxu0 }
 0x3b1   :  { %v12545_v40 = vpop.f32.mrf.mxu1 }
 0x3b2   :  { %v10844_v31 = vpop.f32.mrf.mxu0 }
 0x3b3   :  { %v10849_v50 = vpop.f32.mrf.mxu1 }
 0x3b4   :  { %v12549_v0 = vpop.f32.mrf.mxu0 }
 0x3b6   :  { %v10854_v57 = vpop.f32.mrf.mxu0 }
 0x3b8   :  { %v12551_v14 = vpop.f32.mrf.mxu1 }
 0x3ba   :  { %v10859_v23 = vpop.f32.mrf.mxu1 }
 0x3bc   :  { %v12555_v60 = vpop.f32.mrf.mxu0 }
 0x3be   :  { %v10864_v36 = vpop.f32.mrf.mxu0 }
 0x3c0   :  { %v12557_v26 = vpop.f32.mrf.mxu1 }
 0x3c2   :  { %v10869_v61 = vpop.f32.mrf.mxu1 }
 0x3c4   :  { %v12561_v55 = vpop.f32.mrf.mxu0 }
 0x3c6   :  { %v10874_v35 = vpop.f32.mrf.mxu0 }
 0x3c8   :  { %v12563_v39 = vpop.f32.mrf.mxu1 }
 0x3ca   :  { %v10879_v48 = vpop.f32.mrf.mxu1 }
 0x3cc   :  { %v12567_v38 = vpop.f32.mrf.mxu0 }
 0x3ce   :  { %v10884_v18 = vpop.f32.mrf.mxu0 }
 0x3d0   :  { %v12569_v6 = vpop.f32.mrf.mxu1  ;;  %v2715_v24 = vpop.f32.mrf.mxu0 }
 0x3d1   :  { %v12573_v58 = vmul.f32 0.125, %v2715_v24 }
 0x3d2   :  { %v10889_v49 = vpop.f32.mrf.mxu1  ;;  %v10894_v46 = vpop.f32.mrf.mxu0 }
 0x3d3   :  { %v3589_v56 = vsel %vm1618_vm2, %v12573_v58, -inf }
 0x3d4   :  { %3590 = vmax.xlane.f32.xlu1 %v3589_v56  ;;  %v2793_v31 = vpop.f32.mrf.mxu1  ;;  %v2871_v50 = vpop.f32.mrf.mxu0 }
 0x3d5   :  { %v12577_v57 = vmul.f32 0.125, %v2793_v31  ;;  %v12579_v61 = vmul.f32 0.125, %v2871_v50 }
 0x3d6   :  { %v10899_v23 = vpop.f32.mrf.mxu1  ;;  %v10904_v36 = vpop.f32.mrf.mxu0 }
 0x3d7   :  { %v3592_v35 = vsel %vm1618_vm2, %v12577_v57, -inf  ;;  %v3595_v49 = vsel %vm1618_vm2, %v12579_v61, -inf }
 0x3d8   :  { %3593 = vmax.xlane.f32.xlu0 %v3592_v35  ;;  %v2949_v48 = vpop.f32.mrf.mxu1 }
 0x3d9   :  { %v12583_v24 = vmul.f32 0.125, %v2949_v48 }
 0x3da   :  { %v10909_v18 = vpop.f32.mrf.mxu1 }
 0x3db   :  { %v3598_v35 = vsel %vm1618_vm2, %v12583_v24, -inf }
 0x3dc   :  { %v3027_v46 = vpop.f32.mrf.mxu0  ;;  %3596 = vmax.xlane.f32.xlu0 %v3595_v49  ;;  %v3105_v56 = vpop.f32.mrf.mxu1 }
 0x3dd   :  { %v3581_v31 = vmul.f32 0.125, %v3027_v46  ;;  %v12587_v36 = vmul.f32 0.125, %v3105_v56 }
 0x3de   :  { %v10914_v42 = vpop.f32.mrf.mxu0  ;;  %v10919_v23 = vpop.f32.mrf.mxu1 }
 0x3df   :  { %v3601_v50 = vsel %vm1618_vm2, %v3581_v31, -inf  ;;  %v3604_v2 = vsel %vm1618_vm2, %v12587_v36, -inf }
 0x3e0   :  { %3602 = vmax.xlane.f32.xlu1 %v3601_v50  ;;  %3599 = vmax.xlane.f32.xlu0 %v3598_v35  ;;  %v3261_v48 = vpop.f32.mrf.mxu1 }
 0x3e1   :  { %v12596_v56 = vmul.f32 0.125, %v3261_v48 }
 0x3e2   :  { %v10929_v18 = vpop.f32.mrf.mxu1 }
 0x3e3   :  { %v3183_v27 = vpop.f32.mrf.mxu0 }
 0x3e4   :  { %v12594_v49 = vmul.f32 0.125, %v3183_v27  ;;  %3605 = vmax.xlane.f32.xlu0 %v3604_v2  ;;  %v3417_v42 = vpop.f32.mrf.mxu1  ;;  %v3610_v27 = vsel %vm1618_vm2, %v12596_v56, -inf }
 0x3e5   :  { %v10924_v46 = vpop.f32.mrf.mxu0  ;;  %v12602_v1 = vmul.f32 0.125, %v3417_v42 }
 0x3e6   :  { %v10939_v23 = vpop.f32.mrf.mxu1  ;;  %v3607_v19 = vsel %vm1618_vm2, %v12594_v49, -inf }
 0x3e7   :  { %3608 = vmax.xlane.f32.xlu1 %v3607_v19  ;;  %v3339_v50 = vpop.f32.mrf.mxu0  ;;  %v3616_v19 = vsel %vm1618_vm2, %v12602_v1, -inf }
 0x3e8   :  { %v12600_v35 = vmul.f32 0.125, %v3339_v50  ;;  %v3573_v18 = vpop.f32.mrf.mxu1  ;;  %v12626_v50 = vpop.permute.xlu1 %3953 }
 0x3e9   :  { %v10934_v20 = vpop.f32.mrf.mxu0  ;;  %v12608_v23 = vmul.f32 0.125, %v3573_v18 }
 0x3ea   :  { %v10949_v53 = vpop.f32.mrf.mxu1  ;;  %v3613_v2 = vsel %vm1618_vm2, %v12600_v35, -inf }
 0x3eb   :  { %v3495_v48 = vpop.f32.mrf.mxu0  ;;  %3614 = vmax.xlane.f32.xlu0 %v3613_v2  ;;  %3611 = vmax.xlane.f32.xlu1 %v3610_v27  ;;  %v3622_v20 = vsel %vm1618_vm2, %v12608_v23, -inf }
 0x3ec   :  { %v12622_v53 = vmul.f32 0.125, %v3495_v48 }
 0x3ed   :  { %v10944_v46 = vpop.f32.mrf.mxu0 }
 0x3ee   :  { %v3619_v42 = vsel %vm1618_vm2, %v12622_v53, -inf }
 0x3ef   :  { %3617 = vmax.xlane.f32.xlu0 %v3616_v19 }
 0x3f3   :  { %3623 = vmax.xlane.f32.xlu0 %v3622_v20 }
 0x3fc   :  { %4107 = vrot.lane.b32.xlu1 %v12388_v12, %s11663_s4 }
 0x409   :  { %3876 = vrot.lane.b32.xlu0 %v12372_v30, %s11663_s4 }
 0x40d   :  { %4261 = vrot.lane.b32.xlu0 %v12409_v52, %s11663_s4 }
 0x411   :  { %4415 = vrot.lane.b32.xlu0 %v12430_v8, %s11663_s4 }
 0x420   :  { %3620 = vmax.xlane.f32.xlu1 %v3619_v42 }
 0x45d   :  { %v3591_v18 = vpop.xlane.xlu1 %3590 }
 0x45e   :  { %v3625_v12 = vsub.f32 %v12573_v58, %v3591_v18 }
 0x460   :  { %v3637_v2 = vmul.f32 1.442695, %v3625_v12 }
 0x461   :  { %v3594_v27 = vpop.xlane.xlu0 %3593 }
 0x462   :  { %11462 = vpow2.f32 %v3637_v2  ;;  %v3626_v30 = vsub.f32 %v12577_v57, %v3594_v27 }
 0x464   :  { %v3639_v52 = vmul.f32 1.442695, %v3626_v30 }
 0x465   :  { %v3597_v46 = vpop.xlane.xlu0 %3596 }
 0x466   :  { %11464 = vpow2.f32 %v3639_v52  ;;  %v3627_v8 = vsub.f32 %v12579_v61, %v3597_v46 }
 0x468   :  { %v3641_v48 = vmul.f32 1.442695, %v3627_v8 }
 0x469   :  { %v3603_v19 = vpop.xlane.xlu1 %3602  ;;  %v3600_v20 = vpop.xlane.xlu0 %3599 }
 0x46a   :  { %11466 = vpow2.f32 %v3641_v48  ;;  %v3629_v42 = vsub.f32 %v3581_v31, %v3603_v19  ;;  %v3628_v7 = vsub.f32 %v12583_v24, %v3600_v20 }
 0x46c   :  { %v3645_v45 = vmul.f32 1.442695, %v3629_v42  ;;  %v3643_v15 = vmul.f32 1.442695, %v3628_v7 }
 0x46d   :  { %v3606_v58 = vpop.xlane.xlu0 %3605 }
 0x46e   :  { %11468 = vpow2.f32 %v3645_v45  ;;  %v3630_v18 = vsub.f32 %v12587_v36, %v3606_v58 }
 0x46f   :  { %v12633_v12 = vpop.eup %11462  ;;  %11470 = vpow2.f32 %v3643_v15 }
 0x470   :  { %v3647_v57 = vmul.f32 1.442695, %v3630_v18  ;;  %v3609_v2 = vpop.xlane.xlu1 %3608  ;;  %v3661_v61 = vsel %vm1618_vm2, %v12633_v12, 0.0 }
 0x471   :  { %v3631_v27 = vsub.f32 %v12594_v49, %v3609_v2  ;;  %3662 = vadd.xlane.f32.xlu1 %v3661_v61 }
 0x472   :  { %11472 = vpow2.f32 %v3647_v57 }
 0x473   :  { %v12638_v31 = vpop.eup %11464  ;;  %v3649_v24 = vmul.f32 1.442695, %v3631_v27 }
 0x474   :  { %v3615_v7 = vpop.xlane.xlu0 %3614  ;;  %v3612_v30 = vpop.xlane.xlu1 %3611  ;;  %v3664_v45 = vsel %vm1618_vm2, %v12638_v31, 0.0 }
 0x475   :  { %11474 = vpow2.f32 %v3649_v24  ;;  %v3632_v15 = vsub.f32 %v12596_v56, %v3612_v30  ;;  %3665 = vadd.xlane.f32.xlu0 %v3664_v45  ;;  %v3633_v30 = vsub.f32 %v12600_v35, %v3615_v7  ;;  %v11658_v7 = vld [vmem:[%s14324_s5] sm:$0x3] }
 0x477   :  { %v12643_v36 = vpop.eup %11466  ;;  %v3651_v52 = vmul.f32 1.442695, %v3632_v15 }
 0x478   :  { %v3618_v46 = vpop.xlane.xlu0 %3617  ;;  %v3667_v49 = vsel %vm1618_vm2, %v12643_v36, 0.0  ;;  %v12675_v45 = vpop.permute.xlu1 %4107 }
 0x479   :  { %v3634_v8 = vsub.f32 %v12602_v1, %v3618_v46  ;;  %3668 = vadd.xlane.f32.xlu0 %v3667_v49  ;;  %11476 = vpow2.f32 %v3651_v52  ;;  %v3653_v46 = vmul.f32 1.442695, %v3633_v30 }
 0x47b   :  { %v12648_v48 = vpop.eup %11468  ;;  %v3655_v19 = vmul.f32 1.442695, %v3634_v8 }
 0x47c   :  { %v12650_v20 = vpop.eup %11470  ;;  %v3673_v56 = vsel %vm1618_vm2, %v12648_v48, 0.0  ;;  %v3624_v15 = vpop.xlane.xlu0 %3623 }
 0x47d   :  { %11478 = vpow2.f32 %v3655_v19  ;;  %3674 = vadd.xlane.f32.xlu1 %v3673_v56  ;;  %v3670_v42 = vsel %vm1618_vm2, %v12650_v20, 0.0  ;;  %v3636_v52 = vsub.f32 %v12608_v23, %v3624_v15 }
 0x47e   :  { %3671 = vadd.xlane.f32.xlu0 %v3670_v42  ;;  %11480 = vpow2.f32 %v3653_v46 }
 0x47f   :  { %v12656_v58 = vpop.eup %11472  ;;  %v3659_v19 = vmul.f32 1.442695, %v3636_v52 }
 0x480   :  { %v3676_v1 = vsel %vm1618_vm2, %v12656_v58, 0.0 }
 0x481   :  { %3677 = vadd.xlane.f32.xlu1 %v3676_v1 }
 0x482   :  { %v12660_v18 = vpop.eup %11474 }
 0x483   :  { %v3679_v57 = vsel %vm1618_vm2, %v12660_v18, 0.0 }
 0x484   :  { %3680 = vadd.xlane.f32.xlu0 %v3679_v57  ;;  %v12699_v57 = vrot.slane %v11658_v7, %v12064_v44 }
 0x486   :  { %v12664_v2 = vpop.eup %11476 }
 0x487   :  { %v3682_v61 = vsel %vm1618_vm2, %v12664_v2, 0.0 }
 0x488   :  { %3683 = vadd.xlane.f32.xlu1 %v3682_v61  ;;  %v12707_v61 = vadd.f32 %v11954_v4, %v12699_v57  ;;  %v12731_v4 = vadd.f32 %v11968_v10, %v12085_v51  ;;  %v12755_v10 = vadd.f32 %v12002_v22, %v12085_v51 }
 0x48a   :  { %v12668_v27 = vpop.eup %11478 }
 0x48b   :  { %v3688_v24 = vsel %vm1618_vm2, %v12668_v27, 0.0  ;;  %v12679_v42 = vpop.eup %11480 }
 0x48c   :  { %3689 = vadd.xlane.f32.xlu0 %v3688_v24  ;;  %v3685_v23 = vsel %vm1618_vm2, %v12679_v42, 0.0 }
 0x499   :  { %4569 = vrot.lane.b32.xlu1 %v12454_v29, %s11663_s4 }
 0x4a9   :  { %v3621_v49 = vpop.xlane.xlu1 %3620 }
 0x4aa   :  { %v3635_v8 = vsub.f32 %v12622_v53, %v3621_v49 }
 0x4ac   :  { %v3657_v56 = vmul.f32 1.442695, %v3635_v8 }
 0x4ae   :  { %11482 = vpow2.f32 %v3657_v56 }
 0x4af   :  { %11484 = vpow2.f32 %v3659_v19 }
 0x4bb   :  { %v12681_v1 = vpop.eup %11482 }
 0x4bc   :  { %v3691_v29 = vsel %vm1618_vm2, %v12681_v1, 0.0  ;;  %v12685_v35 = vpop.eup %11484 }
 0x4bd   :  { %3692 = vadd.xlane.f32.xlu0 %v3691_v29  ;;  %3686 = vadd.xlane.f32.xlu1 %v3685_v23  ;;  %v3694_v53 = vsel %vm1618_vm2, %v12685_v35, 0.0 }
 0x4c1   :  { %3695 = vadd.xlane.f32.xlu0 %v3694_v53 }
 0x4ce   :  { %4184 = vrot.lane.b32.xlu1 %v12397_v37, %s11663_s4  ;;  %v12711_v37 = vadd.f32 %v11956_v5, %v12085_v51  ;;  %v12735_v5 = vadd.f32 %v11998_v21, %v12699_v57  ;;  %v3877_v21 = vpop.permute.xlu0 %3876 }
 0x4d2   :  { %4338 = vrot.lane.b32.xlu1 %v12420_v25, %s11663_s4  ;;  %v12719_v25 = vadd.f32 %v11964_v9, %v12699_v57  ;;  %v12743_v9 = vadd.f32 %v11988_v17, %v12085_v51  ;;  %v4262_v17 = vpop.permute.xlu0 %4261 }
 0x4d6   :  { %4492 = vrot.lane.b32.xlu1 %v12444_v63, %s11663_s4  ;;  %v4416_v63 = vpop.permute.xlu0 %4415 }
 0x4d7   :  { %4030 = vrot.lane.b32.xlu0 %v12380_v62, %s11663_s4  ;;  %v12723_v62 = vadd.f32 %v11984_v16, %v12699_v57  ;;  %v12747_v16 = vadd.f32 %v12018_v28, %v12699_v57 }
 0x4da   :  { %7082 = vrot.lane.b32.xlu1 %v12711_v37, %s11663_s4 }
 0x4db   :  { %7084 = vrot.lane.b32.xlu0 %v12707_v61, %s11663_s4 }
 0x4de   :  { %7162 = vrot.lane.b32.xlu1 %v12719_v25, %s11663_s4 }
 0x4df   :  { %7240 = vrot.lane.b32.xlu0 %v12723_v62, %s11663_s4 }
 0x4e2   :  { %7160 = vrot.lane.b32.xlu1 %v12731_v4, %s11663_s4 }
 0x4e3   :  { %7318 = vrot.lane.b32.xlu0 %v12735_v5, %s11663_s4 }
 0x4e6   :  { %7238 = vrot.lane.b32.xlu1 %v12743_v9, %s11663_s4 }
 0x4e7   :  { %7396 = vrot.lane.b32.xlu0 %v12747_v16, %s11663_s4 }
 0x4ea   :  { %7316 = vrot.lane.b32.xlu1 %v12755_v10, %s11663_s4 }
 0x4fa   :  { %v3663_v24 = vpop.xlane.xlu1 %3662 }
 0x4fb   :  { %11486 = vrcp.f32 %v3663_v24 }
 0x4fe   :  { %v3666_v28 = vpop.xlane.xlu0 %3665 }
 0x4ff   :  { %11488 = vrcp.f32 %v3666_v28 }
 0x502   :  { %v3669_v30 = vpop.xlane.xlu0 %3668 }
 0x503   :  { %11490 = vrcp.f32 %v3669_v30 }
 0x506   :  { %v3675_v15 = vpop.xlane.xlu1 %3674 }
 0x507   :  { %v3672_v52 = vpop.xlane.xlu0 %3671 }
 0x508   :  { %v11487_v46 = vpop.eup %11486  ;;  %11492 = vrcp.f32 %v3672_v52 }
 0x509   :  { %v3709_v49 = vmul.f32 %v11487_v46, %v12633_v12 }
 0x50a   :  { %v3678_v22 = vpop.xlane.xlu1 %3677 }
 0x50b   :  { %11494 = vrcp.f32 %v3678_v22  ;;  %10953 = vmatmul.mubr.msk.f32.vlgmr.msra.gmra.mxu0 %vm1618_vm2, %v3709_v49 }
 0x50c   :  { %v11489_v8 = vpop.eup %11488  ;;  %10961 = vmatpush3.msra.mxu0 %v3877_v21  ;;  %10962 = vmatprep.mubr.msk.f32.mxu0 %vm11662_vm0, %v14365_v59 }
 0x50d   :  { %v3710_v19 = vmul.f32 %v11489_v8, %v12638_v31  ;;  %10970 = vmatprep.subr.mxu0 %v14365_v59  ;;  %v3681_v12 = vpop.xlane.xlu0 %3680 }
 0x50f   :  { %10958 = vmatmul.mubr.msk.f32.vlgmr.msra.gmra.mxu1 %vm1618_vm2, %v3710_v19  ;;  %v11364_v19 = vld [vmem:[%s14327_s7 + $0x74] ss:$8 sps:$4 sm:$0xff]  }
 0x510   :  { %v11491_v56 = vpop.eup %11490  ;;  %10966 = vmatpush3.msra.mxu1 %v12626_v50  ;;  %10967 = vmatprep.mubr.msk.f32.mxu1 %vm11662_vm0, %v14365_v59 }
 0x511   :  { %v3711_v29 = vmul.f32 %v11491_v56, %v12643_v36  ;;  %10975 = vmatprep.subr.mxu1 %v14365_v59  ;;  %v3684_v23 = vpop.xlane.xlu1 %3683 }
 0x512   :  { %11496 = vrcp.f32 %v3684_v23 }
 0x513   :  { %10963 = vmatmul.mubr.msk.f32.vlgmr.msra.gmra.mxu0 %vm1618_vm2, %v3711_v29 }
 0x514   :  { %10972 = vmatprep.mubr.msk.f32.mxu0 %vm11662_vm0, %v14365_v59 }
 0x515   :  { %v11493_v31 = vpop.eup %11492  ;;  %v3690_v53 = vpop.xlane.xlu0 %3689 }
 0x516   :  { %11498 = vrcp.f32 %v3690_v53  ;;  %v3712_v50 = vmul.f32 %v11493_v31, %v12650_v20  ;;  %v11362_v53 = vld [vmem:[%s14327_s7 + $0x70] ss:$8 sps:$4 sm:$0xff]  }
 0x517   :  { %11500 = vrcp.f32 %v3675_v15 }
 0x518   :  { %v11495_v7 = vpop.eup %11494  ;;  %10968 = vmatmul.mubr.msk.f32.vlgmr.msra.gmra.mxu1 %vm1618_vm2, %v3712_v50  ;;  %11502 = vrcp.f32 %v3681_v12  ;;  %v11367_v50 = vld [vmem:[%s14327_s7 + $0x64] ss:$8 sps:$4 sm:$0xff]  }
 0x519   :  { %10976 = vmatpush3.msra.mxu1 %v12675_v45  ;;  %10977 = vmatprep.mubr.msk.f32.mxu1 %vm11662_vm0, %v14365_v59  ;;  %v3714_v36 = vmul.f32 %v11495_v7, %v12656_v58  ;;  %v11352_v45 = vld [vmem:[%s14327_s7 + $0x34] ss:$8 sps:$4 sm:$0xff]   ;;  %v14370_v7 = vmov 0  }
 0x51a   :  { %10985 = vmatprep.subr.mxu1 %v14365_v59 }
 0x51c   :  { %10978 = vmatmul.mubr.msk.f32.vlgmr.msra.gmra.mxu1 %vm1618_vm2, %v3714_v36  ;;  %v11365_v36 = vld [vmem:[%s14327_s7 + $0x60] ss:$8 sps:$4 sm:$0xff]  }
 0x51d   :  { %10986 = vmatpush3.msra.mxu1 %v4262_v17  ;;  %10987 = vmatprep.mubr.msk.f32.mxu1 %vm11662_vm0, %v14365_v59  ;;  %v4570_v17 = vpop.permute.xlu1 %4569 }
 0x51e   :  { %10995 = vmatprep.subr.mxu1 %v14365_v59 }
 0x51f   :  { %v11497_v20 = vpop.eup %11496 }
 0x520   :  { %v3716_v21 = vmul.f32 %v11497_v20, %v12664_v2  ;;  %v11370_v20 = vld [vmem:[%s14327_s7 + $0x54] ss:$8 sps:$4 sm:$0xff]  }
 0x522   :  { %10988 = vmatmul.mubr.msk.f32.vlgmr.msra.gmra.mxu1 %vm1618_vm2, %v3716_v21  ;;  %v11356_v21 = vld [vmem:[%s14327_s7 + $0x10] ss:$8 sps:$4 sm:$0xff]  }
 0x523   :  { %v11499_v24 = vpop.eup %11498  ;;  %10996 = vmatpush3.msra.mxu1 %v4416_v63  ;;  %10997 = vmatprep.mubr.msk.f32.mxu1 %vm11662_vm0, %v14365_v59 }
 0x524   :  { %v3718_v58 = vmul.f32 %v11499_v24, %v12668_v27  ;;  %11005 = vmatprep.subr.mxu1 %v14365_v59  ;;  %v11501_v28 = vpop.eup %11500  ;;  %v11361_v24 = vld [vmem:[%s14327_s7 + $0x4] ss:$8 sps:$4 sm:$0xff]  }
 0x525   :  { %v3713_v46 = vmul.f32 %v11501_v28, %v12648_v48  ;;  %v11503_v49 = vpop.eup %11502  ;;  %v14382_v28 = vld [vmem:[#allocation19_spill] sm:$0xff] }
 0x526   :  { %10998 = vmatmul.mubr.msk.f32.vlgmr.msra.gmra.mxu1 %vm1618_vm2, %v3718_v58  ;;  %v3715_v22 = vmul.f32 %v11503_v49, %v12660_v18  ;;  %v11350_v18 = vld [vmem:[%s14327_s7 + $0x30] ss:$8 sps:$4 sm:$0xff]  }
 0x527   :  { %11006 = vmatpush3.msra.mxu1 %v4570_v17  ;;  %11007 = vmatprep.mubr.msk.f32.mxu1 %vm11662_vm0, %v14365_v59  ;;  %v11368_v58 = vld [vmem:[%s14327_s7 + $0x50] ss:$8 sps:$4 sm:$0xff]   ;;  %v11359_v17 = vld [vmem:[%s14327_s7] ss:$8 sps:$4 sm:$0xff]  }
 0x528   :  { %4876 = vmatprep.subr.bf16.mxu1 %v11352_v45  ;;  %v11373_v45 = vld [vmem:[%s14327_s7 + $0x44] ss:$8 sps:$4 sm:$0xff]  }
 0x546   :  { %v3693_v2 = vpop.xlane.xlu0 %3692  ;;  %v3687_v63 = vpop.xlane.xlu1 %3686 }
 0x547   :  { %11504 = vrcp.f32 %v3687_v63  ;;  %v14371_v63 = vpack.c.bf16 %v12535_v11, %v12539_v41  ;;  %v14373_v11 = vpack.c.bf16 %v12551_v14, %v12549_v0  ;;  %v14374_v41 = vpack.c.bf16 %v12557_v26, %v12555_v60  ;;  %v14377_v60 = vld [vmem:[#allocation8_spill] sm:$0xff] }
 0x548   :  { %11506 = vrcp.f32 %v3693_v2  ;;  %v11371_v2 = vld [vmem:[%s14327_s7 + $0x40] ss:$8 sps:$4 sm:$0xff]   ;;  %v12908_v0 = vadd.f32 %v12032_v33, %v12699_v57  ;;  %v12918_v14 = vadd.f32 %v12036_v34, %v12085_v51  ;;  %v12923_v26 = vadd.f32 %v14377_v60, %v12699_v57  ;;  %v14378_v33 = vld [vmem:[#allocation9_spill] sm:$0xff]  ;;  %v14379_v34 = vld [vmem:[#allocation12_spill] sm:$0xff] }
 0x54a   :  { %v3696_v27 = vpop.xlane.xlu0 %3695  ;;  %v4185_v30 = vpop.permute.xlu1 %4184 }
 0x54b   :  { %11508 = vrcp.f32 %v3696_v27  ;;  %v14372_v27 = vpack.c.bf16 %v12545_v40, %v12543_v43  ;;  %v14375_v43 = vpack.c.bf16 %v12563_v39, %v12561_v55  ;;  %v14376_v40 = vpack.c.bf16 %v12569_v6, %v12567_v38  ;;  %v14380_v38 = vld [vmem:[#allocation13_spill] sm:$0xff] }
 0x54c   :  { %v12933_v55 = vadd.f32 %v14378_v33, %v12085_v51  ;;  %v12938_v39 = vadd.f32 %v14379_v34, %v12699_v57  ;;  %v12948_v6 = vadd.f32 %v14380_v38, %v12085_v51 }
 0x54e   :  { %v4031_v52 = vpop.permute.xlu0 %4030  ;;  %v4339_v15 = vpop.permute.xlu1 %4338 }
 0x54f   :  { %10971 = vmatpush3.msra.mxu0 %v4031_v52 }
 0x550   :  { %10973 = vmatmul.mubr.msk.f32.vlgmr.msra.gmra.mxu0 %vm1618_vm2, %v3713_v46  ;;  %10980 = vmatprep.subr.mxu0 %v14365_v59 }
 0x551   :  { %10981 = vmatpush3.msra.mxu0 %v4185_v30  ;;  %10982 = vmatprep.mubr.msk.f32.mxu0 %vm11662_vm0, %v14365_v59  ;;  %v12969_v30 = vadd.f32 %v14382_v28, %v12085_v51 }
 0x552   :  { %10990 = vmatprep.subr.mxu0 %v14365_v59  ;;  %v4493_v29 = vpop.permute.xlu1 %4492 }
 0x554   :  { %10983 = vmatmul.mubr.msk.f32.vlgmr.msra.gmra.mxu0 %vm1618_vm2, %v3715_v22  ;;  %v11505_v8 = vpop.eup %11504 }
 0x555   :  { %10991 = vmatpush3.msra.mxu0 %v4339_v15  ;;  %10992 = vmatprep.mubr.msk.f32.mxu0 %vm11662_vm0, %v14365_v59  ;;  %v3717_v48 = vmul.f32 %v11505_v8, %v12679_v42  ;;  %v11507_v56 = vpop.eup %11506  ;;  %v11355_v42 = vld [vmem:[%s14327_s7 + $0x24] ss:$8 sps:$4 sm:$0xff]  }
 0x556   :  { %11000 = vmatprep.subr.mxu0 %v14365_v59  ;;  %v3719_v31 = vmul.f32 %v11507_v56, %v12681_v1  ;;  %v11358_v1 = vld [vmem:[%s14327_s7 + $0x14] ss:$8 sps:$4 sm:$0xff]  }
 0x558   :  { %v11509_v12 = vpop.eup %11508  ;;  %10993 = vmatmul.mubr.msk.f32.vlgmr.msra.gmra.mxu0 %vm1618_vm2, %v3717_v48 }
 0x559   :  { %11001 = vmatpush3.msra.mxu0 %v4493_v29  ;;  %11002 = vmatprep.mubr.msk.f32.mxu0 %vm11662_vm0, %v14365_v59  ;;  %v3720_v23 = vmul.f32 %v11509_v12, %v12685_v35  ;;  %v11353_v35 = vld [vmem:[%s14327_s7 + $0x20] ss:$8 sps:$4 sm:$0xff]  }
 0x55a   :  { %4725 = vmatprep.subr.bf16.mxu0 %v11364_v19 }
 0x55b   :  { %11008 = vmatmul.mubr.msk.f32.vlgmr.msra.gmra.mxu1 %vm1618_vm2, %v3720_v23 }
 0x55c   :  { %4877 = vmatpush1.bf16.msra.mxu1 %v11350_v18  ;;  %11003 = vmatmul.mubr.msk.f32.vlgmr.msra.gmra.mxu0 %vm1618_vm2, %v3719_v31 }
 0x55d   :  { %4878 = vmatprep.subr.bf16.mxu1 %v11355_v42  ;;  %4900 = vmatprep.mubr.bf16.mxu1 %v14370_v7 }
 0x55e   :  { %4726 = vmatpush1.bf16.msra.mxu0 %v11362_v53  ;;  %4749 = vmatprep.mubr.bf16.mxu0 %v14370_v7 }
 0x55f   :  { %4727 = vmatprep.subr.bf16.mxu0 %v11367_v50 }
 0x560   :  { %4879 = vmatpush1.bf16.msra.mxu1 %v11353_v35 }
 0x561   :  { %4880 = vmatprep.subr.bf16.mxu1 %v11358_v1 }
 0x562   :  { %4728 = vmatpush1.bf16.msra.mxu0 %v11365_v36 }
 0x563   :  { %4729 = vmatprep.subr.bf16.mxu0 %v11370_v20 }
 0x564   :  { %4881 = vmatpush1.bf16.msra.mxu1 %v11356_v21 }
 0x565   :  { %4882 = vmatprep.subr.bf16.mxu1 %v11361_v24 }
 0x566   :  { %4730 = vmatpush1.bf16.msra.mxu0 %v11368_v58 }
 0x567   :  { %4731 = vmatprep.subr.bf16.mxu0 %v11373_v45 }
 0x568   :  { %4883 = vmatpush1.bf16.msra.mxu1 %v11359_v17 }
 0x569   :  { %11015 = vmatprep.subr.mxu1 %v14365_v59 }
 0x56a   :  { %4732 = vmatpush1.bf16.msra.mxu0 %v11371_v2 }
 0x56b   :  { %10402 = vmatmul.mubr.msk.bf16.vlgmr.msra.gmra.mxu1 %vm693_vm1, %v14371_v63  ;;  %11010 = vmatprep.subr.mxu0 %v14365_v59 }
 0x56c   :  { %11016 = vmatpush3.xpose.msk.msra.mxu1 %vm693_vm1, %v12719_v25  ;;  %4910 = vmatprep.mubr.bf16.mxu1 %v14370_v7  ;;  %v14381_v25 = vld [vmem:[#allocation16_spill] sm:$0xff] }
 0x56d   :  { %11025 = vmatprep.subr.mxu1 %v14365_v59 }
 0x573   :  { %10403 = vmatmul.mubr.msk.bf16.gmra.mxu1 %vm693_vm1, %v14372_v27 }
 0x574   :  { %4920 = vmatprep.mubr.bf16.mxu1 %v14370_v7 }
 0x57b   :  { %10404 = vmatmul.mubr.msk.bf16.gmra.mxu1 %vm693_vm1, %v14373_v11 }
 0x57c   :  { %4930 = vmatprep.mubr.bf16.mxu1 %v14370_v7 }
 0x583   :  { %10405 = vmatmul.mubr.msk.bf16.gmra.mxu1 %vm693_vm1, %v14374_v41 }
 0x584   :  { %4940 = vmatprep.mubr.bf16.mxu1 %v14370_v7 }
 0x58b   :  { %10406 = vmatmul.mubr.msk.bf16.gmra.mxu1 %vm693_vm1, %v14375_v43 }
 0x58c   :  { %4950 = vmatprep.mubr.bf16.mxu1 %v14370_v7 }
 0x593   :  { %10407 = vmatmul.mubr.msk.bf16.gmra.mxu1 %vm693_vm1, %v14376_v40 }
 0x594   :  { %11017 = vmatprep.mubr.msk.f32.mxu1 %vm11662_vm0, %v14365_v59 }
 0x59b   :  { %11018 = vmatmul.mubr.msk.f32.vlgmr.msra.gmra.mxu1 %vm693_vm1, %v12731_v4  ;;  %v12953_v4 = vadd.f32 %v14381_v25, %v12699_v57  ;;  %v14385_v25 = vld [vmem:[#allocation5_spill] sm:$0xff] }
 0x59c   :  { %11026 = vmatpush3.xpose.msk.msra.mxu1 %vm693_vm1, %v12735_v5  ;;  %11027 = vmatprep.mubr.msk.f32.mxu1 %vm11662_vm0, %v14365_v59  ;;  %v11659_v5 = vld [vmem:[%s14326_s6] sm:$0x3] }
 0x59d   :  { %11035 = vmatprep.subr.mxu1 %v14365_v59 }
 0x59f   :  { %11028 = vmatmul.mubr.msk.f32.vlgmr.msra.gmra.mxu1 %vm693_vm1, %v12755_v10  ;;  %v12961_v10 = vrot.slane %v11659_v5, %v12064_v44  ;;  %v13034_v5 = vadd.f32 %v14385_v25, %v12699_v57 }
 0x5a0   :  { %11036 = vmatpush3.xpose.msk.msra.mxu1 %vm693_vm1, %v12908_v0  ;;  %11037 = vmatprep.mubr.msk.f32.mxu1 %vm11662_vm0, %v14365_v59 }
 0x5a1   :  { %11045 = vmatprep.subr.mxu1 %v14365_v59  ;;  %v12974_v52 = vadd.f32 %v12327_v3, %v12961_v10 }
 0x5a3   :  { %11038 = vmatmul.mubr.msk.f32.vlgmr.msra.gmra.mxu1 %vm693_vm1, %v12918_v14 }
 0x5a4   :  { %11046 = vmatpush3.xpose.msk.msra.mxu1 %vm693_vm1, %v12923_v26  ;;  %11047 = vmatprep.mubr.msk.f32.mxu1 %vm11662_vm0, %v14365_v59 }
 0x5a5   :  { %11055 = vmatprep.subr.mxu1 %v14365_v59 }
 0x5a7   :  { %11048 = vmatmul.mubr.msk.f32.vlgmr.msra.gmra.mxu1 %vm693_vm1, %v12933_v55 }
 0x5a8   :  { %11056 = vmatpush3.xpose.msk.msra.mxu1 %vm693_vm1, %v12938_v39  ;;  %11057 = vmatprep.mubr.msk.f32.mxu1 %vm11662_vm0, %v14365_v59 }
 0x5a9   :  { %11065 = vmatprep.subr.mxu1 %v14365_v59 }
 0x5ab   :  { %11058 = vmatmul.mubr.msk.f32.vlgmr.msra.gmra.mxu1 %vm693_vm1, %v12948_v6 }
 0x5ac   :  { %11066 = vmatpush3.xpose.msk.msra.mxu1 %vm693_vm1, %v12953_v4  ;;  %11067 = vmatprep.mubr.msk.f32.mxu1 %vm11662_vm0, %v14365_v59 }
 0x5ad   :  { %11075 = vmatprep.subr.mxu1 %v14365_v59 }
 0x5af   :  { %11068 = vmatmul.mubr.msk.f32.vlgmr.msra.gmra.mxu1 %vm693_vm1, %v12969_v30 }
 0x5b0   :  { %11076 = vmatpush3.msra.mxu1 %v12974_v52  ;;  %11077 = vmatprep.mubr.msk.f32.mxu1 %vm11662_vm0, %v14365_v59 }
 0x5b1   :  { %11085 = vmatprep.subr.mxu1 %v14365_v59 }
 0x5cb   :  { %v3794_v46 = vpop.f32.mrf.mxu0 }
 0x5cd   :  { %v10954_v49 = vpop.f32.mrf.mxu0 }
 0x5ce   :  { %v14389_v49 = vld [vmem:[#allocation10_spill] sm:$0xff] }
 0x5cf   :  { %v3871_v15 = vpop.f32.mrf.mxu1 }
 0x5d0   :  { %v4645_v22 = vpack.c.bf16 %v3871_v15, %v3794_v46  ;;  %v13053_v15 = vadd.f32 %v14389_v49, %v12699_v57 }
 0x5d1   :  { %v10959_v8 = vpop.f32.mrf.mxu1 }
 0x5d2   :  { %10388 = vmatmul.mubr.msk.bf16.vlgmr.msra.gmra.mxu0 %vm693_vm1, %v4645_v22  ;;  %v14392_v8 = vld [vmem:[#allocation14_spill] sm:$0xff] }
 0x5d3   :  { %11011 = vmatpush3.xpose.msk.msra.mxu0 %vm693_vm1, %v12707_v61  ;;  %v3948_v3 = vpop.f32.mrf.mxu0  ;;  %4759 = vmatprep.mubr.bf16.mxu0 %v14370_v7 }
 0x5d4   :  { %11020 = vmatprep.subr.mxu0 %v14365_v59 }
 0x5d5   :  { %v10964_v48 = vpop.f32.mrf.mxu0 }
 0x5d8   :  { %v4025_v19 = vpop.f32.mrf.mxu1 }
 0x5d9   :  { %v4646_v56 = vpack.c.bf16 %v4025_v19, %v3948_v3  ;;  %v13068_v3 = vadd.f32 %v14392_v8, %v12699_v57  ;;  %v14394_v19 = vld [vmem:[#allocation11_spill] sm:$0xff] }
 0x5da   :  { %v10969_v12 = vpop.f32.mrf.mxu1 }
 0x5db   :  { %10389 = vmatmul.mubr.msk.bf16.gmra.mxu0 %vm693_vm1, %v4646_v56  ;;  %v14396_v12 = vld [vmem:[#allocation20_spill] sm:$0xff] }
 0x5dc   :  { %v4179_v29 = vpop.f32.mrf.mxu1  ;;  %4769 = vmatprep.mubr.bf16.mxu0 %v14370_v7 }
 0x5de   :  { %v10979_v18 = vpop.f32.mrf.mxu1 }
 0x5df   :  { %v14398_v18 = vld [vmem:[#allocation15_spill] sm:$0xff] }
 0x5e2   :  { %v4333_v23 = vpop.f32.mrf.mxu1 }
 0x5e4   :  { %v10989_v42 = vpop.f32.mrf.mxu1 }
 0x5e6   :  { %v4487_v31 = vpop.f32.mrf.mxu1 }
 0x5e8   :  { %v10999_v53 = vpop.f32.mrf.mxu1 }
 0x610   :  { %v4102_v61 = vpop.f32.mrf.mxu0 }
 0x611   :  { %v4647_v50 = vpack.c.bf16 %v4179_v29, %v4102_v61  ;;  %v13083_v29 = vadd.f32 %v14396_v12, %v12961_v10 }
 0x612   :  { %v10974_v35 = vpop.f32.mrf.mxu0 }
 0x613   :  { %10390 = vmatmul.mubr.msk.bf16.gmra.mxu0 %vm693_vm1, %v4647_v50 }
 0x614   :  { %v4256_v1 = vpop.f32.mrf.mxu0  ;;  %4779 = vmatprep.mubr.bf16.mxu0 %v14370_v7 }
 0x615   :  { %v4648_v21 = vpack.c.bf16 %v4333_v23, %v4256_v1 }
 0x616   :  { %v10984_v36 = vpop.f32.mrf.mxu0 }
 0x618   :  { %v4410_v20 = vpop.f32.mrf.mxu0 }
 0x619   :  { %v4649_v63 = vpack.c.bf16 %v4487_v31, %v4410_v20 }
 0x61a   :  { %v10994_v24 = vpop.f32.mrf.mxu0 }
 0x61b   :  { %v4641_v58 = vpop.f32.mrf.mxu1  ;;  %10391 = vmatmul.mubr.msk.bf16.gmra.mxu0 %vm693_vm1, %v4648_v21 }
 0x61c   :  { %v4564_v45 = vpop.f32.mrf.mxu0  ;;  %4789 = vmatprep.mubr.bf16.mxu0 %v14370_v7 }
 0x61d   :  { %v11009_v17 = vpop.f32.mrf.mxu1  ;;  %v4650_v27 = vpack.c.bf16 %v4641_v58, %v4564_v45 }
 0x61e   :  { %v11004_v2 = vpop.f32.mrf.mxu0 }
 0x623   :  { %10392 = vmatmul.mubr.msk.bf16.gmra.mxu0 %vm693_vm1, %v4649_v63 }
 0x624   :  { %4799 = vmatprep.mubr.bf16.mxu0 %v14370_v7 }
 0x62b   :  { %v12995_v11 = vpop.f32.mrf.mxu1  ;;  %10393 = vmatmul.mubr.msk.bf16.gmra.mxu0 %vm693_vm1, %v4650_v27 }
 0x62c   :  { %11012 = vmatprep.mubr.msk.f32.mxu0 %vm11662_vm0, %v14365_v59 }
 0x62d   :  { %v13000_v41 = vpop.f32.mrf.mxu1 }
 0x62f   :  { %v13002_v43 = vpop.f32.mrf.mxu1 }
 0x631   :  { %v13004_v40 = vpop.f32.mrf.mxu1 }
 0x633   :  { %v13006_v60 = vpop.f32.mrf.mxu1  ;;  %11013 = vmatmul.mubr.msk.f32.vlgmr.msra.gmra.mxu0 %vm693_vm1, %v12711_v37  ;;  %v14383_v37 = vld [vmem:[#allocation4_spill] sm:$0xff] }
 0x634   :  { %11021 = vmatpush3.xpose.msk.msra.mxu0 %vm693_vm1, %v12723_v62  ;;  %11022 = vmatprep.mubr.msk.f32.mxu0 %vm11662_vm0, %v14365_v59  ;;  %v13027_v62 = vadd.f32 %v14383_v37, %v12085_v51 }
 0x635   :  { %v13014_v33 = vpop.f32.mrf.mxu1  ;;  %11030 = vmatprep.subr.mxu0 %v14365_v59 }
 0x637   :  { %v13017_v34 = vpop.f32.mrf.mxu1  ;;  %11023 = vmatmul.mubr.msk.f32.vlgmr.msra.gmra.mxu0 %vm693_vm1, %v12743_v9  ;;  %v14387_v9 = vld [vmem:[#allocation6_spill] sm:$0xff] }
 0x638   :  { %11031 = vmatpush3.xpose.msk.msra.mxu0 %vm693_vm1, %v12747_v16  ;;  %11032 = vmatprep.mubr.msk.f32.mxu0 %vm11662_vm0, %v14365_v59  ;;  %v13046_v16 = vadd.f32 %v14387_v9, %v12085_v51 }
 0x639   :  { %v13029_v38 = vpop.f32.mrf.mxu1  ;;  %11040 = vmatprep.subr.mxu0 %v14365_v59 }
 0x63a   :  { %14384 = vst [vmem:[#allocation8_spill] sm:$0xff] %v13029_v38 }
 0x63b   :  { %v13036_v28 = vpop.f32.mrf.mxu1  ;;  %11033 = vmatmul.mubr.msk.f32.vlgmr.msra.gmra.mxu0 %vm693_vm1, %v13027_v62 }
 0x63c   :  { %14386 = vst [vmem:[#allocation9_spill] sm:$0xff] %v13036_v28  ;;  %11041 = vmatpush3.xpose.msk.msra.mxu0 %vm693_vm1, %v13034_v5  ;;  %11042 = vmatprep.mubr.msk.f32.mxu0 %vm11662_vm0, %v14365_v59 }
 0x63d   :  { %v13048_v46 = vpop.f32.mrf.mxu1  ;;  %11050 = vmatprep.subr.mxu0 %v14365_v59 }
 0x63e   :  { %14388 = vst [vmem:[#allocation12_spill] sm:$0xff] %v13048_v46 }
 0x63f   :  { %v13055_v22 = vpop.f32.mrf.mxu1  ;;  %11043 = vmatmul.mubr.msk.f32.vlgmr.msra.gmra.mxu0 %vm693_vm1, %v13046_v16 }
 0x640   :  { %14390 = vst [vmem:[#allocation13_spill] sm:$0xff] %v13055_v22  ;;  %11051 = vmatpush3.xpose.msk.msra.mxu0 %vm693_vm1, %v13053_v15  ;;  %11052 = vmatprep.mubr.msk.f32.mxu0 %vm11662_vm0, %v14365_v59 }
 0x641   :  { %v13063_v51 = vpop.f32.mrf.mxu1  ;;  %11060 = vmatprep.subr.mxu0 %v14365_v59 }
 0x642   :  { %14391 = vst [vmem:[#allocation16_spill] sm:$0xff] %v13063_v51 }
 0x643   :  { %v13070_v48 = vpop.f32.mrf.mxu1  ;;  %11053 = vmatmul.mubr.msk.f32.vlgmr.msra.gmra.mxu0 %vm693_vm1, %v14394_v19 }
 0x644   :  { %14393 = vst [vmem:[#allocation19_spill] sm:$0xff] %v13070_v48  ;;  %11061 = vmatpush3.xpose.msk.msra.mxu0 %vm693_vm1, %v13068_v3  ;;  %11062 = vmatprep.mubr.msk.f32.mxu0 %vm11662_vm0, %v14365_v59 }
 0x645   :  { %v13078_v56 = vpop.f32.mrf.mxu1  ;;  %11070 = vmatprep.subr.mxu0 %v14365_v59 }
 0x646   :  { %14395 = vst [vmem:[#allocation4_spill] sm:$0xff] %v13078_v56 }
 0x647   :  { %v13085_v57 = vpop.f32.mrf.mxu1  ;;  %11063 = vmatmul.mubr.msk.f32.vlgmr.msra.gmra.mxu0 %vm693_vm1, %v14398_v18 }
 0x648   :  { %14397 = vst [vmem:[#allocation5_spill] sm:$0xff] %v13085_v57  ;;  %11071 = vmatpush3.msra.mxu0 %v13083_v29  ;;  %11072 = vmatprep.mubr.msk.f32.mxu0 %vm11662_vm0, %v14365_v59 }
 0x649   :  { %v13092_v23 = vpop.f32.mrf.mxu1  ;;  %11080 = vmatprep.subr.mxu0 %v14365_v59 }
 0x64a   :  { %14399 = vst [vmem:[#allocation6_spill] sm:$0xff] %v13092_v23 }
 0x64b   :  { %v13095_v42 = vpop.f32.mrf.mxu1 }
 0x64c   :  { %14400 = vst [vmem:[#allocation10_spill] sm:$0xff] %v13095_v42 }
 0x64d   :  { %v13097_v31 = vpop.f32.mrf.mxu1 }
 0x64e   :  { %14401 = vst [vmem:[#allocation14_spill] sm:$0xff] %v13097_v31 }
 0x64f   :  { %v13099_v53 = vpop.f32.mrf.mxu1 }
 0x650   :  { %14402 = vst [vmem:[#allocation11_spill] sm:$0xff] %v13099_v53 }
 0x651   :  { %v13101_v61 = vpop.f32.mrf.mxu1 }
 0x652   :  { %14403 = vst [vmem:[#allocation20_spill] sm:$0xff] %v13101_v61 }
 0x653   :  { %v13103_v50 = vpop.f32.mrf.mxu1 }
 0x654   :  { %14404 = vst [vmem:[#allocation15_spill] sm:$0xff] %v13103_v50 }
 0x655   :  { %v13105_v35 = vpop.f32.mrf.mxu1 }
 0x656   :  { %14405 = vst [vmem:[#allocation25_spill] sm:$0xff] %v13105_v35 }
 0x657   :  { %v13107_v1 = vpop.f32.mrf.mxu1 }
 0x658   :  { %14406 = vst [vmem:[#allocation26_spill] sm:$0xff] %v13107_v1 }
 0x659   :  { %v13109_v36 = vpop.f32.mrf.mxu1 }
 0x65a   :  { %14407 = vst [vmem:[#allocation27_spill] sm:$0xff] %v13109_v36  ;;  %v13160_v36 = vpop.permute.xlu0 %7084 }
 0x65b   :  { %v5109_v20 = vpop.f32.mrf.mxu1 }
 0x65c   :  { %v5874_v21 = vmul.f32 0.125, %v5109_v20 }
 0x65d   :  { %v11019_v24 = vpop.f32.mrf.mxu1 }
 0x65e   :  { %v5888_v58 = vsel %vm1618_vm2, %v5874_v21, -inf  ;;  %v13170_v53 = vpop.permute.xlu0 %7240 }
 0x65f   :  { %5889 = vmax.xlane.f32.xlu1 %v5888_v58  ;;  %v5261_v45 = vpop.f32.mrf.mxu1 }
 0x660   :  { %v13112_v17 = vmul.f32 0.125, %v5261_v45 }
 0x661   :  { %v11029_v2 = vpop.f32.mrf.mxu1 }
 0x662   :  { %v5894_v63 = vsel %vm1618_vm2, %v13112_v17, -inf  ;;  %v13180_v56 = vpop.permute.xlu0 %7318 }
 0x663   :  { %5895 = vmax.xlane.f32.xlu0 %v5894_v63  ;;  %v5413_v27 = vpop.f32.mrf.mxu1 }
 0x664   :  { %v13116_v37 = vmul.f32 0.125, %v5413_v27 }
 0x665   :  { %v11039_v25 = vpop.f32.mrf.mxu1 }
 0x666   :  { %v5900_v9 = vsel %vm1618_vm2, %v13116_v37, -inf }
 0x667   :  { %5901 = vmax.xlane.f32.xlu0 %v5900_v9  ;;  %v5565_v49 = vpop.f32.mrf.mxu1 }
 0x668   :  { %v13120_v8 = vmul.f32 0.125, %v5565_v49 }
 0x669   :  { %v11049_v12 = vpop.f32.mrf.mxu1 }
 0x66a   :  { %v5906_v20 = vsel %vm1618_vm2, %v13120_v8, -inf }
 0x66b   :  { %5907 = vmax.xlane.f32.xlu1 %v5906_v20  ;;  %v5717_v24 = vpop.f32.mrf.mxu1 }
 0x66c   :  { %v13124_v58 = vmul.f32 0.125, %v5717_v24 }
 0x66d   :  { %v11059_v45 = vpop.f32.mrf.mxu1 }
 0x66e   :  { %v5912_v2 = vsel %vm1618_vm2, %v13124_v58, -inf }
 0x66f   :  { %5913 = vmax.xlane.f32.xlu0 %v5912_v2  ;;  %v5869_v63 = vpop.f32.mrf.mxu1 }
 0x670   :  { %v13128_v27 = vmul.f32 0.125, %v5869_v63  ;;  %v13148_v63 = vpop.permute.xlu1 %7082 }
 0x671   :  { %v11069_v25 = vpop.f32.mrf.mxu1 }
 0x672   :  { %v5918_v9 = vsel %vm1618_vm2, %v13128_v27, -inf }
 0x673   :  { %5919 = vmax.xlane.f32.xlu1 %v5918_v9 }
 0x674   :  { %v13154_v9 = vpop.permute.xlu1 %7162 }
 0x678   :  { %v13164_v35 = vpop.permute.xlu1 %7160 }
 0x67c   :  { %v13174_v42 = vpop.permute.xlu1 %7238 }
 0x680   :  { %v13184_v51 = vpop.permute.xlu1 %7316 }
 0x684   :  { %7394 = vrot.lane.b32.xlu1 %v13027_v62, %s11663_s4 }
 0x685   :  { %7474 = vrot.lane.b32.xlu0 %v12908_v0, %s11663_s4 }
 0x692   :  { %v13136_v49 = vpop.f32.mrf.mxu0 }
 0x694   :  { %v13138_v12 = vpop.f32.mrf.mxu0 }
 0x696   :  { %v13140_v20 = vpop.f32.mrf.mxu0 }
 0x698   :  { %v13142_v24 = vpop.f32.mrf.mxu0 }
 0x69b   :  { %v13144_v45 = vpop.f32.mrf.mxu0 }
 0x69d   :  { %v13146_v2 = vpop.f32.mrf.mxu0 }
 0x69f   :  { %v13150_v25 = vpop.f32.mrf.mxu0 }
 0x6a1   :  { %v13152_v62 = vpop.f32.mrf.mxu0 }
 0x6a2   :  { %14408 = vst [vmem:[#allocation28_spill] sm:$0xff] %v13152_v62 }
 0x6d3   :  { %v13156_v0 = vpop.f32.mrf.mxu0 }
 0x6d4   :  { %14409 = vst [vmem:[#allocation29_spill] sm:$0xff] %v13156_v0 }
 0x6d5   :  { %v13158_v44 = vpop.f32.mrf.mxu0 }
 0x6d6   :  { %14410 = vst [vmem:[#allocation30_spill] sm:$0xff] %v13158_v44 }
 0x6d7   :  { %v13162_v1 = vpop.f32.mrf.mxu0 }
 0x6d8   :  { %14411 = vst [vmem:[#allocation31_spill] sm:$0xff] %v13162_v1 }
 0x6d9   :  { %v13166_v50 = vpop.f32.mrf.mxu0 }
 0x6da   :  { %14412 = vst [vmem:[#allocation32_spill] sm:$0xff] %v13166_v50 }
 0x6db   :  { %v13168_v61 = vpop.f32.mrf.mxu0 }
 0x6dc   :  { %14413 = vst [vmem:[#allocation33_spill] sm:$0xff] %v13168_v61  ;;  %v13190_v61 = vpop.permute.xlu0 %7396 }
 0x6dd   :  { %v13172_v31 = vpop.f32.mrf.mxu0 }
 0x6de   :  { %14414 = vst [vmem:[#allocation34_spill] sm:$0xff] %v13172_v31 }
 0x6df   :  { %v13176_v23 = vpop.f32.mrf.mxu0 }
 0x6e0   :  { %14415 = vst [vmem:[#allocation35_spill] sm:$0xff] %v13176_v23 }
 0x6e1   :  { %v13178_v57 = vpop.f32.mrf.mxu0 }
 0x6e2   :  { %14416 = vst [vmem:[#allocation36_spill] sm:$0xff] %v13178_v57 }
 0x6e3   :  { %v13182_v48 = vpop.f32.mrf.mxu0 }
 0x6e4   :  { %14417 = vst [vmem:[#allocation37_spill] sm:$0xff] %v13182_v48 }
 0x6e5   :  { %v13186_v22 = vpop.f32.mrf.mxu0 }
 0x6e6   :  { %14418 = vst [vmem:[#allocation38_spill] sm:$0xff] %v13186_v22 }
 0x6e7   :  { %v13188_v50 = vpop.f32.mrf.mxu0 }
 0x6e8   :  { %14419 = vst [vmem:[#allocation39_spill] sm:$0xff] %v13188_v50  ;;  %v5890_v1 = vpop.xlane.xlu1 %5889 }
 0x6e9   :  { %v5922_v31 = vsub.f32 %v5874_v21, %v5890_v1  ;;  %v13192_v46 = vpop.f32.mrf.mxu0 }
 0x6ea   :  { %14420 = vst [vmem:[#allocation40_spill] sm:$0xff] %v13192_v46 }
 0x6eb   :  { %v5935_v44 = vmul.f32 1.442695, %v5922_v31  ;;  %v13194_v23 = vpop.f32.mrf.mxu0 }
 0x6ec   :  { %14421 = vst [vmem:[#allocation41_spill] sm:$0xff] %v13194_v23  ;;  %v5896_v57 = vpop.xlane.xlu0 %5895 }
 0x6ed   :  { %11510 = vpow2.f32 %v5935_v44  ;;  %v5924_v28 = vsub.f32 %v13112_v17, %v5896_v57  ;;  %v13197_v48 = vpop.f32.mrf.mxu0 }
 0x6ee   :  { %14422 = vst [vmem:[#allocation42_spill] sm:$0xff] %v13197_v48 }
 0x6ef   :  { %v5939_v0 = vmul.f32 1.442695, %v5924_v28  ;;  %v13199_v38 = vpop.f32.mrf.mxu0 }
 0x6f0   :  { %14423 = vst [vmem:[#allocation43_spill] sm:$0xff] %v13199_v38  ;;  %v5902_v22 = vpop.xlane.xlu0 %5901 }
 0x6f1   :  { %11512 = vpow2.f32 %v5939_v0  ;;  %v5926_v50 = vsub.f32 %v13116_v37, %v5902_v22  ;;  %v13202_v62 = vpop.f32.mrf.mxu0 }
 0x6f3   :  { %v5943_v1 = vmul.f32 1.442695, %v5926_v50  ;;  %v5033_v21 = vpop.f32.mrf.mxu0 }
 0x6f4   :  { %v5908_v31 = vpop.xlane.xlu1 %5907 }
 0x6f5   :  { %11514 = vpow2.f32 %v5943_v1  ;;  %v5928_v23 = vsub.f32 %v13120_v8, %v5908_v31  ;;  %v11014_v44 = vpop.f32.mrf.mxu0 }
 0x6f7   :  { %v5947_v46 = vmul.f32 1.442695, %v5928_v23  ;;  %v5185_v57 = vpop.f32.mrf.mxu0 }
 0x6f8   :  { %v5914_v17 = vpop.xlane.xlu0 %5913 }
 0x6f9   :  { %11516 = vpow2.f32 %v5947_v46  ;;  %v5930_v28 = vsub.f32 %v13124_v58, %v5914_v17  ;;  %v11024_v38 = vpop.f32.mrf.mxu0 }
 0x6fa   :  { %v13206_v48 = vpop.eup %11510 }
 0x6fb   :  { %v5951_v0 = vmul.f32 1.442695, %v5930_v28  ;;  %v5337_v22 = vpop.f32.mrf.mxu0  ;;  %v5960_v50 = vsel %vm1618_vm2, %v13206_v48, 0.0 }
 0x6fc   :  { %5961 = vadd.xlane.f32.xlu0 %v5960_v50  ;;  %v5920_v37 = vpop.xlane.xlu1 %5919 }
 0x6fd   :  { %11518 = vpow2.f32 %v5951_v0  ;;  %v5932_v8 = vsub.f32 %v13128_v27, %v5920_v37  ;;  %v11034_v1 = vpop.f32.mrf.mxu0 }
 0x6fe   :  { %v13211_v23 = vpop.eup %11512 }
 0x6ff   :  { %v5955_v31 = vmul.f32 1.442695, %v5932_v8  ;;  %v5489_v46 = vpop.f32.mrf.mxu0  ;;  %v5966_v38 = vsel %vm1618_vm2, %v13211_v23, 0.0 }
 0x700   :  { %5967 = vadd.xlane.f32.xlu1 %v5966_v38 }
 0x701   :  { %11520 = vpow2.f32 %v5955_v31  ;;  %v11044_v58 = vpop.f32.mrf.mxu0 }
 0x702   :  { %v13215_v44 = vpop.eup %11514 }
 0x703   :  { %v5641_v17 = vpop.f32.mrf.mxu0  ;;  %v5972_v28 = vsel %vm1618_vm2, %v13215_v44, 0.0 }
 0x704   :  { %5973 = vadd.xlane.f32.xlu0 %v5972_v28  ;;  %v13243_v28 = vmul.f32 0.125, %v5033_v21 }
 0x705   :  { %v11054_v0 = vpop.f32.mrf.mxu0 }
 0x706   :  { %v13219_v27 = vpop.eup %11516  ;;  %v13247_v0 = vmul.f32 0.125, %v5185_v57 }
 0x707   :  { %v5793_v50 = vpop.f32.mrf.mxu0  ;;  %v5978_v37 = vsel %vm1618_vm2, %v13219_v27, 0.0 }
 0x708   :  { %5979 = vadd.xlane.f32.xlu1 %v5978_v37  ;;  %v13288_v37 = vadd.f32 %v12355_v32, %v12961_v10 }
 0x709   :  { %v11064_v8 = vpop.f32.mrf.mxu0 }
 0x70a   :  { %v13223_v1 = vpop.eup %11518 }
 0x70b   :  { %v5984_v31 = vsel %vm1618_vm2, %v13223_v1, 0.0 }
 0x70c   :  { %5985 = vadd.xlane.f32.xlu0 %v5984_v31 }
 0x70e   :  { %v13227_v38 = vpop.eup %11520 }
 0x70f   :  { %v5990_v58 = vsel %vm1618_vm2, %v13227_v38, 0.0 }
 0x710   :  { %5991 = vadd.xlane.f32.xlu1 %v5990_v58 }
 0x721   :  { %7472 = vrot.lane.b32.xlu1 %v12918_v14, %s11663_s4  ;;  %v5885_v14 = vsel %vm1618_vm2, %v13243_v28, -inf }
 0x722   :  { %7552 = vrot.lane.b32.xlu0 %v13034_v5, %s11663_s4  ;;  %v5891_v5 = vsel %vm1618_vm2, %v13247_v0, -inf }
 0x726   :  { %7550 = vrot.lane.b32.xlu0 %v13046_v16, %s11663_s4 }
 0x72a   :  { %7630 = vrot.lane.b32.xlu0 %v12923_v26, %s11663_s4  ;;  %v13265_v26 = vmul.f32 0.125, %v5337_v22 }
 0x72c   :  { %v5897_v16 = vsel %vm1618_vm2, %v13265_v26, -inf }
 0x72e   :  { %7628 = vrot.lane.b32.xlu0 %v12933_v55, %s11663_s4  ;;  %v13267_v55 = vpop.permute.xlu0 %7474 }
 0x732   :  { %7708 = vrot.lane.b32.xlu0 %v13053_v15, %s11663_s4  ;;  %v13275_v15 = vmul.f32 0.125, %v5793_v50 }
 0x745   :  { %5886 = vmax.xlane.f32.xlu1 %v5885_v14 }
 0x751   :  { %5892 = vmax.xlane.f32.xlu0 %v5891_v5 }
 0x756   :  { %7706 = vrot.lane.b32.xlu1 %v14394_v19, %s11663_s4  ;;  %v5915_v19 = vsel %vm1618_vm2, %v13275_v15, -inf }
 0x75a   :  { %7784 = vrot.lane.b32.xlu1 %v12948_v6, %s11663_s4  ;;  %v13269_v6 = vmul.f32 0.125, %v5641_v17 }
 0x75e   :  { %7864 = vrot.lane.b32.xlu1 %v13068_v3, %s11663_s4 }
 0x767   :  { %7786 = vrot.lane.b32.xlu0 %v12938_v39, %s11663_s4  ;;  %v13273_v39 = vpop.permute.xlu1 %7394 }
 0x76b   :  { %7862 = vrot.lane.b32.xlu0 %v14398_v18, %s11663_s4  ;;  %v13281_v18 = vmul.f32 0.125, %v5489_v46 }
 0x76d   :  { %v5903_v22 = vsel %vm1618_vm2, %v13281_v18, -inf }
 0x76f   :  { %7942 = vrot.lane.b32.xlu0 %v12953_v4, %s11663_s4  ;;  %v5909_v4 = vsel %vm1618_vm2, %v13269_v6, -inf }
 0x773   :  { %7940 = vrot.lane.b32.xlu0 %v12969_v30, %s11663_s4 }
 0x782   :  { %5898 = vmax.xlane.f32.xlu1 %v5897_v16 }
 0x785   :  { %v5962_v3 = vpop.xlane.xlu0 %5961 }
 0x786   :  { %11522 = vrcp.f32 %v5962_v3  ;;  %5910 = vmax.xlane.f32.xlu1 %v5909_v4 }
 0x789   :  { %v5968_v30 = vpop.xlane.xlu1 %5967 }
 0x78a   :  { %11524 = vrcp.f32 %v5968_v30  ;;  %5916 = vmax.xlane.f32.xlu1 %v5915_v19 }
 0x78d   :  { %v5974_v21 = vpop.xlane.xlu0 %5973 }
 0x78e   :  { %11526 = vrcp.f32 %v5974_v21 }
 0x791   :  { %v5980_v57 = vpop.xlane.xlu1 %5979 }
 0x792   :  { %11528 = vrcp.f32 %v5980_v57  ;;  %5904 = vmax.xlane.f32.xlu0 %v5903_v22 }
 0x793   :  { %v11523_v17 = vpop.eup %11522 }
 0x794   :  { %v6006_v50 = vmul.f32 %v11523_v17, %v13206_v48  ;;  %v13298_v48 = vadd.f32 %v12365_v13, %v12961_v10 }
 0x795   :  { %v5986_v8 = vpop.xlane.xlu0 %5985 }
 0x796   :  { %11530 = vrcp.f32 %v5986_v8  ;;  %11078 = vmatmul.mubr.msk.f32.vlgmr.msra.gmra.mxu1 %vm1618_vm2, %v6006_v50 }
 0x797   :  { %v11525_v46 = vpop.eup %11524  ;;  %11086 = vmatpush3.msra.mxu1 %v13288_v37  ;;  %11087 = vmatprep.mubr.msk.f32.mxu1 %vm11662_vm0, %v14365_v59 }
 0x798   :  { %v6008_v31 = vmul.f32 %v11525_v46, %v13211_v23  ;;  %11095 = vmatprep.subr.mxu1 %v14365_v59  ;;  %v13308_v23 = vadd.f32 %v12390_v54, %v12961_v10 }
 0x799   :  { %v5992_v32 = vpop.xlane.xlu1 %5991 }
 0x79a   :  { %11532 = vrcp.f32 %v5992_v32  ;;  %11088 = vmatmul.mubr.msk.f32.vlgmr.msra.gmra.mxu1 %vm1618_vm2, %v6008_v31 }
 0x79b   :  { %v11527_v58 = vpop.eup %11526  ;;  %11096 = vmatpush3.msra.mxu1 %v13298_v48  ;;  %11097 = vmatprep.mubr.msk.f32.mxu1 %vm11662_vm0, %v14365_v59 }
 0x79c   :  { %v6010_v14 = vmul.f32 %v11527_v58, %v13215_v44  ;;  %11105 = vmatprep.subr.mxu1 %v14365_v59  ;;  %v13318_v44 = vadd.f32 %v12537_v47, %v12961_v10 }
 0x79e   :  { %11098 = vmatmul.mubr.msk.f32.vlgmr.msra.gmra.mxu1 %vm1618_vm2, %v6010_v14 }
 0x79f   :  { %v11529_v13 = vpop.eup %11528  ;;  %11106 = vmatpush3.msra.mxu1 %v13308_v23  ;;  %11107 = vmatprep.mubr.msk.f32.mxu1 %vm11662_vm0, %v14365_v59 }
 0x7a0   :  { %v6012_v5 = vmul.f32 %v11529_v13, %v13219_v27  ;;  %11115 = vmatprep.subr.mxu1 %v14365_v59  ;;  %v14424_v27 = vld [vmem:[#allocation18_spill] sm:$0xff] }
 0x7a1   :  { %v13328_v3 = vadd.f32 %v14424_v27, %v12961_v10 }
 0x7a2   :  { %11108 = vmatmul.mubr.msk.f32.vlgmr.msra.gmra.mxu1 %vm1618_vm2, %v6012_v5 }
 0x7a3   :  { %v11531_v54 = vpop.eup %11530  ;;  %11116 = vmatpush3.msra.mxu1 %v13318_v44  ;;  %11117 = vmatprep.mubr.msk.f32.mxu1 %vm11662_vm0, %v14365_v59 }
 0x7a4   :  { %v6014_v16 = vmul.f32 %v11531_v54, %v13223_v1  ;;  %11125 = vmatprep.subr.mxu1 %v14365_v59  ;;  %v7553_v1 = vpop.permute.xlu0 %7552 }
 0x7a6   :  { %11118 = vmatmul.mubr.msk.f32.vlgmr.msra.gmra.mxu1 %vm1618_vm2, %v6014_v16 }
 0x7a7   :  { %v11533_v47 = vpop.eup %11532  ;;  %11126 = vmatpush3.msra.mxu1 %v13328_v3  ;;  %11127 = vmatprep.mubr.msk.f32.mxu1 %vm11662_vm0, %v14365_v59 }
 0x7a8   :  { %v6016_v4 = vmul.f32 %v11533_v47, %v13227_v38  ;;  %11130 = vmatprep.subr.mxu1 %v14365_v59 }
 0x7aa   :  { %11128 = vmatmul.mubr.msk.f32.vlgmr.msra.gmra.mxu1 %vm1618_vm2, %v6016_v4 }
 0x7ab   :  { %11131 = vmatpush3.xpose.msk.msra.mxu1 %vm693_vm1, %v13160_v36  ;;  %11132 = vmatprep.mubr.msk.f32.mxu1 %vm11662_vm0, %v14365_v59  ;;  %v7551_v36 = vpop.permute.xlu0 %7550 }
 0x7ac   :  { %11135 = vmatprep.subr.mxu1 %v14365_v59 }
 0x7ae   :  { %11133 = vmatmul.mubr.msk.f32.vlgmr.msra.gmra.mxu1 %vm693_vm1, %v13148_v63 }
 0x7af   :  { %11136 = vmatpush3.xpose.msk.msra.mxu1 %vm693_vm1, %v13154_v9  ;;  %11137 = vmatprep.mubr.msk.f32.mxu1 %vm11662_vm0, %v14365_v59 }
 0x7b0   :  { %11140 = vmatprep.subr.mxu1 %v14365_v59 }
 0x7b2   :  { %11138 = vmatmul.mubr.msk.f32.vlgmr.msra.gmra.mxu1 %vm693_vm1, %v13164_v35 }
 0x7b3   :  { %11141 = vmatpush3.xpose.msk.msra.mxu1 %vm693_vm1, %v13170_v53  ;;  %11142 = vmatprep.mubr.msk.f32.mxu1 %vm11662_vm0, %v14365_v59 }
 0x7b4   :  { %11145 = vmatprep.subr.mxu1 %v14365_v59 }
 0x7b6   :  { %11143 = vmatmul.mubr.msk.f32.vlgmr.msra.gmra.mxu1 %vm693_vm1, %v13174_v42  ;;  %v7631_v42 = vpop.permute.xlu0 %7630 }
 0x7b7   :  { %11146 = vmatpush3.xpose.msk.msra.mxu1 %vm693_vm1, %v13180_v56  ;;  %11147 = vmatprep.mubr.msk.f32.mxu1 %vm11662_vm0, %v14365_v59 }
 0x7b8   :  { %11150 = vmatprep.subr.mxu1 %v14365_v59 }
 0x7ba   :  { %11148 = vmatmul.mubr.msk.f32.vlgmr.msra.gmra.mxu1 %vm693_vm1, %v13184_v51  ;;  %v7473_v51 = vpop.permute.xlu1 %7472  ;;  %v7629_v56 = vpop.permute.xlu0 %7628 }
 0x7bb   :  { %11151 = vmatpush3.xpose.msk.msra.mxu1 %vm693_vm1, %v13190_v61  ;;  %11152 = vmatprep.mubr.msk.f32.mxu1 %vm11662_vm0, %v14365_v59 }
 0x7bc   :  { %11155 = vmatprep.subr.mxu1 %v14365_v59 }
 0x7be   :  { %11153 = vmatmul.mubr.msk.f32.vlgmr.msra.gmra.mxu1 %vm693_vm1, %v13273_v39  ;;  %v7709_v53 = vpop.permute.xlu0 %7708 }
 0x7bf   :  { %11156 = vmatpush3.xpose.msk.msra.mxu1 %vm693_vm1, %v13267_v55  ;;  %11157 = vmatprep.mubr.msk.f32.mxu1 %vm11662_vm0, %v14365_v59 }
 0x7c0   :  { %11160 = vmatprep.subr.mxu1 %v14365_v59 }
 0x7c2   :  { %11158 = vmatmul.mubr.msk.f32.vlgmr.msra.gmra.mxu1 %vm693_vm1, %v7473_v51 }
 0x7c3   :  { %11161 = vmatpush3.xpose.msk.msra.mxu1 %vm693_vm1, %v7553_v1  ;;  %11162 = vmatprep.mubr.msk.f32.mxu1 %vm11662_vm0, %v14365_v59 }
 0x7c4   :  { %11165 = vmatprep.subr.mxu1 %v14365_v59 }
 0x7c6   :  { %11163 = vmatmul.mubr.msk.f32.vlgmr.msra.gmra.mxu1 %vm693_vm1, %v7551_v36 }
 0x7c7   :  { %11166 = vmatpush3.xpose.msk.msra.mxu1 %vm693_vm1, %v7631_v42  ;;  %11167 = vmatprep.mubr.msk.f32.mxu1 %vm11662_vm0, %v14365_v59 }
 0x7c8   :  { %11170 = vmatprep.subr.mxu1 %v14365_v59 }
 0x7ca   :  { %11168 = vmatmul.mubr.msk.f32.vlgmr.msra.gmra.mxu1 %vm693_vm1, %v7629_v56  ;;  %v14425_v56 = vld [vmem:[#allocation21_spill] sm:$0xff] }
 0x7cb   :  { %11171 = vmatpush3.xpose.msk.msra.mxu1 %vm693_vm1, %v7709_v53  ;;  %11172 = vmatprep.mubr.msk.f32.mxu1 %vm11662_vm0, %v14365_v59  ;;  %v647_v53 = vadd.f32 %v14425_v56, %v12961_v10 }
 0x7cc   :  { %11175 = vmatprep.subr.mxu1 %v14365_v59 }
 0x7ce   :  { %v5887_v61 = vpop.xlane.xlu1 %5886 }
 0x7cf   :  { %v5921_v35 = vsub.f32 %v13243_v28, %v5887_v61  ;;  %v14426_v61 = vld [vmem:[#allocation22_spill] sm:$0xff] }
 0x7d1   :  { %v5933_v63 = vmul.f32 1.442695, %v5921_v35  ;;  %v657_v35 = vadd.f32 %v14426_v61, %v12961_v10 }
 0x7d2   :  { %v7707_v9 = vpop.permute.xlu1 %7706 }
 0x7d3   :  { %11534 = vpow2.f32 %v5933_v63  ;;  %11173 = vmatmul.mubr.msk.f32.vlgmr.msra.gmra.mxu1 %vm693_vm1, %v7707_v9 }
 0x7d4   :  { %11177 = vmatprep.mubr.msk.f32.mxu1 %vm11662_vm0, %v14365_v59 }
 0x7d6   :  { %v7785_v39 = vpop.permute.xlu1 %7784 }
 0x7da   :  { %v5893_v38 = vpop.xlane.xlu0 %5892  ;;  %v7865_v57 = vpop.permute.xlu1 %7864 }
 0x7db   :  { %v5923_v55 = vsub.f32 %v13247_v0, %v5893_v38 }
 0x7dd   :  { %v5937_v30 = vmul.f32 1.442695, %v5923_v55 }
 0x7de   :  { %v7787_v19 = vpop.permute.xlu0 %7786 }
 0x7df   :  { %11536 = vpow2.f32 %v5937_v30  ;;  %11176 = vmatpush3.xpose.msk.msra.mxu1 %vm693_vm1, %v7787_v19 }
 0x7e0   :  { %v13398_v21 = vpop.eup %11534  ;;  %11180 = vmatprep.subr.mxu1 %v14365_v59 }
 0x7e1   :  { %v5957_v28 = vsel %vm1618_vm2, %v13398_v21, 0.0 }
 0x7e2   :  { %v7863_v22 = vpop.permute.xlu0 %7862  ;;  %5958 = vadd.xlane.f32.xlu1 %v5957_v28  ;;  %11178 = vmatmul.mubr.msk.f32.vlgmr.msra.gmra.mxu1 %vm693_vm1, %v7785_v39 }
 0x7e3   :  { %11181 = vmatpush3.xpose.msk.msra.mxu1 %vm693_vm1, %v7865_v57  ;;  %11182 = vmatprep.mubr.msk.f32.mxu1 %vm11662_vm0, %v14365_v59 }
 0x7e4   :  { %11185 = vmatprep.subr.mxu1 %v14365_v59 }
 0x7e6   :  { %v7943_v0 = vpop.permute.xlu0 %7942  ;;  %11183 = vmatmul.mubr.msk.f32.vlgmr.msra.gmra.mxu1 %vm693_vm1, %v7863_v22 }
 0x7e7   :  { %11186 = vmatpush3.xpose.msk.msra.mxu1 %vm693_vm1, %v7943_v0  ;;  %11187 = vmatprep.mubr.msk.f32.mxu1 %vm11662_vm0, %v14365_v59 }
 0x7e8   :  { %11190 = vmatprep.subr.mxu1 %v14365_v59 }
 0x7ea   :  { %v7941_v17 = vpop.permute.xlu0 %7940 }
 0x7eb   :  { %11188 = vmatmul.mubr.msk.f32.vlgmr.msra.gmra.mxu1 %vm693_vm1, %v7941_v17 }
 0x7ec   :  { %v13414_v50 = vpop.eup %11536  ;;  %11192 = vmatprep.mubr.msk.f32.mxu1 %vm11662_vm0, %v14365_v59 }
 0x7ed   :  { %v5963_v8 = vsel %vm1618_vm2, %v13414_v50, 0.0 }
 0x7ee   :  { %5964 = vadd.xlane.f32.xlu1 %v5963_v8 }
 0x80b   :  { %v5899_v46 = vpop.xlane.xlu1 %5898 }
 0x80c   :  { %v5925_v31 = vsub.f32 %v13265_v26, %v5899_v46 }
 0x80e   :  { %v5941_v32 = vmul.f32 1.442695, %v5925_v31 }
 0x80f   :  { %v5911_v58 = vpop.xlane.xlu1 %5910 }
 0x810   :  { %11538 = vpow2.f32 %v5941_v32  ;;  %v5929_v14 = vsub.f32 %v13269_v6, %v5911_v58 }
 0x812   :  { %v5949_v13 = vmul.f32 1.442695, %v5929_v14 }
 0x813   :  { %v5917_v5 = vpop.xlane.xlu1 %5916 }
 0x814   :  { %11540 = vpow2.f32 %v5949_v13  ;;  %v5931_v54 = vsub.f32 %v13275_v15, %v5917_v5 }
 0x816   :  { %v5953_v4 = vmul.f32 1.442695, %v5931_v54 }
 0x81b   :  { %v5905_v16 = vpop.xlane.xlu0 %5904 }
 0x81c   :  { %v5927_v27 = vsub.f32 %v13281_v18, %v5905_v16 }
 0x81d   :  { %v13424_v47 = vpop.eup %11538 }
 0x81e   :  { %v5945_v1 = vmul.f32 1.442695, %v5927_v27  ;;  %v5969_v26 = vsel %vm1618_vm2, %v13424_v47, 0.0 }
 0x81f   :  { %5970 = vadd.xlane.f32.xlu0 %v5969_v26 }
 0x820   :  { %11542 = vpow2.f32 %v5945_v1 }
 0x821   :  { %v13428_v36 = vpop.eup %11540  ;;  %11544 = vpow2.f32 %v5953_v4 }
 0x822   :  { %v5981_v6 = vsel %vm1618_vm2, %v13428_v36, 0.0 }
 0x823   :  { %5982 = vadd.xlane.f32.xlu0 %v5981_v6 }
 0x82d   :  { %v13432_v15 = vpop.eup %11542 }
 0x82e   :  { %v5975_v18 = vsel %vm1618_vm2, %v13432_v15, 0.0  ;;  %v13436_v42 = vpop.eup %11544 }
 0x82f   :  { %5976 = vadd.xlane.f32.xlu1 %v5975_v18  ;;  %v5987_v51 = vsel %vm1618_vm2, %v13436_v42, 0.0 }
 0x833   :  { %5988 = vadd.xlane.f32.xlu1 %v5987_v51 }
 0x839   :  { %8163 = vrot.lane.b32.xlu0 %v13083_v29, %s11663_s4 }
 0x83d   :  { %8317 = vrot.lane.b32.xlu0 %v647_v53, %s11663_s4 }
 0x841   :  { %8471 = vrot.lane.b32.xlu0 %v657_v35, %s11663_s4 }
 0x844   :  { %8240 = vrot.lane.b32.xlu1 %v12974_v52, %s11663_s4 }
 0x848   :  { %8394 = vrot.lane.b32.xlu1 %v13288_v37, %s11663_s4 }
 0x84c   :  { %8548 = vrot.lane.b32.xlu1 %v13298_v48, %s11663_s4 }
 0x856   :  { %v13454_v29 = vpop.f32.mrf.mxu1 }
 0x858   :  { %v11079_v63 = vpop.f32.mrf.mxu1 }
 0x85a   :  { %v13456_v9 = vpop.f32.mrf.mxu1 }
 0x85c   :  { %v11089_v38 = vpop.f32.mrf.mxu1 }
 0x85e   :  { %v13458_v55 = vpop.f32.mrf.mxu1 }
 0x860   :  { %v11099_v39 = vpop.f32.mrf.mxu1 }
 0x862   :  { %v13460_v30 = vpop.f32.mrf.mxu1 }
 0x864   :  { %v11109_v19 = vpop.f32.mrf.mxu1 }
 0x866   :  { %v13462_v28 = vpop.f32.mrf.mxu1 }
 0x868   :  { %v11119_v52 = vpop.f32.mrf.mxu1 }
 0x86a   :  { %v13464_v57 = vpop.f32.mrf.mxu1 }
 0x86b   :  { %v5959_v37 = vpop.xlane.xlu1 %5958 }
 0x86c   :  { %11546 = vrcp.f32 %v5959_v37  ;;  %v11129_v48 = vpop.f32.mrf.mxu1 }
 0x86e   :  { %v7156_v22 = vpop.f32.mrf.mxu1 }
 0x86f   :  { %v13466_v0 = vmul.f32 0.125, %v7156_v22 }
 0x870   :  { %v11134_v17 = vpop.f32.mrf.mxu1 }
 0x871   :  { %v8030_v8 = vsel %vm1618_vm2, %v13466_v0, -inf }
 0x872   :  { %8031 = vmax.xlane.f32.xlu0 %v8030_v8  ;;  %v7234_v46 = vpop.f32.mrf.mxu1 }
 0x873   :  { %v13470_v31 = vmul.f32 0.125, %v7234_v46 }
 0x874   :  { %v11139_v32 = vpop.f32.mrf.mxu1 }
 0x875   :  { %v8033_v58 = vsel %vm1618_vm2, %v13470_v31, -inf }
 0x876   :  { %8034 = vmax.xlane.f32.xlu1 %v8033_v58  ;;  %v7312_v14 = vpop.f32.mrf.mxu1 }
 0x877   :  { %v13474_v13 = vmul.f32 0.125, %v7312_v14  ;;  %v5965_v5 = vpop.xlane.xlu1 %5964 }
 0x878   :  { %11548 = vrcp.f32 %v5965_v5  ;;  %v11144_v54 = vpop.f32.mrf.mxu1 }
 0x879   :  { %v11547_v16 = vpop.eup %11546  ;;  %v8036_v27 = vsel %vm1618_vm2, %v13474_v13, -inf }
 0x87a   :  { %v6005_v4 = vmul.f32 %v11547_v16, %v13398_v21  ;;  %8037 = vmax.xlane.f32.xlu0 %v8036_v27  ;;  %v7390_v1 = vpop.f32.mrf.mxu1 }
 0x87b   :  { %v13479_v26 = vmul.f32 0.125, %v7390_v1 }
 0x87c   :  { %11073 = vmatmul.mubr.msk.f32.vlgmr.msra.gmra.mxu0 %vm1618_vm2, %v6005_v4  ;;  %v11149_v6 = vpop.f32.mrf.mxu1 }
 0x87d   :  { %11081 = vmatpush3.msra.mxu0 %v647_v53  ;;  %v8039_v18 = vsel %vm1618_vm2, %v13479_v26, -inf  ;;  %11082 = vmatprep.mubr.msk.f32.mxu0 %vm11662_vm0, %v14365_v59 }
 0x87e   :  { %8040 = vmax.xlane.f32.xlu1 %v8039_v18  ;;  %v7468_v51 = vpop.f32.mrf.mxu1  ;;  %11090 = vmatprep.subr.mxu0 %v14365_v59 }
 0x87f   :  { %v13487_v56 = vmul.f32 0.125, %v7468_v51 }
 0x880   :  { %v11154_v21 = vpop.f32.mrf.mxu1 }
 0x881   :  { %v8042_v61 = vsel %vm1618_vm2, %v13487_v56, -inf }
 0x882   :  { %8043 = vmax.xlane.f32.xlu0 %v8042_v61  ;;  %v7546_v63 = vpop.f32.mrf.mxu1 }
 0x883   :  { %v13491_v38 = vmul.f32 0.125, %v7546_v63 }
 0x884   :  { %v11159_v53 = vpop.f32.mrf.mxu1 }
 0x885   :  { %v11549_v39 = vpop.eup %11548  ;;  %v8045_v19 = vsel %vm1618_vm2, %v13491_v38, -inf }
 0x886   :  { %v6007_v52 = vmul.f32 %v11549_v39, %v13414_v50  ;;  %8046 = vmax.xlane.f32.xlu1 %v8045_v19  ;;  %v7624_v37 = vpop.f32.mrf.mxu1 }
 0x887   :  { %v13496_v48 = vmul.f32 0.125, %v7624_v37 }
 0x888   :  { %11083 = vmatmul.mubr.msk.f32.vlgmr.msra.gmra.mxu0 %vm1618_vm2, %v6007_v52  ;;  %v11164_v22 = vpop.f32.mrf.mxu1 }
 0x889   :  { %11091 = vmatpush3.msra.mxu0 %v657_v35  ;;  %v8048_v17 = vsel %vm1618_vm2, %v13496_v48, -inf  ;;  %11092 = vmatprep.mubr.msk.f32.mxu0 %vm11662_vm0, %v14365_v59 }
 0x88a   :  { %8049 = vmax.xlane.f32.xlu0 %v8048_v17  ;;  %v7702_v8 = vpop.f32.mrf.mxu1  ;;  %11100 = vmatprep.subr.mxu0 %v14365_v59  ;;  %v14427_v17 = vld [vmem:[#allocation23_spill] sm:$0xff] }
 0x88b   :  { %v13504_v46 = vmul.f32 0.125, %v7702_v8  ;;  %v667_v8 = vadd.f32 %v14427_v17, %v12961_v10 }
 0x88c   :  { %v11169_v50 = vpop.f32.mrf.mxu1 }
 0x88d   :  { %v8051_v32 = vsel %vm1618_vm2, %v13504_v46, -inf }
 0x88e   :  { %8052 = vmax.xlane.f32.xlu1 %v8051_v32 }
 0x893   :  { %v7780_v58 = vpop.f32.mrf.mxu1 }
 0x894   :  { %v13508_v14 = vmul.f32 0.125, %v7780_v58 }
 0x895   :  { %v11174_v35 = vpop.f32.mrf.mxu1 }
 0x896   :  { %v8054_v5 = vsel %vm1618_vm2, %v13508_v14, -inf }
 0x897   :  { %8055 = vmax.xlane.f32.xlu0 %v8054_v5  ;;  %v14428_v5 = vld [vmem:[#allocation24_spill] sm:$0xff] }
 0x8a2   :  { %v7858_v54 = vpop.f32.mrf.mxu1 }
 0x8a3   :  { %v13512_v16 = vmul.f32 0.125, %v7858_v54  ;;  %v13538_v54 = vadd.f32 %v14428_v5, %v12961_v10 }
 0x8a4   :  { %v11179_v27 = vpop.f32.mrf.mxu1 }
 0x8a5   :  { %v8057_v4 = vsel %vm1618_vm2, %v13512_v16, -inf }
 0x8a6   :  { %8058 = vmax.xlane.f32.xlu1 %v8057_v4  ;;  %v7936_v1 = vpop.f32.mrf.mxu1  ;;  %v14429_v4 = vld [vmem:[#allocation17_spill] sm:$0xff] }
 0x8a7   :  { %v13516_v6 = vmul.f32 0.125, %v7936_v1  ;;  %v13551_v1 = vadd.f32 %v14429_v4, %v12961_v10  ;;  %v11377_v10 = vld [vmem:[%s14327_s7 + $0xa0] ss:$8 sps:$4 sm:$0xff]  }
 0x8a8   :  { %v5971_v18 = vpop.xlane.xlu0 %5970  ;;  %v11184_v51 = vpop.f32.mrf.mxu1 }
 0x8a9   :  { %11550 = vrcp.f32 %v5971_v18  ;;  %v8060_v21 = vsel %vm1618_vm2, %v13516_v6, -inf  ;;  %v11379_v51 = vld [vmem:[%s14327_s7 + $0xa4] ss:$8 sps:$4 sm:$0xff]  }
 0x8aa   :  { %8061 = vmax.xlane.f32.xlu0 %v8060_v21  ;;  %v11382_v21 = vld [vmem:[%s14327_s7 + $0x94] ss:$8 sps:$4 sm:$0xff]  }
 0x8ab   :  { %v8014_v61 = vpop.f32.mrf.mxu1 }
 0x8ac   :  { %v13520_v63 = vmul.f32 0.125, %v8014_v61  ;;  %v5983_v53 = vpop.xlane.xlu0 %5982  ;;  %v11385_v61 = vld [vmem:[%s14327_s7 + $0x84] ss:$8 sps:$4 sm:$0xff]  }
 0x8ad   :  { %v11189_v39 = vpop.f32.mrf.mxu1 }
 0x8ae   :  { %v8063_v19 = vsel %vm1618_vm2, %v13520_v63, -inf }
 0x8af   :  { %8064 = vmax.xlane.f32.xlu1 %v8063_v19 }
 0x8b0   :  { %v8164_v52 = vpop.permute.xlu0 %8163 }
 0x8b1   :  { %11191 = vmatpush3.msra.mxu1 %v8164_v52 }
 0x8b2   :  { %11195 = vmatprep.subr.mxu1 %v14365_v59 }
 0x8b4   :  { %v13584_v19 = vpop.permute.xlu0 %8317 }
 0x8b6   :  { %v11551_v37 = vpop.eup %11550 }
 0x8b7   :  { %v6009_v22 = vmul.f32 %v11551_v37, %v13424_v47 }
 0x8b8   :  { %v5977_v50 = vpop.xlane.xlu1 %5976  ;;  %v13586_v37 = vpop.permute.xlu0 %8471 }
 0x8b9   :  { %11552 = vrcp.f32 %v5977_v50  ;;  %11093 = vmatmul.mubr.msk.f32.vlgmr.msra.gmra.mxu0 %vm1618_vm2, %v6009_v22 }
 0x8ba   :  { %11101 = vmatpush3.msra.mxu0 %v667_v8  ;;  %11102 = vmatprep.mubr.msk.f32.mxu0 %vm11662_vm0, %v14365_v59  ;;  %11554 = vrcp.f32 %v5983_v53  ;;  %v11383_v53 = vld [vmem:[%s14327_s7 + $0x80] ss:$8 sps:$4 sm:$0xff]  }
 0x8bb   :  { %11110 = vmatprep.subr.mxu0 %v14365_v59 }
 0x8bc   :  { %v5989_v32 = vpop.xlane.xlu1 %5988 }
 0x8bd   :  { %11556 = vrcp.f32 %v5989_v32 }
 0x8c0   :  { %8625 = vrot.lane.b32.xlu0 %v667_v8, %s11663_s4  ;;  %8702 = vrot.lane.b32.xlu1 %v13308_v23, %s11663_s4  ;;  %v11376_v23 = vld [vmem:[%s14327_s7 + $0xb4] ss:$8 sps:$4 sm:$0xff]   ;;  %v13582_v39 = vpop.permute.xlu1 %8240 }
 0x8c4   :  { %v8395_v52 = vpop.permute.xlu1 %8394 }
 0x8c6   :  { %v11553_v47 = vpop.eup %11552 }
 0x8c7   :  { %v6011_v58 = vmul.f32 %v11553_v47, %v13432_v15  ;;  %v11555_v35 = vpop.eup %11554 }
 0x8c8   :  { %v6013_v27 = vmul.f32 %v11555_v35, %v13428_v36  ;;  %v11374_v36 = vld [vmem:[%s14327_s7 + $0xb0] ss:$8 sps:$4 sm:$0xff]   ;;  %v13588_v22 = vpop.permute.xlu1 %8548 }
 0x8c9   :  { %11103 = vmatmul.mubr.msk.f32.vlgmr.msra.gmra.mxu0 %vm1618_vm2, %v6011_v58 }
 0x8ca   :  { %11111 = vmatpush3.msra.mxu0 %v13538_v54  ;;  %11112 = vmatprep.mubr.msk.f32.mxu0 %vm11662_vm0, %v14365_v59  ;;  %v11557_v15 = vpop.eup %11556 }
 0x8cb   :  { %11120 = vmatprep.subr.mxu0 %v14365_v59  ;;  %v6015_v18 = vmul.f32 %v11557_v15, %v13436_v42  ;;  %v11380_v42 = vld [vmem:[%s14327_s7 + $0x90] ss:$8 sps:$4 sm:$0xff]  }
 0x8cd   :  { %11113 = vmatmul.mubr.msk.f32.vlgmr.msra.gmra.mxu0 %vm1618_vm2, %v6013_v27 }
 0x8ce   :  { %11121 = vmatpush3.msra.mxu0 %v13551_v1  ;;  %11122 = vmatprep.mubr.msk.f32.mxu0 %vm11662_vm0, %v14365_v59 }
 0x8cf   :  { %6973 = vmatprep.subr.bf16.mxu0 %v11376_v23 }
 0x8d1   :  { %11123 = vmatmul.mubr.msk.f32.vlgmr.msra.gmra.mxu0 %vm1618_vm2, %v6015_v18 }
 0x8d2   :  { %6974 = vmatpush1.bf16.msra.mxu0 %v11374_v36  ;;  %6997 = vmatprep.mubr.bf16.mxu0 %v14370_v7 }
 0x8d3   :  { %6975 = vmatprep.subr.bf16.mxu0 %v11379_v51 }
 0x8d6   :  { %6976 = vmatpush1.bf16.msra.mxu0 %v11377_v10 }
 0x8d7   :  { %6977 = vmatprep.subr.bf16.mxu0 %v11382_v21 }
 0x8da   :  { %6978 = vmatpush1.bf16.msra.mxu0 %v11380_v42 }
 0x8db   :  { %6979 = vmatprep.subr.bf16.mxu0 %v11385_v61 }
 0x8de   :  { %6980 = vmatpush1.bf16.msra.mxu0 %v11383_v53 }
 0x8df   :  { %11205 = vmatprep.subr.mxu0 %v14365_v59 }
 0x8fb   :  { %v8032_v17 = vpop.xlane.xlu0 %8031 }
 0x8fc   :  { %v8066_v8 = vsub.f32 %v13466_v0, %v8032_v17 }
 0x8fe   :  { %v8078_v50 = vmul.f32 1.442695, %v8066_v8 }
 0x8ff   :  { %v8035_v32 = vpop.xlane.xlu1 %8034 }
 0x900   :  { %11558 = vpow2.f32 %v8078_v50  ;;  %v8067_v47 = vsub.f32 %v13470_v31, %v8035_v32 }
 0x902   :  { %v8080_v58 = vmul.f32 1.442695, %v8067_v47 }
 0x903   :  { %v8038_v35 = vpop.xlane.xlu0 %8037 }
 0x904   :  { %11560 = vpow2.f32 %v8080_v58  ;;  %v8068_v5 = vsub.f32 %v13474_v13, %v8038_v35 }
 0x906   :  { %v8082_v27 = vmul.f32 1.442695, %v8068_v5 }
 0x907   :  { %v8041_v23 = vpop.xlane.xlu1 %8040 }
 0x908   :  { %11562 = vpow2.f32 %v8082_v27  ;;  %v8069_v15 = vsub.f32 %v13479_v26, %v8041_v23 }
 0x90a   :  { %v8084_v4 = vmul.f32 1.442695, %v8069_v15 }
 0x90b   :  { %v8044_v36 = vpop.xlane.xlu0 %8043 }
 0x90c   :  { %11564 = vpow2.f32 %v8084_v4  ;;  %v8070_v0 = vsub.f32 %v13487_v56, %v8044_v36 }
 0x90d   :  { %v13595_v18 = vpop.eup %11558 }
 0x90e   :  { %v8086_v51 = vmul.f32 1.442695, %v8070_v0  ;;  %v8102_v31 = vsel %vm1618_vm2, %v13595_v18, 0.0 }
 0x90f   :  { %8103 = vadd.xlane.f32.xlu0 %v8102_v31  ;;  %v8047_v17 = vpop.xlane.xlu1 %8046 }
 0x910   :  { %11566 = vpow2.f32 %v8086_v51  ;;  %v8071_v50 = vsub.f32 %v13491_v38, %v8047_v17 }
 0x911   :  { %v13599_v10 = vpop.eup %11560 }
 0x912   :  { %v8105_v13 = vsel %vm1618_vm2, %v13599_v10, 0.0  ;;  %v8088_v58 = vmul.f32 1.442695, %v8071_v50 }
 0x913   :  { %8106 = vadd.xlane.f32.xlu1 %v8105_v13  ;;  %v8050_v8 = vpop.xlane.xlu0 %8049 }
 0x914   :  { %v8072_v47 = vsub.f32 %v13496_v48, %v8050_v8  ;;  %11568 = vpow2.f32 %v8088_v58 }
 0x915   :  { %v13603_v26 = vpop.eup %11562 }
 0x916   :  { %v8108_v21 = vsel %vm1618_vm2, %v13603_v26, 0.0  ;;  %v8090_v4 = vmul.f32 1.442695, %v8072_v47 }
 0x917   :  { %8109 = vadd.xlane.f32.xlu0 %v8108_v21  ;;  %v8053_v35 = vpop.xlane.xlu1 %8052 }
 0x918   :  { %11570 = vpow2.f32 %v8090_v4 }
 0x919   :  { %v13607_v56 = vpop.eup %11564 }
 0x91a   :  { %v8111_v42 = vsel %vm1618_vm2, %v13607_v56, 0.0 }
 0x91b   :  { %8112 = vadd.xlane.f32.xlu1 %v8111_v42 }
 0x91d   :  { %v13611_v61 = vpop.eup %11566 }
 0x91e   :  { %v8114_v53 = vsel %vm1618_vm2, %v13611_v61, 0.0 }
 0x91f   :  { %8115 = vadd.xlane.f32.xlu0 %v8114_v53 }
 0x920   :  { %v8056_v32 = vpop.xlane.xlu0 %8055 }
 0x921   :  { %v8074_v5 = vsub.f32 %v13508_v14, %v8056_v32  ;;  %v13632_v42 = vpop.eup %11568 }
 0x922   :  { %v8117_v53 = vsel %vm1618_vm2, %v13632_v42, 0.0 }
 0x923   :  { %v8094_v0 = vmul.f32 1.442695, %v8074_v5 }
 0x925   :  { %11572 = vpow2.f32 %v8094_v0 }
 0x92c   :  { %8856 = vrot.lane.b32.xlu1 %v13318_v44, %s11663_s4  ;;  %v8073_v44 = vsub.f32 %v13504_v46, %v8053_v35 }
 0x92e   :  { %v8092_v48 = vmul.f32 1.442695, %v8073_v44 }
 0x92f   :  { %v8059_v38 = vpop.xlane.xlu1 %8058 }
 0x930   :  { %11574 = vpow2.f32 %v8092_v48 }
 0x933   :  { %v8062_v27 = vpop.xlane.xlu0 %8061 }
 0x935   :  { %8779 = vrot.lane.b32.xlu0 %v13538_v54, %s11663_s4  ;;  %v8076_v54 = vsub.f32 %v13516_v6, %v8062_v27 }
 0x937   :  { %v8098_v14 = vmul.f32 1.442695, %v8076_v54 }
 0x938   :  { %v8065_v46 = vpop.xlane.xlu1 %8064 }
 0x939   :  { %11576 = vpow2.f32 %v8098_v14  ;;  %v8077_v6 = vsub.f32 %v13520_v63, %v8065_v46 }
 0x93b   :  { %v8100_v21 = vmul.f32 1.442695, %v8077_v6 }
 0x93c   :  { %v6086_v23 = vpop.f32.mrf.mxu0 }
 0x93d   :  { %v6893_v15 = vpack.c.bf16 %v13454_v29, %v6086_v23  ;;  %v8075_v29 = vsub.f32 %v13512_v16, %v8059_v38  ;;  %v13635_v16 = vpop.eup %11570 }
 0x93e   :  { %v11074_v36 = vpop.f32.mrf.mxu0  ;;  %v13639_v17 = vpop.eup %11572  ;;  %v8120_v8 = vsel %vm1618_vm2, %v13635_v16, 0.0 }
 0x93f   :  { %10452 = vmatmul.mubr.msk.bf16.vlgmr.msra.gmra.mxu0 %vm693_vm1, %v6893_v15  ;;  %v8096_v51 = vmul.f32 1.442695, %v8075_v29  ;;  %v13641_v63 = vpop.eup %11574  ;;  %v13674_v29 = vpop.permute.xlu1 %8702 }
 0x940   :  { %11206 = vmatpush3.msra.mxu0 %v8395_v52  ;;  %7007 = vmatprep.mubr.bf16.mxu0 %v14370_v7  ;;  %v8123_v47 = vsel %vm1618_vm2, %v13641_v63, 0.0 }
 0x941   :  { %11215 = vmatprep.subr.mxu0 %v14365_v59  ;;  %11578 = vpow2.f32 %v8096_v51 }
 0x942   :  { %11580 = vpow2.f32 %v8100_v21 }
 0x946   :  { %v13647_v50 = vpop.eup %11576 }
 0x947   :  { %v8132_v32 = vsel %vm1618_vm2, %v13647_v50, 0.0 }
 0x948   :  { %v6232_v31 = vpop.f32.mrf.mxu0 }
 0x949   :  { %v6894_v13 = vpack.c.bf16 %v13456_v9, %v6232_v31  ;;  %v8126_v9 = vsel %vm1618_vm2, %v13639_v17, 0.0 }
 0x94a   :  { %v11084_v52 = vpop.f32.mrf.mxu0 }
 0x94b   :  { %10453 = vmatmul.mubr.msk.bf16.gmra.mxu0 %vm693_vm1, %v6894_v13 }
 0x94c   :  { %7017 = vmatprep.mubr.bf16.mxu0 %v14370_v7 }
 0x94e   :  { %v13653_v58 = vpop.eup %11578 }
 0x94f   :  { %v8129_v35 = vsel %vm1618_vm2, %v13653_v58, 0.0  ;;  %v13657_v5 = vpop.eup %11580 }
 0x950   :  { %8118 = vadd.xlane.f32.xlu1 %v8117_v53  ;;  %v8135_v27 = vsel %vm1618_vm2, %v13657_v5, 0.0 }
 0x954   :  { %8127 = vadd.xlane.f32.xlu0 %v8126_v9  ;;  %8121 = vadd.xlane.f32.xlu1 %v8120_v8 }
 0x958   :  { %8133 = vadd.xlane.f32.xlu0 %v8132_v32  ;;  %8124 = vadd.xlane.f32.xlu1 %v8123_v47 }
 0x95c   :  { %8130 = vadd.xlane.f32.xlu1 %v8129_v35 }
 0x960   :  { %8136 = vadd.xlane.f32.xlu1 %v8135_v27 }
 0x96e   :  { %8933 = vrot.lane.b32.xlu0 %v13551_v1, %s11663_s4 }
 0x971   :  { %9010 = vrot.lane.b32.xlu1 %v13328_v3, %s11663_s4 }
 0x979   :  { %v6378_v23 = vpop.f32.mrf.mxu0 }
 0x97a   :  { %v6895_v15 = vpack.c.bf16 %v13458_v55, %v6378_v23  ;;  %v8626_v55 = vpop.permute.xlu0 %8625 }
 0x97b   :  { %v11094_v4 = vpop.f32.mrf.mxu0 }
 0x97c   :  { %10454 = vmatmul.mubr.msk.bf16.gmra.mxu0 %vm693_vm1, %v6895_v15 }
 0x97d   :  { %7027 = vmatprep.mubr.bf16.mxu0 %v14370_v7 }
 0x989   :  { %v6524_v44 = vpop.f32.mrf.mxu0 }
 0x98a   :  { %v6896_v36 = vpack.c.bf16 %v13460_v30, %v6524_v44 }
 0x98b   :  { %v11104_v0 = vpop.f32.mrf.mxu0 }
 0x98c   :  { %10455 = vmatmul.mubr.msk.bf16.gmra.mxu0 %vm693_vm1, %v6896_v36 }
 0x98d   :  { %v6670_v54 = vpop.f32.mrf.mxu0  ;;  %7037 = vmatprep.mubr.bf16.mxu0 %v14370_v7 }
 0x98e   :  { %v6897_v3 = vpack.c.bf16 %v13462_v28, %v6670_v54  ;;  %v11388_v54 = vld [vmem:[%s14327_s7 + $0xf4] ss:$8 sps:$4 sm:$0xff]  }
 0x98f   :  { %v11114_v1 = vpop.f32.mrf.mxu0 }
 0x991   :  { %v6816_v38 = vpop.f32.mrf.mxu0 }
 0x992   :  { %v6898_v30 = vpack.c.bf16 %v13464_v57, %v6816_v38 }
 0x993   :  { %v11124_v48 = vpop.f32.mrf.mxu0 }
 0x994   :  { %10456 = vmatmul.mubr.msk.bf16.gmra.mxu0 %vm693_vm1, %v6897_v3 }
 0x995   :  { %7047 = vmatprep.mubr.bf16.mxu0 %v14370_v7 }
 0x998   :  { %v8104_v14 = vpop.xlane.xlu0 %8103 }
 0x999   :  { %11582 = vrcp.f32 %v8104_v14  ;;  %v11397_v14 = vld [vmem:[%s14327_s7 + $0xc4] ss:$8 sps:$4 sm:$0xff]  }
 0x99c   :  { %10457 = vmatmul.mubr.msk.bf16.gmra.mxu0 %vm693_vm1, %v6898_v30  ;;  %v8107_v46 = vpop.xlane.xlu1 %8106 }
 0x99d   :  { %11584 = vrcp.f32 %v8107_v46  ;;  %11207 = vmatprep.mubr.msk.f32.mxu0 %vm11662_vm0, %v14365_v59  ;;  %v4905_v46 = vadd.f32 %v13000_v41, %v13138_v12 }
 0x9a0   :  { %v8110_v28 = vpop.xlane.xlu0 %8109 }
 0x9a1   :  { %11586 = vrcp.f32 %v8110_v28 }
 0x9a4   :  { %v8113_v51 = vpop.xlane.xlu1 %8112 }
 0x9a5   :  { %11588 = vrcp.f32 %v8113_v51 }
 0x9a6   :  { %v11583_v6 = vpop.eup %11582 }
 0x9a7   :  { %v8150_v31 = vmul.f32 %v11583_v6, %v13595_v18  ;;  %v11395_v6 = vld [vmem:[%s14327_s7 + $0xc0] ss:$8 sps:$4 sm:$0xff]  }
 0x9a8   :  { %v8116_v13 = vpop.xlane.xlu0 %8115 }
 0x9a9   :  { %11590 = vrcp.f32 %v8116_v13  ;;  %11193 = vmatmul.mubr.msk.f32.vlgmr.msra.gmra.mxu1 %vm1618_vm2, %v8150_v31  ;;  %v4909_v13 = vadd.f32 %v13004_v40, %v13142_v24 }
 0x9aa   :  { %v11585_v52 = vpop.eup %11584  ;;  %11196 = vmatpush3.msra.mxu1 %v13582_v39  ;;  %11197 = vmatprep.mubr.msk.f32.mxu1 %vm11662_vm0, %v14365_v59 }
 0x9ab   :  { %v8151_v57 = vmul.f32 %v11585_v52, %v13599_v10  ;;  %11200 = vmatprep.subr.mxu1 %v14365_v59 }
 0x9ad   :  { %11198 = vmatmul.mubr.msk.f32.vlgmr.msra.gmra.mxu1 %vm1618_vm2, %v8151_v57  ;;  %v4913_v57 = vadd.f32 %v13006_v60, %v13144_v45  ;;  %v14432_v45 = vld [vmem:[#allocation29_spill] sm:$0xff] }
 0x9ae   :  { %v11587_v21 = vpop.eup %11586  ;;  %11201 = vmatpush3.msra.mxu1 %v13584_v19  ;;  %11202 = vmatprep.mubr.msk.f32.mxu1 %vm11662_vm0, %v14365_v59 }
 0x9af   :  { %v8152_v18 = vmul.f32 %v11587_v21, %v13603_v26  ;;  %11210 = vmatprep.subr.mxu1 %v14365_v59 }
 0x9b1   :  { %11203 = vmatmul.mubr.msk.f32.vlgmr.msra.gmra.mxu1 %vm1618_vm2, %v8152_v18 }
 0x9b2   :  { %v11589_v39 = vpop.eup %11588  ;;  %11211 = vmatpush3.msra.mxu1 %v13586_v37  ;;  %11212 = vmatprep.mubr.msk.f32.mxu1 %vm11662_vm0, %v14365_v59  ;;  %v8857_v37 = vpop.permute.xlu1 %8856 }
 0x9b3   :  { %v8153_v10 = vmul.f32 %v11589_v39, %v13607_v56  ;;  %11220 = vmatprep.subr.mxu1 %v14365_v59  ;;  %v8780_v56 = vpop.permute.xlu0 %8779  ;;  %v4917_v39 = vadd.f32 %v13017_v34, %v13150_v25  ;;  %v14436_v25 = vld [vmem:[#allocation31_spill] sm:$0xff] }
 0x9b5   :  { %11208 = vmatmul.mubr.msk.f32.vlgmr.msra.gmra.mxu0 %vm1618_vm2, %v8153_v10  ;;  %v14430_v10 = vld [vmem:[#allocation28_spill] sm:$0xff] }
 0x9b6   :  { %v11591_v19 = vpop.eup %11590  ;;  %11216 = vmatpush3.msra.mxu0 %v13588_v22  ;;  %11217 = vmatprep.mubr.msk.f32.mxu0 %vm11662_vm0, %v14365_v59 }
 0x9b7   :  { %v8154_v26 = vmul.f32 %v11591_v19, %v13611_v61  ;;  %11225 = vmatprep.subr.mxu0 %v14365_v59  ;;  %v14431_v19 = vld [vmem:[#allocation8_spill] sm:$0xff] }
 0x9b9   :  { %11213 = vmatmul.mubr.msk.f32.vlgmr.msra.gmra.mxu1 %vm1618_vm2, %v8154_v26  ;;  %v4919_v26 = vadd.f32 %v14431_v19, %v14430_v10 }
 0x9ba   :  { %11221 = vmatpush3.msra.mxu1 %v8626_v55  ;;  %11222 = vmatprep.mubr.msk.f32.mxu1 %vm11662_vm0, %v14365_v59  ;;  %v11389_v55 = vld [vmem:[%s14327_s7 + $0xe0] ss:$8 sps:$4 sm:$0xff]  }
 0x9bb   :  { %11230 = vmatprep.subr.mxu1 %v14365_v59 }
 0x9d9   :  { %v8119_v53 = vpop.xlane.xlu1 %8118 }
 0x9da   :  { %11592 = vrcp.f32 %v8119_v53  ;;  %v14433_v53 = vld [vmem:[#allocation9_spill] sm:$0xff] }
 0x9dd   :  { %v8128_v22 = vpop.xlane.xlu0 %8127  ;;  %v8122_v9 = vpop.xlane.xlu1 %8121 }
 0x9de   :  { %11594 = vrcp.f32 %v8122_v9  ;;  %v14435_v9 = vld [vmem:[#allocation12_spill] sm:$0xff] }
 0x9df   :  { %11596 = vrcp.f32 %v8128_v22  ;;  %v14434_v22 = vld [vmem:[#allocation30_spill] sm:$0xff] }
 0x9e1   :  { %v8125_v8 = vpop.xlane.xlu1 %8124  ;;  %v8134_v61 = vpop.xlane.xlu0 %8133 }
 0x9e2   :  { %11598 = vrcp.f32 %v8125_v8  ;;  %v4925_v8 = vadd.f32 %v14435_v9, %v14434_v22  ;;  %v11407_v22 = vld [vmem:[%s14328_s9 + $0x18] sm:$0xff]   ;;  %v14452_v9 = vld [vmem:[#allocation39_spill] sm:$0xff] }
 0x9e3   :  { %11600 = vrcp.f32 %v8134_v61 }
 0x9e5   :  { %v8131_v32 = vpop.xlane.xlu1 %8130  ;;  %v8934_v1 = vpop.permute.xlu0 %8933 }
 0x9e6   :  { %11602 = vrcp.f32 %v8131_v32  ;;  %v14437_v32 = vld [vmem:[#allocation13_spill] sm:$0xff] }
 0x9e7   :  { %v11593_v47 = vpop.eup %11592 }
 0x9e8   :  { %v8155_v35 = vmul.f32 %v11593_v47, %v13632_v42  ;;  %v4927_v47 = vadd.f32 %v14437_v32, %v14436_v25 }
 0x9e9   :  { %v8137_v27 = vpop.xlane.xlu1 %8136 }
 0x9ea   :  { %11604 = vrcp.f32 %v8137_v27  ;;  %11218 = vmatmul.mubr.msk.f32.vlgmr.msra.gmra.mxu0 %vm1618_vm2, %v8155_v35 }
 0x9eb   :  { %11226 = vmatpush3.msra.mxu0 %v13674_v29  ;;  %11227 = vmatprep.mubr.msk.f32.mxu0 %vm11662_vm0, %v14365_v59  ;;  %v11595_v23 = vpop.eup %11594  ;;  %v11394_v29 = vld [vmem:[%s14327_s7 + $0xd4] ss:$8 sps:$4 sm:$0xff]  }
 0x9ec   :  { %11235 = vmatprep.subr.mxu0 %v14365_v59  ;;  %v8156_v15 = vmul.f32 %v11595_v23, %v13635_v16  ;;  %v11597_v4 = vpop.eup %11596  ;;  %v14438_v23 = vld [vmem:[#allocation32_spill] sm:$0xff] }
 0x9ed   :  { %v8158_v42 = vmul.f32 %v11597_v4, %v13639_v17  ;;  %v9011_v48 = vpop.permute.xlu1 %9010 }
 0x9ee   :  { %11223 = vmatmul.mubr.msk.f32.vlgmr.msra.gmra.mxu1 %vm1618_vm2, %v8156_v15  ;;  %v14439_v15 = vld [vmem:[#allocation16_spill] sm:$0xff] }
 0x9ef   :  { %v11599_v44 = vpop.eup %11598  ;;  %11231 = vmatpush3.msra.mxu1 %v8780_v56  ;;  %11232 = vmatprep.mubr.msk.f32.mxu1 %vm11662_vm0, %v14365_v59  ;;  %v4929_v4 = vadd.f32 %v14439_v15, %v14438_v23 }
 0x9f0   :  { %v8157_v36 = vmul.f32 %v11599_v44, %v13641_v63  ;;  %11240 = vmatprep.subr.mxu1 %v14365_v59  ;;  %v11601_v0 = vpop.eup %11600  ;;  %v11386_v63 = vld [vmem:[%s14327_s7 + $0xf0] ss:$8 sps:$4 sm:$0xff]  }
 0x9f1   :  { %v8160_v17 = vmul.f32 %v11601_v0, %v13647_v50  ;;  %v11398_v0 = vld [vmem:[%s14328_s9 + $0x78] sm:$0xff]  }
 0x9f2   :  { %11228 = vmatmul.mubr.msk.f32.vlgmr.msra.gmra.mxu0 %vm1618_vm2, %v8157_v36  ;;  %11233 = vmatmul.mubr.msk.f32.vlgmr.msra.gmra.mxu1 %vm1618_vm2, %v8158_v42 }
 0x9f3   :  { %v11603_v16 = vpop.eup %11602  ;;  %11236 = vmatpush3.msra.mxu0 %v8857_v37  ;;  %11241 = vmatpush3.msra.mxu1 %v8934_v1  ;;  %v11401_v1 = vld [vmem:[%s14328_s9 + $0x30] sm:$0xff]  }
 0x9f4   :  { %v8159_v38 = vmul.f32 %v11603_v16, %v13653_v58  ;;  %11237 = vmatprep.mubr.msk.f32.mxu0 %vm11662_vm0, %v14365_v59  ;;  %11242 = vmatprep.mubr.msk.f32.mxu1 %vm11662_vm0, %v14365_v59  ;;  %v11391_v58 = vld [vmem:[%s14327_s7 + $0xe4] ss:$8 sps:$4 sm:$0xff]   ;;  %v11400_v16 = vld [vmem:[%s14328_s9 + $0x70] sm:$0xff]  }
 0x9f5   :  { %11245 = vmatprep.subr.mxu0 %v14365_v59  ;;  %9166 = vmatprep.subr.bf16.mxu1 %v11388_v54  ;;  %v11399_v54 = vld [vmem:[%s14328_s9 + $0x38] sm:$0xff]  }
 0x9f6   :  { %11238 = vmatmul.mubr.msk.f32.vlgmr.msra.gmra.mxu0 %vm1618_vm2, %v8159_v38  ;;  %11243 = vmatmul.mubr.msk.f32.vlgmr.msra.gmra.mxu1 %vm1618_vm2, %v8160_v17  ;;  %v14440_v38 = vld [vmem:[#allocation33_spill] sm:$0xff]  ;;  %v14441_v17 = vld [vmem:[#allocation19_spill] sm:$0xff] }
 0x9f7   :  { %v11605_v3 = vpop.eup %11604  ;;  %11246 = vmatpush3.msra.mxu0 %v9011_v48  ;;  %11247 = vmatprep.mubr.msk.f32.mxu0 %vm11662_vm0, %v14365_v59  ;;  %v4903_v59 = vadd.f32 %v12995_v11, %v13136_v49  ;;  %v4907_v11 = vadd.f32 %v13002_v43, %v13140_v20  ;;  %v4915_v43 = vadd.f32 %v13014_v33, %v13146_v2  ;;  %v14442_v48 = vld [vmem:[#allocation34_spill] sm:$0xff] }
 0x9f8   :  { %v8161_v50 = vmul.f32 %v11605_v3, %v13657_v5  ;;  %9167 = vmatpush1.bf16.msra.mxu1 %v11386_v63  ;;  %9190 = vmatprep.mubr.bf16.mxu1 %v14370_v7  ;;  %v11392_v5 = vld [vmem:[%s14327_s7 + $0xd0] ss:$8 sps:$4 sm:$0xff]   ;;  %v4923_v33 = vadd.f32 %v14433_v53, %v14432_v45  ;;  %v4933_v63 = vadd.f32 %v14441_v17, %v14440_v38  ;;  %v14451_v45 = vld [vmem:[#allocation14_spill] sm:$0xff] }
 0x9f9   :  { %9168 = vmatprep.subr.bf16.mxu1 %v11391_v58  ;;  %10718 = vmatprep.subr.bf16.mxu0 %v11398_v0  ;;  %v11402_v58 = vld [vmem:[%s14328_s9 + $0x68] sm:$0xff]   ;;  %v14458_v38 = vld [vmem:[#allocation42_spill] sm:$0xff]  ;;  %v14459_v17 = vld [vmem:[#allocation25_spill] sm:$0xff] }
 0x9fa   :  { %11248 = vmatmul.mubr.msk.f32.vlgmr.msra.gmra.mxu0 %vm1618_vm2, %v8161_v50  ;;  %v14443_v50 = vld [vmem:[#allocation4_spill] sm:$0xff]  ;;  %v14457_v0 = vld [vmem:[#allocation15_spill] sm:$0xff] }
 0x9fb   :  { %10719 = vmatpush3.bf16.msra.mxu0 %v11399_v54 }
 0x9fc   :  { %9169 = vmatpush1.bf16.msra.mxu1 %v11389_v55  ;;  %10720 = vmatprep.subr.bf16.mxu0 %v11400_v16  ;;  %v4935_v55 = vadd.f32 %v14443_v50, %v14442_v48  ;;  %v14460_v48 = vld [vmem:[#allocation43_spill] sm:$0xff]  ;;  %v14461_v50 = vld [vmem:[#allocation26_spill] sm:$0xff] }
 0x9fd   :  { %9170 = vmatprep.subr.bf16.mxu1 %v11394_v29 }
 0x9ff   :  { %v6999_v30 = vpop.f32.mrf.mxu0  ;;  %10721 = vmatpush3.bf16.msra.mxu0 %v11401_v1 }
 0xa00   :  { %v13763_v28 = vadd.f32 %v6999_v30, %v4903_v59  ;;  %9171 = vmatpush1.bf16.msra.mxu1 %v11392_v5  ;;  %v11403_v59 = vld [vmem:[%s14328_s9 + $0x28] sm:$0xff]   ;;  %v14445_v30 = vld [vmem:[#allocation5_spill] sm:$0xff]  ;;  %10722 = vmatprep.subr.bf16.mxu0 %v11402_v58 }
 0xa01   :  { %v7001_v51 = vpop.f32.mrf.mxu0  ;;  %9172 = vmatprep.subr.bf16.mxu1 %v11397_v14  ;;  %v14444_v14 = vld [vmem:[#allocation35_spill] sm:$0xff] }
 0xa02   :  { %v13770_v49 = vadd.f32 %v7001_v51, %v4905_v46  ;;  %v4937_v46 = vadd.f32 %v14445_v30, %v14444_v14  ;;  %v14462_v14 = vld [vmem:[#allocation27_spill] sm:$0xff] }
 0xa03   :  { %v7003_v31 = vpop.f32.mrf.mxu0  ;;  %10723 = vmatpush3.bf16.msra.mxu0 %v11403_v59  ;;  %v4959_v30 = vadd.f32 %v14462_v14, %v13202_v62 }
 0xa04   :  { %v13774_v52 = vadd.f32 %v7003_v31, %v4907_v11  ;;  %9173 = vmatpush1.bf16.msra.mxu1 %v11395_v6  ;;  %v11404_v6 = vld [vmem:[%s14328_s9 + $0x60] sm:$0xff]  }
 0xa05   :  { %v7005_v41 = vpop.f32.mrf.mxu0  ;;  %v11405_v31 = vld [vmem:[%s14328_s9 + $0x20] sm:$0xff]   ;;  %10724 = vmatprep.subr.bf16.mxu0 %v11404_v6 }
 0xa06   :  { %v13776_v12 = vadd.f32 %v7005_v41, %v4909_v13  ;;  %v14446_v13 = vld [vmem:[#allocation36_spill] sm:$0xff]  ;;  %v14447_v41 = vld [vmem:[#allocation6_spill] sm:$0xff] }
 0xa07   :  { %10725 = vmatpush3.bf16.msra.mxu0 %v11405_v31 }
 0xa0b   :  { %v7009_v21 = vpop.f32.mrf.mxu0 }
 0xa0c   :  { %v13782_v20 = vadd.f32 %v7009_v21, %v4913_v57  ;;  %v4939_v57 = vadd.f32 %v14447_v41, %v14446_v13 }
 0xa0d   :  { %v7011_v18 = vpop.f32.mrf.mxu0 }
 0xa0e   :  { %v13786_v40 = vadd.f32 %v7011_v18, %v4915_v43  ;;  %v11406_v43 = vld [vmem:[%s14328_s9 + $0x58] sm:$0xff]  }
 0xa0f   :  { %v7013_v24 = vpop.f32.mrf.mxu0  ;;  %10726 = vmatprep.subr.bf16.mxu0 %v11406_v43 }
 0xa10   :  { %v13790_v37 = vadd.f32 %v7013_v24, %v4917_v39  ;;  %v14448_v39 = vld [vmem:[#allocation37_spill] sm:$0xff]  ;;  %v14449_v24 = vld [vmem:[#allocation10_spill] sm:$0xff]  ;;  %10727 = vmatpush3.bf16.msra.mxu0 %v11407_v22 }
 0xa11   :  { %v7015_v56 = vpop.f32.mrf.mxu0  ;;  %v4943_v10 = vadd.f32 %v14449_v24, %v14448_v39 }
 0xa12   :  { %v13792_v60 = vadd.f32 %v7015_v56, %v4919_v26  ;;  %v14450_v56 = vld [vmem:[#allocation38_spill] sm:$0xff] }
 0xa13   :  { %v4945_v53 = vadd.f32 %v14451_v45, %v14450_v56 }
 0xa3c   :  { %v7019_v2 = vpop.f32.mrf.mxu0 }
 0xa3d   :  { %v13798_v61 = vadd.f32 %v7019_v2, %v4923_v33 }
 0xa3e   :  { %v7021_v34 = vpop.f32.mrf.mxu0 }
 0xa3f   :  { %v13802_v35 = vadd.f32 %v7021_v34, %v4925_v8  ;;  %v14453_v8 = vld [vmem:[#allocation11_spill] sm:$0xff] }
 0xa40   :  { %v7023_v27 = vpop.f32.mrf.mxu0  ;;  %v4947_v34 = vadd.f32 %v14453_v8, %v14452_v9  ;;  %v11408_v8 = vld [vmem:[%s14328_s9 + $0x50] sm:$0xff]  }
 0xa41   :  { %v13806_v44 = vadd.f32 %v7023_v27, %v4927_v47  ;;  %v14454_v47 = vld [vmem:[#allocation40_spill] sm:$0xff]  ;;  %10728 = vmatprep.subr.bf16.mxu0 %v11408_v8 }
 0xa42   :  { %v7025_v42 = vpop.f32.mrf.mxu0  ;;  %v14455_v27 = vld [vmem:[#allocation20_spill] sm:$0xff] }
 0xa43   :  { %v13808_v36 = vadd.f32 %v7025_v42, %v4929_v4  ;;  %v4949_v23 = vadd.f32 %v14455_v27, %v14454_v47  ;;  %v14456_v42 = vld [vmem:[#allocation41_spill] sm:$0xff]  ;;  %v11409_v47 = vld [vmem:[%s14328_s9 + $0x10] sm:$0xff]  }
 0xa44   :  { %v4953_v54 = vadd.f32 %v14457_v0, %v14456_v42  ;;  %10729 = vmatpush3.bf16.msra.mxu0 %v11409_v47  ;;  %v11410_v42 = vld [vmem:[%s14328_s9 + $0x48] sm:$0xff]  }
 0xa45   :  { %10730 = vmatprep.subr.bf16.mxu0 %v11410_v42 }
 0xa4c   :  { %v7029_v3 = vpop.f32.mrf.mxu0 }
 0xa4d   :  { %v13829_v29 = vadd.f32 %v7029_v3, %v4933_v63  ;;  %v4955_v63 = vadd.f32 %v14459_v17, %v14458_v38 }
 0xa4e   :  { %v7031_v5 = vpop.f32.mrf.mxu0 }
 0xa4f   :  { %v13836_v51 = vadd.f32 %v7031_v5, %v4935_v55  ;;  %v4957_v55 = vadd.f32 %v14461_v50, %v14460_v48  ;;  %v11413_v48 = vld [vmem:[%s14328_s9] sm:$0xff]  }
 0xa50   :  { %v7033_v11 = vpop.f32.mrf.mxu0 }
 0xa51   :  { %v13846_v21 = vadd.f32 %v7033_v11, %v4937_v46 }
 0xa52   :  { %v7035_v18 = vpop.f32.mrf.mxu0 }
 0xa53   :  { %v13853_v19 = vadd.f32 %v7035_v18, %v4939_v57 }
 0xa54   :  { %v7039_v26 = vpop.f32.mrf.mxu0 }
 0xa55   :  { %v13857_v33 = vadd.f32 %v7039_v26, %v4943_v10 }
 0xa56   :  { %v7041_v2 = vpop.f32.mrf.mxu0 }
 0xa57   :  { %v13864_v25 = vadd.f32 %v7041_v2, %v4945_v53 }
 0xa58   :  { %v7043_v32 = vpop.f32.mrf.mxu0 }
 0xa59   :  { %v13868_v15 = vadd.f32 %v7043_v32, %v4947_v34 }
 0xa5a   :  { %v7045_v4 = vpop.f32.mrf.mxu0 }
 0xa5b   :  { %v13872_v16 = vadd.f32 %v7045_v4, %v4949_v23 }
 0xa5c   :  { %v7049_v1 = vpop.f32.mrf.mxu0 }
 0xa5d   :  { %v13876_v58 = vadd.f32 %v7049_v1, %v4953_v54  ;;  %v11411_v1 = vld [vmem:[%s14328_s9 + $0x8] sm:$0xff]  }
 0xa5e   :  { %v7051_v3 = vpop.f32.mrf.mxu0  ;;  %10731 = vmatpush3.bf16.msra.mxu0 %v11411_v1 }
 0xa5f   :  { %v13880_v5 = vadd.f32 %v7051_v3, %v4955_v63  ;;  %v11412_v63 = vld [vmem:[%s14328_s9 + $0x40] sm:$0xff]  }
 0xa60   :  { %v7053_v59 = vpop.f32.mrf.mxu0  ;;  %10732 = vmatprep.subr.bf16.mxu0 %v11412_v63 }
 0xa61   :  { %v13884_v46 = vadd.f32 %v7053_v59, %v4957_v55 }
 0xa62   :  { %v7055_v6 = vpop.f32.mrf.mxu0  ;;  %10733 = vmatpush3.bf16.msra.mxu0 %v11413_v48 }
 0xa63   :  { %v13886_v11 = vadd.f32 %v7055_v6, %v4959_v30  ;;  %v9275_v6 = vld [vmem:[%s14329_s8] sm:$0x3] }
 0xa69   :  { %v8235_v31 = vpop.f32.mrf.mxu1 }
 0xa6b   :  { %v11194_v13 = vpop.f32.mrf.mxu1 }
 0xa6d   :  { %v8312_v41 = vpop.f32.mrf.mxu1 }
 0xa6e   :  { %v9086_v57 = vpack.c.bf16 %v8312_v41, %v8235_v31  ;;  %v14463_v41 = vld [vmem:[#allocation7_spill] sm:$0xff] }
 0xa6f   :  { %v11199_v43 = vpop.f32.mrf.mxu1 }
 0xa70   :  { %10502 = vmatmul.mubr.msk.bf16.vlgmr.msra.gmra.mxu1 %vm693_vm1, %v9086_v57  ;;  %v13922_v57 = vrot.slane %v9275_v6, %v14463_v41 }
 0xa71   :  { %v8389_v18 = vpop.f32.mrf.mxu1  ;;  %9200 = vmatprep.mubr.bf16.mxu1 %v14370_v7 }
 0xa73   :  { %v11204_v39 = vpop.f32.mrf.mxu1 }
 0xa75   :  { %v8466_v24 = vpop.f32.mrf.mxu0 }
 0xa76   :  { %v9087_v10 = vpack.c.bf16 %v8466_v24, %v8389_v18 }
 0xa77   :  { %v11209_v26 = vpop.f32.mrf.mxu0 }
 0xa78   :  { %10503 = vmatmul.mubr.msk.bf16.gmra.mxu1 %vm693_vm1, %v9087_v10 }
 0xa79   :  { %v8543_v62 = vpop.f32.mrf.mxu1  ;;  %9210 = vmatprep.mubr.bf16.mxu1 %v14370_v7 }
 0xa7b   :  { %v11214_v56 = vpop.f32.mrf.mxu1 }
 0xaaa   :  { %v8620_v45 = vpop.f32.mrf.mxu0 }
 0xaab   :  { %v9088_v53 = vpack.c.bf16 %v8620_v45, %v8543_v62 }
 0xaac   :  { %v11219_v2 = vpop.f32.mrf.mxu0 }
 0xaad   :  { %10504 = vmatmul.mubr.msk.bf16.gmra.mxu1 %vm693_vm1, %v9088_v53 }
 0xaae   :  { %9220 = vmatprep.mubr.bf16.mxu1 %v14370_v7  ;;  %v8697_v22 = vpop.f32.mrf.mxu1 }
 0xab0   :  { %v11224_v9 = vpop.f32.mrf.mxu1 }
 0xab2   :  { %v8774_v34 = vpop.f32.mrf.mxu0  ;;  %v8851_v32 = vpop.f32.mrf.mxu1 }
 0xab3   :  { %v9089_v27 = vpack.c.bf16 %v8774_v34, %v8697_v22 }
 0xab4   :  { %v11229_v23 = vpop.f32.mrf.mxu0  ;;  %v11234_v4 = vpop.f32.mrf.mxu1 }
 0xab5   :  { %10505 = vmatmul.mubr.msk.bf16.gmra.mxu1 %vm693_vm1, %v9089_v27 }
 0xab6   :  { %v8928_v0 = vpop.f32.mrf.mxu0  ;;  %v9005_v54 = vpop.f32.mrf.mxu1  ;;  %9230 = vmatprep.mubr.bf16.mxu1 %v14370_v7 }
 0xab7   :  { %v9090_v50 = vpack.c.bf16 %v8928_v0, %v8851_v32 }
 0xab8   :  { %v11239_v38 = vpop.f32.mrf.mxu0  ;;  %v11244_v17 = vpop.f32.mrf.mxu1 }
 0xaba   :  { %v9082_v3 = vpop.f32.mrf.mxu0 }
 0xabb   :  { %v9091_v59 = vpack.c.bf16 %v9082_v3, %v9005_v54 }
 0xabc   :  { %v11249_v55 = vpop.f32.mrf.mxu0 }
 0xabd   :  { %10506 = vmatmul.mubr.msk.bf16.gmra.mxu1 %vm693_vm1, %v9090_v50 }
 0xabe   :  { %9240 = vmatprep.mubr.bf16.mxu1 %v14370_v7  ;;  %v14464_v7 = vld [vmem:[#allocation3_spill] sm:$0xff] }
 0xabf   :  { %v13927_v39 = vrot.slane %v9275_v6, %v14464_v7 }
 0xac5   :  { %10507 = vmatmul.mubr.msk.bf16.gmra.mxu1 %vm693_vm1, %v9091_v59 }
 0xb30   :  { %v9192_v14 = vpop.f32.mrf.mxu1 }
 0xb31   :  { %v9251_v18 = vadd.f32 %v9192_v14, %v13763_v28 }
 0xb32   :  { %v9194_v30 = vpop.f32.mrf.mxu1 }
 0xb33   :  { %v9252_v13 = vadd.f32 %v9194_v30, %v13770_v49 }
 0xb34   :  { %v9196_v31 = vpop.f32.mrf.mxu1 }
 0xb35   :  { %v9253_v43 = vadd.f32 %v9196_v31, %v13774_v52  ;;  %v13934_v56 = vadd.f32 %v13922_v57, %v9252_v13  ;;  %v13940_v52 = vadd.f32 %v13927_v39, %v9251_v18 }
 0xb36   :  { %v9198_v24 = vpop.f32.mrf.mxu1 }
 0xb37   :  { %v9254_v10 = vadd.f32 %v9198_v24, %v13776_v12  ;;  %v13931_v26 = vadd.f32 %v13927_v39, %v9253_v43 }
 0xb38   :  { %v9202_v62 = vpop.f32.mrf.mxu1 }
 0xb39   :  { %v13937_v49 = vadd.f32 %v13922_v57, %v9254_v10  ;;  %v9311_v12 = vpack.c.bf16 %v13931_v26, %v13940_v52  ;;  %v9255_v9 = vadd.f32 %v9202_v62, %v13782_v20 }
 0xb3a   :  { %v9204_v28 = vpop.f32.mrf.mxu1 }
 0xb3b   :  { %v9312_v45 = vpack.c.bf16 %v13937_v49, %v13934_v56  ;;  %v9256_v2 = vadd.f32 %v9204_v28, %v13786_v40  ;;  %v13960_v40 = vadd.f32 %v13927_v39, %v9255_v9 }
 0xb3c   :  { %v9206_v53 = vpop.f32.mrf.mxu1 }
 0xb3d   :  { %v9257_v22 = vadd.f32 %v9206_v53, %v13790_v37  ;;  %9490 = vmatprep.mubr.bf16.mxu0 %v9312_v45  ;;  %v13954_v47 = vadd.f32 %v13922_v57, %v9256_v2 }
 0xb3e   :  { %v9208_v8 = vpop.f32.mrf.mxu1  ;;  %9491 = vmatmul.mubr.bf16.vlgmr.msra.gmra.mxu0 %v9311_v12 }
 0xb3f   :  { %v9258_v34 = vadd.f32 %v9208_v8, %v13792_v60  ;;  %v13951_v32 = vadd.f32 %v13927_v39, %v9257_v22 }
 0xb41   :  { %v13957_v27 = vadd.f32 %v13922_v57, %v9258_v34  ;;  %v9313_v20 = vpack.c.bf16 %v13951_v32, %v13960_v40 }
 0xb43   :  { %v9314_v37 = vpack.c.bf16 %v13957_v27, %v13954_v47 }
 0xb45   :  { %9498 = vmatprep.mubr.bf16.mxu0 %v9314_v37 }
 0xb46   :  { %9499 = vmatmul.mubr.bf16.gmra.mxu0 %v9313_v20 }
 0xb6d   :  { %v9212_v60 = vpop.f32.mrf.mxu1 }
 0xb6e   :  { %v9259_v54 = vadd.f32 %v9212_v60, %v13798_v61 }
 0xb6f   :  { %v9214_v23 = vpop.f32.mrf.mxu1 }
 0xb70   :  { %v9260_v42 = vadd.f32 %v9214_v23, %v13802_v35  ;;  %v13980_v50 = vadd.f32 %v13927_v39, %v9259_v54  ;;  %v14049_v54 = vld [vmem:[%s14330_s10] ss:$0 sm:$0xff] }
 0xb71   :  { %v9216_v4 = vpop.f32.mrf.mxu1 }
 0xb72   :  { %v9261_v0 = vadd.f32 %v9216_v4, %v13806_v44  ;;  %v13974_v63 = vadd.f32 %v13922_v57, %v9260_v42 }
 0xb73   :  { %v9218_v1 = vpop.f32.mrf.mxu1 }
 0xb74   :  { %v9262_v38 = vadd.f32 %v9218_v1, %v13808_v36  ;;  %v13971_v17 = vadd.f32 %v13927_v39, %v9261_v0 }
 0xb75   :  { %v9222_v48 = vpop.f32.mrf.mxu1 }
 0xb76   :  { %v13977_v3 = vadd.f32 %v13922_v57, %v9262_v38  ;;  %v9315_v44 = vpack.c.bf16 %v13971_v17, %v13980_v50  ;;  %v9263_v14 = vadd.f32 %v9222_v48, %v13829_v29 }
 0xb77   :  { %v9224_v35 = vpop.f32.mrf.mxu1 }
 0xb78   :  { %v9316_v61 = vpack.c.bf16 %v13977_v3, %v13974_v63  ;;  %v9264_v55 = vadd.f32 %v9224_v35, %v13836_v51  ;;  %v14000_v51 = vadd.f32 %v13927_v39, %v9263_v14 }
 0xb79   :  { %v9226_v36 = vpop.f32.mrf.mxu1 }
 0xb7a   :  { %9506 = vmatprep.mubr.bf16.mxu0 %v9316_v61  ;;  %v9265_v59 = vadd.f32 %v9226_v36, %v13846_v21  ;;  %v13994_v43 = vadd.f32 %v13922_v57, %v9264_v55 }
 0xb7b   :  { %9507 = vmatmul.mubr.bf16.gmra.mxu0 %v9315_v44  ;;  %v9228_v30 = vpop.f32.mrf.mxu1 }
 0xb7c   :  { %v9266_v6 = vadd.f32 %v9228_v30, %v13853_v19  ;;  %v13991_v31 = vadd.f32 %v13927_v39, %v9265_v59 }
 0xb7d   :  { %v9232_v13 = vpop.f32.mrf.mxu1 }
 0xb7e   :  { %v13997_v18 = vadd.f32 %v13922_v57, %v9266_v6  ;;  %v9317_v19 = vpack.c.bf16 %v13991_v31, %v14000_v51  ;;  %v9267_v28 = vadd.f32 %v9232_v13, %v13857_v33 }
 0xb7f   :  { %v9234_v21 = vpop.f32.mrf.mxu1 }
 0xb80   :  { %v9318_v29 = vpack.c.bf16 %v13997_v18, %v13994_v43  ;;  %v9268_v10 = vadd.f32 %v9234_v21, %v13864_v25  ;;  %v14020_v25 = vadd.f32 %v13927_v39, %v9267_v28  ;;  %v14058_v21 = vld [vmem:[%s14331_s11] ss:$0 sm:$0xff] }
 0xb81   :  { %v9236_v24 = vpop.f32.mrf.mxu1 }
 0xb82   :  { %v9269_v62 = vadd.f32 %v9236_v24, %v13868_v15  ;;  %9514 = vmatprep.mubr.bf16.mxu0 %v9318_v29  ;;  %v14014_v22 = vadd.f32 %v13922_v57, %v9268_v10 }
 0xb83   :  { %v9238_v45 = vpop.f32.mrf.mxu1  ;;  %9515 = vmatmul.mubr.bf16.gmra.mxu0 %v9317_v19 }
 0xb84   :  { %v9270_v12 = vadd.f32 %v9238_v45, %v13872_v16  ;;  %v14011_v53 = vadd.f32 %v13927_v39, %v9269_v62 }
 0xb85   :  { %v9242_v2 = vpop.f32.mrf.mxu1 }
 0xb86   :  { %v14017_v9 = vadd.f32 %v13922_v57, %v9270_v12  ;;  %v9319_v16 = vpack.c.bf16 %v14011_v53, %v14020_v25  ;;  %v9271_v20 = vadd.f32 %v9242_v2, %v13876_v58 }
 0xb87   :  { %v9244_v15 = vpop.f32.mrf.mxu1 }
 0xb88   :  { %v9320_v33 = vpack.c.bf16 %v14017_v9, %v14014_v22  ;;  %v9272_v34 = vadd.f32 %v9244_v15, %v13880_v5  ;;  %v14040_v5 = vadd.f32 %v13927_v39, %v9271_v20 }
 0xb89   :  { %v9246_v8 = vpop.f32.mrf.mxu1 }
 0xb8a   :  { %v9273_v37 = vadd.f32 %v9246_v8, %v13884_v46  ;;  %9522 = vmatprep.mubr.bf16.mxu0 %v9320_v33  ;;  %v14034_v42 = vadd.f32 %v13922_v57, %v9272_v34 }
 0xb8b   :  { %v9248_v60 = vpop.f32.mrf.mxu1  ;;  %9523 = vmatmul.mubr.bf16.gmra.mxu0 %v9319_v16 }
 0xb8c   :  { %v9274_v23 = vadd.f32 %v9248_v60, %v13886_v11  ;;  %v14031_v4 = vadd.f32 %v13927_v39, %v9273_v37 }
 0xb8e   :  { %v14037_v0 = vadd.f32 %v13922_v57, %v9274_v23  ;;  %v9321_v58 = vpack.c.bf16 %v14031_v4, %v14040_v5 }
 0xb90   :  { %v9322_v46 = vpack.c.bf16 %v14037_v0, %v14034_v42 }
 0xb92   :  { %9530 = vmatprep.mubr.bf16.mxu0 %v9322_v46 }
 0xb93   :  { %9531 = vmatmul.mubr.bf16.gmra.mxu0 %v9321_v58 }
 0xbfe   :  { %v10734_v11 = vpop.f32.mrf.mxu0 }
 0xc00   :  { %v10735_v1 = vpop.f32.mrf.mxu0 }
 0xc01   :  { %v10736_v57 = vadd.f32 %v10735_v1, %v10734_v11 }
 0xc02   :  { %v10737_v38 = vpop.f32.mrf.mxu0 }
 0xc03   :  { %v9493_v39 = vadd.f32 %v10736_v57, %v14049_v54 }
 0xc04   :  { %v10738_v48 = vpop.f32.mrf.mxu0 }
 0xc05   :  { %11606 = vtanh.f32 %v9493_v39  ;;  %v10739_v35 = vadd.f32 %v10738_v48, %v10737_v38 }
 0xc06   :  { %v10740_v61 = vpop.f32.mrf.mxu0 }
 0xc07   :  { %v9496_v44 = vadd.f32 %v10739_v35, %v14049_v54 }
 0xc08   :  { %v10741_v36 = vpop.f32.mrf.mxu0 }
 0xc09   :  { %11608 = vtanh.f32 %v9496_v44  ;;  %v10742_v55 = vadd.f32 %v10741_v36, %v10740_v61 }
 0xc0a   :  { %v10743_v59 = vpop.f32.mrf.mxu0 }
 0xc0b   :  { %v9501_v14 = vadd.f32 %v10742_v55, %v14049_v54 }
 0xc0c   :  { %v10744_v30 = vpop.f32.mrf.mxu0 }
 0xc0d   :  { %11610 = vtanh.f32 %v9501_v14  ;;  %v10745_v6 = vadd.f32 %v10744_v30, %v10743_v59 }
 0xc0f   :  { %v9504_v13 = vadd.f32 %v10745_v6, %v14049_v54 }
 0xc11   :  { %11612 = vtanh.f32 %v9504_v13 }
 0xc12   :  { %v11607_v29 = vpop.eup %11606 }
 0xc13   :  { %v9558_v19 = vmul.f32 %v11607_v29, %v14058_v21 }
 0xc15   :  { %9570 = vadd.xlane.f32.xlu0 %v9558_v19 }
 0xc16   :  { %v11609_v24 = vpop.eup %11608 }
 0xc17   :  { %v9559_v10 = vmul.f32 %v11609_v24, %v14058_v21 }
 0xc19   :  { %9572 = vadd.xlane.f32.xlu1 %v9559_v10 }
 0xc1a   :  { %v11611_v62 = vpop.eup %11610 }
 0xc1b   :  { %v9560_v28 = vmul.f32 %v11611_v62, %v14058_v21 }
 0xc1d   :  { %9574 = vadd.xlane.f32.xlu0 %v9560_v28 }
 0xc1e   :  { %v11613_v45 = vpop.eup %11612 }
 0xc1f   :  { %v9561_v12 = vmul.f32 %v11613_v45, %v14058_v21 }
 0xc21   :  { %9576 = vadd.xlane.f32.xlu0 %v9561_v12 }
 0xc3b   :  { %v10746_v2 = vpop.f32.mrf.mxu0 }
 0xc3d   :  { %v10747_v15 = vpop.f32.mrf.mxu0 }
 0xc3e   :  { %v10748_v33 = vadd.f32 %v10747_v15, %v10746_v2 }
 0xc3f   :  { %v10749_v16 = vpop.f32.mrf.mxu0 }
 0xc40   :  { %v9509_v8 = vadd.f32 %v10748_v33, %v14049_v54 }
 0xc41   :  { %v10750_v34 = vpop.f32.mrf.mxu0 }
 0xc42   :  { %11614 = vtanh.f32 %v9509_v8  ;;  %v10751_v37 = vadd.f32 %v10750_v34, %v10749_v16 }
 0xc43   :  { %v10752_v60 = vpop.f32.mrf.mxu0 }
 0xc44   :  { %v9512_v20 = vadd.f32 %v10751_v37, %v14049_v54 }
 0xc45   :  { %v10753_v23 = vpop.f32.mrf.mxu0 }
 0xc46   :  { %11616 = vtanh.f32 %v9512_v20  ;;  %v10754_v46 = vadd.f32 %v10753_v23, %v10752_v60 }
 0xc47   :  { %v10755_v58 = vpop.f32.mrf.mxu0 }
 0xc48   :  { %v9517_v11 = vadd.f32 %v10754_v46, %v14049_v54 }
 0xc49   :  { %v10756_v1 = vpop.f32.mrf.mxu0 }
 0xc4a   :  { %11618 = vtanh.f32 %v9517_v11  ;;  %v10757_v57 = vadd.f32 %v10756_v1, %v10755_v58  ;;  %v14465_v1 = vlaneseq }
 0xc4b   :  { %v10758_v38 = vpop.f32.mrf.mxu0 }
 0xc4c   :  { %v9520_v39 = vadd.f32 %v10757_v57, %v14049_v54  ;;  %v9607_v57 = vand.u32 127, %v14465_v1 }
 0xc4d   :  { %v10759_v48 = vpop.f32.mrf.mxu0 }
 0xc4e   :  { %11620 = vtanh.f32 %v9520_v39  ;;  %v10760_v61 = vadd.f32 %v10759_v48, %v10758_v38  ;;  %v14466_v48 = vld [vmem:[#allocation2_spill] sm:$0xff] }
 0xc4f   :  { %v11615_v35 = vpop.eup %11614  ;;  %v10761_v44 = vpop.f32.mrf.mxu0 }
 0xc50   :  { %v9562_v36 = vmul.f32 %v11615_v35, %v14058_v21  ;;  %v9525_v55 = vadd.f32 %v10760_v61, %v14049_v54  ;;  %v14082_v35 = vsub.s32 %v9607_v57, %v14466_v48 }
 0xc51   :  { %v10762_v59 = vpop.f32.mrf.mxu0 }
 0xc52   :  { %9578 = vadd.xlane.f32.xlu0 %v9562_v36  ;;  %11622 = vtanh.f32 %v9525_v55  ;;  %v10763_v30 = vadd.f32 %v10762_v59, %v10761_v44 }
 0xc53   :  { %v11617_v14 = vpop.eup %11616  ;;  %v10764_v6 = vpop.f32.mrf.mxu0 }
 0xc54   :  { %v9563_v13 = vmul.f32 %v11617_v14, %v14058_v21  ;;  %v9528_v29 = vadd.f32 %v10763_v30, %v14049_v54 }
 0xc55   :  { %v10765_v19 = vpop.f32.mrf.mxu0 }
 0xc56   :  { %9580 = vadd.xlane.f32.xlu1 %v9563_v13  ;;  %11624 = vtanh.f32 %v9528_v29  ;;  %v10766_v24 = vadd.f32 %v10765_v19, %v10764_v6 }
 0xc57   :  { %v11619_v10 = vpop.eup %11618  ;;  %v10767_v62 = vpop.f32.mrf.mxu0 }
 0xc58   :  { %v9533_v28 = vadd.f32 %v10766_v24, %v14049_v54  ;;  %v9564_v45 = vmul.f32 %v11619_v10, %v14058_v21 }
 0xc59   :  { %v10768_v12 = vpop.f32.mrf.mxu0 }
 0xc5a   :  { %11626 = vtanh.f32 %v9533_v28  ;;  %v10769_v2 = vadd.f32 %v10768_v12, %v10767_v62  ;;  %9582 = vadd.xlane.f32.xlu0 %v9564_v45 }
 0xc5b   :  { %v11621_v15 = vpop.eup %11620 }
 0xc5c   :  { %v9536_v33 = vadd.f32 %v10769_v2, %v14049_v54  ;;  %v9565_v16 = vmul.f32 %v11621_v15, %v14058_v21 }
 0xc5e   :  { %11628 = vtanh.f32 %v9536_v33  ;;  %9584 = vadd.xlane.f32.xlu1 %v9565_v16 }
 0xc5f   :  { %v11623_v8 = vpop.eup %11622 }
 0xc60   :  { %v9566_v34 = vmul.f32 %v11623_v8, %v14058_v21 }
 0xc62   :  { %9586 = vadd.xlane.f32.xlu0 %v9566_v34 }
 0xc63   :  { %v11625_v37 = vpop.eup %11624 }
 0xc64   :  { %v9567_v20 = vmul.f32 %v11625_v37, %v14058_v21 }
 0xc66   :  { %9588 = vadd.xlane.f32.xlu1 %v9567_v20 }
 0xc67   :  { %v11627_v60 = vpop.eup %11626 }
 0xc68   :  { %v9568_v23 = vmul.f32 %v11627_v60, %v14058_v21 }
 0xc6a   :  { %9590 = vadd.xlane.f32.xlu0 %v9568_v23 }
 0xc6b   :  { %v11629_v46 = vpop.eup %11628 }
 0xc6c   :  { %v9569_v58 = vmul.f32 %v11629_v46, %v14058_v21 }
 0xc6e   :  { %9592 = vadd.xlane.f32.xlu1 %v9569_v58 }
 0xc9e   :  { %v9571_v54 = vpop.xlane.xlu0 %9570 }
 0xc9f   :  { %v9611_v21 = vrot.slane %v9571_v54, %v14082_v35 }
 0xca2   :  { %v9573_v39 = vpop.xlane.xlu1 %9572 }
 0xca3   :  { %v9615_v44 = vrot.slane %v9573_v39, %v14082_v35 }
 0xca5   :  { %v9657_v6 = vsel %vm9656_vm3, %v9615_v44, %v9611_v21  ;;  %v14127_v44 = vsub.s32 2, %v14466_v48 }
 0xca6   :  { %v9575_v11 = vpop.xlane.xlu0 %9574 }
 0xca7   :  { %v9619_v36 = vrot.slane %v9575_v11, %v14082_v35 }
 0xca9   :  { %v9659_v29 = vsel %vm9658_vm4, %v9619_v36, %v9657_v6 }
 0xcaa   :  { %v9577_v38 = vpop.xlane.xlu0 %9576 }
 0xcab   :  { %v9623_v59 = vrot.slane %v9577_v38, %v14082_v35 }
 0xcad   :  { %v9661_v24 = vsel %vm9660_vm5, %v9623_v59, %v9659_v29 }
 0xcdb   :  { %v14084_v61 = vpop.xlane.xlu0 %9578 }
 0xcdc   :  { %v9627_v14 = vrot.slane %v14084_v61, %v14082_v35 }
 0xcde   :  { %v9663_v10 = vsel %vm9662_vm6, %v9627_v14, %v9661_v24  ;;  %v14132_v14 = vsub.s32 3, %v14466_v48 }
 0xcdf   :  { %v14088_v55 = vpop.xlane.xlu1 %9580 }
 0xce0   :  { %v9631_v13 = vrot.slane %v14088_v55, %v14082_v35 }
 0xce2   :  { %v9665_v28 = vsel %vm9664_vm7, %v9631_v13, %v9663_v10 }
 0xce3   :  { %v14094_v30 = vpop.xlane.xlu0 %9582 }
 0xce4   :  { %v9635_v19 = vrot.slane %v14094_v30, %v14082_v35 }
 0xce6   :  { %v9667_v12 = vsel %vm9666_vm8, %v9635_v19, %v9665_v28  ;;  %v9702_v19 = vsub.s32 4, %v14466_v48 }
 0xce7   :  { %v14104_v62 = vpop.xlane.xlu1 %9584 }
 0xce8   :  { %v9639_v45 = vrot.slane %v14104_v62, %v14082_v35 }
 0xcea   :  { %v9669_v2 = vsel %vm9668_vm9, %v9639_v45, %v9667_v12  ;;  %v9706_v12 = vsub.s32 5, %v14466_v48 }
 0xceb   :  { %v9675_v15 = vsel %vm1618_vm2, %v9669_v2, -inf  ;;  %v14112_v33 = vpop.xlane.xlu0 %9586 }
 0xcec   :  { %9676 = vmax.xlane.f32.xlu0 %v9675_v15  ;;  %v9643_v20 = vrot.slane %v14112_v33, %v14082_v35 }
 0xcef   :  { %v9589_v16 = vpop.xlane.xlu1 %9588 }
 0xcf0   :  { %v9647_v34 = vrot.slane %v9589_v16, %v14082_v35 }
 0xcf2   :  { %v9670_v23 = vsel %vm9656_vm3, %v9647_v34, %v9643_v20 }
 0xcf3   :  { %v14114_v8 = vpop.xlane.xlu0 %9590 }
 0xcf4   :  { %v9651_v37 = vrot.slane %v14114_v8, %v14082_v35 }
 0xcf6   :  { %v9671_v58 = vsel %vm9658_vm4, %v9651_v37, %v9670_v23  ;;  %v9710_v37 = vsub.s32 6, %v14466_v48 }
 0xcf7   :  { %v9593_v60 = vpop.xlane.xlu1 %9592 }
 0xcf8   :  { %v9655_v46 = vrot.slane %v9593_v60, %v14082_v35 }
 0xcfa   :  { %v9672_v1 = vsel %vm9660_vm5, %v9655_v46, %v9671_v58 }
 0xcfb   :  { %v9679_v57 = vsel %vm9678_vm10, %v9672_v1, -inf }
 0xcfc   :  { %9680 = vmax.xlane.f32.xlu1 %v9679_v57 }
 0xd75   :  { %v9677_v36 = vpop.xlane.xlu0 %9676 }
 0xd76   :  { %v9687_v21 = vrot.slane %v9677_v36, %v14464_v7  ;;  %v9691_v59 = vrot.slane %v9677_v36, %v14463_v41  ;;  %v9695_v6 = vrot.slane %v9677_v36, %v14127_v44  ;;  %v9699_v28 = vrot.slane %v9677_v36, %v14132_v14 }
 0xd77   :  { %v9703_v2 = vrot.slane %v9677_v36, %v9702_v19  ;;  %v9711_v23 = vrot.slane %v9677_v36, %v9710_v37 }
 0xd78   :  { %v9744_v13 = vsub.f32 %v9571_v54, %v9687_v21  ;;  %v9745_v29 = vsub.f32 %v9573_v39, %v9691_v59  ;;  %v9746_v45 = vsub.f32 %v9575_v11, %v9695_v6  ;;  %v9747_v15 = vsub.f32 %v9577_v38, %v9699_v28 }
 0xd79   :  { %v9707_v54 = vrot.slane %v9677_v36, %v9706_v12  ;;  %v9748_v39 = vsub.f32 %v14084_v61, %v9703_v2  ;;  %v9714_v11 = vsub.s32 7, %v14466_v48 }
 0xd7a   :  { %v9756_v24 = vmul.f32 1.442695, %v9744_v13  ;;  %v9758_v10 = vmul.f32 1.442695, %v9745_v29  ;;  %v9760_v34 = vmul.f32 1.442695, %v9746_v45  ;;  %v9750_v29 = vsub.f32 %v14094_v30, %v9711_v23 }
 0xd7b   :  { %v9762_v20 = vmul.f32 1.442695, %v9747_v15  ;;  %v9749_v46 = vsub.f32 %v14088_v55, %v9707_v54  ;;  %v9764_v1 = vmul.f32 1.442695, %v9748_v39  ;;  %v9715_v61 = vrot.slane %v9677_v36, %v9714_v11 }
 0xd7c   :  { %11630 = vpow2.f32 %v9756_v24  ;;  %v9768_v28 = vmul.f32 1.442695, %v9750_v29 }
 0xd7d   :  { %11632 = vpow2.f32 %v9758_v10  ;;  %v9766_v55 = vmul.f32 1.442695, %v9749_v46 }
 0xd7e   :  { %11634 = vpow2.f32 %v9760_v34 }
 0xd7f   :  { %11636 = vpow2.f32 %v9762_v20 }
 0xd80   :  { %11638 = vpow2.f32 %v9764_v1 }
 0xd85   :  { %v9681_v58 = vpop.xlane.xlu1 %9680 }
 0xd86   :  { %v9723_v38 = vrot.slane %v9681_v58, %v14463_v41  ;;  %v9731_v57 = vrot.slane %v9681_v58, %v14132_v14  ;;  %v9719_v36 = vrot.slane %v9681_v58, %v14464_v7  ;;  %v9727_v45 = vrot.slane %v9681_v58, %v14127_v44 }
 0xd88   :  { %v9753_v21 = vsub.f32 %v9589_v16, %v9723_v38  ;;  %v9755_v6 = vsub.f32 %v9593_v60, %v9731_v57  ;;  %v9751_v16 = vsub.f32 %v14104_v62, %v9715_v61  ;;  %v9752_v2 = vsub.f32 %v14112_v33, %v9719_v36 }
 0xd89   :  { %v14150_v59 = vpop.eup %11630  ;;  %v9754_v62 = vsub.f32 %v14114_v8, %v9727_v45 }
 0xd8a   :  { %v14154_v13 = vpop.eup %11632  ;;  %v9774_v24 = vmul.f32 1.442695, %v9753_v21  ;;  %9793 = vperm.xlu0 %11270, %v14150_v59   ;;  %v9778_v10 = vmul.f32 1.442695, %v9755_v6  ;;  %v9770_v30 = vmul.f32 1.442695, %v9751_v16 }
 0xd8b   :  { %9796 = vperm.xlu1 %11271, %v14154_v13   ;;  %v14161_v60 = vpop.eup %11634  ;;  %v9772_v34 = vmul.f32 1.442695, %v9752_v2  ;;  %v9776_v20 = vmul.f32 1.442695, %v9754_v62 }
 0xd8c   :  { %11640 = vpow2.f32 %v9774_v24  ;;  %v14166_v15 = vpop.eup %11636 }
 0xd8d   :  { %11642 = vpow2.f32 %v9766_v55  ;;  %v14170_v54 = vpop.eup %11638 }
 0xd8e   :  { %11644 = vpow2.f32 %v9778_v10 }
 0xd8f   :  { %9799 = vperm.xlu1 %11271, %v14161_v60   ;;  %11646 = vpow2.f32 %v9768_v28 }
 0xd90   :  { %11648 = vpow2.f32 %v9770_v30 }
 0xd91   :  { %11650 = vpow2.f32 %v9772_v34 }
 0xd92   :  { %11652 = vpow2.f32 %v9776_v20 }
 0xd93   :  { %9802 = vperm.xlu1 %11271, %v14166_v15  }
 0xd97   :  { %9805 = vperm.xlu1 %11271, %v14170_v54  }
 0xd99   :  { %v14173_v39 = vpop.eup %11640 }
 0xd9a   :  { %v14175_v23 = vpop.eup %11642  ;;  %9820 = vperm.xlu0 %11270, %v14173_v39  }
 0xd9b   :  { %9808 = vperm.xlu1 %11271, %v14175_v23   ;;  %v14179_v33 = vpop.eup %11644 }
 0xd9c   :  { %v14181_v46 = vpop.eup %11646 }
 0xd9d   :  { %v14185_v8 = vpop.eup %11648 }
 0xd9e   :  { %9826 = vperm.xlu0 %11270, %v14179_v33   ;;  %v14188_v58 = vpop.eup %11650 }
 0xd9f   :  { %9811 = vperm.xlu1 %11271, %v14181_v46   ;;  %v14191_v1 = vpop.eup %11652 }
 0xda3   :  { %9814 = vperm.xlu1 %11271, %v14185_v8  }
 0xda7   :  { %9817 = vperm.xlu1 %11271, %v14188_v58  }
 0xdab   :  { %9823 = vperm.xlu1 %11271, %v14191_v1  }
 0xe05   :  { %v9794_v6 = vpop.permute.xlu0 %9793 }
 0xe06   :  { %v9797_v38 = vpop.permute.xlu1 %9796  ;;  %v9831_v24 = vrot.slane %v9794_v6, %v14082_v35 }
 0xe07   :  { %v9835_v55 = vrot.slane %v9797_v38, %v14082_v35 }
 0xe09   :  { %v9876_v30 = vsel %vm9656_vm3, %v9835_v55, %v9831_v24 }
 0xe0a   :  { %v9800_v57 = vpop.permute.xlu1 %9799 }
 0xe0b   :  { %v9839_v10 = vrot.slane %v9800_v57, %v14082_v35 }
 0xe0d   :  { %v9877_v2 = vsel %vm9658_vm4, %v9839_v10, %v9876_v30 }
 0xe0e   :  { %v9803_v21 = vpop.permute.xlu1 %9802 }
 0xe0f   :  { %v9843_v16 = vrot.slane %v9803_v21, %v14082_v35 }
 0xe11   :  { %v9878_v34 = vsel %vm9660_vm5, %v9843_v16, %v9877_v2 }
 0xe12   :  { %v9806_v61 = vpop.permute.xlu1 %9805 }
 0xe13   :  { %v9847_v28 = vrot.slane %v9806_v61, %v14082_v35 }
 0xe15   :  { %v9879_v20 = vsel %vm9662_vm6, %v9847_v28, %v9878_v34  ;;  %v9821_v6 = vpop.permute.xlu0 %9820 }
 0xe16   :  { %v9809_v29 = vpop.permute.xlu1 %9808  ;;  %v9867_v16 = vrot.slane %v9821_v6, %v14082_v35 }
 0xe17   :  { %v9851_v45 = vrot.slane %v9809_v29, %v14082_v35 }
 0xe19   :  { %v9880_v57 = vsel %vm9664_vm7, %v9851_v45, %v9879_v20 }
 0xe1a   :  { %v9812_v36 = vpop.permute.xlu1 %9811 }
 0xe1b   :  { %v9855_v62 = vrot.slane %v9812_v36, %v14082_v35  ;;  %v9827_v36 = vpop.permute.xlu0 %9826 }
 0xe1c   :  { %v9875_v45 = vrot.slane %v9827_v36, %v14082_v35 }
 0xe1d   :  { %v9881_v61 = vsel %vm9666_vm8, %v9855_v62, %v9880_v57 }
 0xe1e   :  { %v9815_v38 = vpop.permute.xlu1 %9814 }
 0xe1f   :  { %v9859_v21 = vrot.slane %v9815_v38, %v14082_v35 }
 0xe21   :  { %v9882_v55 = vsel %vm9668_vm9, %v9859_v21, %v9881_v61 }
 0xe22   :  { %v9818_v24 = vpop.permute.xlu1 %9817  ;;  %v9888_v29 = vsel %vm1618_vm2, %v9882_v55, 0.0 }
 0xe23   :  { %9889 = vadd.xlane.f32.xlu1 %v9888_v29  ;;  %v9863_v10 = vrot.slane %v9818_v24, %v14082_v35 }
 0xe25   :  { %v9883_v2 = vsel %vm9656_vm3, %v9867_v16, %v9863_v10 }
 0xe26   :  { %v9824_v28 = vpop.permute.xlu1 %9823 }
 0xe27   :  { %v9871_v30 = vrot.slane %v9824_v28, %v14082_v35 }
 0xe29   :  { %v9884_v62 = vsel %vm9658_vm4, %v9871_v30, %v9883_v2 }
 0xe2a   :  { %v9885_v34 = vsel %vm9660_vm5, %v9875_v45, %v9884_v62 }
 0xe2b   :  { %v9891_v20 = vsel %vm9678_vm10, %v9885_v34, 0.0 }
 0xe2c   :  { %9892 = vadd.xlane.f32.xlu0 %v9891_v20 }
 0xeac   :  { %v9890_v38 = vpop.xlane.xlu1 %9889 }
 0xead   :  { %11654 = vrcp.f32 %v9890_v38 }
 0xeb5   :  { %v9893_v57 = vpop.xlane.xlu0 %9892 }
 0xeb6   :  { %11656 = vrcp.f32 %v9893_v57 }
 0xeba   :  { %v11655_v21 = vpop.eup %11654 }
 0xebb   :  { %v9905_v6 = vrot.slane %v11655_v21, %v14463_v41  ;;  %v9901_v61 = vrot.slane %v11655_v21, %v14464_v7  ;;  %v9909_v24 = vrot.slane %v11655_v21, %v14127_v44  ;;  %v9913_v29 = vrot.slane %v11655_v21, %v14132_v14 }
 0xebc   :  { %v9917_v16 = vrot.slane %v11655_v21, %v9702_v19  ;;  %v9921_v28 = vrot.slane %v11655_v21, %v9706_v12  ;;  %v9925_v45 = vrot.slane %v11655_v21, %v9710_v37 }
 0xebd   :  { %v9959_v35 = vmul.f32 %v14154_v13, %v9905_v6  ;;  %v9958_v55 = vmul.f32 %v14150_v59, %v9901_v61  ;;  %v9960_v10 = vmul.f32 %v14161_v60, %v9909_v24  ;;  %v9961_v36 = vmul.f32 %v14166_v15, %v9913_v29 }
 0xebe   :  { %v9962_v59 = vmul.f32 %v14170_v54, %v9917_v16  ;;  %v9963_v13 = vmul.f32 %v14175_v23, %v9921_v28  ;;  %v9964_v15 = vmul.f32 %v14181_v46, %v9925_v45 }
 0xebf   :  { %9977 = vperm.xlu1 %11271, %v9959_v35   ;;  %9972 = vperm.xlu0 %11270, %v9958_v55  }
 0xec3   :  { %v11657_v30 = vpop.eup %11656  ;;  %9982 = vperm.xlu1 %11271, %v9960_v10   ;;  %9987 = vperm.xlu0 %11270, %v9961_v36  }
 0xec4   :  { %v9937_v60 = vrot.slane %v11657_v30, %v14463_v41  ;;  %v9941_v12 = vrot.slane %v11657_v30, %v14127_v44  ;;  %v9933_v2 = vrot.slane %v11657_v30, %v14464_v7  ;;  %v9945_v37 = vrot.slane %v11657_v30, %v14132_v14 }
 0xec5   :  { %v9929_v41 = vrot.slane %v11655_v21, %v9714_v11 }
 0xec6   :  { %v9967_v19 = vmul.f32 %v14173_v39, %v9937_v60  ;;  %v9968_v54 = vmul.f32 %v14191_v1, %v9941_v12  ;;  %v9966_v23 = vmul.f32 %v14188_v58, %v9933_v2  ;;  %v9969_v46 = vmul.f32 %v14179_v33, %v9945_v37 }
 0xec7   :  { %9992 = vperm.xlu1 %11271, %v9962_v59   ;;  %9997 = vperm.xlu0 %11270, %v9963_v13   ;;  %v9965_v39 = vmul.f32 %v14185_v8, %v9929_v41 }
 0xecb   :  { %10002 = vperm.xlu1 %11271, %v9964_v15   ;;  %10017 = vperm.xlu0 %11270, %v9967_v19  }
 0xecf   :  { %10022 = vperm.xlu0 %11270, %v9968_v54   ;;  %10012 = vperm.xlu1 %11271, %v9966_v23  }
 0xed3   :  { %10027 = vperm.xlu0 %11270, %v9969_v46   ;;  %10007 = vperm.xlu1 %11271, %v9965_v39  }
 0xf3a   :  { %v9978_v7 = vpop.permute.xlu1 %9977  ;;  %v9973_v44 = vpop.permute.xlu0 %9972 }
 0xf3b   :  { %v10032_v62 = vmul.f32 %v9978_v7, %v13931_v26  ;;  %v10033_v1 = vmul.f32 %v9978_v7, %v13937_v49  ;;  %v10030_v58 = vmul.f32 %v9973_v44, %v13940_v52  ;;  %v10031_v14 = vmul.f32 %v9973_v44, %v13934_v56 }
 0xf3d   :  { %v10066_v48 = vrot.slane %v10032_v62, 4  ;;  %v10072_v11 = vrot.slane %v10033_v1, 4  ;;  %v10054_v34 = vrot.slane %v10030_v58, 4  ;;  %v10060_v20 = vrot.slane %v10031_v14, 4 }
 0xf3e   :  { %v9983_v38 = vpop.permute.xlu1 %9982  ;;  %v9988_v33 = vpop.permute.xlu0 %9987 }
 0xf3f   :  { %v10067_v57 = vadd.f32 %v10066_v48, %v10032_v62  ;;  %v10073_v8 = vadd.f32 %v10072_v11, %v10033_v1  ;;  %v10055_v21 = vadd.f32 %v10054_v34, %v10030_v58  ;;  %v10061_v6 = vadd.f32 %v10060_v20, %v10031_v14 }
 0xf40   :  { %v10034_v61 = vmul.f32 %v9983_v38, %v13960_v40  ;;  %v10035_v26 = vmul.f32 %v9983_v38, %v13954_v47  ;;  %v10036_v49 = vmul.f32 %v9988_v33, %v13951_v32  ;;  %v10037_v52 = vmul.f32 %v9988_v33, %v13957_v27 }
 0xf41   :  { %v10068_v35 = vrot.slane %v10067_v57, 2  ;;  %v10074_v56 = vrot.slane %v10073_v8, 2  ;;  %v10056_v55 = vrot.slane %v10055_v21, 2  ;;  %v10062_v24 = vrot.slane %v10061_v6, 2 }
 0xf42   :  { %v10078_v29 = vrot.slane %v10034_v61, 4  ;;  %v10084_v10 = vrot.slane %v10035_v26, 4  ;;  %v10090_v36 = vrot.slane %v10036_v49, 4  ;;  %v10096_v16 = vrot.slane %v10037_v52, 4  ;;  %v9993_v12 = vpop.permute.xlu1 %9992  ;;  %v9998_v14 = vpop.permute.xlu0 %9997 }
 0xf43   :  { %v10069_v28 = vadd.f32 %v10068_v35, %v10067_v57  ;;  %v10075_v30 = vadd.f32 %v10074_v56, %v10073_v8  ;;  %v10057_v59 = vadd.f32 %v10056_v55, %v10055_v21  ;;  %v10063_v13 = vadd.f32 %v10062_v24, %v10061_v6 }
 0xf44   :  { %v10079_v45 = vadd.f32 %v10078_v29, %v10034_v61  ;;  %v10085_v40 = vadd.f32 %v10084_v10, %v10035_v26  ;;  %v10091_v60 = vadd.f32 %v10090_v36, %v10036_v49  ;;  %v10097_v47 = vadd.f32 %v10096_v16, %v10037_v52 }
 0xf45   :  { %v10070_v15 = vrot.slane %v10069_v28, 1  ;;  %v10076_v32 = vrot.slane %v10075_v30, 1  ;;  %v10058_v19 = vrot.slane %v10057_v59, 1  ;;  %v10064_v27 = vrot.slane %v10063_v13, 1 }
 0xf46   :  { %v10080_v2 = vrot.slane %v10079_v45, 2  ;;  %v10086_v54 = vrot.slane %v10085_v40, 2  ;;  %v10092_v23 = vrot.slane %v10091_v60, 2  ;;  %v10098_v37 = vrot.slane %v10097_v47, 2  ;;  %v10003_v61 = vpop.permute.xlu1 %10002  ;;  %v10018_v10 = vpop.permute.xlu0 %10017 }
 0xf47   :  { %v10071_v41 = vadd.f32 %v10070_v15, %v10069_v28  ;;  %v10077_v46 = vadd.f32 %v10076_v32, %v10075_v30  ;;  %v10059_v39 = vadd.f32 %v10058_v19, %v10057_v59  ;;  %v10065_v7 = vadd.f32 %v10064_v27, %v10063_v13 }
 0xf48   :  { %v10081_v44 = vadd.f32 %v10080_v2, %v10079_v45  ;;  %v10087_v62 = vadd.f32 %v10086_v54, %v10085_v40  ;;  %v10093_v1 = vadd.f32 %v10092_v23, %v10091_v60  ;;  %v10099_v58 = vadd.f32 %v10098_v37, %v10097_v47 }
 0xf49   :  { %v10038_v48 = vmul.f32 %v9993_v12, %v13980_v50  ;;  %v10039_v11 = vmul.f32 %v9993_v12, %v13974_v63  ;;  %v10040_v21 = vmul.f32 %v9998_v14, %v13971_v17  ;;  %v10041_v6 = vmul.f32 %v9998_v14, %v13977_v3 }
 0xf4a   :  { %v10082_v34 = vrot.slane %v10081_v44, 1  ;;  %v10088_v20 = vrot.slane %v10087_v62, 1  ;;  %v10094_v38 = vrot.slane %v10093_v1, 1  ;;  %v10100_v33 = vrot.slane %v10099_v58, 1  ;;  %v10023_v14 = vpop.permute.xlu0 %10022 }
 0xf4b   :  { %v10102_v57 = vrot.slane %v10038_v48, 4  ;;  %v10108_v8 = vrot.slane %v10039_v11, 4  ;;  %v10222_v26 = vsel %vm9656_vm3, %v10071_v41, %v10059_v39  ;;  %v10229_v49 = vsel %vm9656_vm3, %v10077_v46, %v10065_v7 }
 0xf4c   :  { %v10114_v50 = vrot.slane %v10040_v21, 4  ;;  %v10120_v56 = vrot.slane %v10041_v6, 4  ;;  %v10083_v63 = vadd.f32 %v10082_v34, %v10081_v44  ;;  %v10089_v55 = vadd.f32 %v10088_v20, %v10087_v62  ;;  %v10013_v44 = vpop.permute.xlu1 %10012 }
 0xf4d   :  { %v10103_v52 = vadd.f32 %v10102_v57, %v10038_v48  ;;  %v10109_v35 = vadd.f32 %v10108_v8, %v10039_v11  ;;  %v10042_v24 = vmul.f32 %v10003_v61, %v14000_v51  ;;  %v10043_v29 = vmul.f32 %v10003_v61, %v13994_v43 }
 0xf4e   :  { %v10095_v36 = vadd.f32 %v10094_v38, %v10093_v1  ;;  %v10101_v17 = vadd.f32 %v10100_v33, %v10099_v58  ;;  %v10115_v28 = vadd.f32 %v10114_v50, %v10040_v21  ;;  %v10121_v30 = vadd.f32 %v10120_v56, %v10041_v6 }
 0xf4f   :  { %v10104_v16 = vrot.slane %v10103_v52, 2  ;;  %v10110_v3 = vrot.slane %v10109_v35, 2  ;;  %v10126_v59 = vrot.slane %v10042_v24, 4  ;;  %v10132_v13 = vrot.slane %v10043_v29, 4 }
 0xf50   :  { %v10048_v60 = vmul.f32 %v10018_v10, %v14011_v53  ;;  %v10049_v47 = vmul.f32 %v10018_v10, %v14017_v9  ;;  %v10116_v15 = vrot.slane %v10115_v28, 2  ;;  %v10122_v32 = vrot.slane %v10121_v30, 2  ;;  %v10028_v10 = vpop.permute.xlu0 %10027 }
 0xf51   :  { %v10105_v45 = vadd.f32 %v10104_v16, %v10103_v52  ;;  %v10111_v40 = vadd.f32 %v10110_v3, %v10109_v35  ;;  %v10127_v51 = vadd.f32 %v10126_v59, %v10042_v24  ;;  %v10133_v19 = vadd.f32 %v10132_v13, %v10043_v29 }
 0xf52   :  { %v10162_v12 = vrot.slane %v10048_v60, 4  ;;  %v10168_v2 = vrot.slane %v10049_v47, 4  ;;  %v10117_v54 = vadd.f32 %v10116_v15, %v10115_v28  ;;  %v10123_v23 = vadd.f32 %v10122_v32, %v10121_v30 }
 0xf53   :  { %v10106_v43 = vrot.slane %v10105_v45, 1  ;;  %v10112_v27 = vrot.slane %v10111_v40, 1  ;;  %v10128_v37 = vrot.slane %v10127_v51, 2  ;;  %v10134_v41 = vrot.slane %v10133_v19, 2 }
 0xf54   :  { %v10223_v46 = vsel %vm9658_vm4, %v10083_v63, %v10222_v26  ;;  %v10230_v39 = vsel %vm9658_vm4, %v10089_v55, %v10229_v49  ;;  %v10163_v7 = vadd.f32 %v10162_v12, %v10048_v60  ;;  %v10169_v53 = vadd.f32 %v10168_v2, %v10049_v47  ;;  %v10008_v55 = vpop.permute.xlu1 %10007 }
 0xf55   :  { %v10107_v9 = vadd.f32 %v10106_v43, %v10105_v45  ;;  %v10113_v62 = vadd.f32 %v10112_v27, %v10111_v40  ;;  %v10129_v1 = vadd.f32 %v10128_v37, %v10127_v51  ;;  %v10135_v58 = vadd.f32 %v10134_v41, %v10133_v19 }
 0xf56   :  { %v10118_v48 = vrot.slane %v10117_v54, 1  ;;  %v10124_v11 = vrot.slane %v10123_v23, 1  ;;  %v10164_v34 = vrot.slane %v10163_v7, 2  ;;  %v10170_v20 = vrot.slane %v10169_v53, 2 }
 0xf57   :  { %v10224_v38 = vsel %vm9660_vm5, %v10095_v36, %v10223_v46  ;;  %v10231_v33 = vsel %vm9660_vm5, %v10101_v17, %v10230_v39  ;;  %v10130_v57 = vrot.slane %v10129_v1, 1  ;;  %v10136_v8 = vrot.slane %v10135_v58, 1 }
 0xf58   :  { %v10165_v21 = vadd.f32 %v10164_v34, %v10163_v7  ;;  %v10171_v6 = vadd.f32 %v10170_v20, %v10169_v53  ;;  %v10046_v61 = vmul.f32 %v10013_v44, %v14020_v25  ;;  %v10047_v26 = vmul.f32 %v10013_v44, %v14014_v22 }
 0xf59   :  { %v14271_v49 = vsel %vm9662_vm6, %v10107_v9, %v10224_v38  ;;  %v14274_v52 = vsel %vm9662_vm6, %v10113_v62, %v10231_v33  ;;  %v14276_v35 = vadd.f32 %v10118_v48, %v10117_v54  ;;  %v14278_v50 = vadd.f32 %v10124_v11, %v10123_v23 }
 0xf5a   :  { %v10150_v56 = vrot.slane %v10046_v61, 4  ;;  %v10156_v63 = vrot.slane %v10047_v26, 4  ;;  %v14280_v24 = vadd.f32 %v10130_v57, %v10129_v1  ;;  %v14282_v29 = vadd.f32 %v10136_v8, %v10135_v58 }
 0xf5b   :  { %v10050_v25 = vmul.f32 %v10023_v14, %v14040_v5  ;;  %v10051_v22 = vmul.f32 %v10023_v14, %v14034_v42  ;;  %v10166_v36 = vrot.slane %v10165_v21, 1  ;;  %v10172_v17 = vrot.slane %v10171_v6, 1 }
 0xf5c   :  { %v10151_v16 = vadd.f32 %v10150_v56, %v10046_v61  ;;  %v10157_v3 = vadd.f32 %v10156_v63, %v10047_v26  ;;  %v10044_v59 = vmul.f32 %v10008_v55, %v13991_v31  ;;  %v10045_v13 = vmul.f32 %v10008_v55, %v13997_v18 }
 0xf5d   :  { %v10174_v28 = vrot.slane %v10050_v25, 4  ;;  %v10180_v30 = vrot.slane %v10051_v22, 4  ;;  %v10052_v60 = vmul.f32 %v10028_v10, %v14031_v4  ;;  %v10053_v47 = vmul.f32 %v10028_v10, %v14037_v0 }
 0xf5e   :  { %v10152_v45 = vrot.slane %v10151_v16, 2  ;;  %v10158_v40 = vrot.slane %v10157_v3, 2  ;;  %v10138_v42 = vrot.slane %v10044_v59, 4  ;;  %v10144_v32 = vrot.slane %v10045_v13, 4 }
 0xf5f   :  { %v10175_v5 = vadd.f32 %v10174_v28, %v10050_v25  ;;  %v10181_v15 = vadd.f32 %v10180_v30, %v10051_v22  ;;  %v10186_v43 = vrot.slane %v10052_v60, 4  ;;  %v10192_v27 = vrot.slane %v10053_v47, 4 }
 0xf60   :  { %v10153_v51 = vadd.f32 %v10152_v45, %v10151_v16  ;;  %v10159_v19 = vadd.f32 %v10158_v40, %v10157_v3  ;;  %v10139_v54 = vadd.f32 %v10138_v42, %v10044_v59  ;;  %v10145_v31 = vadd.f32 %v10144_v32, %v10045_v13 }
 0xf61   :  { %v10176_v12 = vrot.slane %v10175_v5, 2  ;;  %v10182_v2 = vrot.slane %v10181_v15, 2  ;;  %v10187_v37 = vadd.f32 %v10186_v43, %v10052_v60  ;;  %v10193_v41 = vadd.f32 %v10192_v27, %v10053_v47 }
 0xf62   :  { %v10154_v23 = vrot.slane %v10153_v51, 1  ;;  %v10160_v18 = vrot.slane %v10159_v19, 1  ;;  %v10140_v39 = vrot.slane %v10139_v54, 2  ;;  %v10146_v0 = vrot.slane %v10145_v31, 2 }
 0xf63   :  { %v10177_v46 = vadd.f32 %v10176_v12, %v10175_v5  ;;  %v10183_v4 = vadd.f32 %v10182_v2, %v10181_v15  ;;  %v10188_v44 = vrot.slane %v10187_v37, 2  ;;  %v10194_v9 = vrot.slane %v10193_v41, 2 }
 0xf64   :  { %v10155_v7 = vadd.f32 %v10154_v23, %v10153_v51  ;;  %v10161_v53 = vadd.f32 %v10160_v18, %v10159_v19  ;;  %v10141_v58 = vadd.f32 %v10140_v39, %v10139_v54  ;;  %v10147_v14 = vadd.f32 %v10146_v0, %v10145_v31 }
 0xf65   :  { %v10178_v62 = vrot.slane %v10177_v46, 1  ;;  %v10184_v1 = vrot.slane %v10183_v4, 1  ;;  %v10167_v48 = vadd.f32 %v10166_v36, %v10165_v21  ;;  %v10173_v11 = vadd.f32 %v10172_v17, %v10171_v6 }
 0xf66   :  { %v10189_v34 = vadd.f32 %v10188_v44, %v10187_v37  ;;  %v10195_v20 = vadd.f32 %v10194_v9, %v10193_v41  ;;  %v10142_v57 = vrot.slane %v10141_v58, 1  ;;  %v10148_v8 = vrot.slane %v10147_v14, 1 }
 0xf67   :  { %v10179_v38 = vadd.f32 %v10178_v62, %v10177_v46  ;;  %v10185_v33 = vadd.f32 %v10184_v1, %v10183_v4  ;;  %v10236_v61 = vsel %vm9656_vm3, %v10167_v48, %v10155_v7  ;;  %v10239_v26 = vsel %vm9656_vm3, %v10173_v11, %v10161_v53 }
 0xf68   :  { %v10190_v56 = vrot.slane %v10189_v34, 1  ;;  %v10196_v63 = vrot.slane %v10195_v20, 1  ;;  %v10226_v55 = vsel %vm9664_vm7, %v14276_v35, %v14271_v49  ;;  %v10233_v21 = vsel %vm9664_vm7, %v14278_v50, %v14274_v52 }
 0xf69   :  { %v10143_v6 = vadd.f32 %v10142_v57, %v10141_v58  ;;  %v10149_v25 = vadd.f32 %v10148_v8, %v10147_v14  ;;  %v10227_v22 = vsel %vm9666_vm8, %v14280_v24, %v10226_v55  ;;  %v10234_v10 = vsel %vm9666_vm8, %v14282_v29, %v10233_v21 }
 0xf6a   :  { %v10191_v36 = vadd.f32 %v10190_v56, %v10189_v34  ;;  %v10197_v17 = vadd.f32 %v10196_v63, %v10195_v20  ;;  %v10237_v16 = vsel %vm9658_vm4, %v10179_v38, %v10236_v61  ;;  %v10240_v3 = vsel %vm9658_vm4, %v10185_v33, %v10239_v26 }
 0xf6b   :  { %v10228_v49 = vsel %vm9668_vm9, %v10143_v6, %v10227_v22  ;;  %v10235_v35 = vsel %vm9668_vm9, %v10149_v25, %v10234_v10 }
 0xf6c   :  { %10246 = vst [vmem:[%s14332_s12] sm:$0xff] %v10228_v49  ;;  %10247 = vst [vmem:[%s14332_s12 + $0x8] sm:$0xff] %v10235_v35  ;;  %v10238_v52 = vsel %vm9660_vm5, %v10191_v36, %v10237_v16  ;;  %v10241_v50 = vsel %vm9660_vm5, %v10197_v17, %v10240_v3 }
 0xf6d   :  { %10248 = vst [vmem:[%s14332_s12 + $0x10] sm:$0xf] %v10238_v52  ;;  %10249 = vst [vmem:[%s14332_s12 + $0x18] sm:$0xf] %v10241_v50 }

</bundles_post_ra>
